<compile_context>
chip_gen: v5e
topology: v5e:2x2
jax: 0.10.0
libtpu: 0.0.40
codegen_flags: <defaults>
</compile_context>

<pallas_src>
import jax
import jax.numpy as jnp
from jax.experimental import pallas as pl
from jax.experimental.pallas import tpu as pltpu

# Logical layer widths of the PyTorch module.
LAYER_DIMS = [28 * 28, 1000, 1000, 500, 200, 10]


def _round_up(x, m):
    return (x + m - 1) // m * m


# Input features (784) stay unpadded: the block spans that full axis so the (8,128)
# rule is exempt.  Hidden/output widths are padded to multiples of 128 so every matmul
# N-dim and the output store are lane-dense.  Zero padding is exact through matmul+ReLU.
PADDED_DIMS = [LAYER_DIMS[0]] + [_round_up(d, 128) for d in LAYER_DIMS[1:]]
# -> [784, 1024, 1024, 512, 256, 128]

WEIGHT_DTYPE = jnp.bfloat16   # deliberate precision trade: halves weight HBM bytes
ACT_DTYPE = jnp.bfloat16      # inter-layer activations (accumulation stays f32)
MAX_TILE_B = 256              # batch tile, budgeted against v7x VMEM


def _mlp_kernel(x_ref, w1_ref, w2_ref, w3_ref, w4_ref, w5_ref, o_ref):
    """One batch tile of the entire 5-layer MLP; all weights resident in VMEM."""

    def hidden_layer(h, w_ref):
        y = jnp.dot(h, w_ref[...], preferred_element_type=jnp.float32)
        # ReLU folded into the bf16 cast: halves vreg/VMEM traffic of intermediates.
        return jnp.maximum(y, 0.0).astype(ACT_DTYPE)

    h = x_ref[...]                       # (TILE_B, 784) bf16
    h = hidden_layer(h, w1_ref)          # (TILE_B, 1024)
    h = hidden_layer(h, w2_ref)          # (TILE_B, 1024)
    h = hidden_layer(h, w3_ref)          # (TILE_B, 512)
    h = hidden_layer(h, w4_ref)          # (TILE_B, 256)
    # Final layer: straight f32 write, lane-dense (128-wide) output slab.
    o_ref[...] = jnp.dot(h, w5_ref[...], preferred_element_type=jnp.float32)


@jax.jit
def linear_network_forward(x, params):
    """Forward pass of LinearNetwork: 4x (Linear + ReLU) + final Linear."""
    batch, in_features = x.shape
    assert in_features == LAYER_DIMS[0]

    # Batch tiling: small batches pad only to 8 rows; large batches use 256-row tiles.
    tile_b = min(MAX_TILE_B, _round_up(batch, 8))
    num_tiles = pl.cdiv(batch, tile_b)
    b_pad = num_tiles * tile_b

    # Single pad + bf16 cast of the activation (weight padding is hoisted to init).
    x_p = jnp.pad(x, ((0, b_pad - batch), (0, 0))).astype(ACT_DTYPE)

    # Advisory cost hint: this kernel is tiny, help XLA schedule around it.
    weight_bytes = sum(w.size * w.dtype.itemsize for w in params)
    flops = 2 * b_pad * sum(PADDED_DIMS[i] * PADDED_DIMS[i + 1] for i in range(5))
    bytes_accessed = (weight_bytes
                      + x_p.size * x_p.dtype.itemsize
                      + b_pad * PADDED_DIMS[-1] * 4)

    x_spec = pl.BlockSpec((tile_b, PADDED_DIMS[0]), lambda b: (b, 0))
    # Constant index_map => weights are DMA'd from HBM exactly once per call and stay
    # VMEM-resident across batch-grid steps.
    weight_specs = [pl.BlockSpec(w.shape, lambda b: (0, 0)) for w in params]
    out_spec = pl.BlockSpec((tile_b, PADDED_DIMS[-1]), lambda b: (b, 0))

    out_p = pl.pallas_call(
        _mlp_kernel,
        out_shape=jax.ShapeDtypeStruct((b_pad, PADDED_DIMS[-1]), jnp.float32),
        grid=(num_tiles,),
        in_specs=[x_spec] + weight_specs,
        out_specs=out_spec,
        compiler_params=pltpu.CompilerParams(
            dimension_semantics=("parallel",)),
        cost_estimate=pl.CostEstimate(
            flops=flops, transcendentals=0, bytes_accessed=bytes_accessed),
    )(x_p, *params)

    return out_p[:batch, :LAYER_DIMS[-1]]


def init_params(key):
    """Deterministic weights, stored as (in_features, out_features), padded + bf16."""
    params = []
    for i in range(5):
        fan_in, fan_out = LAYER_DIMS[i], LAYER_DIMS[i + 1]
        k = jax.random.fold_in(key, i)
        # PyTorch nn.Linear default init: U(-1/sqrt(fan_in), 1/sqrt(fan_in)).
        bound = 1.0 / (fan_in ** 0.5)
        w = jax.random.uniform(
            k, (fan_in, fan_out), jnp.float32, minval=-bound, maxval=bound
        )
        w = w.astype(WEIGHT_DTYPE)
        # Zero-pad once here (hoisted out of the forward hot path); zeros are exact.
        w = jnp.pad(
            w, ((0, PADDED_DIMS[i] - fan_in), (0, PADDED_DIMS[i + 1] - fan_out))
        )
        params.append(w)
    return params


def reference_forward(x, params):
    """Pure-JAX reference with the same bf16-weight / f32-accumulate math."""
    h = x.astype(ACT_DTYPE)
    y = None
    for idx, w in enumerate(params):
        y = jnp.dot(h, w, preferred_element_type=jnp.float32)
        if idx < len(params) - 1:
            h = jnp.maximum(y, 0.0).astype(ACT_DTYPE)
    return y[:, :LAYER_DIMS[-1]]


if __name__ == "__main__":
    key = jax.random.PRNGKey(0)
    params = init_params(key)

    # batch=2: single small tile (padded to 8 rows).
    # batch=300: exercises the multi-tile batch grid (2 tiles of 256).
    for batch in (2, 300):
        x = jax.random.normal(
            jax.random.fold_in(key, 100 + batch), (batch, LAYER_DIMS[0]), jnp.float32
        )
        out = linear_network_forward(x, params)
        jax.block_until_ready(out)

        ref = reference_forward(x, params)
        assert out.shape == (batch, LAYER_DIMS[-1])
        assert jnp.allclose(out, ref, atol=1e-2, rtol=1e-2), float(
            jnp.max(jnp.abs(out - ref))
        )

    print("KERNEL_OK")
</pallas_src>

<mosaic_0001>
module attributes {stable_mosaic.version = 11 : i64} {
  func.func @_mlp_kernel(%arg0: i32, %arg1: memref<8x784xbf16, #tpu.memory_space<vmem>>, %arg2: memref<784x1024xbf16, #tpu.memory_space<vmem>>, %arg3: memref<1024x1024xbf16, #tpu.memory_space<vmem>>, %arg4: memref<1024x512xbf16, #tpu.memory_space<vmem>>, %arg5: memref<512x256xbf16, #tpu.memory_space<vmem>>, %arg6: memref<256x128xbf16, #tpu.memory_space<vmem>>, %arg7: memref<8x128xf32, #tpu.memory_space<vmem>>) attributes {dimension_semantics = [#tpu.dimension_semantics<parallel>], iteration_bounds = array<i64: 1>, scalar_prefetch = 0 : i64, scratch_operands = 0 : i64, tpu.core_type = #tpu.core_type<tc>, window_params = [{transform_indices = @transform_0, window_bounds = array<i64: 8, 784>}, {pipeline_mode = #tpu.pipeline_mode<synchronous>, transform_indices = @transform_1, window_bounds = array<i64: 784, 1024>}, {pipeline_mode = #tpu.pipeline_mode<synchronous>, transform_indices = @transform_2, window_bounds = array<i64: 1024, 1024>}, {pipeline_mode = #tpu.pipeline_mode<synchronous>, transform_indices = @transform_3, window_bounds = array<i64: 1024, 512>}, {pipeline_mode = #tpu.pipeline_mode<synchronous>, transform_indices = @transform_4, window_bounds = array<i64: 512, 256>}, {pipeline_mode = #tpu.pipeline_mode<synchronous>, transform_indices = @transform_5, window_bounds = array<i64: 256, 128>}, {transform_indices = @transform_6, window_bounds = array<i64: 8, 128>}]} {
    %c0 = arith.constant 0 : index
    %c0_0 = arith.constant 0 : index
    %0 = vector.load %arg1[%c0, %c0_0] : memref<8x784xbf16, #tpu.memory_space<vmem>>, vector<8x784xbf16>
    %c0_1 = arith.constant 0 : index
    %c0_2 = arith.constant 0 : index
    %1 = vector.load %arg2[%c0_1, %c0_2] : memref<784x1024xbf16, #tpu.memory_space<vmem>>, vector<784x1024xbf16>
    %cst = arith.constant dense<0.000000e+00> : vector<8x1024xf32>
    %2 = tpu.matmul %0, %1, %cst {dimension_numbers = #tpu.dot_dimension_numbers<[1], [0], [0], [1], [0, 0, 1, 1], [], []>} : vector<8x784xbf16>, vector<784x1024xbf16>, vector<8x1024xf32> -> vector<8x1024xf32>
    %cst_3 = arith.constant 0.000000e+00 : f32
    %3 = vector.broadcast %cst_3 : f32 to vector<8x1024xf32>
    %4 = arith.maximumf %2, %3 : vector<8x1024xf32>
    %5 = arith.truncf %4 : vector<8x1024xf32> to vector<8x1024xbf16>
    %c0_4 = arith.constant 0 : index
    %c0_5 = arith.constant 0 : index
    %6 = vector.load %arg3[%c0_4, %c0_5] : memref<1024x1024xbf16, #tpu.memory_space<vmem>>, vector<1024x1024xbf16>
    %cst_6 = arith.constant dense<0.000000e+00> : vector<8x1024xf32>
    %7 = tpu.matmul %5, %6, %cst_6 {dimension_numbers = #tpu.dot_dimension_numbers<[1], [0], [0], [1], [0, 0, 1, 1], [], []>} : vector<8x1024xbf16>, vector<1024x1024xbf16>, vector<8x1024xf32> -> vector<8x1024xf32>
    %cst_7 = arith.constant 0.000000e+00 : f32
    %8 = vector.broadcast %cst_7 : f32 to vector<8x1024xf32>
    %9 = arith.maximumf %7, %8 : vector<8x1024xf32>
    %10 = arith.truncf %9 : vector<8x1024xf32> to vector<8x1024xbf16>
    %c0_8 = arith.constant 0 : index
    %c0_9 = arith.constant 0 : index
    %11 = vector.load %arg4[%c0_8, %c0_9] : memref<1024x512xbf16, #tpu.memory_space<vmem>>, vector<1024x512xbf16>
    %cst_10 = arith.constant dense<0.000000e+00> : vector<8x512xf32>
    %12 = tpu.matmul %10, %11, %cst_10 {dimension_numbers = #tpu.dot_dimension_numbers<[1], [0], [0], [1], [0, 0, 1, 1], [], []>} : vector<8x1024xbf16>, vector<1024x512xbf16>, vector<8x512xf32> -> vector<8x512xf32>
    %cst_11 = arith.constant 0.000000e+00 : f32
    %13 = vector.broadcast %cst_11 : f32 to vector<8x512xf32>
    %14 = arith.maximumf %12, %13 : vector<8x512xf32>
    %15 = arith.truncf %14 : vector<8x512xf32> to vector<8x512xbf16>
    %c0_12 = arith.constant 0 : index
    %c0_13 = arith.constant 0 : index
    %16 = vector.load %arg5[%c0_12, %c0_13] : memref<512x256xbf16, #tpu.memory_space<vmem>>, vector<512x256xbf16>
    %cst_14 = arith.constant dense<0.000000e+00> : vector<8x256xf32>
    %17 = tpu.matmul %15, %16, %cst_14 {dimension_numbers = #tpu.dot_dimension_numbers<[1], [0], [0], [1], [0, 0, 1, 1], [], []>} : vector<8x512xbf16>, vector<512x256xbf16>, vector<8x256xf32> -> vector<8x256xf32>
    %cst_15 = arith.constant 0.000000e+00 : f32
    %18 = vector.broadcast %cst_15 : f32 to vector<8x256xf32>
    %19 = arith.maximumf %17, %18 : vector<8x256xf32>
    %20 = arith.truncf %19 : vector<8x256xf32> to vector<8x256xbf16>
    %c0_16 = arith.constant 0 : index
    %c0_17 = arith.constant 0 : index
    %21 = vector.load %arg6[%c0_16, %c0_17] : memref<256x128xbf16, #tpu.memory_space<vmem>>, vector<256x128xbf16>
    %cst_18 = arith.constant dense<0.000000e+00> : vector<8x128xf32>
    %22 = tpu.matmul %20, %21, %cst_18 {dimension_numbers = #tpu.dot_dimension_numbers<[1], [0], [0], [1], [0, 0, 1, 1], [], []>} : vector<8x256xbf16>, vector<256x128xbf16>, vector<8x128xf32> -> vector<8x128xf32>
    %c0_19 = arith.constant 0 : index
    %c0_20 = arith.constant 0 : index
    %23 = vector.load %arg7[%c0_19, %c0_20] : memref<8x128xf32, #tpu.memory_space<vmem>>, vector<8x128xf32>
    tpu.vector_store %arg7[%c0_19, %c0_20], %22 {strides = array<i32>} : memref<8x128xf32, #tpu.memory_space<vmem>>, vector<8x128xf32>,
    return
  }
  func.func @transform_0(%arg0: i32) -> (i32, i32) {
    %c0_i32 = arith.constant 0 : i32
    %c0_i32_0 = arith.constant 0 : i32
    return %arg0, %c0_i32 : i32, i32
  }
  func.func @transform_1(%arg0: i32) -> (i32, i32) {
    %c0_i32 = arith.constant 0 : i32
    %c0_i32_0 = arith.constant 0 : i32
    %c0_i32_1 = arith.constant 0 : i32
    return %c0_i32, %c0_i32_0 : i32, i32
  }
  func.func @transform_2(%arg0: i32) -> (i32, i32) {
    %c0_i32 = arith.constant 0 : i32
    %c0_i32_0 = arith.constant 0 : i32
    %c0_i32_1 = arith.constant 0 : i32
    return %c0_i32, %c0_i32_0 : i32, i32
  }
  func.func @transform_3(%arg0: i32) -> (i32, i32) {
    %c0_i32 = arith.constant 0 : i32
    %c0_i32_0 = arith.constant 0 : i32
    %c0_i32_1 = arith.constant 0 : i32
    return %c0_i32, %c0_i32_0 : i32, i32
  }
  func.func @transform_4(%arg0: i32) -> (i32, i32) {
    %c0_i32 = arith.constant 0 : i32
    %c0_i32_0 = arith.constant 0 : i32
    %c0_i32_1 = arith.constant 0 : i32
    return %c0_i32, %c0_i32_0 : i32, i32
  }
  func.func @transform_5(%arg0: i32) -> (i32, i32) {
    %c0_i32 = arith.constant 0 : i32
    %c0_i32_0 = arith.constant 0 : i32
    %c0_i32_1 = arith.constant 0 : i32
    return %c0_i32, %c0_i32_0 : i32, i32
  }
  func.func @transform_6(%arg0: i32) -> (i32, i32) {
    %c0_i32 = arith.constant 0 : i32
    %c0_i32_0 = arith.constant 0 : i32
    return %arg0, %c0_i32 : i32, i32
  }
}

</mosaic_0001>

<bundles_post_ra>
// kernel: linear_network_forward.1
= control target key start
LH: loop header
LB: loop body
LE: loop exit
PB: predicated region body
PF: predicated region fallthrough
CT: control target
= control target key end

     0   :  { %11 = vsyncpa [#allocation3], 0  ;;  %s16671_s0 = inlined_call_operand.vmem [shape: bf16[8,784], index: 0, kind: input, shape index: {}]   ;;  %s16672_s1 = inlined_call_operand.hbm [shape: bf16[784,1024], index: 1, kind: input, shape index: {}]   ;;  %s16673_s2 = inlined_call_operand.hbm [shape: bf16[1024,1024], index: 2, kind: input, shape index: {}]   ;;  %s16674_s3 = inlined_call_operand.hbm [shape: bf16[1024,512], index: 3, kind: input, shape index: {}]   ;;  %s16675_s4 = inlined_call_operand.hbm [shape: bf16[512,256], index: 4, kind: input, shape index: {}]   ;;  %s16676_s5 = inlined_call_operand.hbm [shape: bf16[256,128], index: 5, kind: input, shape index: {}]   ;;  %s16677_s6 = inlined_call_operand.vmem [shape: f32[8,128], index: 6, kind: output, shape index: {}]  }
   0x1   :  { %12 = vsyncpa [#allocation5], 0 }
   0x2   :  { %13 = vsyncpa [#allocation8], 0  ;;  %s33_s23 = sshll.u32 %s16673_s2, 4  ;;  %s16111_s24 = smov [#allocation4]   ;;  %s34_s23 = int_to_ptr.hbm [resolvable:$true] %s33_s23 }
   0x3   :  { %s35_s25 = sshll.u32 %s16111_s24, 4  ;;  %s59_s28 = sshll.u32 %s16675_s4, 4  ;;  %s36_s25 = int_to_ptr.vmem [resolvable:$true] %s35_s25  ;;  %s60_s28 = int_to_ptr.hbm [resolvable:$true] %s59_s28 }
   0x4   :  { %s16112_s29 = smov 512   ;;  %s16113_s30 = smov 32  }
   0x5   :  { %41 = dma.hbm_to_vmem [thread:$0]  %s34_s23, 65536, %s36_s25, [#allocation5], %s16112_s29, %s16112_s29, %s16113_s30  }
   0x6   :  { %s16114_s7 = smov [#allocation7]   ;;  %s16115_s9 = smov 128  }
   0x7   :  { %s61_s8 = sshll.u32 %s16114_s7, 4  ;;  %s16116_s10 = smov 8   ;;  %s62_s8 = int_to_ptr.vmem [resolvable:$true] %s61_s8 }
   0x8   :  { %67 = dma.hbm_to_vmem [thread:$0]  %s60_s28, 8192, %s62_s8, [#allocation8], %s16115_s9, %s16115_s9, %s16116_s10  }
   0x9   :  { %s20_s12 = sshll.u32 %s16672_s1, 4  ;;  %s16117_s13 = smov [#allocation2]   ;;  %s21_s12 = int_to_ptr.hbm [resolvable:$true] %s20_s12 }
   0xa   :  { %s22_s14 = sshll.u32 %s16117_s13, 4  ;;  %s46_s16 = sshll.u32 %s16674_s3, 4  ;;  %s23_s14 = int_to_ptr.vmem [resolvable:$true] %s22_s14  ;;  %s47_s16 = int_to_ptr.hbm [resolvable:$true] %s46_s16 }
   0xb   :  { %28 = dma.hbm_to_vmem [thread:$0]  %s21_s12, 50176, %s23_s14, [#allocation3], %s16112_s29, %s16112_s29, %s16113_s30  }
   0xc   :  { %s16118_s17 = smov [#allocation6]   ;;  %s16119_s19 = smov 256  }
   0xd   :  { %s48_s18 = sshll.u32 %s16118_s17, 4  ;;  %s16120_s20 = smov 16   ;;  %s49_s18 = int_to_ptr.vmem [resolvable:$true] %s48_s18 }
   0xe   :  { %54 = dma.hbm_to_vmem [thread:$0]  %s47_s16, 32768, %s49_s18, [#allocation5], %s16119_s19, %s16119_s19, %s16120_s20  }
   0xf   :  { %s72_s1 = sshll.u32 %s16676_s5, 4  ;;  %s16121_s23 = smov [#allocation9]   ;;  %s73_s1 = int_to_ptr.hbm [resolvable:$true] %s72_s1 }
  0x10   :  { %s74_s24 = sshll.u32 %s16121_s23, 4  ;;  %s16122_s25 = smov 64   ;;  %s75_s24 = int_to_ptr.vmem [resolvable:$true] %s74_s24 }
  0x11   :  { %s16123_s26 = smov 4  }
  0x12   :  { %80 = dma.hbm_to_vmem [thread:$0]  %s73_s1, 2048, %s75_s24, [#allocation8], %s16122_s25, %s16122_s25, %s16123_s26  }
  0x13   :  { %16105 = dma.done.wait [#allocation3], 50176  }
  0x14   :  { %16106 = vsyncadd [#allocation3], 4294917120 }
  0x15   :  { %16107 = dma.done.wait [#allocation5], 98304  }
  0x16   :  { %16108 = vsyncadd [#allocation5], 4294868992 }
  0x17   :  { %16109 = dma.done.wait [#allocation8], 10240  }
  0x18   :  { %16110 = vsyncadd [#allocation8], 4294957056  ;;  %v9990_v0 = vld [vmem:[#allocation2 + $0x1c0] sm:$0xf]  ;;  %vm2482_vm0 = vcmask 130048  }
  0x19   :  { %v14792_v1 = vld [vmem:[#allocation2 + $0x1dc] sm:$0xf0] }
  0x1a   :  { %v10246_v2 = vld [vmem:[#allocation2 + $0x3c0] sm:$0xf]  ;;  %v9991_v3 = vor.u32 %v14792_v1, %v9990_v0 }
  0x1b   :  { %v14856_v4 = vld [vmem:[#allocation2 + $0x3dc] sm:$0xf0] }
  0x1c   :  { %v10502_v5 = vld [vmem:[#allocation2 + $0x5c0] sm:$0xf]  ;;  %v10247_v7 = vor.u32 %v14856_v4, %v10246_v2  ;;  %2486 = vmatpush.bf16.msra.mxu0 %v9991_v3 }
  0x1d   :  { %v14920_v6 = vld [vmem:[#allocation2 + $0x5dc] sm:$0xf0] }
  0x1e   :  { %v10503_v8 = vor.u32 %v14920_v6, %v10502_v5  ;;  %v10758_v9 = vld [vmem:[#allocation2 + $0x7c0] sm:$0xf]  ;;  %2499 = vmatpush.bf16.msra.mxu1 %v10247_v7 }
  0x1f   :  { %v14984_v10 = vld [vmem:[#allocation2 + $0x7dc] sm:$0xf0] }
  0x20   :  { %v9958_v11 = vld [vmem:[#allocation2 + $0x180] sm:$0xf]  ;;  %v10759_v12 = vor.u32 %v14984_v10, %v10758_v9  ;;  %2512 = vmatpush.bf16.msra.mxu2 %v10503_v8 }
  0x21   :  { %v14784_v13 = vld [vmem:[#allocation2 + $0x19c] sm:$0xf0] }
  0x22   :  { %v10214_v14 = vld [vmem:[#allocation2 + $0x380] sm:$0xf]  ;;  %v9959_v16 = vor.u32 %v14784_v13, %v9958_v11  ;;  %2525 = vmatpush.bf16.msra.mxu3 %v10759_v12 }
  0x23   :  { %v14848_v15 = vld [vmem:[#allocation2 + $0x39c] sm:$0xf0] }
  0x24   :  { %v10215_v17 = vor.u32 %v14848_v15, %v10214_v14  ;;  %v10470_v18 = vld [vmem:[#allocation2 + $0x580] sm:$0xf]  ;;  %2487 = vmatpush.bf16.msra.mxu0 %v9959_v16 }
  0x25   :  { %v14912_v19 = vld [vmem:[#allocation2 + $0x59c] sm:$0xf0] }
  0x26   :  { %v10726_v20 = vld [vmem:[#allocation2 + $0x780] sm:$0xf]  ;;  %v10471_v21 = vor.u32 %v14912_v19, %v10470_v18  ;;  %2500 = vmatpush.bf16.msra.mxu1 %v10215_v17 }
  0x27   :  { %v14976_v22 = vld [vmem:[#allocation2 + $0x79c] sm:$0xf0] }
  0x28   :  { %v9926_v23 = vld [vmem:[#allocation2 + $0x140] sm:$0xf]  ;;  %v10727_v25 = vor.u32 %v14976_v22, %v10726_v20  ;;  %2513 = vmatpush.bf16.msra.mxu2 %v10471_v21 }
  0x29   :  { %v14776_v24 = vld [vmem:[#allocation2 + $0x15c] sm:$0xf0] }
  0x2a   :  { %v10182_v26 = vld [vmem:[#allocation2 + $0x340] sm:$0xf]  ;;  %v9927_v29 = vor.u32 %v14776_v24, %v9926_v23  ;;  %2526 = vmatpush.bf16.msra.mxu3 %v10727_v25  ;;  %v103_v25 = vld [vmem:[%s16671_s0 + $0x8] sm:$0xff] }
  0x2b   :  { %v14840_v27 = vld [vmem:[#allocation2 + $0x35c] sm:$0xf0] }
  0x2c   :  { %v10438_v28 = vld [vmem:[#allocation2 + $0x540] sm:$0xf]  ;;  %v10183_v33 = vor.u32 %v14840_v27, %v10182_v26  ;;  %2488 = vmatpush.bf16.msra.mxu0 %v9927_v29 }
  0x2d   :  { %v14904_v30 = vld [vmem:[#allocation2 + $0x55c] sm:$0xf0] }
  0x2e   :  { %v10694_v31 = vld [vmem:[#allocation2 + $0x740] sm:$0xf]  ;;  %v10439_v34 = vor.u32 %v14904_v30, %v10438_v28  ;;  %2501 = vmatpush.bf16.msra.mxu1 %v10183_v33 }
  0x2f   :  { %v14968_v32 = vld [vmem:[#allocation2 + $0x75c] sm:$0xf0] }
  0x30   :  { %v9894_v35 = vld [vmem:[#allocation2 + $0x100] sm:$0xf]  ;;  %v10695_v38 = vor.u32 %v14968_v32, %v10694_v31  ;;  %2514 = vmatpush.bf16.msra.mxu2 %v10439_v34  ;;  %v14788_v34 = vld [vmem:[#allocation2 + $0x1c4] sm:$0xf] }
  0x31   :  { %v14768_v36 = vld [vmem:[#allocation2 + $0x11c] sm:$0xf0] }
  0x32   :  { %v10150_v37 = vld [vmem:[#allocation2 + $0x300] sm:$0xf]  ;;  %v9895_v44 = vor.u32 %v14768_v36, %v9894_v35  ;;  %2527 = vmatpush.bf16.msra.mxu3 %v10695_v38  ;;  %v9992_v35 = vld [vmem:[#allocation2 + $0x1e0] sm:$0xf0]  ;;  %v504_v36 = vunpack.c.l.b16 %v103_v25 }
  0x33   :  { %v14832_v39 = vld [vmem:[#allocation2 + $0x31c] sm:$0xf0] }
  0x34   :  { %v10406_v40 = vld [vmem:[#allocation2 + $0x500] sm:$0xf]  ;;  %v10151_v45 = vor.u32 %v14832_v39, %v10150_v37  ;;  %2489 = vmatpush.bf16.msra.mxu0 %v9895_v44 }
  0x35   :  { %v14896_v41 = vld [vmem:[#allocation2 + $0x51c] sm:$0xf0] }
  0x36   :  { %v10662_v42 = vld [vmem:[#allocation2 + $0x700] sm:$0xf]  ;;  %v10407_v46 = vor.u32 %v14896_v41, %v10406_v40  ;;  %2502 = vmatpush.bf16.msra.mxu1 %v10151_v45  ;;  %v505_v41 = vunpack.c.h.b16 %v103_v25  ;;  %v14828_v25 = vld [vmem:[#allocation2 + $0x304] sm:$0xf] }
  0x37   :  { %v14960_v43 = vld [vmem:[#allocation2 + $0x71c] sm:$0xf0] }
  0x38   :  { %v9862_v47 = vld [vmem:[#allocation2 + $0xc0] sm:$0xf]  ;;  %v10663_v50 = vor.u32 %v14960_v43, %v10662_v42  ;;  %2515 = vmatpush.bf16.msra.mxu2 %v10407_v46  ;;  %v14852_v46 = vld [vmem:[#allocation2 + $0x3c4] sm:$0xf] }
  0x39   :  { %v14760_v48 = vld [vmem:[#allocation2 + $0xdc] sm:$0xf0] }
  0x3a   :  { %v10118_v49 = vld [vmem:[#allocation2 + $0x2c0] sm:$0xf]  ;;  %v9863_v56 = vor.u32 %v14760_v48, %v9862_v47  ;;  %2528 = vmatpush.bf16.msra.mxu3 %v10663_v50  ;;  %v10248_v47 = vld [vmem:[#allocation2 + $0x3e0] sm:$0xf0] }
  0x3b   :  { %v14824_v51 = vld [vmem:[#allocation2 + $0x2dc] sm:$0xf0] }
  0x3c   :  { %v10374_v52 = vld [vmem:[#allocation2 + $0x4c0] sm:$0xf]  ;;  %v10119_v57 = vor.u32 %v14824_v51, %v10118_v49  ;;  %2490 = vmatpush.bf16.msra.mxu0 %v9863_v56  ;;  %v9995_v49 = vor.u32 %v14788_v34, %v9992_v35  ;;  %v9960_v56 = vld [vmem:[#allocation2 + $0x1a0] sm:$0xf0] }
  0x3d   :  { %v14888_v53 = vld [vmem:[#allocation2 + $0x4dc] sm:$0xf0]  ;;  %v9864_v34 = vld [vmem:[#allocation2 + $0xe0] sm:$0xf0] }
  0x3e   :  { %v10630_v54 = vld [vmem:[#allocation2 + $0x6c0] sm:$0xf]  ;;  %v10375_v58 = vor.u32 %v14888_v53, %v10374_v52  ;;  %2503 = vmatpush.bf16.msra.mxu1 %v10119_v57  ;;  %v16180_v53 = vpack.c.b16 %v504_v36, %v504_v36 }
  0x3f   :  { %v14952_v55 = vld [vmem:[#allocation2 + $0x6dc] sm:$0xf0] }
  0x40   :  { %v9830_v59 = vld [vmem:[#allocation2 + $0x80] sm:$0xf]  ;;  %v10631_v62 = vor.u32 %v14952_v55, %v10630_v54  ;;  %2516 = vmatpush.bf16.msra.mxu2 %v10375_v58  ;;  %v14780_v55 = vld [vmem:[#allocation2 + $0x184] sm:$0xf] }
  0x41   :  { %v14752_v60 = vld [vmem:[#allocation2 + $0x9c] sm:$0xf0] }
  0x42   :  { %v10086_v61 = vld [vmem:[#allocation2 + $0x280] sm:$0xf]  ;;  %v9831_v4 = vor.u32 %v14752_v60, %v9830_v59  ;;  %2529 = vmatpush.bf16.msra.mxu3 %v10631_v62  ;;  %v16184_v60 = vpack.c.b16 %v505_v41, %v505_v41 }
  0x43   :  { %v14816_v63 = vld [vmem:[#allocation2 + $0x29c] sm:$0xf0] }
  0x44   :  { %v10342_v0 = vld [vmem:[#allocation2 + $0x480] sm:$0xf]  ;;  %v10087_v5 = vor.u32 %v14816_v63, %v10086_v61  ;;  %2491 = vmatpush.bf16.msra.mxu0 %v9831_v4  ;;  %v10251_v61 = vor.u32 %v14852_v46, %v10248_v47  ;;  %v14844_v63 = vld [vmem:[#allocation2 + $0x384] sm:$0xf] }
  0x45   :  { %v14880_v1 = vld [vmem:[#allocation2 + $0x49c] sm:$0xf0]  ;;  %v14748_v46 = vld [vmem:[#allocation2 + $0x84] sm:$0xf] }
  0x46   :  { %v10598_v2 = vld [vmem:[#allocation2 + $0x680] sm:$0xf]  ;;  %v10343_v6 = vor.u32 %v14880_v1, %v10342_v0  ;;  %2504 = vmatpush.bf16.msra.mxu1 %v10087_v5  ;;  %v10216_v0 = vld [vmem:[#allocation2 + $0x3a0] sm:$0xf0] }
  0x47   :  { %v14944_v3 = vld [vmem:[#allocation2 + $0x69c] sm:$0xf0]  ;;  %v9832_v47 = vld [vmem:[#allocation2 + $0xa0] sm:$0xf0] }
  0x48   :  { %v9798_v7 = vld [vmem:[#allocation2 + $0x40] sm:$0xf]  ;;  %v10599_v10 = vor.u32 %v14944_v3, %v10598_v2  ;;  %2517 = vmatpush.bf16.msra.mxu2 %v10343_v6  ;;  %v9963_v2 = vor.u32 %v14780_v55, %v9960_v56  ;;  %v9835_v55 = vor.u32 %v14748_v46, %v9832_v47  ;;  %v11240_v46 = vld [vmem:[#allocation2 + $0xba0] sm:$0xf0] }
  0x49   :  { %v14744_v8 = vld [vmem:[#allocation2 + $0x5c] sm:$0xf0]  ;;  %v14900_v47 = vld [vmem:[#allocation2 + $0x544] sm:$0xf] }
  0x4a   :  { %v10054_v9 = vld [vmem:[#allocation2 + $0x240] sm:$0xf]  ;;  %v9799_v17 = vor.u32 %v14744_v8, %v9798_v7  ;;  %2530 = vmatpush.bf16.msra.mxu3 %v10599_v10  ;;  %v14772_v8 = vld [vmem:[#allocation2 + $0x144] sm:$0xf]  ;;  %v10219_v10 = vor.u32 %v14844_v63, %v10216_v0 }
  0x4b   :  { %v14808_v11 = vld [vmem:[#allocation2 + $0x25c] sm:$0xf0]  ;;  %v9800_v63 = vld [vmem:[#allocation2 + $0x60] sm:$0xf0] }
  0x4c   :  { %v10310_v12 = vld [vmem:[#allocation2 + $0x440] sm:$0xf]  ;;  %v10055_v21 = vor.u32 %v14808_v11, %v10054_v9  ;;  %2492 = vmatpush.bf16.msra.mxu0 %v9799_v17  ;;  %v9928_v9 = vld [vmem:[#allocation2 + $0x160] sm:$0xf0] }
  0x4d   :  { %v14872_v13 = vld [vmem:[#allocation2 + $0x45c] sm:$0xf0]  ;;  %v14804_v0 = vld [vmem:[#allocation2 + $0x244] sm:$0xf] }
  0x4e   :  { %v10566_v14 = vld [vmem:[#allocation2 + $0x640] sm:$0xf]  ;;  %v10311_v22 = vor.u32 %v14872_v13, %v10310_v12  ;;  %2505 = vmatpush.bf16.msra.mxu1 %v10055_v21  ;;  %v14836_v12 = vld [vmem:[#allocation2 + $0x344] sm:$0xf] }
  0x4f   :  { %v14936_v15 = vld [vmem:[#allocation2 + $0x65c] sm:$0xf0]  ;;  %v10184_v13 = vld [vmem:[#allocation2 + $0x360] sm:$0xf0] }
  0x50   :  { %v9766_v16 = vld [vmem:[#allocation2] sm:$0xf]  ;;  %v10567_v26 = vor.u32 %v14936_v15, %v10566_v14  ;;  %2518 = vmatpush.bf16.msra.mxu2 %v10311_v22  ;;  %v9931_v15 = vor.u32 %v14772_v8, %v9928_v9  ;;  %v9896_v21 = vld [vmem:[#allocation2 + $0x120] sm:$0xf0]  ;;  %v105_v22 = vld [vmem:[%s16671_s0 + $0x18] sm:$0xf] }
  0x51   :  { %v14736_v18 = vld [vmem:[#allocation2 + $0x1c] sm:$0xf0]  ;;  %v508_v35 = vunpack.c.l.b16 %v105_v22  ;;  %v11016_v22 = vld [vmem:[#allocation2 + $0x9e0] sm:$0xf0] }
  0x52   :  { %v10022_v19 = vld [vmem:[#allocation2 + $0x200] sm:$0xf]  ;;  %v9767_v33 = vor.u32 %v14736_v18, %v9766_v16  ;;  %2531 = vmatpush.bf16.msra.mxu3 %v10567_v26  ;;  %v10152_v26 = vld [vmem:[#allocation2 + $0x320] sm:$0xf0] }
  0x53   :  { %v14800_v20 = vld [vmem:[#allocation2 + $0x21c] sm:$0xf0]  ;;  %v10155_v36 = vor.u32 %v14828_v25, %v10152_v26  ;;  %v14796_v26 = vld [vmem:[#allocation2 + $0x204] sm:$0xf] }
  0x54   :  { %v10278_v23 = vld [vmem:[#allocation2 + $0x400] sm:$0xf]  ;;  %v10023_v38 = vor.u32 %v14800_v20, %v10022_v19  ;;  %2493 = vmatpush.bf16.msra.mxu0 %v9767_v33  ;;  %v14764_v20 = vld [vmem:[#allocation2 + $0x104] sm:$0xf] }
  0x55   :  { %v14864_v24 = vld [vmem:[#allocation2 + $0x41c] sm:$0xf0]  ;;  %v14756_v33 = vld [vmem:[#allocation2 + $0xc4] sm:$0xf] }
  0x56   :  { %v10534_v27 = vld [vmem:[#allocation2 + $0x600] sm:$0xf]  ;;  %v10279_v39 = vor.u32 %v14864_v24, %v10278_v23  ;;  %2506 = vmatpush.bf16.msra.mxu1 %v10023_v38  ;;  %v10187_v23 = vor.u32 %v14836_v12, %v10184_v13  ;;  %v14820_v38 = vld [vmem:[#allocation2 + $0x2c4] sm:$0xf]  ;;  %v9867_v41 = vor.u32 %v14756_v33, %v9864_v34 }
  0x57   :  { %v14928_v28 = vld [vmem:[#allocation2 + $0x61c] sm:$0xf0]  ;;  %v14732_v12 = vld [vmem:[#allocation2 + $0x4] sm:$0xf] }
  0x58   :  { %v11014_v29 = vld [vmem:[#allocation2 + $0x9c0] sm:$0xf]  ;;  %v10535_v43 = vor.u32 %v14928_v28, %v10534_v27  ;;  %2519 = vmatpush.bf16.msra.mxu2 %v10279_v39  ;;  %v9899_v28 = vor.u32 %v14764_v20, %v9896_v21  ;;  %v10120_v39 = vld [vmem:[#allocation2 + $0x2e0] sm:$0xf0] }
  0x59   :  { %v15048_v30 = vld [vmem:[#allocation2 + $0x9dc] sm:$0xf0]  ;;  %v9768_v13 = vld [vmem:[#allocation2 + $0x20] sm:$0xf0] }
  0x5a   :  { %v11270_v31 = vld [vmem:[#allocation2 + $0xbc0] sm:$0xf]  ;;  %v11015_v44 = vor.u32 %v15048_v30, %v11014_v29  ;;  %2532 = vmatpush.bf16.msra.mxu3 %v10535_v43  ;;  %v15044_v21 = vld [vmem:[#allocation2 + $0x9c4] sm:$0xf]  ;;  %v9771_v25 = vor.u32 %v14732_v12, %v9768_v13 }
  0x5b   :  { %v15112_v32 = vld [vmem:[#allocation2 + $0xbdc] sm:$0xf0]  ;;  %2520 = vmatmul.bf16.vlgmr.msra.gmra.mxu2 %v16180_v53  ;;  %v11019_v33 = vor.u32 %v15044_v21, %v11016_v22  ;;  %v14884_v12 = vld [vmem:[#allocation2 + $0x4c4] sm:$0xf] }
  0x5c   :  { %v102_v37 = vld [vmem:[%s16671_s0] sm:$0xff]  ;;  %v11271_v48 = vor.u32 %v15112_v32, %v11270_v31  ;;  %2538 = vmatpush.bf16.msrb.mxu0 %v11015_v44 }
  0x5d   :  { %v11302_v40 = vld [vmem:[#allocation2 + $0xc00] sm:$0xf]  ;;  %v502_v42 = vunpack.c.l.b16 %v102_v37  ;;  %v503_v58 = vunpack.c.h.b16 %v102_v37  ;;  %2533 = vmatmul.bf16.vlgmr.msra.gmra.mxu3 %v16184_v60  ;;  %v15076_v22 = vld [vmem:[#allocation2 + $0xac4] sm:$0xf] }
  0x5e   :  { %v15120_v45 = vld [vmem:[#allocation2 + $0xc1c] sm:$0xf0]  ;;  %2551 = vmatpush.bf16.msrb.mxu1 %v11271_v48  ;;  %2577 = vmatpush.bf16.msrb.mxu3 %v9995_v49  ;;  %v16195_v48 = vpack.c.b16 %v508_v35, %v508_v35  ;;  %v10123_v49 = vor.u32 %v14820_v38, %v10120_v39  ;;  %v10472_v35 = vld [vmem:[#allocation2 + $0x5a0] sm:$0xf0] }
  0x5f   :  { %v10982_v50 = vld [vmem:[#allocation2 + $0x980] sm:$0xf]  ;;  %v16182_v57 = vpack.c.b16 %v502_v42, %v502_v42  ;;  %v11303_v59 = vor.u32 %v15120_v45, %v11302_v40  ;;  %v16188_v6 = vpack.c.b16 %v503_v58, %v503_v58 }
  0x60   :  { %v15040_v51 = vld [vmem:[#allocation2 + $0x99c] sm:$0xf0] }
  0x61   :  { %v11238_v52 = vld [vmem:[#allocation2 + $0xb80] sm:$0xf]  ;;  %v10983_v62 = vor.u32 %v15040_v51, %v10982_v50  ;;  %2494 = vmatmul.bf16.vlgmr.msra.gmra.mxu0 %v16182_v57  ;;  %2571 = vmatpush.bf16.msrb.mxu2 %v11303_v59  ;;  %v14812_v51 = vld [vmem:[#allocation2 + $0x284] sm:$0xf] }
  0x62   :  { %v15104_v54 = vld [vmem:[#allocation2 + $0xb9c] sm:$0xf0]  ;;  %2578 = vmatpush.bf16.msrb.mxu3 %v9963_v2  ;;  %2507 = vmatmul.bf16.vlgmr.msra.gmra.mxu1 %v16188_v6 }
  0x63   :  { %v11239_v1 = vor.u32 %v15104_v54, %v11238_v52  ;;  %v10950_v3 = vld [vmem:[#allocation2 + $0x940] sm:$0xf]  ;;  %2539 = vmatpush.bf16.msrb.mxu0 %v10983_v62  ;;  %v10088_v52 = vld [vmem:[#allocation2 + $0x2a0] sm:$0xf0] }
  0x64   :  { %v15032_v4 = vld [vmem:[#allocation2 + $0x95c] sm:$0xf0]  ;;  %v14740_v62 = vld [vmem:[#allocation2 + $0x44] sm:$0xf] }
  0x65   :  { %v11206_v5 = vld [vmem:[#allocation2 + $0xb40] sm:$0xf]  ;;  %2590 = vmatpush.bf16.msra.mxu2 %v10251_v61  ;;  %v10951_v11 = vor.u32 %v15032_v4, %v10950_v3  ;;  %2552 = vmatpush.bf16.msrb.mxu1 %v11239_v1  ;;  %v10091_v1 = vor.u32 %v14812_v51, %v10088_v52  ;;  %v10056_v3 = vld [vmem:[#allocation2 + $0x260] sm:$0xf0]  ;;  %v9803_v8 = vor.u32 %v14740_v62, %v9800_v63 }
  0x66   :  { %v15096_v7 = vld [vmem:[#allocation2 + $0xb5c] sm:$0xf0]  ;;  %2579 = vmatpush.bf16.msrb.mxu3 %v9931_v15  ;;  %v10504_v15 = vld [vmem:[#allocation2 + $0x5e0] sm:$0xf0] }
  0x67   :  { %v11207_v14 = vor.u32 %v15096_v7, %v11206_v5  ;;  %v10918_v16 = vld [vmem:[#allocation2 + $0x900] sm:$0xf]  ;;  %2540 = vmatpush.bf16.msrb.mxu0 %v10951_v11  ;;  %v104_v5 = vld [vmem:[%s16671_s0 + $0x10] sm:$0xff]  ;;  %v14964_v51 = vld [vmem:[#allocation2 + $0x744] sm:$0xf] }
  0x68   :  { %v15024_v17 = vld [vmem:[#allocation2 + $0x91c] sm:$0xf0]  ;;  %v10696_v52 = vld [vmem:[#allocation2 + $0x760] sm:$0xf0] }
  0x69   :  { %v11174_v18 = vld [vmem:[#allocation2 + $0xb00] sm:$0xf]  ;;  %2591 = vmatpush.bf16.msra.mxu2 %v10219_v10  ;;  %v10919_v24 = vor.u32 %v15024_v17, %v10918_v16  ;;  %2553 = vmatpush.bf16.msrb.mxu1 %v11207_v14  ;;  %v14916_v14 = vld [vmem:[#allocation2 + $0x5c4] sm:$0xf] }
  0x6a   :  { %v15088_v19 = vld [vmem:[#allocation2 + $0xb1c] sm:$0xf0]  ;;  %2580 = vmatpush.bf16.msrb.mxu3 %v9899_v28  ;;  %v14980_v16 = vld [vmem:[#allocation2 + $0x7c4] sm:$0xf]  ;;  %v10507_v28 = vor.u32 %v14916_v14, %v10504_v15 }
  0x6b   :  { %v11175_v27 = vor.u32 %v15088_v19, %v11174_v18  ;;  %v10886_v29 = vld [vmem:[#allocation2 + $0x8c0] sm:$0xf]  ;;  %2541 = vmatpush.bf16.msrb.mxu0 %v10919_v24  ;;  %11332 = vmatmul.msk.bf16.vlgmr.msrb.gmra.mxu2 %vm2482_vm0, %v16195_v48  ;;  %v10760_v17 = vld [vmem:[#allocation2 + $0x7e0] sm:$0xf0]  ;;  %v506_v18 = vunpack.c.l.b16 %v104_v5  ;;  %v10059_v19 = vor.u32 %v14804_v0, %v10056_v3 }
  0x6c   :  { %v15016_v30 = vld [vmem:[#allocation2 + $0x8dc] sm:$0xf0]  ;;  %v11208_v62 = vld [vmem:[#allocation2 + $0xb60] sm:$0xf0] }
  0x6d   :  { %v11142_v31 = vld [vmem:[#allocation2 + $0xac0] sm:$0xf]  ;;  %2592 = vmatpush.bf16.msra.mxu2 %v10187_v23  ;;  %v10887_v37 = vor.u32 %v15016_v30, %v10886_v29  ;;  %2554 = vmatpush.bf16.msrb.mxu1 %v11175_v27  ;;  %v507_v23 = vunpack.c.h.b16 %v104_v5  ;;  %v10024_v27 = vld [vmem:[#allocation2 + $0x220] sm:$0xf0]  ;;  %v10763_v29 = vor.u32 %v14980_v16, %v10760_v17  ;;  %v16202_v34 = vpack.c.b16 %v506_v18, %v506_v18 }
  0x6e   :  { %v15080_v32 = vld [vmem:[#allocation2 + $0xadc] sm:$0xf0]  ;;  %2581 = vmatpush.bf16.msrb.mxu3 %v9867_v41  ;;  %v15108_v30 = vld [vmem:[#allocation2 + $0xbc4] sm:$0xf]  ;;  %v10027_v38 = vor.u32 %v14796_v26, %v10024_v27 }
  0x6f   :  { %v11143_v40 = vor.u32 %v15080_v32, %v11142_v31  ;;  %v10854_v42 = vld [vmem:[#allocation2 + $0x880] sm:$0xf]  ;;  %2542 = vmatpush.bf16.msrb.mxu0 %v10887_v37  ;;  %v11272_v31 = vld [vmem:[#allocation2 + $0xbe0] sm:$0xf0]  ;;  %v16204_v39 = vpack.c.b16 %v507_v23, %v507_v23 }
  0x70   :  { %v15008_v43 = vld [vmem:[#allocation2 + $0x89c] sm:$0xf0]  ;;  %v14908_v32 = vld [vmem:[#allocation2 + $0x584] sm:$0xf] }
  0x71   :  { %v11110_v44 = vld [vmem:[#allocation2 + $0xa80] sm:$0xf]  ;;  %2593 = vmatpush.bf16.msra.mxu2 %v10155_v36  ;;  %v10855_v50 = vor.u32 %v15008_v43, %v10854_v42  ;;  %2555 = vmatpush.bf16.msrb.mxu1 %v11143_v40  ;;  %v14972_v36 = vld [vmem:[#allocation2 + $0x784] sm:$0xf]  ;;  %v11275_v42 = vor.u32 %v15108_v30, %v11272_v31  ;;  %v10475_v43 = vor.u32 %v14908_v32, %v10472_v35 }
  0x72   :  { %v15072_v45 = vld [vmem:[#allocation2 + $0xa9c] sm:$0xf0]  ;;  %2582 = vmatpush.bf16.msrb.mxu3 %v9835_v55  ;;  %v10728_v37 = vld [vmem:[#allocation2 + $0x7a0] sm:$0xf0] }
  0x73   :  { %v11111_v54 = vor.u32 %v15072_v45, %v11110_v44  ;;  %v10822_v56 = vld [vmem:[#allocation2 + $0x840] sm:$0xf]  ;;  %2543 = vmatpush.bf16.msrb.mxu0 %v10855_v50  ;;  %v15036_v40 = vld [vmem:[#allocation2 + $0x984] sm:$0xf]  ;;  %v10731_v44 = vor.u32 %v14972_v36, %v10728_v37 }
  0x74   :  { %v15000_v58 = vld [vmem:[#allocation2 + $0x85c] sm:$0xf0]  ;;  %v10984_v41 = vld [vmem:[#allocation2 + $0x9a0] sm:$0xf0] }
  0x75   :  { %v11078_v59 = vld [vmem:[#allocation2 + $0xa40] sm:$0xf]  ;;  %2594 = vmatpush.bf16.msra.mxu2 %v10123_v49  ;;  %v10823_v2 = vor.u32 %v15000_v58, %v10822_v56  ;;  %2556 = vmatpush.bf16.msrb.mxu1 %v11111_v54  ;;  %v15100_v45 = vld [vmem:[#allocation2 + $0xb84] sm:$0xf]  ;;  %v10987_v49 = vor.u32 %v15036_v40, %v10984_v41 }
  0x76   :  { %v15064_v61 = vld [vmem:[#allocation2 + $0xa5c] sm:$0xf0]  ;;  %2583 = vmatpush.bf16.msrb.mxu3 %v9803_v8  ;;  %v10440_v50 = vld [vmem:[#allocation2 + $0x560] sm:$0xf0]  ;;  %v11243_v56 = vor.u32 %v15100_v45, %v11240_v46 }
  0x77   :  { %v10790_v4 = vld [vmem:[#allocation2 + $0x800] sm:$0xf]  ;;  %v11079_v7 = vor.u32 %v15064_v61, %v11078_v59  ;;  %2544 = vmatpush.bf16.msrb.mxu0 %v10823_v2  ;;  %v15028_v54 = vld [vmem:[#allocation2 + $0x944] sm:$0xf]  ;;  %v10443_v58 = vor.u32 %v14900_v47, %v10440_v50  ;;  %v10699_v59 = vor.u32 %v14964_v51, %v10696_v52 }
  0x78   :  { %v14992_v9 = vld [vmem:[#allocation2 + $0x81c] sm:$0xf0]  ;;  %v10952_v55 = vld [vmem:[#allocation2 + $0x960] sm:$0xf0] }
  0x79   :  { %v11046_v10 = vld [vmem:[#allocation2 + $0xa00] sm:$0xf]  ;;  %2595 = vmatpush.bf16.msra.mxu2 %v10091_v1  ;;  %v10791_v20 = vor.u32 %v14992_v9, %v10790_v4  ;;  %2557 = vmatpush.bf16.msrb.mxu1 %v11079_v7  ;;  %v15092_v61 = vld [vmem:[#allocation2 + $0xb44] sm:$0xf]  ;;  %v10955_v0 = vor.u32 %v15028_v54, %v10952_v55 }
  0x7a   :  { %v15056_v11 = vld [vmem:[#allocation2 + $0xa1c] sm:$0xf0]  ;;  %2584 = vmatpush.bf16.msrb.mxu3 %v9771_v25  ;;  %v14892_v63 = vld [vmem:[#allocation2 + $0x504] sm:$0xf]  ;;  %v11211_v7 = vor.u32 %v15092_v61, %v11208_v62  ;;  %v9998_v61 = vld [vmem:[#allocation2 + $0x1c8] sm:$0xf] }
  0x7b   :  { %v11047_v24 = vor.u32 %v15056_v11, %v11046_v10  ;;  %2545 = vmatpush.bf16.msrb.mxu0 %v10791_v20  ;;  %v10408_v1 = vld [vmem:[#allocation2 + $0x520] sm:$0xf0]  ;;  %v14793_v62 = vld [vmem:[#allocation2 + $0x1e4] sm:$0xf0] }
  0x7c   :  { %v14956_v2 = vld [vmem:[#allocation2 + $0x704] sm:$0xf]  ;;  %v10411_v8 = vor.u32 %v14892_v63, %v10408_v1  ;;  %v10254_v63 = vld [vmem:[#allocation2 + $0x3c8] sm:$0xf] }
  0x7d   :  { %2596 = vmatpush.bf16.msra.mxu2 %v10059_v19  ;;  %2558 = vmatpush.bf16.msrb.mxu1 %v11047_v24  ;;  %v10664_v3 = vld [vmem:[#allocation2 + $0x720] sm:$0xf0]  ;;  %v14857_v1 = vld [vmem:[#allocation2 + $0x3e4] sm:$0xf0] }
  0x7e   :  { %2629 = vmatpush.bf16.msra.mxu3 %v11019_v33  ;;  %2546 = vmatmul.bf16.vlgmr.msrb.gmra.mxu0 %v16202_v34  ;;  %v15020_v4 = vld [vmem:[#allocation2 + $0x904] sm:$0xf]  ;;  %v10667_v9 = vor.u32 %v14956_v2, %v10664_v3 }
  0x7f   :  { %2603 = vmatpush.bf16.msra.mxu0 %v10507_v28  ;;  %2585 = vmatmul.bf16.vlgmr.msrb.gmra.mxu3 %v16182_v57  ;;  %v10920_v5 = vld [vmem:[#allocation2 + $0x920] sm:$0xf0] }
  0x80   :  { %2559 = vmatmul.bf16.vlgmr.msrb.gmra.mxu1 %v16204_v39  ;;  %v15084_v10 = vld [vmem:[#allocation2 + $0xb04] sm:$0xf]  ;;  %v10923_v13 = vor.u32 %v15020_v4, %v10920_v5 }
  0x81   :  { %2616 = vmatpush.bf16.msra.mxu1 %v10763_v29  ;;  %2597 = vmatpush.bf16.msra.mxu2 %v10027_v38  ;;  %v11176_v11 = vld [vmem:[#allocation2 + $0xb20] sm:$0xf0] }
  0x82   :  { %2630 = vmatpush.bf16.msra.mxu3 %v10987_v49  ;;  %v10376_v14 = vld [vmem:[#allocation2 + $0x4e0] sm:$0xf0]  ;;  %v11179_v19 = vor.u32 %v15084_v10, %v11176_v11  ;;  %v9999_v11 = vor.u32 %v14793_v62, %v9998_v61  ;;  %v14761_v61 = vld [vmem:[#allocation2 + $0xe4] sm:$0xf0] }
  0x83   :  { %2604 = vmatpush.bf16.msra.mxu0 %v10475_v43  ;;  %v14948_v15 = vld [vmem:[#allocation2 + $0x6c4] sm:$0xf]  ;;  %v10379_v20 = vor.u32 %v14884_v12, %v10376_v14  ;;  %v14921_v12 = vld [vmem:[#allocation2 + $0x5e4] sm:$0xf0] }
  0x84   :  { %2598 = vmatmul.bf16.vlgmr.msra.gmra.mxu2 %v16188_v6  ;;  %v10632_v16 = vld [vmem:[#allocation2 + $0x6e0] sm:$0xf0]  ;;  %v14985_v14 = vld [vmem:[#allocation2 + $0x7e4] sm:$0xf0] }
  0x85   :  { %2642 = vmatpush.bf16.msrb.mxu2 %v11275_v42  ;;  %2617 = vmatpush.bf16.msra.mxu1 %v10731_v44  ;;  %v15012_v17 = vld [vmem:[#allocation2 + $0x8c4] sm:$0xf]  ;;  %v10635_v21 = vor.u32 %v14948_v15, %v10632_v16  ;;  %v10255_v15 = vor.u32 %v14857_v1, %v10254_v63  ;;  %v10126_v62 = vld [vmem:[#allocation2 + $0x2c8] sm:$0xf] }
  0x86   :  { %2631 = vmatpush.bf16.msra.mxu3 %v10955_v0  ;;  %v10888_v18 = vld [vmem:[#allocation2 + $0x8e0] sm:$0xf0]  ;;  %v14825_v63 = vld [vmem:[#allocation2 + $0x2e4] sm:$0xf0] }
  0x87   :  { %2605 = vmatpush.bf16.msra.mxu0 %v10443_v58  ;;  %v11144_v23 = vld [vmem:[#allocation2 + $0xae0] sm:$0xf0]  ;;  %v10891_v25 = vor.u32 %v15012_v17, %v10888_v18  ;;  %v9966_v17 = vld [vmem:[#allocation2 + $0x188] sm:$0xf] }
  0x88   :  { %v14876_v24 = vld [vmem:[#allocation2 + $0x484] sm:$0xf]  ;;  %v11147_v31 = vor.u32 %v15076_v22, %v11144_v23  ;;  %v14785_v18 = vld [vmem:[#allocation2 + $0x1a4] sm:$0xf0] }
  0x89   :  { %2643 = vmatpush.bf16.msrb.mxu2 %v11243_v56  ;;  %2618 = vmatpush.bf16.msra.mxu1 %v10699_v59  ;;  %v10344_v26 = vld [vmem:[#allocation2 + $0x4a0] sm:$0xf0] }
  0x8a   :  { %2632 = vmatpush.bf16.msra.mxu3 %v10923_v13  ;;  %v14940_v27 = vld [vmem:[#allocation2 + $0x684] sm:$0xf]  ;;  %v10347_v32 = vor.u32 %v14876_v24, %v10344_v26  ;;  %v10766_v13 = vld [vmem:[#allocation2 + $0x7c8] sm:$0xf] }
  0x8b   :  { %2606 = vmatpush.bf16.msra.mxu0 %v10411_v8  ;;  %v10600_v28 = vld [vmem:[#allocation2 + $0x6a0] sm:$0xf0]  ;;  %v10767_v23 = vor.u32 %v14985_v14, %v10766_v13  ;;  %v10478_v24 = vld [vmem:[#allocation2 + $0x588] sm:$0xf] }
  0x8c   :  { %v15004_v29 = vld [vmem:[#allocation2 + $0x884] sm:$0xf]  ;;  %v10603_v33 = vor.u32 %v14940_v27, %v10600_v28  ;;  %v14913_v26 = vld [vmem:[#allocation2 + $0x5a4] sm:$0xf0] }
  0x8d   :  { %2644 = vmatpush.bf16.msrb.mxu2 %v11211_v7  ;;  %2619 = vmatpush.bf16.msra.mxu1 %v10667_v9  ;;  %v10856_v30 = vld [vmem:[#allocation2 + $0x8a0] sm:$0xf0]  ;;  %v10510_v9 = vld [vmem:[#allocation2 + $0x5c8] sm:$0xf] }
  0x8e   :  { %v15068_v35 = vld [vmem:[#allocation2 + $0xa84] sm:$0xf]  ;;  %2633 = vmatpush.bf16.msra.mxu3 %v10891_v25  ;;  %v10859_v38 = vor.u32 %v15004_v29, %v10856_v30  ;;  %v10511_v22 = vor.u32 %v14921_v12, %v10510_v9  ;;  %v9967_v25 = vor.u32 %v14785_v18, %v9966_v17  ;;  %v10734_v27 = vld [vmem:[#allocation2 + $0x788] sm:$0xf] }
  0x8f   :  { %2607 = vmatpush.bf16.msra.mxu0 %v10379_v20  ;;  %v11112_v36 = vld [vmem:[#allocation2 + $0xaa0] sm:$0xf0]  ;;  %v10222_v20 = vld [vmem:[#allocation2 + $0x388] sm:$0xf] }
  0x90   :  { %v14868_v37 = vld [vmem:[#allocation2 + $0x444] sm:$0xf]  ;;  %v11115_v45 = vor.u32 %v15068_v35, %v11112_v36  ;;  %v14977_v28 = vld [vmem:[#allocation2 + $0x7a4] sm:$0xf0]  ;;  %v10479_v35 = vor.u32 %v14913_v26, %v10478_v24 }
  0x91   :  { %2645 = vmatpush.bf16.msrb.mxu2 %v11179_v19  ;;  %2620 = vmatpush.bf16.msra.mxu1 %v10635_v21  ;;  %v10312_v40 = vld [vmem:[#allocation2 + $0x460] sm:$0xf0]  ;;  %v14849_v21 = vld [vmem:[#allocation2 + $0x3a4] sm:$0xf0]  ;;  %v10735_v36 = vor.u32 %v14977_v28, %v10734_v27 }
  0x92   :  { %v14932_v41 = vld [vmem:[#allocation2 + $0x644] sm:$0xf]  ;;  %v10315_v49 = vor.u32 %v14868_v37, %v10312_v40  ;;  %2634 = vmatpush.bf16.msra.mxu3 %v10859_v38  ;;  %v10223_v29 = vor.u32 %v14849_v21, %v10222_v20  ;;  %v9934_v30 = vld [vmem:[#allocation2 + $0x148] sm:$0xf] }
  0x93   :  { %v10568_v42 = vld [vmem:[#allocation2 + $0x660] sm:$0xf0]  ;;  %2608 = vmatpush.bf16.msra.mxu0 %v10347_v32  ;;  %v10190_v32 = vld [vmem:[#allocation2 + $0x348] sm:$0xf] }
  0x94   :  { %v14996_v43 = vld [vmem:[#allocation2 + $0x844] sm:$0xf]  ;;  %v10571_v50 = vor.u32 %v14932_v41, %v10568_v42  ;;  %v10446_v37 = vld [vmem:[#allocation2 + $0x548] sm:$0xf] }
  0x95   :  { %v10824_v44 = vld [vmem:[#allocation2 + $0x860] sm:$0xf0]  ;;  %2646 = vmatpush.bf16.msrb.mxu2 %v11147_v31  ;;  %2621 = vmatpush.bf16.msra.mxu1 %v10603_v33  ;;  %v14777_v31 = vld [vmem:[#allocation2 + $0x164] sm:$0xf0] }
  0x96   :  { %v15060_v46 = vld [vmem:[#allocation2 + $0xa44] sm:$0xf]  ;;  %v10827_v55 = vor.u32 %v14996_v43, %v10824_v44  ;;  %v14841_v33 = vld [vmem:[#allocation2 + $0x364] sm:$0xf0]  ;;  %v9935_v38 = vor.u32 %v14777_v31, %v9934_v30 }
  0x97   :  { %v11080_v47 = vld [vmem:[#allocation2 + $0xa60] sm:$0xf0]  ;;  %2609 = vmatpush.bf16.msra.mxu0 %v10315_v49  ;;  %v14905_v40 = vld [vmem:[#allocation2 + $0x564] sm:$0xf0]  ;;  %v10191_v43 = vor.u32 %v14841_v33, %v10190_v32 }
  0x98   :  { %v14860_v51 = vld [vmem:[#allocation2 + $0x404] sm:$0xf]  ;;  %v11083_v0 = vor.u32 %v15060_v46, %v11080_v47  ;;  %2635 = vmatpush.bf16.msra.mxu3 %v10827_v55  ;;  %v10702_v41 = vld [vmem:[#allocation2 + $0x748] sm:$0xf]  ;;  %v10447_v49 = vor.u32 %v14905_v40, %v10446_v37 }
  0x99   :  { %v10280_v52 = vld [vmem:[#allocation2 + $0x420] sm:$0xf0]  ;;  %2647 = vmatpush.bf16.msrb.mxu2 %v11115_v45  ;;  %2622 = vmatpush.bf16.msra.mxu1 %v10571_v50  ;;  %v14969_v42 = vld [vmem:[#allocation2 + $0x764] sm:$0xf0] }
  0x9a   :  { %v14924_v54 = vld [vmem:[#allocation2 + $0x604] sm:$0xf]  ;;  %v10283_v4 = vor.u32 %v14860_v51, %v10280_v52  ;;  %v9902_v44 = vld [vmem:[#allocation2 + $0x108] sm:$0xf]  ;;  %v10703_v50 = vor.u32 %v14969_v42, %v10702_v41 }
  0x9b   :  { %v10536_v56 = vld [vmem:[#allocation2 + $0x620] sm:$0xf0]  ;;  %v14769_v45 = vld [vmem:[#allocation2 + $0x124] sm:$0xf0] }
  0x9c   :  { %v14988_v58 = vld [vmem:[#allocation2 + $0x804] sm:$0xf]  ;;  %v10539_v5 = vor.u32 %v14924_v54, %v10536_v56  ;;  %2610 = vmatpush.bf16.msra.mxu0 %v10283_v4  ;;  %v10158_v46 = vld [vmem:[#allocation2 + $0x308] sm:$0xf]  ;;  %v9903_v52 = vor.u32 %v14769_v45, %v9902_v44 }
  0x9d   :  { %v10792_v59 = vld [vmem:[#allocation2 + $0x820] sm:$0xf0]  ;;  %2648 = vmatpush.bf16.msrb.mxu2 %v11083_v0  ;;  %v14833_v47 = vld [vmem:[#allocation2 + $0x324] sm:$0xf0] }
  0x9e   :  { %v15116_v2 = vld [vmem:[#allocation2 + $0xc04] sm:$0xf]  ;;  %v10795_v10 = vor.u32 %v14988_v58, %v10792_v59  ;;  %2623 = vmatpush.bf16.msra.mxu1 %v10539_v5  ;;  %v10414_v51 = vld [vmem:[#allocation2 + $0x508] sm:$0xf]  ;;  %v10159_v58 = vor.u32 %v14833_v47, %v10158_v46 }
  0x9f   :  { %v11304_v3 = vld [vmem:[#allocation2 + $0xc20] sm:$0xf0]  ;;  %2611 = vmatmul.bf16.vlgmr.msra.gmra.mxu0 %v16180_v53  ;;  %v14897_v54 = vld [vmem:[#allocation2 + $0x524] sm:$0xf0] }
  0xa0   :  { %v15052_v7 = vld [vmem:[#allocation2 + $0xa04] sm:$0xf]  ;;  %v11307_v16 = vor.u32 %v15116_v2, %v11304_v3  ;;  %2636 = vmatpush.bf16.msra.mxu3 %v10795_v10  ;;  %v10670_v55 = vld [vmem:[#allocation2 + $0x708] sm:$0xf]  ;;  %v10415_v0 = vor.u32 %v14897_v54, %v10414_v51  ;;  %v14789_v51 = vld [vmem:[#allocation2 + $0x1cc] sm:$0xf] }
  0xa1   :  { %v11048_v8 = vld [vmem:[#allocation2 + $0xa20] sm:$0xf0]  ;;  %2624 = vmatmul.bf16.vlgmr.msra.gmra.mxu1 %v16184_v60  ;;  %v14961_v56 = vld [vmem:[#allocation2 + $0x724] sm:$0xf0] }
  0xa2   :  { %v11051_v19 = vor.u32 %v15052_v7, %v11048_v8  ;;  %2668 = vmatpush.bf16.msrb.mxu1 %v9999_v11  ;;  %2662 = vmatpush.bf16.msrb.mxu0 %v11307_v16  ;;  %v9870_v59 = vld [vmem:[#allocation2 + $0xc8] sm:$0xf]  ;;  %v10671_v1 = vor.u32 %v14961_v56, %v10670_v55  ;;  %v10127_v8 = vor.u32 %v14825_v63, %v10126_v62  ;;  %v10000_v55 = vld [vmem:[#allocation2 + $0x1e8] sm:$0xf0] }
  0xa3   :  { %2637 = vmatmul.bf16.vlgmr.msra.gmra.mxu3 %v16202_v34  ;;  %v10382_v2 = vld [vmem:[#allocation2 + $0x4c8] sm:$0xf]  ;;  %v9871_v3 = vor.u32 %v14761_v61, %v9870_v59 }
  0xa4   :  { %2681 = vmatpush.bf16.msrb.mxu3 %v10255_v15  ;;  %2649 = vmatpush.bf16.msrb.mxu2 %v11051_v19  ;;  %v14889_v4 = vld [vmem:[#allocation2 + $0x4e4] sm:$0xf0] }
  0xa5   :  { %v10638_v5 = vld [vmem:[#allocation2 + $0x6c8] sm:$0xf]  ;;  %v10383_v13 = vor.u32 %v14889_v4, %v10382_v2 }
  0xa6   :  { %2694 = vmatpush.bf16.msra.mxu0 %v10511_v22  ;;  %2669 = vmatpush.bf16.msrb.mxu1 %v9967_v25  ;;  %v14953_v7 = vld [vmem:[#allocation2 + $0x6e4] sm:$0xf0] }
  0xa7   :  { %2650 = vmatmul.bf16.vlgmr.msrb.gmra.mxu2 %v16204_v39  ;;  %v9838_v9 = vld [vmem:[#allocation2 + $0x88] sm:$0xf]  ;;  %v10639_v14 = vor.u32 %v14953_v7, %v10638_v5  ;;  %v14853_v5 = vld [vmem:[#allocation2 + $0x3cc] sm:$0xf] }
  0xa8   :  { %2707 = vmatpush.bf16.msra.mxu2 %v10767_v23  ;;  %2682 = vmatpush.bf16.msrb.mxu3 %v10223_v29  ;;  %v14753_v10 = vld [vmem:[#allocation2 + $0xa4] sm:$0xf0]  ;;  %v10256_v7 = vld [vmem:[#allocation2 + $0x3e8] sm:$0xf0] }
  0xa9   :  { %v10094_v11 = vld [vmem:[#allocation2 + $0x288] sm:$0xf]  ;;  %v9839_v16 = vor.u32 %v14753_v10, %v9838_v9  ;;  %v14781_v9 = vld [vmem:[#allocation2 + $0x18c] sm:$0xf] }
  0xaa   :  { %2695 = vmatpush.bf16.msra.mxu0 %v10479_v35  ;;  %2670 = vmatpush.bf16.msrb.mxu1 %v9935_v38  ;;  %v14817_v12 = vld [vmem:[#allocation2 + $0x2a4] sm:$0xf0]  ;;  %v9968_v10 = vld [vmem:[#allocation2 + $0x1a8] sm:$0xf0] }
  0xab   :  { %v10350_v15 = vld [vmem:[#allocation2 + $0x488] sm:$0xf]  ;;  %v10095_v20 = vor.u32 %v14817_v12, %v10094_v11 }
  0xac   :  { %2708 = vmatpush.bf16.msra.mxu2 %v10735_v36  ;;  %2683 = vmatpush.bf16.msrb.mxu3 %v10191_v43  ;;  %v14881_v17 = vld [vmem:[#allocation2 + $0x4a4] sm:$0xf0] }
  0xad   :  { %v10606_v18 = vld [vmem:[#allocation2 + $0x688] sm:$0xf]  ;;  %v10351_v25 = vor.u32 %v14881_v17, %v10350_v15  ;;  %v9971_v17 = vor.u32 %v14781_v9, %v9968_v10  ;;  %v14813_v9 = vld [vmem:[#allocation2 + $0x28c] sm:$0xf] }
  0xae   :  { %2696 = vmatpush.bf16.msra.mxu0 %v10447_v49  ;;  %2671 = vmatpush.bf16.msrb.mxu1 %v9903_v52  ;;  %v14945_v19 = vld [vmem:[#allocation2 + $0x6a4] sm:$0xf0]  ;;  %v10096_v10 = vld [vmem:[#allocation2 + $0x2a8] sm:$0xf0] }
  0xaf   :  { %v9806_v21 = vld [vmem:[#allocation2 + $0x48] sm:$0xf]  ;;  %11333 = vmatmul.msk.bf16.vlgmr.msrb.gmra.mxu0 %vm2482_vm0, %v16195_v48  ;;  %v10607_v26 = vor.u32 %v14945_v19, %v10606_v18  ;;  %v14845_v18 = vld [vmem:[#allocation2 + $0x38c] sm:$0xf] }
  0xb0   :  { %2709 = vmatpush.bf16.msra.mxu2 %v10703_v50  ;;  %2684 = vmatpush.bf16.msrb.mxu3 %v10159_v58  ;;  %v14745_v22 = vld [vmem:[#allocation2 + $0x64] sm:$0xf0]  ;;  %v10224_v19 = vld [vmem:[#allocation2 + $0x3a8] sm:$0xf0] }
  0xb1   :  { %v10062_v23 = vld [vmem:[#allocation2 + $0x248] sm:$0xf]  ;;  %v9807_v29 = vor.u32 %v14745_v22, %v9806_v21  ;;  %v14773_v21 = vld [vmem:[#allocation2 + $0x14c] sm:$0xf] }
  0xb2   :  { %2697 = vmatpush.bf16.msra.mxu0 %v10415_v0  ;;  %2672 = vmatpush.bf16.msrb.mxu1 %v9871_v3  ;;  %v14809_v24 = vld [vmem:[#allocation2 + $0x264] sm:$0xf0]  ;;  %v10003_v3 = vor.u32 %v14789_v51, %v10000_v55  ;;  %v9936_v22 = vld [vmem:[#allocation2 + $0x168] sm:$0xf0] }
  0xb3   :  { %v10318_v27 = vld [vmem:[#allocation2 + $0x448] sm:$0xf]  ;;  %v10063_v33 = vor.u32 %v14809_v24, %v10062_v23 }
  0xb4   :  { %2710 = vmatpush.bf16.msra.mxu2 %v10671_v1  ;;  %2685 = vmatpush.bf16.msrb.mxu3 %v10127_v8  ;;  %v14873_v28 = vld [vmem:[#allocation2 + $0x464] sm:$0xf0] }
  0xb5   :  { %v10574_v30 = vld [vmem:[#allocation2 + $0x648] sm:$0xf]  ;;  %v10319_v42 = vor.u32 %v14873_v28, %v10318_v27 }
  0xb6   :  { %2698 = vmatpush.bf16.msra.mxu0 %v10383_v13  ;;  %2673 = vmatpush.bf16.msrb.mxu1 %v9839_v16  ;;  %v14937_v31 = vld [vmem:[#allocation2 + $0x664] sm:$0xf0] }
  0xb7   :  { %v9774_v32 = vld [vmem:[#allocation2 + $0x8] sm:$0xf]  ;;  %v10575_v43 = vor.u32 %v14937_v31, %v10574_v30  ;;  %v14837_v30 = vld [vmem:[#allocation2 + $0x34c] sm:$0xf] }
  0xb8   :  { %2711 = vmatpush.bf16.msra.mxu2 %v10639_v14  ;;  %2686 = vmatpush.bf16.msrb.mxu3 %v10095_v20  ;;  %v14737_v35 = vld [vmem:[#allocation2 + $0x24] sm:$0xf0]  ;;  %v10259_v14 = vor.u32 %v14853_v5, %v10256_v7  ;;  %v10192_v31 = vld [vmem:[#allocation2 + $0x368] sm:$0xf0] }
  0xb9   :  { %v10030_v36 = vld [vmem:[#allocation2 + $0x208] sm:$0xf]  ;;  %v9775_v47 = vor.u32 %v14737_v35, %v9774_v32  ;;  %v9904_v35 = vld [vmem:[#allocation2 + $0x128] sm:$0xf0] }
  0xba   :  { %v14801_v37 = vld [vmem:[#allocation2 + $0x224] sm:$0xf0]  ;;  %2699 = vmatpush.bf16.msra.mxu0 %v10351_v25  ;;  %2674 = vmatpush.bf16.msrb.mxu1 %v9807_v29  ;;  %v9939_v29 = vor.u32 %v14773_v21, %v9936_v22  ;;  %v10512_v21 = vld [vmem:[#allocation2 + $0x5e8] sm:$0xf0] }
  0xbb   :  { %v11022_v38 = vld [vmem:[#allocation2 + $0x9c8] sm:$0xf]  ;;  %v10031_v52 = vor.u32 %v14801_v37, %v10030_v36  ;;  %v14981_v22 = vld [vmem:[#allocation2 + $0x7cc] sm:$0xf] }
  0xbc   :  { %v15049_v40 = vld [vmem:[#allocation2 + $0x9e4] sm:$0xf0]  ;;  %2712 = vmatpush.bf16.msra.mxu2 %v10607_v26  ;;  %2687 = vmatpush.bf16.msrb.mxu3 %v10063_v33  ;;  %v10227_v26 = vor.u32 %v14845_v18, %v10224_v19  ;;  %v14765_v33 = vld [vmem:[#allocation2 + $0x10c] sm:$0xf]  ;;  %v10099_v19 = vor.u32 %v14813_v9, %v10096_v10 }
  0xbd   :  { %v11278_v41 = vld [vmem:[#allocation2 + $0xbc8] sm:$0xf]  ;;  %v11023_v54 = vor.u32 %v15049_v40, %v11022_v38  ;;  %v10195_v40 = vor.u32 %v14837_v30, %v10192_v31  ;;  %v14957_v9 = vld [vmem:[#allocation2 + $0x70c] sm:$0xf] }
  0xbe   :  { %v15113_v44 = vld [vmem:[#allocation2 + $0xbe4] sm:$0xf0]  ;;  %2700 = vmatpush.bf16.msra.mxu0 %v10319_v42  ;;  %2675 = vmatpush.bf16.msrb.mxu1 %v9775_v47  ;;  %v14757_v47 = vld [vmem:[#allocation2 + $0xcc] sm:$0xf] }
  0xbf   :  { %v10286_v45 = vld [vmem:[#allocation2 + $0x408] sm:$0xf]  ;;  %v11279_v59 = vor.u32 %v15113_v44, %v11278_v41  ;;  %v14829_v44 = vld [vmem:[#allocation2 + $0x30c] sm:$0xf] }
  0xc0   :  { %v14865_v46 = vld [vmem:[#allocation2 + $0x424] sm:$0xf0]  ;;  %2713 = vmatpush.bf16.msra.mxu2 %v10575_v43  ;;  %2688 = vmatpush.bf16.msrb.mxu3 %v10031_v52  ;;  %v9907_v43 = vor.u32 %v14765_v33, %v9904_v35  ;;  %v11024_v33 = vld [vmem:[#allocation2 + $0x9e8] sm:$0xf0] }
  0xc1   :  { %v10542_v49 = vld [vmem:[#allocation2 + $0x608] sm:$0xf]  ;;  %v10287_v63 = vor.u32 %v14865_v46, %v10286_v45  ;;  %2676 = vmatmul.bf16.vlgmr.msrb.gmra.mxu1 %v16182_v57  ;;  %v10160_v45 = vld [vmem:[#allocation2 + $0x328] sm:$0xf0] }
  0xc2   :  { %v14929_v50 = vld [vmem:[#allocation2 + $0x624] sm:$0xf0]  ;;  %2720 = vmatpush.bf16.msra.mxu1 %v11023_v54  ;;  %v10163_v54 = vor.u32 %v14829_v44, %v10160_v45  ;;  %v10032_v44 = vld [vmem:[#allocation2 + $0x228] sm:$0xf0] }
  0xc3   :  { %v11310_v56 = vld [vmem:[#allocation2 + $0xc08] sm:$0xf]  ;;  %v10543_v0 = vor.u32 %v14929_v50, %v10542_v49  ;;  %2701 = vmatpush.bf16.msra.mxu0 %v10287_v63  ;;  %2689 = vmatmul.bf16.vlgmr.msrb.gmra.mxu3 %v16188_v6  ;;  %v9872_v49 = vld [vmem:[#allocation2 + $0xe8] sm:$0xf0] }
  0xc4   :  { %v15121_v58 = vld [vmem:[#allocation2 + $0xc24] sm:$0xf0]  ;;  %2733 = vmatpush.bf16.msra.mxu3 %v11279_v59  ;;  %v14821_v59 = vld [vmem:[#allocation2 + $0x2cc] sm:$0xf] }
  0xc5   :  { %v10990_v61 = vld [vmem:[#allocation2 + $0x988] sm:$0xf]  ;;  %v11311_v4 = vor.u32 %v15121_v58, %v11310_v56  ;;  %2714 = vmatpush.bf16.msra.mxu2 %v10543_v0  ;;  %v9875_v58 = vor.u32 %v14757_v47, %v9872_v49  ;;  %v14749_v63 = vld [vmem:[#allocation2 + $0x8c] sm:$0xf] }
  0xc6   :  { %v15041_v62 = vld [vmem:[#allocation2 + $0x9a4] sm:$0xf0]  ;;  %2702 = vmatmul.bf16.vlgmr.msra.gmra.mxu0 %v16180_v53  ;;  %v9840_v0 = vld [vmem:[#allocation2 + $0xa8] sm:$0xf0] }
  0xc7   :  { %v11246_v1 = vld [vmem:[#allocation2 + $0xb88] sm:$0xf]  ;;  %v10991_v8 = vor.u32 %v15041_v62, %v10990_v61  ;;  %2753 = vmatpush.bf16.msrb.mxu0 %v11311_v4  ;;  %v10128_v61 = vld [vmem:[#allocation2 + $0x2e8] sm:$0xf0] }
  0xc8   :  { %v15105_v2 = vld [vmem:[#allocation2 + $0xba4] sm:$0xf0]  ;;  %2715 = vmatmul.bf16.vlgmr.msra.gmra.mxu2 %v16184_v60  ;;  %v10131_v4 = vor.u32 %v14821_v59, %v10128_v61  ;;  %v11280_v47 = vld [vmem:[#allocation2 + $0xbe8] sm:$0xf0] }
  0xc9   :  { %v11247_v11 = vor.u32 %v15105_v2, %v11246_v1  ;;  %v10958_v12 = vld [vmem:[#allocation2 + $0x948] sm:$0xf]  ;;  %2759 = vmatpush.bf16.msrb.mxu2 %v10003_v3  ;;  %2721 = vmatpush.bf16.msra.mxu1 %v10991_v8  ;;  %v9843_v8 = vor.u32 %v14749_v63, %v9840_v0  ;;  %v14965_v59 = vld [vmem:[#allocation2 + $0x74c] sm:$0xf] }
  0xca   :  { %v15033_v13 = vld [vmem:[#allocation2 + $0x964] sm:$0xf0]  ;;  %v10704_v61 = vld [vmem:[#allocation2 + $0x768] sm:$0xf0] }
  0xcb   :  { %v11214_v15 = vld [vmem:[#allocation2 + $0xb48] sm:$0xf]  ;;  %v10959_v20 = vor.u32 %v15033_v13, %v10958_v12  ;;  %2734 = vmatpush.bf16.msra.mxu3 %v11247_v11  ;;  %2772 = vmatpush.bf16.msra.mxu0 %v10259_v14  ;;  %v14741_v12 = vld [vmem:[#allocation2 + $0x4c] sm:$0xf] }
  0xcc   :  { %v15097_v16 = vld [vmem:[#allocation2 + $0xb64] sm:$0xf0]  ;;  %v9808_v13 = vld [vmem:[#allocation2 + $0x68] sm:$0xf0] }
  0xcd   :  { %v11215_v23 = vor.u32 %v15097_v16, %v11214_v15  ;;  %v10926_v24 = vld [vmem:[#allocation2 + $0x908] sm:$0xf]  ;;  %2760 = vmatpush.bf16.msrb.mxu2 %v9971_v17  ;;  %2722 = vmatpush.bf16.msra.mxu1 %v10959_v20  ;;  %v14917_v20 = vld [vmem:[#allocation2 + $0x5cc] sm:$0xf] }
  0xce   :  { %v15025_v25 = vld [vmem:[#allocation2 + $0x924] sm:$0xf0]  ;;  %v10515_v31 = vor.u32 %v14917_v20, %v10512_v21  ;;  %v15101_v63 = vld [vmem:[#allocation2 + $0xb8c] sm:$0xf] }
  0xcf   :  { %v11182_v27 = vld [vmem:[#allocation2 + $0xb08] sm:$0xf]  ;;  %v10927_v32 = vor.u32 %v15025_v25, %v10926_v24  ;;  %2735 = vmatpush.bf16.msra.mxu3 %v11215_v23  ;;  %2773 = vmatpush.bf16.msra.mxu0 %v10227_v26  ;;  %v9811_v23 = vor.u32 %v14741_v12, %v9808_v13  ;;  %v10768_v24 = vld [vmem:[#allocation2 + $0x7e8] sm:$0xf0] }
  0xd0   :  { %v15089_v28 = vld [vmem:[#allocation2 + $0xb24] sm:$0xf0]  ;;  %v14805_v25 = vld [vmem:[#allocation2 + $0x24c] sm:$0xf]  ;;  %v10771_v35 = vor.u32 %v14981_v22, %v10768_v24 }
  0xd1   :  { %v11183_v36 = vor.u32 %v15089_v28, %v11182_v27  ;;  %v10894_v37 = vld [vmem:[#allocation2 + $0x8c8] sm:$0xf]  ;;  %2761 = vmatpush.bf16.msrb.mxu2 %v9939_v29  ;;  %2723 = vmatpush.bf16.msra.mxu1 %v10927_v32  ;;  %v10064_v26 = vld [vmem:[#allocation2 + $0x268] sm:$0xf0] }
  0xd2   :  { %v15017_v38 = vld [vmem:[#allocation2 + $0x8e4] sm:$0xf0]  ;;  %v14733_v28 = vld [vmem:[#allocation2 + $0xc] sm:$0xf] }
  0xd3   :  { %v11150_v41 = vld [vmem:[#allocation2 + $0xac8] sm:$0xf]  ;;  %v10895_v46 = vor.u32 %v15017_v38, %v10894_v37  ;;  %2736 = vmatpush.bf16.msra.mxu3 %v11183_v36  ;;  %2774 = vmatpush.bf16.msra.mxu0 %v10195_v40  ;;  %v9776_v29 = vld [vmem:[#allocation2 + $0x28] sm:$0xf0]  ;;  %v10067_v36 = vor.u32 %v14805_v25, %v10064_v26 }
  0xd4   :  { %v15081_v42 = vld [vmem:[#allocation2 + $0xae4] sm:$0xf0]  ;;  %v15045_v32 = vld [vmem:[#allocation2 + $0x9cc] sm:$0xf] }
  0xd5   :  { %v11151_v50 = vor.u32 %v15081_v42, %v11150_v41  ;;  %v10862_v51 = vld [vmem:[#allocation2 + $0x888] sm:$0xf]  ;;  %2762 = vmatpush.bf16.msrb.mxu2 %v9907_v43  ;;  %2724 = vmatpush.bf16.msra.mxu1 %v10895_v46  ;;  %v14909_v37 = vld [vmem:[#allocation2 + $0x58c] sm:$0xf]  ;;  %v9779_v41 = vor.u32 %v14733_v28, %v9776_v29  ;;  %v11027_v45 = vor.u32 %v15045_v32, %v11024_v33 }
  0xd6   :  { %v15009_v52 = vld [vmem:[#allocation2 + $0x8a4] sm:$0xf0]  ;;  %11334 = vmatmul.msk.bf16.vlgmr.msrb.gmra.mxu0 %vm2482_vm0, %v16195_v48  ;;  %v10480_v38 = vld [vmem:[#allocation2 + $0x5a8] sm:$0xf0] }
  0xd7   :  { %v11118_v55 = vld [vmem:[#allocation2 + $0xa88] sm:$0xf]  ;;  %v10863_v62 = vor.u32 %v15009_v52, %v10862_v51  ;;  %2737 = vmatpush.bf16.msra.mxu3 %v11151_v50  ;;  %2775 = vmatpush.bf16.msra.mxu0 %v10163_v54  ;;  %v14973_v40 = vld [vmem:[#allocation2 + $0x78c] sm:$0xf]  ;;  %v10483_v49 = vor.u32 %v14909_v37, %v10480_v38 }
  0xd8   :  { %v15073_v56 = vld [vmem:[#allocation2 + $0xaa4] sm:$0xf0]  ;;  %v10736_v42 = vld [vmem:[#allocation2 + $0x7a8] sm:$0xf0] }
  0xd9   :  { %v11119_v1 = vor.u32 %v15073_v56, %v11118_v55  ;;  %v10830_v2 = vld [vmem:[#allocation2 + $0x848] sm:$0xf]  ;;  %2763 = vmatpush.bf16.msrb.mxu2 %v9875_v58  ;;  %2725 = vmatpush.bf16.msra.mxu1 %v10863_v62  ;;  %v14797_v43 = vld [vmem:[#allocation2 + $0x20c] sm:$0xf]  ;;  %v10739_v52 = vor.u32 %v14973_v40, %v10736_v42 }
  0xda   :  { %v15001_v3 = vld [vmem:[#allocation2 + $0x864] sm:$0xf0]  ;;  %v15109_v46 = vld [vmem:[#allocation2 + $0xbcc] sm:$0xf]  ;;  %v10035_v54 = vor.u32 %v14797_v43, %v10032_v44 }
  0xdb   :  { %v11086_v5 = vld [vmem:[#allocation2 + $0xa48] sm:$0xf]  ;;  %v10831_v11 = vor.u32 %v15001_v3, %v10830_v2  ;;  %2738 = vmatpush.bf16.msra.mxu3 %v11119_v1  ;;  %2776 = vmatpush.bf16.msra.mxu0 %v10131_v4  ;;  %v15037_v50 = vld [vmem:[#allocation2 + $0x98c] sm:$0xf]  ;;  %v11283_v58 = vor.u32 %v15109_v46, %v11280_v47  ;;  %v10707_v4 = vor.u32 %v14965_v59, %v10704_v61 }
  0xdc   :  { %v15065_v7 = vld [vmem:[#allocation2 + $0xa64] sm:$0xf0]  ;;  %v10992_v51 = vld [vmem:[#allocation2 + $0x9a8] sm:$0xf0] }
  0xdd   :  { %v10798_v14 = vld [vmem:[#allocation2 + $0x808] sm:$0xf]  ;;  %v11087_v15 = vor.u32 %v15065_v7, %v11086_v5  ;;  %2764 = vmatpush.bf16.msrb.mxu2 %v9843_v8  ;;  %2726 = vmatpush.bf16.msra.mxu1 %v10831_v11  ;;  %v14901_v55 = vld [vmem:[#allocation2 + $0x54c] sm:$0xf]  ;;  %v10995_v62 = vor.u32 %v15037_v50, %v10992_v51 }
  0xde   :  { %v14993_v16 = vld [vmem:[#allocation2 + $0x824] sm:$0xf0]  ;;  %v10448_v56 = vld [vmem:[#allocation2 + $0x568] sm:$0xf0]  ;;  %v2495_v21 = vpop.f32.mrf.mxu0  ;;  %v2521_v43 = vpop.f32.mrf.mxu2 }
  0xdf   :  { %v11054_v17 = vld [vmem:[#allocation2 + $0xa08] sm:$0xf]  ;;  %v10799_v27 = vor.u32 %v14993_v16, %v10798_v14  ;;  %2739 = vmatpush.bf16.msra.mxu3 %v11087_v15  ;;  %2777 = vmatpush.bf16.msra.mxu0 %v10099_v19  ;;  %v11248_v0 = vld [vmem:[#allocation2 + $0xba8] sm:$0xf0]  ;;  %v10451_v1 = vor.u32 %v14901_v55, %v10448_v56  ;;  %v2508_v33 = vpop.f32.mrf.mxu1 }
  0xe0   :  { %v15057_v18 = vld [vmem:[#allocation2 + $0xa24] sm:$0xf0]  ;;  %v15029_v2 = vld [vmem:[#allocation2 + $0x94c] sm:$0xf]  ;;  %v11251_v8 = vor.u32 %v15101_v63, %v11248_v0  ;;  %v2509_v38 = vadd.f32 %v2508_v33, %v2495_v21  ;;  %v14786_v33 = vld [vmem:[#allocation2 + $0x1ac] sm:$0xf0] }
  0xe1   :  { %v11055_v30 = vor.u32 %v15057_v18, %v11054_v17  ;;  %2765 = vmatpush.bf16.msrb.mxu2 %v9811_v23  ;;  %2727 = vmatpush.bf16.msra.mxu1 %v10799_v27  ;;  %v10960_v3 = vld [vmem:[#allocation2 + $0x968] sm:$0xf0] }
  0xe2   :  { %v14893_v5 = vld [vmem:[#allocation2 + $0x50c] sm:$0xf]  ;;  %v10963_v11 = vor.u32 %v15029_v2, %v10960_v3  ;;  %v2522_v47 = vadd.f32 %v2521_v43, %v2509_v38  ;;  %v10518_v38 = vld [vmem:[#allocation2 + $0x5d0] sm:$0xf] }
  0xe3   :  { %2740 = vmatpush.bf16.msra.mxu3 %v11055_v30  ;;  %2778 = vmatpush.bf16.msra.mxu0 %v10067_v36  ;;  %v10416_v7 = vld [vmem:[#allocation2 + $0x528] sm:$0xf0]  ;;  %v14986_v43 = vld [vmem:[#allocation2 + $0x7ec] sm:$0xf0] }
  0xe4   :  { %2728 = vmatmul.bf16.vlgmr.msra.gmra.mxu1 %v16202_v34  ;;  %v10672_v10 = vld [vmem:[#allocation2 + $0x728] sm:$0xf0]  ;;  %v10419_v14 = vor.u32 %v14893_v5, %v10416_v7 }
  0xe5   :  { %2785 = vmatpush.bf16.msrb.mxu1 %v10515_v31  ;;  %2766 = vmatpush.bf16.msrb.mxu2 %v9779_v41  ;;  %v15093_v12 = vld [vmem:[#allocation2 + $0xb4c] sm:$0xf]  ;;  %v10675_v17 = vor.u32 %v14957_v9, %v10672_v10  ;;  %v10006_v10 = vld [vmem:[#allocation2 + $0x1d0] sm:$0xf] }
  0xe6   :  { %2741 = vmatmul.bf16.vlgmr.msra.gmra.mxu3 %v16204_v39  ;;  %v11216_v13 = vld [vmem:[#allocation2 + $0xb68] sm:$0xf0] }
  0xe7   :  { %2798 = vmatpush.bf16.msrb.mxu3 %v10771_v35  ;;  %2779 = vmatpush.bf16.msra.mxu0 %v10035_v54  ;;  %v15021_v15 = vld [vmem:[#allocation2 + $0x90c] sm:$0xf]  ;;  %v11219_v20 = vor.u32 %v15093_v12, %v11216_v13  ;;  %v14858_v12 = vld [vmem:[#allocation2 + $0x3ec] sm:$0xf0]  ;;  %v2510_v13 = vpop.f32.mrf.mxu1 }
  0xe8   :  { %2767 = vmatmul.bf16.vlgmr.msrb.gmra.mxu2 %v16182_v57  ;;  %v10928_v16 = vld [vmem:[#allocation2 + $0x928] sm:$0xf0]  ;;  %v10134_v13 = vld [vmem:[#allocation2 + $0x2d0] sm:$0xf] }
  0xe9   :  { %2811 = vmatpush.bf16.msra.mxu2 %v11027_v45  ;;  %2786 = vmatpush.bf16.msrb.mxu1 %v10483_v49  ;;  %v14885_v18 = vld [vmem:[#allocation2 + $0x4cc] sm:$0xf]  ;;  %v10931_v24 = vor.u32 %v15021_v15, %v10928_v16  ;;  %v2534_v49 = vpop.f32.mrf.mxu3  ;;  %v14794_v15 = vld [vmem:[#allocation2 + $0x1ec] sm:$0xf0] }
  0xea   :  { %2780 = vmatmul.bf16.vlgmr.msra.gmra.mxu0 %v16188_v6  ;;  %v10384_v19 = vld [vmem:[#allocation2 + $0x4e8] sm:$0xf0]  ;;  %v16226_v59 = vadd.f32 %v2534_v49, %v2522_v47 }
  0xeb   :  { %2799 = vmatpush.bf16.msrb.mxu3 %v10739_v52  ;;  %2824 = vmatpush.bf16.msrb.mxu0 %v11283_v58  ;;  %v14949_v22 = vld [vmem:[#allocation2 + $0x6cc] sm:$0xf]  ;;  %v10387_v27 = vor.u32 %v14885_v18, %v10384_v19  ;;  %v2497_v58 = vpop.f32.mrf.mxu0  ;;  %v2523_v18 = vpop.f32.mrf.mxu2 }
  0xec   :  { %v10640_v23 = vld [vmem:[#allocation2 + $0x6e8] sm:$0xf0]  ;;  %v14762_v18 = vld [vmem:[#allocation2 + $0xec] sm:$0xf0] }
  0xed   :  { %2812 = vmatpush.bf16.msra.mxu2 %v10995_v62  ;;  %2787 = vmatpush.bf16.msrb.mxu1 %v10451_v1  ;;  %v15085_v25 = vld [vmem:[#allocation2 + $0xb0c] sm:$0xf]  ;;  %v10643_v30 = vor.u32 %v14949_v22, %v10640_v23 }
  0xee   :  { %v11184_v26 = vld [vmem:[#allocation2 + $0xb28] sm:$0xf0] }
  0xef   :  { %2800 = vmatpush.bf16.msrb.mxu3 %v10707_v4  ;;  %2825 = vmatpush.bf16.msrb.mxu0 %v11251_v8  ;;  %v15013_v28 = vld [vmem:[#allocation2 + $0x8cc] sm:$0xf]  ;;  %v11187_v35 = vor.u32 %v15085_v25, %v11184_v26 }
  0xf0   :  { %v10896_v29 = vld [vmem:[#allocation2 + $0x8e8] sm:$0xf0] }
  0xf1   :  { %2813 = vmatpush.bf16.msra.mxu2 %v10963_v11  ;;  %2788 = vmatpush.bf16.msrb.mxu1 %v10419_v14  ;;  %v14877_v31 = vld [vmem:[#allocation2 + $0x48c] sm:$0xf]  ;;  %v10899_v40 = vor.u32 %v15013_v28, %v10896_v29  ;;  %v10262_v11 = vld [vmem:[#allocation2 + $0x3d0] sm:$0xf]  ;;  %v2536_v26 = vpop.f32.mrf.mxu3 }
  0xf2   :  { %v10352_v32 = vld [vmem:[#allocation2 + $0x4a8] sm:$0xf0]  ;;  %v10263_v23 = vor.u32 %v14858_v12, %v10262_v11  ;;  %v10230_v29 = vld [vmem:[#allocation2 + $0x390] sm:$0xf] }
  0xf3   :  { %2801 = vmatpush.bf16.msrb.mxu3 %v10675_v17  ;;  %2826 = vmatpush.bf16.msrb.mxu0 %v11219_v20  ;;  %v14941_v36 = vld [vmem:[#allocation2 + $0x68c] sm:$0xf]  ;;  %v10355_v44 = vor.u32 %v14877_v31, %v10352_v32  ;;  %v9974_v32 = vld [vmem:[#allocation2 + $0x190] sm:$0xf] }
  0xf4   :  { %v10608_v37 = vld [vmem:[#allocation2 + $0x6a8] sm:$0xf0]  ;;  %v14970_v11 = vld [vmem:[#allocation2 + $0x76c] sm:$0xf0] }
  0xf5   :  { %2814 = vmatpush.bf16.msra.mxu2 %v10931_v24  ;;  %v15077_v41 = vld [vmem:[#allocation2 + $0xacc] sm:$0xf]  ;;  %2789 = vmatpush.bf16.msrb.mxu1 %v10387_v27  ;;  %v10611_v50 = vor.u32 %v14941_v36, %v10608_v37  ;;  %v10007_v27 = vor.u32 %v14794_v15, %v10006_v10  ;;  %v10710_v10 = vld [vmem:[#allocation2 + $0x750] sm:$0xf] }
  0xf6   :  { %v11152_v42 = vld [vmem:[#allocation2 + $0xae8] sm:$0xf0]  ;;  %v10678_v26 = vld [vmem:[#allocation2 + $0x710] sm:$0xf] }
  0xf7   :  { %v15005_v45 = vld [vmem:[#allocation2 + $0x88c] sm:$0xf]  ;;  %2802 = vmatpush.bf16.msrb.mxu3 %v10643_v30  ;;  %2827 = vmatpush.bf16.msrb.mxu0 %v11187_v35  ;;  %v11155_v54 = vor.u32 %v15077_v41, %v11152_v42  ;;  %v14850_v30 = vld [vmem:[#allocation2 + $0x3ac] sm:$0xf0] }
  0xf8   :  { %v10864_v46 = vld [vmem:[#allocation2 + $0x8a8] sm:$0xf0]  ;;  %v10231_v41 = vor.u32 %v14850_v30, %v10230_v29  ;;  %v10774_v42 = vld [vmem:[#allocation2 + $0x7d0] sm:$0xf] }
  0xf9   :  { %v14869_v51 = vld [vmem:[#allocation2 + $0x44c] sm:$0xf]  ;;  %2815 = vmatpush.bf16.msra.mxu2 %v10899_v40  ;;  %v10867_v61 = vor.u32 %v15005_v45, %v10864_v46  ;;  %2790 = vmatpush.bf16.msrb.mxu1 %v10355_v44  ;;  %v14922_v40 = vld [vmem:[#allocation2 + $0x5ec] sm:$0xf0]  ;;  %v9975_v44 = vor.u32 %v14786_v33, %v9974_v32 }
  0xfa   :  { %v10320_v52 = vld [vmem:[#allocation2 + $0x468] sm:$0xf0]  ;;  %v10198_v45 = vld [vmem:[#allocation2 + $0x350] sm:$0xf]  ;;  %v10519_v49 = vor.u32 %v14922_v40, %v10518_v38 }
  0xfb   :  { %v14933_v55 = vld [vmem:[#allocation2 + $0x64c] sm:$0xf]  ;;  %v10323_v0 = vor.u32 %v14869_v51, %v10320_v52  ;;  %2803 = vmatpush.bf16.msrb.mxu3 %v10611_v50  ;;  %2828 = vmatpush.bf16.msrb.mxu0 %v11155_v54  ;;  %v14842_v46 = vld [vmem:[#allocation2 + $0x36c] sm:$0xf0]  ;;  %v10775_v52 = vor.u32 %v14986_v43, %v10774_v42  ;;  %v2573_v54 = vpop.f32.mrf.mxu2  ;;  %v2547_v15 = vpop.f32.mrf.mxu0 }
  0xfc   :  { %v10576_v56 = vld [vmem:[#allocation2 + $0x668] sm:$0xf0]  ;;  %v9942_v50 = vld [vmem:[#allocation2 + $0x150] sm:$0xf]  ;;  %v10199_v58 = vor.u32 %v14842_v46, %v10198_v45 }
  0xfd   :  { %v15069_v62 = vld [vmem:[#allocation2 + $0xa8c] sm:$0xf]  ;;  %v10579_v4 = vor.u32 %v14933_v55, %v10576_v56  ;;  %2816 = vmatpush.bf16.msra.mxu2 %v10867_v61  ;;  %2791 = vmatpush.bf16.msrb.mxu1 %v10323_v0  ;;  %v14778_v51 = vld [vmem:[#allocation2 + $0x16c] sm:$0xf0] }
  0xfe   :  { %v11120_v63 = vld [vmem:[#allocation2 + $0xaa8] sm:$0xf0]  ;;  %v10486_v55 = vld [vmem:[#allocation2 + $0x590] sm:$0xf] }
  0xff   :  { %v14997_v1 = vld [vmem:[#allocation2 + $0x84c] sm:$0xf]  ;;  %v11123_v9 = vor.u32 %v15069_v62, %v11120_v63  ;;  %2804 = vmatpush.bf16.msrb.mxu3 %v10579_v4  ;;  %v14914_v56 = vld [vmem:[#allocation2 + $0x5ac] sm:$0xf0]  ;;  %v9943_v63 = vor.u32 %v14778_v51, %v9942_v50 }
 0x100   :  { %v10832_v2 = vld [vmem:[#allocation2 + $0x868] sm:$0xf0]  ;;  %v10742_v61 = vld [vmem:[#allocation2 + $0x790] sm:$0xf] }
 0x101   :  { %v14861_v3 = vld [vmem:[#allocation2 + $0x40c] sm:$0xf]  ;;  %v10835_v14 = vor.u32 %v14997_v1, %v10832_v2  ;;  %2829 = vmatpush.bf16.msrb.mxu0 %v11123_v9  ;;  %v14978_v62 = vld [vmem:[#allocation2 + $0x7ac] sm:$0xf0]  ;;  %v10487_v2 = vor.u32 %v14914_v56, %v10486_v55 }
 0x102   :  { %v10288_v5 = vld [vmem:[#allocation2 + $0x428] sm:$0xf0]  ;;  %v10166_v0 = vld [vmem:[#allocation2 + $0x310] sm:$0xf]  ;;  %v2586_v51 = vpop.f32.mrf.mxu3 }
 0x103   :  { %v14925_v7 = vld [vmem:[#allocation2 + $0x60c] sm:$0xf]  ;;  %v10291_v19 = vor.u32 %v14861_v3, %v10288_v5  ;;  %2817 = vmatpush.bf16.msra.mxu2 %v10835_v14  ;;  %v14834_v1 = vld [vmem:[#allocation2 + $0x32c] sm:$0xf0]  ;;  %v10743_v5 = vor.u32 %v14978_v62, %v10742_v61  ;;  %v2549_v50 = vpop.f32.mrf.mxu0 }
 0x104   :  { %v10544_v8 = vld [vmem:[#allocation2 + $0x628] sm:$0xf0]  ;;  %v9910_v3 = vld [vmem:[#allocation2 + $0x110] sm:$0xf]  ;;  %v10167_v9 = vor.u32 %v14834_v1, %v10166_v0  ;;  %v10264_v50 = vld [vmem:[#allocation2 + $0x3f0] sm:$0xf0] }
 0x105   :  { %v15061_v16 = vld [vmem:[#allocation2 + $0xa4c] sm:$0xf]  ;;  %v10547_v22 = vor.u32 %v14925_v7, %v10544_v8  ;;  %2792 = vmatpush.bf16.msrb.mxu1 %v10291_v19  ;;  %v14770_v4 = vld [vmem:[#allocation2 + $0x12c] sm:$0xf0]  ;;  %v2548_v19 = vadd.f32 %v2547_v15, %v16226_v59 }
 0x106   :  { %v11088_v17 = vld [vmem:[#allocation2 + $0xa68] sm:$0xf0]  ;;  %v10454_v7 = vld [vmem:[#allocation2 + $0x550] sm:$0xf]  ;;  %v9911_v12 = vor.u32 %v14770_v4, %v9910_v3 }
 0x107   :  { %v14989_v20 = vld [vmem:[#allocation2 + $0x80c] sm:$0xf]  ;;  %v11091_v28 = vor.u32 %v15061_v16, %v11088_v17  ;;  %2805 = vmatpush.bf16.msrb.mxu3 %v10547_v22  ;;  %v14906_v8 = vld [vmem:[#allocation2 + $0x56c] sm:$0xf0]  ;;  %v2575_v22 = vpop.f32.mrf.mxu2 }
 0x108   :  { %v10800_v21 = vld [vmem:[#allocation2 + $0x828] sm:$0xf0]  ;;  %2793 = vmatmul.bf16.vlgmr.msrb.gmra.mxu1 %v16180_v53  ;;  %v14826_v14 = vld [vmem:[#allocation2 + $0x2ec] sm:$0xf0]  ;;  %v10455_v16 = vor.u32 %v14906_v8, %v10454_v7 }
 0x109   :  { %v15117_v24 = vld [vmem:[#allocation2 + $0xc0c] sm:$0xf]  ;;  %v10803_v31 = vor.u32 %v14989_v20, %v10800_v21  ;;  %2863 = vmatpush.bf16.msra.mxu1 %v10263_v23  ;;  %2830 = vmatpush.bf16.msrb.mxu0 %v11091_v28  ;;  %v9878_v17 = vld [vmem:[#allocation2 + $0xd0] sm:$0xf]  ;;  %v2560_v20 = vpop.f32.mrf.mxu1  ;;  %v10711_v21 = vor.u32 %v14970_v11, %v10710_v10 }
 0x10a   :  { %v11312_v25 = vld [vmem:[#allocation2 + $0xc28] sm:$0xf0]  ;;  %2806 = vmatmul.bf16.vlgmr.msrb.gmra.mxu3 %v16184_v60  ;;  %v10422_v23 = vld [vmem:[#allocation2 + $0x510] sm:$0xf]  ;;  %v2561_v28 = vadd.f32 %v2560_v20, %v2548_v19  ;;  %v9879_v29 = vor.u32 %v14762_v18, %v9878_v17 }
 0x10b   :  { %v15053_v35 = vld [vmem:[#allocation2 + $0xa0c] sm:$0xf]  ;;  %v11315_v37 = vor.u32 %v15117_v24, %v11312_v25  ;;  %2850 = vmatpush.bf16.msra.mxu3 %v10007_v27  ;;  %2818 = vmatpush.bf16.msra.mxu2 %v10803_v31  ;;  %v14898_v24 = vld [vmem:[#allocation2 + $0x52c] sm:$0xf0]  ;;  %v10135_v25 = vor.u32 %v14826_v14, %v10134_v13 }
 0x10c   :  { %v11056_v36 = vld [vmem:[#allocation2 + $0xa28] sm:$0xf0]  ;;  %v14962_v27 = vld [vmem:[#allocation2 + $0x72c] sm:$0xf0]  ;;  %v10423_v32 = vor.u32 %v14898_v24, %v10422_v23 }
 0x10d   :  { %v11059_v47 = vor.u32 %v15053_v35, %v11056_v36  ;;  %2864 = vmatpush.bf16.msra.mxu1 %v10231_v41  ;;  %v10102_v30 = vld [vmem:[#allocation2 + $0x290] sm:$0xf]  ;;  %v16233_v36 = vadd.f32 %v2573_v54, %v2561_v28  ;;  %v10679_v59 = vor.u32 %v14962_v27, %v10678_v26  ;;  %v2588_v26 = vpop.f32.mrf.mxu3 }
 0x10e   :  { %2819 = vmatmul.bf16.vlgmr.msra.gmra.mxu2 %v16202_v34  ;;  %v14818_v31 = vld [vmem:[#allocation2 + $0x2ac] sm:$0xf0] }
 0x10f   :  { %2844 = vmatpush.bf16.msrb.mxu2 %v11315_v37  ;;  %2851 = vmatpush.bf16.msra.mxu3 %v9975_v44  ;;  %v9846_v33 = vld [vmem:[#allocation2 + $0x90] sm:$0xf]  ;;  %v10103_v40 = vor.u32 %v14818_v31, %v10102_v30  ;;  %v2599_v0 = vpop.f32.mrf.mxu2 }
 0x110   :  { %2831 = vmatpush.bf16.msrb.mxu0 %v11059_v47  ;;  %v14754_v35 = vld [vmem:[#allocation2 + $0xac] sm:$0xf0] }
 0x111   :  { %2865 = vmatpush.bf16.msra.mxu1 %v10199_v58  ;;  %v10390_v37 = vld [vmem:[#allocation2 + $0x4d0] sm:$0xf]  ;;  %v9847_v43 = vor.u32 %v14754_v35, %v9846_v33  ;;  %v2562_v56 = vpop.f32.mrf.mxu1 }
 0x112   :  { %v14890_v38 = vld [vmem:[#allocation2 + $0x4ec] sm:$0xf0] }
 0x113   :  { %2876 = vmatpush.bf16.msra.mxu2 %v10519_v49  ;;  %2852 = vmatpush.bf16.msra.mxu3 %v9943_v63  ;;  %v10646_v41 = vld [vmem:[#allocation2 + $0x6d0] sm:$0xf]  ;;  %v10391_v46 = vor.u32 %v14890_v38, %v10390_v37  ;;  %v14790_v37 = vld [vmem:[#allocation2 + $0x1d4] sm:$0xf] }
 0x114   :  { %2889 = vmatpush.bf16.msra.mxu0 %v10775_v52  ;;  %v14954_v42 = vld [vmem:[#allocation2 + $0x6ec] sm:$0xf0]  ;;  %v10008_v38 = vld [vmem:[#allocation2 + $0x1f0] sm:$0xf0] }
 0x115   :  { %2832 = vmatmul.bf16.vlgmr.msrb.gmra.mxu0 %v16204_v39  ;;  %2866 = vmatpush.bf16.msra.mxu1 %v10167_v9  ;;  %v10070_v44 = vld [vmem:[#allocation2 + $0x250] sm:$0xf]  ;;  %v10647_v52 = vor.u32 %v14954_v42, %v10646_v41 }
 0x116   :  { %v14810_v45 = vld [vmem:[#allocation2 + $0x26c] sm:$0xf0] }
 0x117   :  { %2877 = vmatpush.bf16.msra.mxu2 %v10487_v2  ;;  %2853 = vmatpush.bf16.msra.mxu3 %v9911_v12  ;;  %v9814_v47 = vld [vmem:[#allocation2 + $0x50] sm:$0xf]  ;;  %v10071_v58 = vor.u32 %v14810_v45, %v10070_v44  ;;  %v2601_v35 = vpop.f32.mrf.mxu2 }
 0x118   :  { %2890 = vmatpush.bf16.msra.mxu0 %v10743_v5  ;;  %v14746_v49 = vld [vmem:[#allocation2 + $0x6c] sm:$0xf0]  ;;  %v16237_v5 = vadd.f32 %v2599_v0, %v2586_v51  ;;  %v10011_v51 = vor.u32 %v14790_v37, %v10008_v38  ;;  %v14758_v35 = vld [vmem:[#allocation2 + $0xd4] sm:$0xf] }
 0x119   :  { %2867 = vmatpush.bf16.msra.mxu1 %v10135_v25  ;;  %v10358_v54 = vld [vmem:[#allocation2 + $0x490] sm:$0xf]  ;;  %v9815_v1 = vor.u32 %v14746_v49, %v9814_v47  ;;  %v14854_v49 = vld [vmem:[#allocation2 + $0x3d4] sm:$0xf] }
 0x11a   :  { %v14882_v55 = vld [vmem:[#allocation2 + $0x4ac] sm:$0xf0] }
 0x11b   :  { %2878 = vmatpush.bf16.msra.mxu2 %v10455_v16  ;;  %2854 = vmatpush.bf16.msra.mxu3 %v9879_v29  ;;  %v10614_v61 = vld [vmem:[#allocation2 + $0x690] sm:$0xf]  ;;  %v10359_v7 = vor.u32 %v14882_v55, %v10358_v54  ;;  %v14782_v54 = vld [vmem:[#allocation2 + $0x194] sm:$0xf] }
 0x11c   :  { %2891 = vmatpush.bf16.msra.mxu0 %v10711_v21  ;;  %v14946_v62 = vld [vmem:[#allocation2 + $0x6ac] sm:$0xf0]  ;;  %v9976_v55 = vld [vmem:[#allocation2 + $0x1b0] sm:$0xf0] }
 0x11d   :  { %2868 = vmatpush.bf16.msra.mxu1 %v10103_v40  ;;  %v9782_v63 = vld [vmem:[#allocation2 + $0x10] sm:$0xf]  ;;  %v10615_v11 = vor.u32 %v14946_v62, %v10614_v61 }
 0x11e   :  { %11335 = vmatmul.msk.bf16.vlgmr.msrb.gmra.mxu2 %vm2482_vm0, %v16195_v48  ;;  %v14738_v2 = vld [vmem:[#allocation2 + $0x2c] sm:$0xf0] }
 0x11f   :  { %2879 = vmatpush.bf16.msra.mxu2 %v10423_v32  ;;  %2855 = vmatpush.bf16.msra.mxu3 %v9847_v43  ;;  %v10038_v3 = vld [vmem:[#allocation2 + $0x210] sm:$0xf]  ;;  %v9783_v18 = vor.u32 %v14738_v2, %v9782_v63  ;;  %v10232_v2 = vld [vmem:[#allocation2 + $0x3b0] sm:$0xf0] }
 0x120   :  { %2892 = vmatpush.bf16.msra.mxu0 %v10679_v59  ;;  %v14802_v4 = vld [vmem:[#allocation2 + $0x22c] sm:$0xf0] }
 0x121   :  { %v11030_v8 = vld [vmem:[#allocation2 + $0x9d0] sm:$0xf]  ;;  %2869 = vmatpush.bf16.msra.mxu1 %v10071_v58  ;;  %v10039_v15 = vor.u32 %v14802_v4, %v10038_v3  ;;  %v10267_v58 = vor.u32 %v14854_v49, %v10264_v50  ;;  %v9979_v3 = vor.u32 %v14782_v54, %v9976_v55  ;;  %v14750_v54 = vld [vmem:[#allocation2 + $0x94] sm:$0xf] }
 0x122   :  { %v11286_v9 = vld [vmem:[#allocation2 + $0xbd0] sm:$0xf]  ;;  %v9848_v55 = vld [vmem:[#allocation2 + $0xb0] sm:$0xf0] }
 0x123   :  { %2880 = vmatpush.bf16.msra.mxu2 %v10391_v46  ;;  %v15114_v10 = vld [vmem:[#allocation2 + $0xbec] sm:$0xf0]  ;;  %2856 = vmatpush.bf16.msra.mxu3 %v9815_v1  ;;  %v14846_v1 = vld [vmem:[#allocation2 + $0x394] sm:$0xf] }
 0x124   :  { %2893 = vmatpush.bf16.msra.mxu0 %v10647_v52  ;;  %v15050_v12 = vld [vmem:[#allocation2 + $0x9ec] sm:$0xf0]  ;;  %v11287_v19 = vor.u32 %v15114_v10, %v11286_v9  ;;  %v10235_v10 = vor.u32 %v14846_v1, %v10232_v2  ;;  %v14814_v2 = vld [vmem:[#allocation2 + $0x294] sm:$0xf] }
 0x125   :  { %v10326_v13 = vld [vmem:[#allocation2 + $0x450] sm:$0xf]  ;;  %v11031_v21 = vor.u32 %v15050_v12, %v11030_v8  ;;  %2870 = vmatpush.bf16.msra.mxu1 %v10039_v15  ;;  %v9944_v8 = vld [vmem:[#allocation2 + $0x170] sm:$0xf0] }
 0x126   :  { %v14874_v14 = vld [vmem:[#allocation2 + $0x46c] sm:$0xf0]  ;;  %v14838_v15 = vld [vmem:[#allocation2 + $0x354] sm:$0xf]  ;;  %v2638_v49 = vpop.f32.mrf.mxu3 }
 0x127   :  { %v10582_v16 = vld [vmem:[#allocation2 + $0x650] sm:$0xf]  ;;  %2881 = vmatpush.bf16.msra.mxu2 %v10359_v7  ;;  %v10327_v22 = vor.u32 %v14874_v14, %v10326_v13  ;;  %2857 = vmatpush.bf16.msra.mxu3 %v9783_v18  ;;  %v14774_v7 = vld [vmem:[#allocation2 + $0x154] sm:$0xf] }
 0x128   :  { %v14938_v17 = vld [vmem:[#allocation2 + $0x66c] sm:$0xf0]  ;;  %2894 = vmatpush.bf16.msra.mxu0 %v10615_v11  ;;  %2871 = vmatmul.bf16.vlgmr.msra.gmra.mxu1 %v16188_v6  ;;  %v9947_v18 = vor.u32 %v14774_v7, %v9944_v8  ;;  %v9851_v7 = vor.u32 %v14750_v54, %v9848_v55  ;;  %v10520_v8 = vld [vmem:[#allocation2 + $0x5f0] sm:$0xf0] }
 0x129   :  { %v10998_v20 = vld [vmem:[#allocation2 + $0x990] sm:$0xf]  ;;  %v10583_v27 = vor.u32 %v14938_v17, %v10582_v16  ;;  %2915 = vmatpush.bf16.msrb.mxu1 %v11287_v19  ;;  %v10200_v16 = vld [vmem:[#allocation2 + $0x370] sm:$0xf0]  ;;  %v2612_v17 = vpop.f32.mrf.mxu0 }
 0x12a   :  { %v15042_v23 = vld [vmem:[#allocation2 + $0x9ac] sm:$0xf0]  ;;  %2858 = vmatmul.bf16.vlgmr.msra.gmra.mxu3 %v16182_v57  ;;  %v2613_v19 = vadd.f32 %v2612_v17, %v16237_v5  ;;  %v14894_v55 = vld [vmem:[#allocation2 + $0x514] sm:$0xf] }
 0x12b   :  { %v11254_v24 = vld [vmem:[#allocation2 + $0xb90] sm:$0xf]  ;;  %2902 = vmatpush.bf16.msrb.mxu3 %v11031_v21  ;;  %2882 = vmatpush.bf16.msra.mxu2 %v10327_v22  ;;  %v10999_v40 = vor.u32 %v15042_v23, %v10998_v20  ;;  %v14766_v21 = vld [vmem:[#allocation2 + $0x114] sm:$0xf] }
 0x12c   :  { %v15106_v25 = vld [vmem:[#allocation2 + $0xbac] sm:$0xf0]  ;;  %2895 = vmatpush.bf16.msra.mxu0 %v10583_v27  ;;  %v9912_v22 = vld [vmem:[#allocation2 + $0x130] sm:$0xf0] }
 0x12d   :  { %v10294_v28 = vld [vmem:[#allocation2 + $0x410] sm:$0xf]  ;;  %v11255_v59 = vor.u32 %v15106_v25, %v11254_v24  ;;  %v10203_v24 = vor.u32 %v14838_v15, %v10200_v16 }
 0x12e   :  { %v14866_v29 = vld [vmem:[#allocation2 + $0x42c] sm:$0xf0] }
 0x12f   :  { %v10550_v30 = vld [vmem:[#allocation2 + $0x610] sm:$0xf]  ;;  %v10295_v41 = vor.u32 %v14866_v29, %v10294_v28  ;;  %2916 = vmatpush.bf16.msrb.mxu1 %v11255_v59  ;;  %2903 = vmatpush.bf16.msrb.mxu3 %v10999_v40  ;;  %v14830_v29 = vld [vmem:[#allocation2 + $0x314] sm:$0xf] }
 0x130   :  { %v14930_v31 = vld [vmem:[#allocation2 + $0x62c] sm:$0xf0]  ;;  %v9880_v59 = vld [vmem:[#allocation2 + $0xf0] sm:$0xf0] }
 0x131   :  { %v11318_v32 = vld [vmem:[#allocation2 + $0xc10] sm:$0xf]  ;;  %v10551_v45 = vor.u32 %v14930_v31, %v10550_v30  ;;  %2883 = vmatpush.bf16.msra.mxu2 %v10295_v41  ;;  %v10168_v30 = vld [vmem:[#allocation2 + $0x330] sm:$0xf0]  ;;  %v9915_v31 = vor.u32 %v14766_v21, %v9912_v22 }
 0x132   :  { %v15122_v33 = vld [vmem:[#allocation2 + $0xc2c] sm:$0xf0]  ;;  %v10171_v38 = vor.u32 %v14830_v29, %v10168_v30  ;;  %v14910_v21 = vld [vmem:[#allocation2 + $0x594] sm:$0xf] }
 0x133   :  { %v10966_v42 = vld [vmem:[#allocation2 + $0x950] sm:$0xf]  ;;  %v11319_v47 = vor.u32 %v15122_v33, %v11318_v32  ;;  %2896 = vmatpush.bf16.msra.mxu0 %v10551_v45  ;;  %v2625_v32 = vpop.f32.mrf.mxu1  ;;  %v10136_v45 = vld [vmem:[#allocation2 + $0x2f0] sm:$0xf0] }
 0x134   :  { %v11222_v43 = vld [vmem:[#allocation2 + $0xb50] sm:$0xf]  ;;  %2884 = vmatmul.bf16.vlgmr.msra.gmra.mxu2 %v16180_v53  ;;  %v2626_v5 = vadd.f32 %v2625_v32, %v2613_v19  ;;  %v14806_v19 = vld [vmem:[#allocation2 + $0x254] sm:$0xf] }
 0x135   :  { %v15098_v44 = vld [vmem:[#allocation2 + $0xb6c] sm:$0xf0]  ;;  %2935 = vmatpush.bf16.msrb.mxu2 %v11319_v47  ;;  %v9883_v47 = vor.u32 %v14758_v35, %v9880_v59  ;;  %v14734_v29 = vld [vmem:[#allocation2 + $0x14] sm:$0xf] }
 0x136   :  { %v15034_v46 = vld [vmem:[#allocation2 + $0x96c] sm:$0xf0]  ;;  %v11223_v52 = vor.u32 %v15098_v44, %v11222_v43  ;;  %2897 = vmatmul.bf16.vlgmr.msra.gmra.mxu0 %v16184_v60  ;;  %v14822_v44 = vld [vmem:[#allocation2 + $0x2d4] sm:$0xf]  ;;  %v2639_v50 = vadd.f32 %v2638_v49, %v2626_v5 }
 0x137   :  { %v10967_v56 = vor.u32 %v15034_v46, %v10966_v42  ;;  %v10934_v61 = vld [vmem:[#allocation2 + $0x910] sm:$0xf]  ;;  %2941 = vmatpush.bf16.msrb.mxu0 %v10011_v51  ;;  %v2614_v46 = vpop.f32.mrf.mxu0  ;;  %v9784_v30 = vld [vmem:[#allocation2 + $0x30] sm:$0xf0] }
 0x138   :  { %v11190_v62 = vld [vmem:[#allocation2 + $0xb10] sm:$0xf]  ;;  %2917 = vmatpush.bf16.msrb.mxu1 %v11223_v52  ;;  %v2651_v52 = vpop.f32.mrf.mxu2  ;;  %v11032_v5 = vld [vmem:[#allocation2 + $0x9f0] sm:$0xf0] }
 0x139   :  { %v15090_v63 = vld [vmem:[#allocation2 + $0xb2c] sm:$0xf0]  ;;  %2904 = vmatpush.bf16.msrb.mxu3 %v10967_v56  ;;  %2954 = vmatpush.bf16.msra.mxu2 %v10267_v58  ;;  %v2652_v1 = vadd.f32 %v2651_v52, %v2639_v50  ;;  %v15110_v46 = vld [vmem:[#allocation2 + $0xbd4] sm:$0xf] }
 0x13a   :  { %v15026_v0 = vld [vmem:[#allocation2 + $0x92c] sm:$0xf0]  ;;  %v11191_v4 = vor.u32 %v15090_v63, %v11190_v62  ;;  %v15038_v50 = vld [vmem:[#allocation2 + $0x994] sm:$0xf] }
 0x13b   :  { %v10935_v9 = vor.u32 %v15026_v0, %v10934_v61  ;;  %v10902_v11 = vld [vmem:[#allocation2 + $0x8d0] sm:$0xf]  ;;  %2942 = vmatpush.bf16.msrb.mxu0 %v9979_v3  ;;  %v10139_v61 = vor.u32 %v14822_v44, %v10136_v45  ;;  %v10104_v3 = vld [vmem:[#allocation2 + $0x2b0] sm:$0xf0] }
 0x13c   :  { %v11158_v12 = vld [vmem:[#allocation2 + $0xad0] sm:$0xf]  ;;  %2918 = vmatpush.bf16.msrb.mxu1 %v11191_v4  ;;  %v14918_v4 = vld [vmem:[#allocation2 + $0x5d4] sm:$0xf]  ;;  %v10107_v16 = vor.u32 %v14814_v2, %v10104_v3 }
 0x13d   :  { %v15082_v13 = vld [vmem:[#allocation2 + $0xaec] sm:$0xf0]  ;;  %2905 = vmatpush.bf16.msrb.mxu3 %v10935_v9  ;;  %2955 = vmatpush.bf16.msra.mxu2 %v10235_v10  ;;  %v14982_v9 = vld [vmem:[#allocation2 + $0x7d4] sm:$0xf]  ;;  %v10523_v17 = vor.u32 %v14918_v4, %v10520_v8 }
 0x13e   :  { %v15018_v14 = vld [vmem:[#allocation2 + $0x8ec] sm:$0xf0]  ;;  %v11159_v20 = vor.u32 %v15082_v13, %v11158_v12  ;;  %v10776_v10 = vld [vmem:[#allocation2 + $0x7f0] sm:$0xf0] }
 0x13f   :  { %v10903_v23 = vor.u32 %v15018_v14, %v10902_v11  ;;  %v10870_v25 = vld [vmem:[#allocation2 + $0x890] sm:$0xf]  ;;  %2943 = vmatpush.bf16.msrb.mxu0 %v9947_v18  ;;  %v2627_v11 = vpop.f32.mrf.mxu1  ;;  %v14742_v13 = vld [vmem:[#allocation2 + $0x54] sm:$0xf]  ;;  %v10779_v18 = vor.u32 %v14982_v9, %v10776_v10  ;;  %v2664_v22 = vpop.f32.mrf.mxu0 }
 0x140   :  { %v11126_v26 = vld [vmem:[#allocation2 + $0xa90] sm:$0xf]  ;;  %2919 = vmatpush.bf16.msrb.mxu1 %v11159_v20  ;;  %v9816_v14 = vld [vmem:[#allocation2 + $0x70] sm:$0xf0] }
 0x141   :  { %v15074_v27 = vld [vmem:[#allocation2 + $0xaac] sm:$0xf0]  ;;  %2906 = vmatpush.bf16.msrb.mxu3 %v10903_v23  ;;  %2956 = vmatpush.bf16.msra.mxu2 %v10203_v24  ;;  %v10072_v20 = vld [vmem:[#allocation2 + $0x270] sm:$0xf0]  ;;  %v9819_v23 = vor.u32 %v14742_v13, %v9816_v14 }
 0x142   :  { %v15010_v28 = vld [vmem:[#allocation2 + $0x8ac] sm:$0xf0]  ;;  %v11127_v33 = vor.u32 %v15074_v27, %v11126_v26  ;;  %v10488_v24 = vld [vmem:[#allocation2 + $0x5b0] sm:$0xf0]  ;;  %v2640_v27 = vpop.f32.mrf.mxu3  ;;  %v10075_v32 = vor.u32 %v14806_v19, %v10072_v20 }
 0x143   :  { %v10871_v37 = vor.u32 %v15010_v28, %v10870_v25  ;;  %v10838_v40 = vld [vmem:[#allocation2 + $0x850] sm:$0xf]  ;;  %2944 = vmatpush.bf16.msrb.mxu0 %v9915_v31  ;;  %v14974_v25 = vld [vmem:[#allocation2 + $0x794] sm:$0xf]  ;;  %v16246_v28 = vadd.f32 %v2664_v22, %v2652_v1  ;;  %v2653_v31 = vpop.f32.mrf.mxu2  ;;  %v10491_v35 = vor.u32 %v14910_v21, %v10488_v24 }
 0x144   :  { %v11094_v41 = vld [vmem:[#allocation2 + $0xa50] sm:$0xf]  ;;  %2920 = vmatpush.bf16.msrb.mxu1 %v11127_v33  ;;  %11336 = vmatmul.msk.bf16.vlgmr.msrb.gmra.mxu2 %vm2482_vm0, %v16195_v48  ;;  %v10744_v26 = vld [vmem:[#allocation2 + $0x7b0] sm:$0xf0] }
 0x145   :  { %v15066_v42 = vld [vmem:[#allocation2 + $0xa6c] sm:$0xf0]  ;;  %2907 = vmatpush.bf16.msrb.mxu3 %v10871_v37  ;;  %2957 = vmatpush.bf16.msra.mxu2 %v10171_v38  ;;  %v15046_v33 = vld [vmem:[#allocation2 + $0x9d4] sm:$0xf]  ;;  %v10747_v59 = vor.u32 %v14974_v25, %v10744_v26 }
 0x146   :  { %v15002_v43 = vld [vmem:[#allocation2 + $0x86c] sm:$0xf0]  ;;  %v11095_v51 = vor.u32 %v15066_v42, %v11094_v41  ;;  %v14798_v37 = vld [vmem:[#allocation2 + $0x214] sm:$0xf]  ;;  %v9787_v41 = vor.u32 %v14734_v29, %v9784_v30  ;;  %v11035_v45 = vor.u32 %v15046_v33, %v11032_v5 }
 0x147   :  { %v10806_v56 = vld [vmem:[#allocation2 + $0x810] sm:$0xf]  ;;  %v10839_v58 = vor.u32 %v15002_v43, %v10838_v40  ;;  %2945 = vmatpush.bf16.msrb.mxu0 %v9883_v47  ;;  %v10040_v38 = vld [vmem:[#allocation2 + $0x230] sm:$0xf0]  ;;  %v2677_v31 = vpop.f32.mrf.mxu1 }
 0x148   :  { %v14994_v62 = vld [vmem:[#allocation2 + $0x82c] sm:$0xf0]  ;;  %2921 = vmatpush.bf16.msrb.mxu1 %v11095_v51  ;;  %v14902_v40 = vld [vmem:[#allocation2 + $0x554] sm:$0xf]  ;;  %v10043_v49 = vor.u32 %v14798_v37, %v10040_v38 }
 0x149   :  { %v11062_v63 = vld [vmem:[#allocation2 + $0xa10] sm:$0xf]  ;;  %2908 = vmatpush.bf16.msrb.mxu3 %v10839_v58  ;;  %2958 = vmatpush.bf16.msra.mxu2 %v10139_v61  ;;  %v10807_v15 = vor.u32 %v14994_v62, %v10806_v56  ;;  %v10456_v42 = vld [vmem:[#allocation2 + $0x570] sm:$0xf0]  ;;  %v2666_v56 = vpop.f32.mrf.mxu0 }
 0x14a   :  { %v15058_v0 = vld [vmem:[#allocation2 + $0xa2c] sm:$0xf0]  ;;  %v14966_v43 = vld [vmem:[#allocation2 + $0x754] sm:$0xf]  ;;  %v10459_v52 = vor.u32 %v14902_v40, %v10456_v42  ;;  %v2690_v42 = vpop.f32.mrf.mxu3 }
 0x14b   :  { %v11063_v12 = vor.u32 %v15058_v0, %v11062_v63  ;;  %2946 = vmatpush.bf16.msrb.mxu0 %v9851_v7  ;;  %v10712_v44 = vld [vmem:[#allocation2 + $0x770] sm:$0xf0] }
 0x14c   :  { %v11288_v47 = vld [vmem:[#allocation2 + $0xbf0] sm:$0xf0]  ;;  %v10715_v54 = vor.u32 %v14966_v43, %v10712_v44 }
 0x14d   :  { %2922 = vmatpush.bf16.msrb.mxu1 %v11063_v12  ;;  %2909 = vmatpush.bf16.msrb.mxu3 %v10807_v15  ;;  %v11000_v51 = vld [vmem:[#allocation2 + $0x9b0] sm:$0xf0]  ;;  %v11291_v58 = vor.u32 %v15110_v46, %v11288_v47  ;;  %v2691_v46 = vadd.f32 %v2690_v42, %v2677_v31  ;;  %v14923_v31 = vld [vmem:[#allocation2 + $0x5f4] sm:$0xf0] }
 0x14e   :  { %2959 = vmatpush.bf16.msra.mxu2 %v10107_v16  ;;  %v10424_v61 = vld [vmem:[#allocation2 + $0x530] sm:$0xf0]  ;;  %v11003_v0 = vor.u32 %v15038_v50, %v11000_v51  ;;  %v9950_v42 = vld [vmem:[#allocation2 + $0x158] sm:$0xf] }
 0x14f   :  { %2947 = vmatpush.bf16.msrb.mxu0 %v9819_v23  ;;  %v14958_v62 = vld [vmem:[#allocation2 + $0x714] sm:$0xf]  ;;  %v10427_v7 = vor.u32 %v14894_v55, %v10424_v61 }
 0x150   :  { %2923 = vmatmul.bf16.vlgmr.msrb.gmra.mxu1 %v16204_v39  ;;  %2910 = vmatmul.bf16.vlgmr.msrb.gmra.mxu3 %v16202_v34  ;;  %v10680_v63 = vld [vmem:[#allocation2 + $0x730] sm:$0xf0] }
 0x151   :  { %2967 = vmatpush.bf16.msra.mxu3 %v10523_v17  ;;  %2980 = vmatpush.bf16.msra.mxu1 %v10779_v18  ;;  %v15102_v1 = vld [vmem:[#allocation2 + $0xb94] sm:$0xf]  ;;  %v10683_v8 = vor.u32 %v14958_v62, %v10680_v63  ;;  %v2703_v22 = vpop.f32.mrf.mxu0 }
 0x152   :  { %2960 = vmatpush.bf16.msra.mxu2 %v10075_v32  ;;  %v11256_v2 = vld [vmem:[#allocation2 + $0xbb0] sm:$0xf0]  ;;  %v2704_v61 = vadd.f32 %v2703_v22, %v2691_v46  ;;  %v14987_v46 = vld [vmem:[#allocation2 + $0x7f4] sm:$0xf0] }
 0x153   :  { %2948 = vmatpush.bf16.msrb.mxu0 %v9787_v41  ;;  %v15030_v3 = vld [vmem:[#allocation2 + $0x954] sm:$0xf]  ;;  %v11259_v10 = vor.u32 %v15102_v1, %v11256_v2 }
 0x154   :  { %v10968_v4 = vld [vmem:[#allocation2 + $0x970] sm:$0xf0] }
 0x155   :  { %2968 = vmatpush.bf16.msra.mxu3 %v10491_v35  ;;  %2981 = vmatpush.bf16.msra.mxu1 %v10747_v59  ;;  %v14886_v9 = vld [vmem:[#allocation2 + $0x4d4] sm:$0xf]  ;;  %v10971_v14 = vor.u32 %v15030_v3, %v10968_v4  ;;  %v10014_v3 = vld [vmem:[#allocation2 + $0x1d8] sm:$0xf] }
 0x156   :  { %2961 = vmatpush.bf16.msra.mxu2 %v10043_v49  ;;  %v10392_v11 = vld [vmem:[#allocation2 + $0x4f0] sm:$0xf0]  ;;  %2949 = vmatmul.bf16.vlgmr.msrb.gmra.mxu0 %v16182_v57  ;;  %v14795_v4 = vld [vmem:[#allocation2 + $0x1f4] sm:$0xf0] }
 0x157   :  { %2993 = vmatpush.bf16.msra.mxu0 %v11035_v45  ;;  %v14950_v12 = vld [vmem:[#allocation2 + $0x6d4] sm:$0xf]  ;;  %v10395_v19 = vor.u32 %v14886_v9, %v10392_v11 }
 0x158   :  { %v10648_v13 = vld [vmem:[#allocation2 + $0x6f0] sm:$0xf0] }
 0x159   :  { %2969 = vmatpush.bf16.msra.mxu3 %v10459_v52  ;;  %2982 = vmatpush.bf16.msra.mxu1 %v10715_v54  ;;  %v15094_v15 = vld [vmem:[#allocation2 + $0xb54] sm:$0xf]  ;;  %v10651_v20 = vor.u32 %v14950_v12, %v10648_v13  ;;  %v2716_v52 = vpop.f32.mrf.mxu2  ;;  %v2679_v12 = vpop.f32.mrf.mxu1 }
 0x15a   :  { %3006 = vmatpush.bf16.msrb.mxu2 %v11291_v58  ;;  %v11224_v16 = vld [vmem:[#allocation2 + $0xb70] sm:$0xf0]  ;;  %v2705_v58 = vpop.f32.mrf.mxu0  ;;  %v9886_v12 = vld [vmem:[#allocation2 + $0xd8] sm:$0xf] }
 0x15b   :  { %2994 = vmatpush.bf16.msra.mxu0 %v11003_v0  ;;  %2962 = vmatmul.bf16.vlgmr.msra.gmra.mxu2 %v16188_v6  ;;  %v15022_v17 = vld [vmem:[#allocation2 + $0x914] sm:$0xf]  ;;  %v11227_v23 = vor.u32 %v15094_v15, %v11224_v16  ;;  %v10015_v16 = vor.u32 %v14795_v4, %v10014_v3  ;;  %v9918_v58 = vld [vmem:[#allocation2 + $0x118] sm:$0xf] }
 0x15c   :  { %v10936_v18 = vld [vmem:[#allocation2 + $0x930] sm:$0xf0]  ;;  %v14907_v3 = vld [vmem:[#allocation2 + $0x574] sm:$0xf0] }
 0x15d   :  { %2970 = vmatpush.bf16.msra.mxu3 %v10427_v7  ;;  %2983 = vmatpush.bf16.msra.mxu1 %v10683_v8  ;;  %v14878_v21 = vld [vmem:[#allocation2 + $0x494] sm:$0xf]  ;;  %v10939_v27 = vor.u32 %v15022_v17, %v10936_v18  ;;  %v16252_v8 = vadd.f32 %v2716_v52, %v2704_v61  ;;  %v10270_v17 = vld [vmem:[#allocation2 + $0x3d8] sm:$0xf] }
 0x15e   :  { %3007 = vmatpush.bf16.msrb.mxu2 %v11259_v10  ;;  %v10360_v24 = vld [vmem:[#allocation2 + $0x4b0] sm:$0xf0]  ;;  %v14859_v18 = vld [vmem:[#allocation2 + $0x3f4] sm:$0xf0] }
 0x15f   :  { %v14942_v25 = vld [vmem:[#allocation2 + $0x694] sm:$0xf]  ;;  %2995 = vmatpush.bf16.msra.mxu0 %v10971_v14  ;;  %v10363_v5 = vor.u32 %v14878_v21, %v10360_v24  ;;  %v14787_v24 = vld [vmem:[#allocation2 + $0x1b4] sm:$0xf0] }
 0x160   :  { %v10616_v26 = vld [vmem:[#allocation2 + $0x6b0] sm:$0xf0]  ;;  %v14771_v61 = vld [vmem:[#allocation2 + $0x134] sm:$0xf0] }
 0x161   :  { %v15086_v29 = vld [vmem:[#allocation2 + $0xb14] sm:$0xf]  ;;  %2971 = vmatpush.bf16.msra.mxu3 %v10395_v19  ;;  %2984 = vmatpush.bf16.msra.mxu1 %v10651_v20  ;;  %v10619_v35 = vor.u32 %v14942_v25, %v10616_v26  ;;  %v2692_v25 = vpop.f32.mrf.mxu3  ;;  %v9919_v4 = vor.u32 %v14771_v61, %v9918_v58  ;;  %v10078_v58 = vld [vmem:[#allocation2 + $0x258] sm:$0xf] }
 0x162   :  { %v11192_v30 = vld [vmem:[#allocation2 + $0xb30] sm:$0xf0]  ;;  %3008 = vmatpush.bf16.msrb.mxu2 %v11227_v23  ;;  %v9982_v23 = vld [vmem:[#allocation2 + $0x198] sm:$0xf] }
 0x163   :  { %v15014_v32 = vld [vmem:[#allocation2 + $0x8d4] sm:$0xf]  ;;  %v11195_v37 = vor.u32 %v15086_v29, %v11192_v30  ;;  %2996 = vmatpush.bf16.msra.mxu0 %v10939_v27  ;;  %v10271_v29 = vor.u32 %v14859_v18, %v10270_v17  ;;  %v10526_v30 = vld [vmem:[#allocation2 + $0x5d8] sm:$0xf] }
 0x164   :  { %v10904_v33 = vld [vmem:[#allocation2 + $0x8f0] sm:$0xf0]  ;;  %v14971_v17 = vld [vmem:[#allocation2 + $0x774] sm:$0xf0] }
 0x165   :  { %v14870_v59 = vld [vmem:[#allocation2 + $0x454] sm:$0xf]  ;;  %v10907_v43 = vor.u32 %v15014_v32, %v10904_v33  ;;  %2972 = vmatpush.bf16.msra.mxu3 %v10363_v5  ;;  %2985 = vmatpush.bf16.msra.mxu1 %v10619_v35  ;;  %v2718_v32 = vpop.f32.mrf.mxu2  ;;  %v9983_v5 = vor.u32 %v14787_v24, %v9982_v23  ;;  %v10238_v35 = vld [vmem:[#allocation2 + $0x398] sm:$0xf] }
 0x166   :  { %v10328_v38 = vld [vmem:[#allocation2 + $0x470] sm:$0xf0]  ;;  %3009 = vmatpush.bf16.msrb.mxu2 %v11195_v37  ;;  %v10142_v23 = vld [vmem:[#allocation2 + $0x2d8] sm:$0xf] }
 0x167   :  { %v14934_v40 = vld [vmem:[#allocation2 + $0x654] sm:$0xf]  ;;  %v10331_v50 = vor.u32 %v14870_v59, %v10328_v38  ;;  %2997 = vmatpush.bf16.msra.mxu0 %v10907_v43  ;;  %v14851_v59 = vld [vmem:[#allocation2 + $0x3b4] sm:$0xf0]  ;;  %v16254_v38 = vpop.f32.mrf.mxu0 }
 0x168   :  { %v10584_v41 = vld [vmem:[#allocation2 + $0x670] sm:$0xf0]  ;;  %v14779_v43 = vld [vmem:[#allocation2 + $0x174] sm:$0xf0] }
 0x169   :  { %v15078_v44 = vld [vmem:[#allocation2 + $0xad4] sm:$0xf]  ;;  %v10587_v51 = vor.u32 %v14934_v40, %v10584_v41  ;;  %2973 = vmatpush.bf16.msra.mxu3 %v10331_v50  ;;  %v14915_v50 = vld [vmem:[#allocation2 + $0x5b4] sm:$0xf0]  ;;  %v9951_v52 = vor.u32 %v14779_v43, %v9950_v42 }
 0x16a   :  { %v11160_v45 = vld [vmem:[#allocation2 + $0xaf0] sm:$0xf0]  ;;  %v14827_v24 = vld [vmem:[#allocation2 + $0x2f4] sm:$0xf0] }
 0x16b   :  { %v15006_v47 = vld [vmem:[#allocation2 + $0x894] sm:$0xf]  ;;  %v11163_v62 = vor.u32 %v15078_v44, %v11160_v45  ;;  %2986 = vmatpush.bf16.msra.mxu1 %v10587_v51  ;;  %v10527_v44 = vor.u32 %v14923_v31, %v10526_v30  ;;  %v10782_v45 = vld [vmem:[#allocation2 + $0x7d8] sm:$0xf] }
 0x16c   :  { %v10872_v49 = vld [vmem:[#allocation2 + $0x8b0] sm:$0xf0]  ;;  %v10686_v30 = vld [vmem:[#allocation2 + $0x718] sm:$0xf] }
 0x16d   :  { %v14862_v54 = vld [vmem:[#allocation2 + $0x414] sm:$0xf]  ;;  %v10875_v2 = vor.u32 %v15006_v47, %v10872_v49  ;;  %3010 = vmatpush.bf16.msrb.mxu2 %v11163_v62  ;;  %v10239_v47 = vor.u32 %v14851_v59, %v10238_v35  ;;  %v10494_v49 = vld [vmem:[#allocation2 + $0x598] sm:$0xf] }
 0x16e   :  { %v10296_v55 = vld [vmem:[#allocation2 + $0x430] sm:$0xf0]  ;;  %v10495_v62 = vor.u32 %v14915_v50, %v10494_v49  ;;  %v14963_v31 = vld [vmem:[#allocation2 + $0x734] sm:$0xf0] }
 0x16f   :  { %v14926_v56 = vld [vmem:[#allocation2 + $0x614] sm:$0xf]  ;;  %v10299_v13 = vor.u32 %v14862_v54, %v10296_v55  ;;  %2998 = vmatpush.bf16.msra.mxu0 %v10875_v2  ;;  %v10206_v54 = vld [vmem:[#allocation2 + $0x358] sm:$0xf] }
 0x170   :  { %v10552_v63 = vld [vmem:[#allocation2 + $0x630] sm:$0xf0]  ;;  %v14843_v55 = vld [vmem:[#allocation2 + $0x374] sm:$0xf0] }
 0x171   :  { %v15070_v0 = vld [vmem:[#allocation2 + $0xa94] sm:$0xf]  ;;  %v10555_v14 = vor.u32 %v14926_v56, %v10552_v63  ;;  %2974 = vmatpush.bf16.msra.mxu3 %v10299_v13  ;;  %v10783_v56 = vor.u32 %v14987_v46, %v10782_v45  ;;  %v10750_v63 = vld [vmem:[#allocation2 + $0x798] sm:$0xf] }
 0x172   :  { %v11128_v1 = vld [vmem:[#allocation2 + $0xab0] sm:$0xf0]  ;;  %v10462_v2 = vld [vmem:[#allocation2 + $0x558] sm:$0xf] }
 0x173   :  { %v14998_v7 = vld [vmem:[#allocation2 + $0x854] sm:$0xf]  ;;  %v11131_v15 = vor.u32 %v15070_v0, %v11128_v1  ;;  %2987 = vmatpush.bf16.msra.mxu1 %v10555_v14  ;;  %v14979_v0 = vld [vmem:[#allocation2 + $0x7b4] sm:$0xf0]  ;;  %v10207_v1 = vor.u32 %v14843_v55, %v10206_v54  ;;  %v2729_v14 = vpop.f32.mrf.mxu1 }
 0x174   :  { %v10840_v9 = vld [vmem:[#allocation2 + $0x870] sm:$0xf0]  ;;  %2975 = vmatmul.bf16.vlgmr.msra.gmra.mxu3 %v16180_v53  ;;  %v14763_v13 = vld [vmem:[#allocation2 + $0xf4] sm:$0xf0]  ;;  %v2730_v18 = vadd.f32 %v2729_v14, %v16252_v8  ;;  %v10143_v8 = vor.u32 %v14827_v24, %v10142_v23 }
 0x175   :  { %v15118_v10 = vld [vmem:[#allocation2 + $0xc14] sm:$0xf]  ;;  %v10843_v20 = vor.u32 %v14998_v7, %v10840_v9  ;;  %3011 = vmatpush.bf16.msrb.mxu2 %v11131_v15  ;;  %v10174_v7 = vld [vmem:[#allocation2 + $0x318] sm:$0xf]  ;;  %v10463_v15 = vor.u32 %v14907_v3, %v10462_v2 }
 0x176   :  { %v11320_v11 = vld [vmem:[#allocation2 + $0xc30] sm:$0xf0]  ;;  %2988 = vmatmul.bf16.vlgmr.msra.gmra.mxu1 %v16184_v60  ;;  %v14835_v9 = vld [vmem:[#allocation2 + $0x334] sm:$0xf0] }
 0x177   :  { %v15062_v19 = vld [vmem:[#allocation2 + $0xa54] sm:$0xf]  ;;  %v11323_v21 = vor.u32 %v15118_v10, %v11320_v11  ;;  %3032 = vmatpush.bf16.msrb.mxu1 %v10015_v16  ;;  %2999 = vmatpush.bf16.msra.mxu0 %v10843_v20  ;;  %v2757_v10 = vpop.f32.mrf.mxu0  ;;  %v10751_v11 = vor.u32 %v14979_v0, %v10750_v63  ;;  %v10718_v16 = vld [vmem:[#allocation2 + $0x758] sm:$0xf] }
 0x178   :  { %v11096_v22 = vld [vmem:[#allocation2 + $0xa70] sm:$0xf0]  ;;  %v10430_v20 = vld [vmem:[#allocation2 + $0x518] sm:$0xf]  ;;  %v10719_v25 = vor.u32 %v14971_v17, %v10718_v16 }
 0x179   :  { %v14990_v26 = vld [vmem:[#allocation2 + $0x814] sm:$0xf]  ;;  %v11099_v33 = vor.u32 %v15062_v19, %v11096_v22  ;;  %3026 = vmatpush.bf16.msrb.mxu3 %v11323_v21  ;;  %v10175_v19 = vor.u32 %v14835_v9, %v10174_v7  ;;  %v14899_v21 = vld [vmem:[#allocation2 + $0x534] sm:$0xf0]  ;;  %v9887_v22 = vor.u32 %v14763_v13, %v9886_v12 }
 0x17a   :  { %v10808_v27 = vld [vmem:[#allocation2 + $0x830] sm:$0xf0]  ;;  %v10398_v32 = vld [vmem:[#allocation2 + $0x4d8] sm:$0xf] }
 0x17b   :  { %v15054_v37 = vld [vmem:[#allocation2 + $0xa14] sm:$0xf]  ;;  %v10811_v40 = vor.u32 %v14990_v26, %v10808_v27  ;;  %3012 = vmatpush.bf16.msrb.mxu2 %v11099_v33  ;;  %3033 = vmatpush.bf16.msrb.mxu1 %v9983_v5  ;;  %v9854_v26 = vld [vmem:[#allocation2 + $0x98] sm:$0xf]  ;;  %v2731_v49 = vpop.f32.mrf.mxu1 }
 0x17c   :  { %v11064_v41 = vld [vmem:[#allocation2 + $0xa30] sm:$0xf0]  ;;  %v14755_v27 = vld [vmem:[#allocation2 + $0xb4] sm:$0xf0]  ;;  %v14855_v49 = vld [vmem:[#allocation2 + $0x3dc] sm:$0xf] }
 0x17d   :  { %3045 = vmatpush.bf16.msra.mxu3 %v10271_v29  ;;  %v11067_v51 = vor.u32 %v15054_v37, %v11064_v41  ;;  %3000 = vmatpush.bf16.msra.mxu0 %v10811_v40  ;;  %v10431_v29 = vor.u32 %v14899_v21, %v10430_v20  ;;  %v14891_v33 = vld [vmem:[#allocation2 + $0x4f4] sm:$0xf0]  ;;  %v9855_v5 = vor.u32 %v14755_v27, %v9854_v26  ;;  %v2742_v40 = vpop.f32.mrf.mxu3 }
 0x17e   :  { %v10110_v35 = vld [vmem:[#allocation2 + $0x298] sm:$0xf]  ;;  %v10687_v41 = vor.u32 %v14963_v31, %v10686_v30  ;;  %v10399_v45 = vor.u32 %v14891_v33, %v10398_v32 }
 0x17f   :  { %3013 = vmatpush.bf16.msrb.mxu2 %v11067_v51  ;;  %3034 = vmatpush.bf16.msrb.mxu1 %v9951_v52  ;;  %v14819_v59 = vld [vmem:[#allocation2 + $0x2b4] sm:$0xf0]  ;;  %v2781_v37 = vpop.f32.mrf.mxu0 }
 0x180   :  { %3001 = vmatmul.bf16.vlgmr.msra.gmra.mxu0 %v16202_v34  ;;  %v9822_v42 = vld [vmem:[#allocation2 + $0x58] sm:$0xf]  ;;  %v10111_v50 = vor.u32 %v14819_v59, %v10110_v35 }
 0x181   :  { %3058 = vmatpush.bf16.msrb.mxu0 %v10527_v44  ;;  %3046 = vmatpush.bf16.msra.mxu3 %v10239_v47  ;;  %v14747_v43 = vld [vmem:[#allocation2 + $0x74] sm:$0xf0]  ;;  %v2743_v44 = vadd.f32 %v2742_v40, %v2730_v18 }
 0x182   :  { %3014 = vmatmul.bf16.vlgmr.msrb.gmra.mxu2 %v16204_v39  ;;  %v10654_v46 = vld [vmem:[#allocation2 + $0x6d8] sm:$0xf]  ;;  %v9823_v55 = vor.u32 %v14747_v43, %v9822_v42 }
 0x183   :  { %3071 = vmatpush.bf16.msra.mxu2 %v10783_v56  ;;  %3035 = vmatpush.bf16.msrb.mxu1 %v9919_v4  ;;  %v14955_v47 = vld [vmem:[#allocation2 + $0x6f4] sm:$0xf0]  ;;  %v16264_v54 = vadd.f32 %v16254_v38, %v2743_v44  ;;  %v2768_v56 = vpop.f32.mrf.mxu2 }
 0x184   :  { %11337 = vmatmul.msk.bf16.vlgmr.msrb.gmra.mxu3 %vm2482_vm0, %v16195_v48  ;;  %v10366_v51 = vld [vmem:[#allocation2 + $0x498] sm:$0xf]  ;;  %v16266_v2 = vadd.f32 %v2781_v37, %v2768_v56 }
 0x185   :  { %3059 = vmatpush.bf16.msrb.mxu0 %v10495_v62  ;;  %3047 = vmatpush.bf16.msra.mxu3 %v10207_v1  ;;  %v14883_v52 = vld [vmem:[#allocation2 + $0x4b4] sm:$0xf0]  ;;  %v10655_v62 = vor.u32 %v14955_v47, %v10654_v46  ;;  %v2744_v21 = vpop.f32.mrf.mxu3  ;;  %v10016_v46 = vld [vmem:[#allocation2 + $0x1f8] sm:$0xf0] }
 0x186   :  { %v14811_v61 = vld [vmem:[#allocation2 + $0x274] sm:$0xf0]  ;;  %v10367_v3 = vor.u32 %v14883_v52, %v10366_v51  ;;  %v10208_v21 = vld [vmem:[#allocation2 + $0x378] sm:$0xf0] }
 0x187   :  { %3072 = vmatpush.bf16.msra.mxu2 %v10751_v11  ;;  %3036 = vmatpush.bf16.msrb.mxu1 %v9887_v22  ;;  %v9790_v63 = vld [vmem:[#allocation2 + $0x18] sm:$0xf]  ;;  %v10079_v38 = vor.u32 %v14811_v61, %v10078_v58 }
 0x188   :  { %v14739_v0 = vld [vmem:[#allocation2 + $0x34] sm:$0xf0] }
 0x189   :  { %3060 = vmatpush.bf16.msrb.mxu0 %v10463_v15  ;;  %3048 = vmatpush.bf16.msra.mxu3 %v10175_v19  ;;  %v10622_v1 = vld [vmem:[#allocation2 + $0x698] sm:$0xf]  ;;  %v9791_v12 = vor.u32 %v14739_v0, %v9790_v63  ;;  %v2783_v15 = vpop.f32.mrf.mxu0  ;;  %v14783_v0 = vld [vmem:[#allocation2 + $0x19c] sm:$0xf] }
 0x18a   :  { %v14947_v4 = vld [vmem:[#allocation2 + $0x6b4] sm:$0xf0] }
 0x18b   :  { %3073 = vmatpush.bf16.msra.mxu2 %v10719_v25  ;;  %3037 = vmatpush.bf16.msrb.mxu1 %v9855_v5  ;;  %v11038_v7 = vld [vmem:[#allocation2 + $0x9d8] sm:$0xf]  ;;  %v10623_v16 = vor.u32 %v14947_v4, %v10622_v1  ;;  %v2770_v31 = vpop.f32.mrf.mxu2  ;;  %v9984_v1 = vld [vmem:[#allocation2 + $0x1b8] sm:$0xf0] }
 0x18c   :  { %v15051_v9 = vld [vmem:[#allocation2 + $0x9f4] sm:$0xf0]  ;;  %v14847_v4 = vld [vmem:[#allocation2 + $0x39c] sm:$0xf] }
 0x18d   :  { %3061 = vmatpush.bf16.msrb.mxu0 %v10431_v29  ;;  %3049 = vmatpush.bf16.msra.mxu3 %v10143_v8  ;;  %v10334_v10 = vld [vmem:[#allocation2 + $0x458] sm:$0xf]  ;;  %v11039_v17 = vor.u32 %v15051_v9, %v11038_v7  ;;  %v10240_v7 = vld [vmem:[#allocation2 + $0x3b8] sm:$0xf0] }
 0x18e   :  { %v14875_v11 = vld [vmem:[#allocation2 + $0x474] sm:$0xf0]  ;;  %v10243_v15 = vor.u32 %v14847_v4, %v10240_v7  ;;  %v9920_v31 = vld [vmem:[#allocation2 + $0x138] sm:$0xf0] }
 0x18f   :  { %3074 = vmatpush.bf16.msra.mxu2 %v10687_v41  ;;  %3038 = vmatpush.bf16.msrb.mxu1 %v9823_v55  ;;  %v10046_v13 = vld [vmem:[#allocation2 + $0x218] sm:$0xf]  ;;  %v10335_v22 = vor.u32 %v14875_v11, %v10334_v10  ;;  %v9987_v11 = vor.u32 %v14783_v0, %v9984_v1  ;;  %v14751_v1 = vld [vmem:[#allocation2 + $0x9c] sm:$0xf] }
 0x190   :  { %v14803_v14 = vld [vmem:[#allocation2 + $0x234] sm:$0xf0]  ;;  %v9856_v7 = vld [vmem:[#allocation2 + $0xb8] sm:$0xf0] }
 0x191   :  { %3062 = vmatpush.bf16.msrb.mxu0 %v10399_v45  ;;  %3050 = vmatpush.bf16.msra.mxu3 %v10111_v50  ;;  %v11294_v18 = vld [vmem:[#allocation2 + $0xbd8] sm:$0xf]  ;;  %v10047_v26 = vor.u32 %v14803_v14, %v10046_v13  ;;  %v14791_v45 = vld [vmem:[#allocation2 + $0x1dc] sm:$0xf]  ;;  %v2794_v14 = vpop.f32.mrf.mxu1 }
 0x192   :  { %v15115_v19 = vld [vmem:[#allocation2 + $0xbf4] sm:$0xf0]  ;;  %v10272_v50 = vld [vmem:[#allocation2 + $0x3f8] sm:$0xf0]  ;;  %v10019_v58 = vor.u32 %v14791_v45, %v10016_v46 }
 0x193   :  { %3075 = vmatpush.bf16.msra.mxu2 %v10655_v62  ;;  %v10590_v20 = vld [vmem:[#allocation2 + $0x658] sm:$0xf]  ;;  %3039 = vmatpush.bf16.msrb.mxu1 %v9791_v12  ;;  %v11295_v30 = vor.u32 %v15115_v19, %v11294_v18  ;;  %v10275_v63 = vor.u32 %v14855_v49, %v10272_v50  ;;  %v2795_v18 = vadd.f32 %v2794_v14, %v16266_v2  ;;  %v14759_v45 = vld [vmem:[#allocation2 + $0xdc] sm:$0xf]  ;;  %v2820_v49 = vpop.f32.mrf.mxu2 }
 0x194   :  { %v14939_v23 = vld [vmem:[#allocation2 + $0x674] sm:$0xf0]  ;;  %v9888_v46 = vld [vmem:[#allocation2 + $0xf8] sm:$0xf0] }
 0x195   :  { %3063 = vmatpush.bf16.msrb.mxu0 %v10367_v3  ;;  %v11006_v24 = vld [vmem:[#allocation2 + $0x998] sm:$0xf]  ;;  %3051 = vmatpush.bf16.msra.mxu3 %v10079_v38  ;;  %v10591_v33 = vor.u32 %v14939_v23, %v10590_v20  ;;  %v14839_v20 = vld [vmem:[#allocation2 + $0x35c] sm:$0xf] }
 0x196   :  { %v15043_v25 = vld [vmem:[#allocation2 + $0x9b4] sm:$0xf0]  ;;  %3040 = vmatmul.bf16.vlgmr.msrb.gmra.mxu1 %v16182_v57 }
 0x197   :  { %v10302_v27 = vld [vmem:[#allocation2 + $0x418] sm:$0xf]  ;;  %3076 = vmatpush.bf16.msra.mxu2 %v10623_v16  ;;  %3084 = vmatpush.bf16.msra.mxu1 %v11039_v17  ;;  %v11007_v5 = vor.u32 %v15043_v25, %v11006_v24  ;;  %v14775_v16 = vld [vmem:[#allocation2 + $0x15c] sm:$0xf] }
 0x198   :  { %v14867_v29 = vld [vmem:[#allocation2 + $0x434] sm:$0xf0]  ;;  %v9952_v17 = vld [vmem:[#allocation2 + $0x178] sm:$0xf0] }
 0x199   :  { %v11326_v8 = vld [vmem:[#allocation2 + $0xc18] sm:$0xf]  ;;  %3064 = vmatpush.bf16.msrb.mxu0 %v10335_v22  ;;  %v10303_v40 = vor.u32 %v14867_v29, %v10302_v27  ;;  %3052 = vmatpush.bf16.msra.mxu3 %v10047_v26  ;;  %v9955_v25 = vor.u32 %v14775_v16, %v9952_v17  ;;  %v10211_v29 = vor.u32 %v14839_v20, %v10208_v21  ;;  %v14743_v20 = vld [vmem:[#allocation2 + $0x5c] sm:$0xf] }
 0x19a   :  { %v15123_v32 = vld [vmem:[#allocation2 + $0xc34] sm:$0xf0]  ;;  %v9859_v16 = vor.u32 %v14751_v1, %v9856_v7  ;;  %v15039_v1 = vld [vmem:[#allocation2 + $0x99c] sm:$0xf] }
 0x19b   :  { %v11262_v35 = vld [vmem:[#allocation2 + $0xb98] sm:$0xf]  ;;  %v11327_v44 = vor.u32 %v15123_v32, %v11326_v8  ;;  %3077 = vmatpush.bf16.msra.mxu2 %v10591_v33  ;;  %3085 = vmatpush.bf16.msra.mxu1 %v11007_v5  ;;  %v14831_v8 = vld [vmem:[#allocation2 + $0x31c] sm:$0xf] }
 0x19c   :  { %v15107_v59 = vld [vmem:[#allocation2 + $0xbb4] sm:$0xf0]  ;;  %3053 = vmatmul.bf16.vlgmr.msra.gmra.mxu3 %v16188_v6  ;;  %v10176_v32 = vld [vmem:[#allocation2 + $0x338] sm:$0xf0] }
 0x19d   :  { %v10558_v37 = vld [vmem:[#allocation2 + $0x618] sm:$0xf]  ;;  %3097 = vmatpush.bf16.msrb.mxu3 %v11295_v30  ;;  %v11263_v47 = vor.u32 %v15107_v59, %v11262_v35  ;;  %3065 = vmatpush.bf16.msrb.mxu0 %v10303_v40  ;;  %v14767_v30 = vld [vmem:[#allocation2 + $0x11c] sm:$0xf]  ;;  %v2807_v59 = vpop.f32.mrf.mxu3  ;;  %v2833_v40 = vpop.f32.mrf.mxu0 }
 0x19e   :  { %v14931_v41 = vld [vmem:[#allocation2 + $0x634] sm:$0xf0] }
 0x19f   :  { %v10974_v42 = vld [vmem:[#allocation2 + $0x958] sm:$0xf]  ;;  %v10559_v51 = vor.u32 %v14931_v41, %v10558_v37  ;;  %v9923_v37 = vor.u32 %v14767_v30, %v9920_v31  ;;  %v14807_v30 = vld [vmem:[#allocation2 + $0x25c] sm:$0xf] }
 0x1a0   :  { %v15035_v43 = vld [vmem:[#allocation2 + $0x974] sm:$0xf0]  ;;  %3066 = vmatmul.bf16.vlgmr.msrb.gmra.mxu0 %v16180_v53  ;;  %v10080_v31 = vld [vmem:[#allocation2 + $0x278] sm:$0xf0] }
 0x1a1   :  { %v10975_v52 = vor.u32 %v15035_v43, %v10974_v42  ;;  %v11230_v55 = vld [vmem:[#allocation2 + $0xb58] sm:$0xf]  ;;  %3117 = vmatpush.bf16.msra.mxu0 %v11327_v44  ;;  %3098 = vmatpush.bf16.msrb.mxu3 %v11263_v47  ;;  %v2808_v43 = vadd.f32 %v2807_v59, %v2795_v18  ;;  %v10179_v44 = vor.u32 %v14831_v8, %v10176_v32  ;;  %v2796_v47 = vpop.f32.mrf.mxu1  ;;  %v14983_v18 = vld [vmem:[#allocation2 + $0x7dc] sm:$0xf] }
 0x1a2   :  { %v15099_v56 = vld [vmem:[#allocation2 + $0xb74] sm:$0xf0]  ;;  %3078 = vmatpush.bf16.msra.mxu2 %v10559_v51  ;;  %v14823_v51 = vld [vmem:[#allocation2 + $0x2dc] sm:$0xf] }
 0x1a3   :  { %v10942_v61 = vld [vmem:[#allocation2 + $0x918] sm:$0xf]  ;;  %v11231_v3 = vor.u32 %v15099_v56, %v11230_v55  ;;  %3086 = vmatpush.bf16.msra.mxu1 %v10975_v52  ;;  %v10144_v52 = vld [vmem:[#allocation2 + $0x2f8] sm:$0xf0]  ;;  %v2821_v55 = vadd.f32 %v2820_v49, %v2808_v43 }
 0x1a4   :  { %v15027_v62 = vld [vmem:[#allocation2 + $0x934] sm:$0xf0]  ;;  %v10147_v4 = vor.u32 %v14823_v51, %v10144_v52  ;;  %v14975_v8 = vld [vmem:[#allocation2 + $0x79c] sm:$0xf] }
 0x1a5   :  { %v10943_v9 = vor.u32 %v15027_v62, %v10942_v61  ;;  %v11198_v38 = vld [vmem:[#allocation2 + $0xb18] sm:$0xf]  ;;  %3136 = vmatpush.bf16.msrb.mxu0 %v10275_v63  ;;  %3099 = vmatpush.bf16.msrb.mxu3 %v11231_v3  ;;  %v9891_v62 = vor.u32 %v14759_v45, %v9888_v46  ;;  %v16273_v3 = vadd.f32 %v2833_v40, %v2821_v55  ;;  %v2809_v21 = vpop.f32.mrf.mxu3  ;;  %v9792_v59 = vld [vmem:[#allocation2 + $0x38] sm:$0xf0] }
 0x1a6   :  { %v15091_v10 = vld [vmem:[#allocation2 + $0xb34] sm:$0xf0]  ;;  %3123 = vmatpush.bf16.msrb.mxu2 %v10019_v58  ;;  %v14799_v40 = vld [vmem:[#allocation2 + $0x21c] sm:$0xf] }
 0x1a7   :  { %v10910_v12 = vld [vmem:[#allocation2 + $0x8d8] sm:$0xf]  ;;  %3079 = vmatmul.bf16.vlgmr.msra.gmra.mxu2 %v16184_v60  ;;  %v11199_v19 = vor.u32 %v15091_v10, %v11198_v38  ;;  %3087 = vmatpush.bf16.msra.mxu1 %v10943_v9  ;;  %v14919_v9 = vld [vmem:[#allocation2 + $0x5dc] sm:$0xf] }
 0x1a8   :  { %v15019_v13 = vld [vmem:[#allocation2 + $0x8f4] sm:$0xf0]  ;;  %v10528_v38 = vld [vmem:[#allocation2 + $0x5f8] sm:$0xf0] }
 0x1a9   :  { %v10911_v22 = vor.u32 %v15019_v13, %v10910_v12  ;;  %v11166_v23 = vld [vmem:[#allocation2 + $0xad8] sm:$0xf]  ;;  %3137 = vmatpush.bf16.msrb.mxu0 %v10243_v15  ;;  %3100 = vmatpush.bf16.msrb.mxu3 %v11199_v19  ;;  %v10112_v12 = vld [vmem:[#allocation2 + $0x2b8] sm:$0xf0]  ;;  %v10531_v17 = vor.u32 %v14919_v9, %v10528_v38 }
 0x1aa   :  { %v15083_v24 = vld [vmem:[#allocation2 + $0xaf4] sm:$0xf0]  ;;  %3124 = vmatpush.bf16.msrb.mxu2 %v9987_v11  ;;  %v14815_v11 = vld [vmem:[#allocation2 + $0x29c] sm:$0xf] }
 0x1ab   :  { %v10878_v26 = vld [vmem:[#allocation2 + $0x898] sm:$0xf]  ;;  %v11167_v2 = vor.u32 %v15083_v24, %v11166_v23  ;;  %3088 = vmatpush.bf16.msra.mxu1 %v10911_v22  ;;  %v10784_v19 = vld [vmem:[#allocation2 + $0x7f8] sm:$0xf0]  ;;  %v2835_v22 = vpop.f32.mrf.mxu0  ;;  %v10115_v23 = vor.u32 %v14815_v11, %v10112_v12 }
 0x1ac   :  { %v15011_v27 = vld [vmem:[#allocation2 + $0x8b4] sm:$0xf0]  ;;  %v9824_v24 = vld [vmem:[#allocation2 + $0x78] sm:$0xf0] }
 0x1ad   :  { %v10879_v33 = vor.u32 %v15011_v27, %v10878_v26  ;;  %v11134_v5 = vld [vmem:[#allocation2 + $0xa98] sm:$0xf]  ;;  %3138 = vmatpush.bf16.msrb.mxu0 %v10211_v29  ;;  %3101 = vmatpush.bf16.msrb.mxu3 %v11167_v2  ;;  %v10496_v26 = vld [vmem:[#allocation2 + $0x5b8] sm:$0xf0]  ;;  %v2822_v27 = vpop.f32.mrf.mxu2  ;;  %v10787_v2 = vor.u32 %v14983_v18, %v10784_v19  ;;  %v9827_v32 = vor.u32 %v14743_v20, %v9824_v24  ;;  %v16281_v19 = vpop.f32.mrf.mxu1 }
 0x1ae   :  { %v15075_v35 = vld [vmem:[#allocation2 + $0xab4] sm:$0xf0]  ;;  %3125 = vmatpush.bf16.msrb.mxu2 %v9955_v25  ;;  %v14911_v25 = vld [vmem:[#allocation2 + $0x59c] sm:$0xf] }
 0x1af   :  { %v10846_v41 = vld [vmem:[#allocation2 + $0x858] sm:$0xf]  ;;  %v11135_v50 = vor.u32 %v15075_v35, %v11134_v5  ;;  %3089 = vmatpush.bf16.msra.mxu1 %v10879_v33  ;;  %v10499_v33 = vor.u32 %v14911_v25, %v10496_v26  ;;  %v10752_v5 = vld [vmem:[#allocation2 + $0x7b8] sm:$0xf0] }
 0x1b0   :  { %v15003_v42 = vld [vmem:[#allocation2 + $0x874] sm:$0xf0]  ;;  %11338 = vmatmul.msk.bf16.vlgmr.msra.gmra.mxu0 %vm2482_vm0, %v16195_v48  ;;  %v14735_v35 = vld [vmem:[#allocation2 + $0x1c] sm:$0xf]  ;;  %v10755_v46 = vor.u32 %v14975_v8, %v10752_v5 }
 0x1b1   :  { %v10847_v56 = vor.u32 %v15003_v42, %v10846_v41  ;;  %v11102_v58 = vld [vmem:[#allocation2 + $0xa58] sm:$0xf]  ;;  %3139 = vmatpush.bf16.msrb.mxu0 %v10179_v44  ;;  %3102 = vmatpush.bf16.msrb.mxu3 %v11135_v50  ;;  %v14903_v41 = vld [vmem:[#allocation2 + $0x55c] sm:$0xf]  ;;  %v9795_v50 = vor.u32 %v14735_v35, %v9792_v59 }
 0x1b2   :  { %v15067_v61 = vld [vmem:[#allocation2 + $0xa74] sm:$0xf0]  ;;  %3126 = vmatpush.bf16.msrb.mxu2 %v9923_v37  ;;  %v10083_v37 = vor.u32 %v14807_v30, %v10080_v31  ;;  %v10464_v42 = vld [vmem:[#allocation2 + $0x578] sm:$0xf0] }
 0x1b3   :  { %v10814_v63 = vld [vmem:[#allocation2 + $0x818] sm:$0xf]  ;;  %v11103_v10 = vor.u32 %v15067_v61, %v11102_v58  ;;  %3090 = vmatpush.bf16.msra.mxu1 %v10847_v56  ;;  %v10048_v43 = vld [vmem:[#allocation2 + $0x238] sm:$0xf0]  ;;  %v10467_v51 = vor.u32 %v14903_v41, %v10464_v42 }
 0x1b4   :  { %v14995_v0 = vld [vmem:[#allocation2 + $0x834] sm:$0xf0]  ;;  %v15047_v44 = vld [vmem:[#allocation2 + $0x9dc] sm:$0xf]  ;;  %v10051_v56 = vor.u32 %v14799_v40, %v10048_v43 }
 0x1b5   :  { %v10815_v13 = vor.u32 %v14995_v0, %v10814_v63  ;;  %v11070_v14 = vld [vmem:[#allocation2 + $0xa18] sm:$0xf]  ;;  %3140 = vmatpush.bf16.msrb.mxu0 %v10147_v4  ;;  %3103 = vmatpush.bf16.msrb.mxu3 %v11103_v10  ;;  %v11040_v45 = vld [vmem:[#allocation2 + $0x9f8] sm:$0xf0]  ;;  %v16279_v63 = vpop.f32.mrf.mxu2 }
 0x1b6   :  { %v15059_v15 = vld [vmem:[#allocation2 + $0xa34] sm:$0xf0]  ;;  %3127 = vmatpush.bf16.msrb.mxu2 %v9891_v62  ;;  %v15111_v47 = vld [vmem:[#allocation2 + $0xbdc] sm:$0xf]  ;;  %v11043_v58 = vor.u32 %v15047_v44, %v11040_v45  ;;  %v16287_v45 = vpop.f32.mrf.mxu0 }
 0x1b7   :  { %v11071_v29 = vor.u32 %v15059_v15, %v11070_v14  ;;  %3091 = vmatpush.bf16.msra.mxu1 %v10815_v13  ;;  %v11296_v49 = vld [vmem:[#allocation2 + $0xbf8] sm:$0xf0] }
 0x1b8   :  { %v14967_v52 = vld [vmem:[#allocation2 + $0x75c] sm:$0xf]  ;;  %v11299_v0 = vor.u32 %v15111_v47, %v11296_v49 }
 0x1b9   :  { %3141 = vmatpush.bf16.msrb.mxu0 %v10115_v23  ;;  %3104 = vmatpush.bf16.msrb.mxu3 %v11071_v29  ;;  %v10720_v55 = vld [vmem:[#allocation2 + $0x778] sm:$0xf0] }
 0x1ba   :  { %3128 = vmatpush.bf16.msrb.mxu2 %v9859_v16  ;;  %3092 = vmatmul.bf16.vlgmr.msra.gmra.mxu1 %v16202_v34  ;;  %v14895_v61 = vld [vmem:[#allocation2 + $0x51c] sm:$0xf]  ;;  %v10723_v7 = vor.u32 %v14967_v52, %v10720_v55 }
 0x1bb   :  { %3149 = vmatpush.bf16.msrb.mxu1 %v10531_v17  ;;  %v10432_v62 = vld [vmem:[#allocation2 + $0x538] sm:$0xf0] }
 0x1bc   :  { %3105 = vmatmul.bf16.vlgmr.msrb.gmra.mxu3 %v16204_v39  ;;  %v11008_v4 = vld [vmem:[#allocation2 + $0x9b8] sm:$0xf0]  ;;  %v10435_v10 = vor.u32 %v14895_v61, %v10432_v62 }
 0x1bd   :  { %3162 = vmatpush.bf16.msra.mxu3 %v10787_v2  ;;  %3142 = vmatpush.bf16.msrb.mxu0 %v10083_v37  ;;  %v15103_v9 = vld [vmem:[#allocation2 + $0xb9c] sm:$0xf]  ;;  %v11011_v13 = vor.u32 %v15039_v1, %v11008_v4  ;;  %v2848_v30 = vpop.f32.mrf.mxu2 }
 0x1be   :  { %3129 = vmatpush.bf16.msrb.mxu2 %v9827_v32  ;;  %v11264_v38 = vld [vmem:[#allocation2 + $0xbb8] sm:$0xf0] }
 0x1bf   :  { %3150 = vmatpush.bf16.msrb.mxu1 %v10499_v33  ;;  %v14959_v11 = vld [vmem:[#allocation2 + $0x71c] sm:$0xf]  ;;  %v11267_v16 = vor.u32 %v15103_v9, %v11264_v38 }
 0x1c0   :  { %v10688_v12 = vld [vmem:[#allocation2 + $0x738] sm:$0xf0] }
 0x1c1   :  { %3163 = vmatpush.bf16.msra.mxu3 %v10755_v46  ;;  %3143 = vmatpush.bf16.msrb.mxu0 %v10051_v56  ;;  %v14887_v14 = vld [vmem:[#allocation2 + $0x4dc] sm:$0xf]  ;;  %v10691_v20 = vor.u32 %v14959_v11, %v10688_v12  ;;  %v2874_v46 = vpop.f32.mrf.mxu1 }
 0x1c2   :  { %3130 = vmatpush.bf16.msrb.mxu2 %v9795_v50  ;;  %v10400_v15 = vld [vmem:[#allocation2 + $0x4f8] sm:$0xf0] }
 0x1c3   :  { %3151 = vmatpush.bf16.msrb.mxu1 %v10467_v51  ;;  %v15031_v17 = vld [vmem:[#allocation2 + $0x95c] sm:$0xf]  ;;  %v10403_v23 = vor.u32 %v14887_v14, %v10400_v15  ;;  %v11566_v15 = vld [vmem:[#allocation4 + $0x1c0] sm:$0xf] }
 0x1c4   :  { %v10976_v18 = vld [vmem:[#allocation2 + $0x978] sm:$0xf0]  ;;  %3144 = vmatmul.bf16.vlgmr.msrb.gmra.mxu0 %v16188_v6  ;;  %v16285_v6 = vpop.f32.mrf.mxu3 }
 0x1c5   :  { %3188 = vmatpush.bf16.msra.mxu0 %v11299_v0  ;;  %3164 = vmatpush.bf16.msra.mxu3 %v10723_v7  ;;  %v15095_v21 = vld [vmem:[#allocation2 + $0xb5c] sm:$0xf]  ;;  %v10979_v26 = vor.u32 %v15031_v17, %v10976_v18  ;;  %v16289_v0 = vpop.f32.mrf.mxu2  ;;  %v15184_v18 = vld [vmem:[#allocation4 + $0x1dc] sm:$0xf0] }
 0x1c6   :  { %3175 = vmatpush.bf16.msra.mxu2 %v11043_v58  ;;  %v11232_v22 = vld [vmem:[#allocation2 + $0xb78] sm:$0xf0] }
 0x1c7   :  { %3131 = vmatmul.bf16.vlgmr.msrb.gmra.mxu2 %v16182_v57  ;;  %3152 = vmatpush.bf16.msrb.mxu1 %v10435_v10  ;;  %v14951_v24 = vld [vmem:[#allocation2 + $0x6dc] sm:$0xf]  ;;  %v11235_v31 = vor.u32 %v15095_v21, %v11232_v22  ;;  %v15248_v21 = vld [vmem:[#allocation4 + $0x3dc] sm:$0xf0] }
 0x1c8   :  { %v10656_v25 = vld [vmem:[#allocation2 + $0x6f8] sm:$0xf0] }
 0x1c9   :  { %v14879_v27 = vld [vmem:[#allocation2 + $0x49c] sm:$0xf]  ;;  %3189 = vmatpush.bf16.msra.mxu0 %v11267_v16  ;;  %3165 = vmatpush.bf16.msra.mxu3 %v10691_v20  ;;  %v10659_v32 = vor.u32 %v14951_v24, %v10656_v25  ;;  %v11822_v20 = vld [vmem:[#allocation4 + $0x3c0] sm:$0xf] }
 0x1ca   :  { %3176 = vmatpush.bf16.msra.mxu2 %v11011_v13  ;;  %v10368_v29 = vld [vmem:[#allocation2 + $0x4b8] sm:$0xf0] }
 0x1cb   :  { %v15023_v2 = vld [vmem:[#allocation2 + $0x91c] sm:$0xf]  ;;  %3153 = vmatpush.bf16.msrb.mxu1 %v10403_v23  ;;  %v10371_v5 = vor.u32 %v14879_v27, %v10368_v29 }
 0x1cc   :  { %v10944_v8 = vld [vmem:[#allocation2 + $0x938] sm:$0xf0]  ;;  %v2861_v22 = vpop.f32.mrf.mxu3 }
 0x1cd   :  { %v15087_v57 = vld [vmem:[#allocation2 + $0xb1c] sm:$0xf]  ;;  %v10947_v37 = vor.u32 %v15023_v2, %v10944_v8  ;;  %3190 = vmatpush.bf16.msra.mxu0 %v11235_v31  ;;  %3166 = vmatpush.bf16.msra.mxu3 %v10659_v32  ;;  %v11567_v31 = vor.u32 %v15184_v18, %v11566_v15  ;;  %v11823_v2 = vor.u32 %v15248_v21, %v11822_v20  ;;  %v11534_v8 = vld [vmem:[#allocation4 + $0x180] sm:$0xf]  ;;  %v16295_v20 = vpop.f32.mrf.mxu1 }
 0x1ce   :  { %v11200_v33 = vld [vmem:[#allocation2 + $0xb38] sm:$0xf0]  ;;  %3177 = vmatpush.bf16.msra.mxu2 %v10979_v26  ;;  %v2900_v26 = vpop.f32.mrf.mxu0  ;;  %v15296_v18 = vld [vmem:[#allocation4 + $0x55c] sm:$0xf0] }
 0x1cf   :  { %v14943_v35 = vld [vmem:[#allocation2 + $0x69c] sm:$0xf]  ;;  %v11203_v42 = vor.u32 %v15087_v57, %v11200_v33  ;;  %3154 = vmatpush.bf16.msrb.mxu1 %v10371_v5  ;;  %v15176_v57 = vld [vmem:[#allocation4 + $0x19c] sm:$0xf0] }
 0x1d0   :  { %v10624_v59 = vld [vmem:[#allocation2 + $0x6b8] sm:$0xf0]  ;;  %v11790_v33 = vld [vmem:[#allocation4 + $0x380] sm:$0xf]  ;;  %v11535_v46 = vor.u32 %v15176_v57, %v11534_v8 }
 0x1d1   :  { %v14871_v40 = vld [vmem:[#allocation2 + $0x45c] sm:$0xf]  ;;  %v10627_v47 = vor.u32 %v14943_v35, %v10624_v59  ;;  %3191 = vmatpush.bf16.msra.mxu0 %v11203_v42  ;;  %v15240_v5 = vld [vmem:[#allocation4 + $0x39c] sm:$0xf0]  ;;  %v2887_v35 = vpop.f32.mrf.mxu2 }
 0x1d2   :  { %v10336_v41 = vld [vmem:[#allocation2 + $0x478] sm:$0xf0]  ;;  %3178 = vmatpush.bf16.msra.mxu2 %v10947_v37  ;;  %v12270_v22 = vld [vmem:[#allocation4 + $0x740] sm:$0xf] }
 0x1d3   :  { %v15015_v43 = vld [vmem:[#allocation2 + $0x8dc] sm:$0xf]  ;;  %v10339_v51 = vor.u32 %v14871_v40, %v10336_v41  ;;  %3167 = vmatpush.bf16.msra.mxu3 %v10627_v47  ;;  %v11791_v47 = vor.u32 %v15240_v5, %v11790_v33  ;;  %v15152_v26 = vld [vmem:[#allocation4 + $0xdc] sm:$0xf0] }
 0x1d4   :  { %v10912_v44 = vld [vmem:[#allocation2 + $0x8f8] sm:$0xf0]  ;;  %v15288_v8 = vld [vmem:[#allocation4 + $0x51c] sm:$0xf0]  ;;  %v16299_v35 = vpop.f32.mrf.mxu3 }
 0x1d5   :  { %v15079_v49 = vld [vmem:[#allocation2 + $0xadc] sm:$0xf]  ;;  %v10915_v56 = vor.u32 %v15015_v43, %v10912_v44  ;;  %3155 = vmatpush.bf16.msrb.mxu1 %v10339_v51  ;;  %v12078_v43 = vld [vmem:[#allocation4 + $0x5c0] sm:$0xf] }
 0x1d6   :  { %v11168_v50 = vld [vmem:[#allocation2 + $0xaf8] sm:$0xf0]  ;;  %v15312_v44 = vld [vmem:[#allocation4 + $0x5dc] sm:$0xf0] }
 0x1d7   :  { %v14935_v52 = vld [vmem:[#allocation2 + $0x65c] sm:$0xf]  ;;  %v11171_v1 = vor.u32 %v15079_v49, %v11168_v50  ;;  %3179 = vmatpush.bf16.msra.mxu2 %v10915_v56  ;;  %v12334_v49 = vld [vmem:[#allocation4 + $0x7c0] sm:$0xf] }
 0x1d8   :  { %v10592_v55 = vld [vmem:[#allocation2 + $0x678] sm:$0xf0]  ;;  %v15376_v50 = vld [vmem:[#allocation4 + $0x7dc] sm:$0xf0] }
 0x1d9   :  { %v14863_v58 = vld [vmem:[#allocation2 + $0x41c] sm:$0xf]  ;;  %v10595_v38 = vor.u32 %v14935_v52, %v10592_v55  ;;  %3192 = vmatpush.bf16.msra.mxu0 %v11171_v1  ;;  %v11502_v52 = vld [vmem:[#allocation4 + $0x140] sm:$0xf]  ;;  %v16293_v15 = vpop.f32.mrf.mxu2 }
 0x1da   :  { %v10304_v61 = vld [vmem:[#allocation2 + $0x438] sm:$0xf0]  ;;  %v15168_v55 = vld [vmem:[#allocation4 + $0x15c] sm:$0xf0] }
 0x1db   :  { %v15007_v62 = vld [vmem:[#allocation2 + $0x89c] sm:$0xf]  ;;  %v10307_v12 = vor.u32 %v14863_v58, %v10304_v61  ;;  %3168 = vmatpush.bf16.msra.mxu3 %v10595_v38  ;;  %v12079_v58 = vor.u32 %v15312_v44, %v12078_v43  ;;  %v15232_v61 = vld [vmem:[#allocation4 + $0x35c] sm:$0xf0] }
 0x1dc   :  { %v10880_v4 = vld [vmem:[#allocation2 + $0x8b8] sm:$0xf0]  ;;  %v12046_v1 = vld [vmem:[#allocation4 + $0x580] sm:$0xf] }
 0x1dd   :  { %v15119_v7 = vld [vmem:[#allocation2 + $0xc1c] sm:$0xf]  ;;  %v10883_v16 = vor.u32 %v15007_v62, %v10880_v4  ;;  %3156 = vmatpush.bf16.msrb.mxu1 %v10307_v12  ;;  %v12335_v62 = vor.u32 %v15376_v50, %v12334_v49  ;;  %v15304_v4 = vld [vmem:[#allocation4 + $0x59c] sm:$0xf0] }
 0x1de   :  { %v11328_v9 = vld [vmem:[#allocation2 + $0xc38] sm:$0xf0]  ;;  %v15368_v38 = vld [vmem:[#allocation4 + $0x79c] sm:$0xf0] }
 0x1df   :  { %v15071_v10 = vld [vmem:[#allocation2 + $0xa9c] sm:$0xf]  ;;  %v11331_v17 = vor.u32 %v15119_v7, %v11328_v9  ;;  %3180 = vmatpush.bf16.msra.mxu2 %v10883_v16  ;;  %v11503_v7 = vor.u32 %v15168_v55, %v11502_v52  ;;  %v12302_v9 = vld [vmem:[#allocation4 + $0x780] sm:$0xf] }
 0x1e0   :  { %v11136_v11 = vld [vmem:[#allocation2 + $0xab8] sm:$0xf0]  ;;  %3157 = vmatmul.bf16.vlgmr.msrb.gmra.mxu1 %v16180_v53  ;;  %v11758_v53 = vld [vmem:[#allocation4 + $0x340] sm:$0xf]  ;;  %v12303_v16 = vor.u32 %v15368_v38, %v12302_v9 }
 0x1e1   :  { %v14927_v13 = vld [vmem:[#allocation2 + $0x61c] sm:$0xf]  ;;  %v11139_v23 = vor.u32 %v15071_v10, %v11136_v11  ;;  %3208 = vmatpush.bf16.msra.mxu1 %v11331_v17  ;;  %v11759_v10 = vor.u32 %v15232_v61, %v11758_v53  ;;  %v11470_v11 = vld [vmem:[#allocation4 + $0x100] sm:$0xf] }
 0x1e2   :  { %v10560_v14 = vld [vmem:[#allocation2 + $0x638] sm:$0xf0]  ;;  %v15160_v12 = vld [vmem:[#allocation4 + $0x11c] sm:$0xf0] }
 0x1e3   :  { %v14999_v24 = vld [vmem:[#allocation2 + $0x85c] sm:$0xf]  ;;  %v10563_v27 = vor.u32 %v14927_v13, %v10560_v14  ;;  %3193 = vmatpush.bf16.msra.mxu0 %v11139_v23  ;;  %v12047_v13 = vor.u32 %v15304_v4, %v12046_v1  ;;  %v15224_v14 = vld [vmem:[#allocation4 + $0x31c] sm:$0xf0]  ;;  %v11471_v21 = vor.u32 %v15160_v12, %v11470_v11 }
 0x1e4   :  { %v10848_v25 = vld [vmem:[#allocation2 + $0x878] sm:$0xf0]  ;;  %v12014_v17 = vld [vmem:[#allocation4 + $0x540] sm:$0xf] }
 0x1e5   :  { %v15063_v29 = vld [vmem:[#allocation2 + $0xa5c] sm:$0xf]  ;;  %v10851_v32 = vor.u32 %v14999_v24, %v10848_v25  ;;  %3169 = vmatpush.bf16.msra.mxu3 %v10563_v27  ;;  %6315 = vmatpush.bf16.msrb.mxu1 %v11823_v2  ;;  %v15360_v23 = vld [vmem:[#allocation4 + $0x75c] sm:$0xf0]  ;;  %v12015_v27 = vor.u32 %v15296_v18, %v12014_v17  ;;  %v2913_v18 = vpop.f32.mrf.mxu3 }
 0x1e6   :  { %v11104_v30 = vld [vmem:[#allocation2 + $0xa78] sm:$0xf0]  ;;  %v11438_v25 = vld [vmem:[#allocation4 + $0xc0] sm:$0xf] }
 0x1e7   :  { %v11107_v59 = vor.u32 %v15063_v29, %v11104_v30  ;;  %v14991_v37 = vld [vmem:[#allocation2 + $0x81c] sm:$0xf]  ;;  %3181 = vmatpush.bf16.msra.mxu2 %v10851_v32  ;;  %v11694_v29 = vld [vmem:[#allocation4 + $0x2c0] sm:$0xf] }
 0x1e8   :  { %v10816_v40 = vld [vmem:[#allocation2 + $0x838] sm:$0xf0]  ;;  %3170 = vmatmul.bf16.vlgmr.msra.gmra.mxu3 %v16184_v60  ;;  %v11726_v60 = vld [vmem:[#allocation4 + $0x300] sm:$0xf] }
 0x1e9   :  { %v15055_v41 = vld [vmem:[#allocation2 + $0xa1c] sm:$0xf]  ;;  %6302 = vmatpush.bf16.msrb.mxu3 %v11567_v31  ;;  %v10819_v51 = vor.u32 %v14991_v37, %v10816_v40  ;;  %3194 = vmatpush.bf16.msra.mxu0 %v11107_v59  ;;  %v11727_v24 = vor.u32 %v15224_v14, %v11726_v60  ;;  %v15216_v30 = vld [vmem:[#allocation4 + $0x2dc] sm:$0xf0]  ;;  %v12271_v31 = vor.u32 %v15360_v23, %v12270_v22 }
 0x1ea   :  { %v11072_v42 = vld [vmem:[#allocation2 + $0xa38] sm:$0xf0]  ;;  %6316 = vmatpush.bf16.msrb.mxu1 %v11791_v47  ;;  %v11982_v2 = vld [vmem:[#allocation4 + $0x500] sm:$0xf]  ;;  %v11695_v33 = vor.u32 %v15216_v30, %v11694_v29  ;;  %v2926_v47 = vpop.f32.mrf.mxu1 }
 0x1eb   :  { %v11075_v56 = vor.u32 %v15055_v41, %v11072_v42  ;;  %3182 = vmatpush.bf16.msra.mxu2 %v10819_v51  ;;  %v12238_v32 = vld [vmem:[#allocation4 + $0x700] sm:$0xf]  ;;  %v11983_v59 = vor.u32 %v15288_v8, %v11982_v2  ;;  %v2939_v41 = vpop.f32.mrf.mxu2  ;;  %v3215_v2 = vmax.f32 %v16246_v28, 0.0 }
 0x1ec   :  { %v15352_v57 = vld [vmem:[#allocation4 + $0x71c] sm:$0xf0] }
 0x1ed   :  { %6303 = vmatpush.bf16.msrb.mxu3 %v11535_v46  ;;  %3195 = vmatpush.bf16.msra.mxu0 %v11075_v56  ;;  %v11406_v5 = vld [vmem:[#allocation4 + $0x80] sm:$0xf]  ;;  %v12239_v42 = vor.u32 %v15352_v57, %v12238_v32  ;;  %v16303_v46 = vpop.f32.mrf.mxu0 }
 0x1ee   :  { %3183 = vmatmul.bf16.vlgmr.msra.gmra.mxu2 %v16202_v34  ;;  %6317 = vmatpush.bf16.msrb.mxu1 %v11759_v10  ;;  %v11439_v34 = vor.u32 %v15152_v26, %v11438_v25  ;;  %v11662_v37 = vld [vmem:[#allocation4 + $0x280] sm:$0xf] }
 0x1ef   :  { %6328 = vmatpush.bf16.msrb.mxu2 %v12079_v58  ;;  %v15208_v40 = vld [vmem:[#allocation4 + $0x29c] sm:$0xf0] }
 0x1f0   :  { %3196 = vmatmul.bf16.vlgmr.msra.gmra.mxu0 %v16204_v39  ;;  %v15144_v39 = vld [vmem:[#allocation4 + $0x9c] sm:$0xf0]  ;;  %11339 = vmatmul.msk.bf16.vlgmr.msra.gmra.mxu1 %vm2482_vm0, %v16195_v48  ;;  %v11663_v52 = vor.u32 %v15208_v40, %v11662_v37 }
 0x1f1   :  { %6341 = vmatpush.bf16.msrb.mxu0 %v12335_v62  ;;  %6304 = vmatpush.bf16.msrb.mxu3 %v11503_v7  ;;  %v11950_v43 = vld [vmem:[#allocation4 + $0x4c0] sm:$0xf]  ;;  %v11407_v49 = vor.u32 %v15144_v39, %v11406_v5 }
 0x1f2   :  { %6318 = vmatpush.bf16.msrb.mxu1 %v11727_v24  ;;  %v15280_v44 = vld [vmem:[#allocation4 + $0x4dc] sm:$0xf0] }
 0x1f3   :  { %6329 = vmatpush.bf16.msrb.mxu2 %v12047_v13  ;;  %v12206_v50 = vld [vmem:[#allocation4 + $0x6c0] sm:$0xf]  ;;  %v11951_v58 = vor.u32 %v15280_v44, %v11950_v43  ;;  %v2989_v18 = vpop.f32.mrf.mxu1 }
 0x1f4   :  { %v15344_v51 = vld [vmem:[#allocation4 + $0x6dc] sm:$0xf0] }
 0x1f5   :  { %6342 = vmatpush.bf16.msrb.mxu0 %v12303_v16  ;;  %6305 = vmatpush.bf16.msrb.mxu3 %v11471_v21  ;;  %v11374_v55 = vld [vmem:[#allocation4 + $0x40] sm:$0xf]  ;;  %v12207_v48 = vor.u32 %v15344_v51, %v12206_v50  ;;  %v16305_v21 = vpop.f32.mrf.mxu2  ;;  %v2952_v26 = vpop.f32.mrf.mxu0  ;;  %v16313_v50 = vpack.c.bf16 %v3215_v2, %v3215_v2 }
 0x1f6   :  { %6319 = vmatpush.bf16.msrb.mxu1 %v11695_v33  ;;  %v15136_v56 = vld [vmem:[#allocation4 + $0x5c] sm:$0xf0] }
 0x1f7   :  { %6330 = vmatpush.bf16.msrb.mxu2 %v12015_v27  ;;  %v11630_v53 = vld [vmem:[#allocation4 + $0x240] sm:$0xf]  ;;  %v11375_v4 = vor.u32 %v15136_v56, %v11374_v55 }
 0x1f8   :  { %v15200_v61 = vld [vmem:[#allocation4 + $0x25c] sm:$0xf0] }
 0x1f9   :  { %6343 = vmatpush.bf16.msrb.mxu0 %v12271_v31  ;;  %6306 = vmatpush.bf16.msrb.mxu3 %v11439_v34  ;;  %v11918_v62 = vld [vmem:[#allocation4 + $0x480] sm:$0xf]  ;;  %v11631_v10 = vor.u32 %v15200_v61, %v11630_v53  ;;  %v3214_v31 = vmax.f32 %v16233_v36, 0.0  ;;  %v2847_v36 = vadd.f32 %v16279_v63, %v16273_v3  ;;  %v3216_v3 = vmax.f32 %v16264_v54, 0.0 }
 0x1fa   :  { %v15272_v1 = vld [vmem:[#allocation4 + $0x49c] sm:$0xf0]  ;;  %6320 = vmatpush.bf16.msrb.mxu1 %v11663_v52 }
 0x1fb   :  { %6331 = vmatpush.bf16.msrb.mxu2 %v11983_v59  ;;  %v12174_v7 = vld [vmem:[#allocation4 + $0x680] sm:$0xf]  ;;  %v11919_v60 = vor.u32 %v15272_v1, %v11918_v62  ;;  %v16311_v47 = vpack.c.bf16 %v3214_v31, %v3214_v31  ;;  %v3217_v62 = vmax.f32 %v2847_v36, 0.0  ;;  %v2873_v1 = vadd.f32 %v16281_v19, %v16285_v6 }
 0x1fc   :  { %v15336_v9 = vld [vmem:[#allocation4 + $0x69c] sm:$0xf0] }
 0x1fd   :  { %6344 = vmatpush.bf16.msrb.mxu0 %v12239_v42  ;;  %6307 = vmatpush.bf16.msrb.mxu3 %v11407_v49  ;;  %v11342_v38 = vld [vmem:[#allocation4] sm:$0xf]  ;;  %v12175_v22 = vor.u32 %v15336_v9, %v12174_v7  ;;  %v2886_v19 = vadd.f32 %v16289_v0, %v2873_v1  ;;  %v11568_v1 = vld [vmem:[#allocation4 + $0x1e0] sm:$0xf0] }
 0x1fe   :  { %v15128_v11 = vld [vmem:[#allocation4 + $0x1c] sm:$0xf0]  ;;  %6321 = vmatpush.bf16.msrb.mxu1 %v11631_v10 }
 0x1ff   :  { %v11598_v12 = vld [vmem:[#allocation4 + $0x200] sm:$0xf]  ;;  %6332 = vmatpush.bf16.msrb.mxu2 %v11951_v58  ;;  %v11343_v27 = vor.u32 %v15128_v11, %v11342_v38  ;;  %v2965_v58 = vpop.f32.mrf.mxu2  ;;  %v16320_v11 = vpack.c.bf16 %v3216_v3, %v3216_v3 }
 0x200   :  { %v15192_v13 = vld [vmem:[#allocation4 + $0x21c] sm:$0xf0] }
 0x201   :  { %v12590_v14 = vld [vmem:[#allocation4 + $0x9c0] sm:$0xf]  ;;  %6345 = vmatpush.bf16.msrb.mxu0 %v12207_v48  ;;  %6308 = vmatpush.bf16.msrb.mxu3 %v11375_v4  ;;  %v11599_v8 = vor.u32 %v15192_v13, %v11598_v12 }
 0x202   :  { %v15440_v16 = vld [vmem:[#allocation4 + $0x9dc] sm:$0xf0] }
 0x203   :  { %v12846_v17 = vld [vmem:[#allocation4 + $0xbc0] sm:$0xf]  ;;  %v12591_v34 = vor.u32 %v15440_v16, %v12590_v14  ;;  %6333 = vmatpush.bf16.msrb.mxu2 %v11919_v60  ;;  %6322 = vmatpush.bf16.msrb.mxu1 %v11599_v8  ;;  %v16322_v14 = vpack.c.bf16 %v3217_v62, %v3217_v62  ;;  %v2964_v8 = vadd.f32 %v16305_v21, %v16303_v46  ;;  %v15180_v62 = vld [vmem:[#allocation4 + $0x1c4] sm:$0xf] }
 0x204   :  { %v15504_v23 = vld [vmem:[#allocation4 + $0xbdc] sm:$0xf0] }
 0x205   :  { %v11886_v24 = vld [vmem:[#allocation4 + $0x440] sm:$0xf]  ;;  %v12847_v57 = vor.u32 %v15504_v23, %v12846_v17  ;;  %6346 = vmatpush.bf16.msrb.mxu0 %v12175_v22  ;;  %6309 = vmatpush.bf16.msrb.mxu3 %v11343_v27 }
 0x206   :  { %v15264_v25 = vld [vmem:[#allocation4 + $0x45c] sm:$0xf0]  ;;  %6323 = vmatmul.bf16.vlgmr.msrb.gmra.mxu1 %v16313_v50 }
 0x207   :  { %v12142_v29 = vld [vmem:[#allocation4 + $0x640] sm:$0xf]  ;;  %v11887_v33 = vor.u32 %v15264_v25, %v11886_v24  ;;  %6367 = vmatpush.bf16.msra.mxu1 %v12847_v57 }
 0x208   :  { %v15328_v30 = vld [vmem:[#allocation4 + $0x65c] sm:$0xf0]  ;;  %6310 = vmatmul.bf16.vlgmr.msrb.gmra.mxu3 %v16311_v47 }
 0x209   :  { %v12558_v32 = vld [vmem:[#allocation4 + $0x980] sm:$0xf]  ;;  %v12143_v37 = vor.u32 %v15328_v30, %v12142_v29  ;;  %6354 = vmatpush.bf16.msra.mxu3 %v12591_v34  ;;  %6334 = vmatpush.bf16.msrb.mxu2 %v11887_v33  ;;  %v2899_v29 = vadd.f32 %v16287_v45, %v2886_v19  ;;  %v2976_v33 = vpop.f32.mrf.mxu3 }
 0x20a   :  { %v15432_v5 = vld [vmem:[#allocation4 + $0x99c] sm:$0xf0]  ;;  %v2977_v36 = vadd.f32 %v2976_v33, %v2964_v8  ;;  %v11504_v33 = vld [vmem:[#allocation4 + $0x160] sm:$0xf0] }
 0x20b   :  { %v12814_v39 = vld [vmem:[#allocation4 + $0xb80] sm:$0xf]  ;;  %v12559_v49 = vor.u32 %v15432_v5, %v12558_v32  ;;  %6347 = vmatpush.bf16.msrb.mxu0 %v12143_v37  ;;  %v2912_v2 = vadd.f32 %v16299_v35, %v2899_v29  ;;  %v3002_v37 = vpop.f32.mrf.mxu0  ;;  %v12080_v29 = vld [vmem:[#allocation4 + $0x5e0] sm:$0xf0] }
 0x20c   :  { %v15496_v59 = vld [vmem:[#allocation4 + $0xb9c] sm:$0xf0]  ;;  %v2990_v3 = vadd.f32 %v2989_v18, %v2977_v36  ;;  %v11536_v18 = vld [vmem:[#allocation4 + $0x1a0] sm:$0xf0] }
 0x20d   :  { %v11854_v40 = vld [vmem:[#allocation4 + $0x400] sm:$0xf]  ;;  %v12815_v51 = vor.u32 %v15496_v59, %v12814_v39  ;;  %6355 = vmatpush.bf16.msra.mxu3 %v12559_v49  ;;  %v2925_v35 = vadd.f32 %v16295_v20, %v2912_v2 }
 0x20e   :  { %v15256_v41 = vld [vmem:[#allocation4 + $0x41c] sm:$0xf0] }
 0x20f   :  { %v12110_v42 = vld [vmem:[#allocation4 + $0x600] sm:$0xf]  ;;  %v11855_v52 = vor.u32 %v15256_v41, %v11854_v40  ;;  %6368 = vmatpush.bf16.msra.mxu1 %v12815_v51  ;;  %v2938_v58 = vadd.f32 %v16293_v15, %v2925_v35  ;;  %v12048_v35 = vld [vmem:[#allocation4 + $0x5a0] sm:$0xf0] }
 0x210   :  { %v15320_v28 = vld [vmem:[#allocation4 + $0x61c] sm:$0xf0] }
 0x211   :  { %v13102_v43 = vld [vmem:[#allocation4 + $0xdc0] sm:$0xf]  ;;  %v12111_v63 = vor.u32 %v15320_v28, %v12110_v42  ;;  %6335 = vmatpush.bf16.msrb.mxu2 %v11855_v52  ;;  %v2991_v42 = vpop.f32.mrf.mxu1  ;;  %v3218_v15 = vmax.f32 %v2938_v58, 0.0 }
 0x212   :  { %v15568_v44 = vld [vmem:[#allocation4 + $0xddc] sm:$0xf0]  ;;  %v15300_v42 = vld [vmem:[#allocation4 + $0x584] sm:$0xf] }
 0x213   :  { %v12526_v55 = vld [vmem:[#allocation4 + $0x940] sm:$0xf]  ;;  %v13103_v48 = vor.u32 %v15568_v44, %v13102_v43  ;;  %6348 = vmatpush.bf16.msrb.mxu0 %v12111_v63 }
 0x214   :  { %v15424_v56 = vld [vmem:[#allocation4 + $0x95c] sm:$0xf0]  ;;  %6336 = vmatmul.bf16.vlgmr.msrb.gmra.mxu2 %v16320_v11 }
 0x215   :  { %v12782_v53 = vld [vmem:[#allocation4 + $0xb40] sm:$0xf]  ;;  %v12527_v9 = vor.u32 %v15424_v56, %v12526_v55  ;;  %6380 = vmatpush.bf16.msra.mxu2 %v13103_v48  ;;  %v2978_v48 = vpop.f32.mrf.mxu3 }
 0x216   :  { %v15488_v61 = vld [vmem:[#allocation4 + $0xb5c] sm:$0xf0]  ;;  %6349 = vmatmul.bf16.vlgmr.msrb.gmra.mxu0 %v16322_v14 }
 0x217   :  { %v13070_v4 = vld [vmem:[#allocation4 + $0xd80] sm:$0xf]  ;;  %v12783_v54 = vor.u32 %v15488_v61, %v12782_v53  ;;  %6356 = vmatpush.bf16.msra.mxu3 %v12527_v9  ;;  %v3015_v9 = vpop.f32.mrf.mxu2 }
 0x218   :  { %v15560_v7 = vld [vmem:[#allocation4 + $0xd9c] sm:$0xf0] }
 0x219   :  { %v12494_v38 = vld [vmem:[#allocation4 + $0x900] sm:$0xf]  ;;  %v13071_v60 = vor.u32 %v15560_v7, %v13070_v4  ;;  %6369 = vmatpush.bf16.msra.mxu1 %v12783_v54  ;;  %v15244_v4 = vld [vmem:[#allocation4 + $0x3c4] sm:$0xf] }
 0x21a   :  { %v15416_v10 = vld [vmem:[#allocation4 + $0x91c] sm:$0xf0]  ;;  %v11824_v54 = vld [vmem:[#allocation4 + $0x3e0] sm:$0xf0] }
 0x21b   :  { %v12750_v12 = vld [vmem:[#allocation4 + $0xb00] sm:$0xf]  ;;  %v12495_v17 = vor.u32 %v15416_v10, %v12494_v38  ;;  %6381 = vmatpush.bf16.msra.mxu2 %v13071_v60  ;;  %v3004_v38 = vpop.f32.mrf.mxu0  ;;  %v3003_v60 = vadd.f32 %v3002_v37, %v2990_v3  ;;  %v15228_v37 = vld [vmem:[#allocation4 + $0x344] sm:$0xf] }
 0x21c   :  { %v15480_v13 = vld [vmem:[#allocation4 + $0xb1c] sm:$0xf0]  ;;  %v15292_v3 = vld [vmem:[#allocation4 + $0x544] sm:$0xf] }
 0x21d   :  { %v13038_v6 = vld [vmem:[#allocation4 + $0xd40] sm:$0xf]  ;;  %v12751_v22 = vor.u32 %v15480_v13, %v12750_v12  ;;  %6357 = vmatpush.bf16.msra.mxu3 %v12495_v17  ;;  %v15172_v17 = vld [vmem:[#allocation4 + $0x184] sm:$0xf] }
 0x21e   :  { %v15552_v16 = vld [vmem:[#allocation4 + $0xd5c] sm:$0xf0]  ;;  %v11696_v38 = vld [vmem:[#allocation4 + $0x2e0] sm:$0xf0] }
 0x21f   :  { %v12462_v23 = vld [vmem:[#allocation4 + $0x8c0] sm:$0xf]  ;;  %v13039_v27 = vor.u32 %v15552_v16, %v13038_v6  ;;  %6370 = vmatpush.bf16.msra.mxu1 %v12751_v22  ;;  %v11571_v6 = vor.u32 %v15180_v62, %v11568_v1  ;;  %v11827_v16 = vor.u32 %v15244_v4, %v11824_v54  ;;  %v15236_v22 = vld [vmem:[#allocation4 + $0x384] sm:$0xf] }
 0x220   :  { %v15408_v24 = vld [vmem:[#allocation4 + $0x8dc] sm:$0xf0]  ;;  %v15148_v4 = vld [vmem:[#allocation4 + $0xc4] sm:$0xf] }
 0x221   :  { %v12718_v25 = vld [vmem:[#allocation4 + $0xac0] sm:$0xf]  ;;  %v12463_v31 = vor.u32 %v15408_v24, %v12462_v23  ;;  %6382 = vmatpush.bf16.msra.mxu2 %v13039_v27  ;;  %v11792_v24 = vld [vmem:[#allocation4 + $0x3a0] sm:$0xf0] }
 0x222   :  { %v15472_v26 = vld [vmem:[#allocation4 + $0xadc] sm:$0xf0]  ;;  %v15308_v27 = vld [vmem:[#allocation4 + $0x5c4] sm:$0xf] }
 0x223   :  { %v13006_v0 = vld [vmem:[#allocation4 + $0xd00] sm:$0xf]  ;;  %v12719_v34 = vor.u32 %v15472_v26, %v12718_v25  ;;  %6358 = vmatpush.bf16.msra.mxu3 %v12463_v31  ;;  %v11539_v31 = vor.u32 %v15172_v17, %v11536_v18  ;;  %v15212_v54 = vld [vmem:[#allocation4 + $0x2c4] sm:$0xf] }
 0x224   :  { %v15544_v30 = vld [vmem:[#allocation4 + $0xd1c] sm:$0xf0]  ;;  %v11408_v17 = vld [vmem:[#allocation4 + $0xa0] sm:$0xf0] }
 0x225   :  { %v12430_v32 = vld [vmem:[#allocation4 + $0x880] sm:$0xf]  ;;  %v13007_v59 = vor.u32 %v15544_v30, %v13006_v0  ;;  %6371 = vmatpush.bf16.msra.mxu1 %v12719_v34  ;;  %v16333_v0 = vpack.c.bf16 %v3218_v15, %v3218_v15  ;;  %v3016_v30 = vadd.f32 %v3015_v9, %v3003_v60  ;;  %v3028_v34 = vpop.f32.mrf.mxu3 }
 0x226   :  { %v15400_v57 = vld [vmem:[#allocation4 + $0x89c] sm:$0xf0] }
 0x227   :  { %v12686_v5 = vld [vmem:[#allocation4 + $0xa80] sm:$0xf]  ;;  %v12431_v41 = vor.u32 %v15400_v57, %v12430_v32  ;;  %6383 = vmatpush.bf16.msra.mxu2 %v13007_v59  ;;  %v11795_v32 = vor.u32 %v15236_v22, %v11792_v24  ;;  %v15164_v57 = vld [vmem:[#allocation4 + $0x144] sm:$0xf]  ;;  %v3029_v59 = vadd.f32 %v3028_v34, %v3016_v30 }
 0x228   :  { %v15464_v39 = vld [vmem:[#allocation4 + $0xa9c] sm:$0xf0]  ;;  %v15204_v22 = vld [vmem:[#allocation4 + $0x284] sm:$0xf] }
 0x229   :  { %v12974_v45 = vld [vmem:[#allocation4 + $0xcc0] sm:$0xf]  ;;  %v12687_v46 = vor.u32 %v15464_v39, %v12686_v5  ;;  %6359 = vmatpush.bf16.msra.mxu3 %v12431_v41  ;;  %v12083_v41 = vor.u32 %v15308_v27, %v12080_v29  ;;  %v3219_v36 = vmax.f32 %v3029_v59, 0.0  ;;  %v11952_v27 = vld [vmem:[#allocation4 + $0x4e0] sm:$0xf0] }
 0x22a   :  { %v15536_v40 = vld [vmem:[#allocation4 + $0xcdc] sm:$0xf0] }
 0x22b   :  { %v12398_v21 = vld [vmem:[#allocation4 + $0x840] sm:$0xf]  ;;  %v12975_v49 = vor.u32 %v15536_v40, %v12974_v45  ;;  %6372 = vmatpush.bf16.msra.mxu1 %v12687_v46  ;;  %v11760_v45 = vld [vmem:[#allocation4 + $0x360] sm:$0xf0]  ;;  %v3017_v40 = vpop.f32.mrf.mxu2  ;;  %v11507_v46 = vor.u32 %v15164_v57, %v11504_v33 }
 0x22c   :  { %v15392_v28 = vld [vmem:[#allocation4 + $0x85c] sm:$0xf0]  ;;  %v11376_v57 = vld [vmem:[#allocation4 + $0x60] sm:$0xf0] }
 0x22d   :  { %v12654_v43 = vld [vmem:[#allocation4 + $0xa40] sm:$0xf]  ;;  %v12399_v55 = vor.u32 %v15392_v28, %v12398_v21  ;;  %6384 = vmatpush.bf16.msra.mxu2 %v12975_v49  ;;  %v11763_v28 = vor.u32 %v15228_v37, %v11760_v45  ;;  %v3030_v1 = vpop.f32.mrf.mxu3  ;;  %v15268_v37 = vld [vmem:[#allocation4 + $0x484] sm:$0xf] }
 0x22e   :  { %v15456_v44 = vld [vmem:[#allocation4 + $0xa5c] sm:$0xf0]  ;;  %v11920_v45 = vld [vmem:[#allocation4 + $0x4a0] sm:$0xf0] }
 0x22f   :  { %v12942_v51 = vld [vmem:[#allocation4 + $0xc80] sm:$0xf]  ;;  %v12655_v63 = vor.u32 %v15456_v44, %v12654_v43  ;;  %6360 = vmatpush.bf16.msra.mxu3 %v12399_v55  ;;  %v15156_v43 = vld [vmem:[#allocation4 + $0x104] sm:$0xf] }
 0x230   :  { %v15528_v52 = vld [vmem:[#allocation4 + $0xc9c] sm:$0xf0]  ;;  %v11472_v44 = vld [vmem:[#allocation4 + $0x120] sm:$0xf0] }
 0x231   :  { %v12366_v56 = vld [vmem:[#allocation4 + $0x800] sm:$0xf]  ;;  %v12943_v7 = vor.u32 %v15528_v52, %v12942_v51  ;;  %6373 = vmatpush.bf16.msra.mxu1 %v12655_v63  ;;  %v16336_v51 = vpack.c.bf16 %v3219_v36, %v3219_v36  ;;  %v15220_v52 = vld [vmem:[#allocation4 + $0x304] sm:$0xf] }
 0x232   :  { %v15384_v20 = vld [vmem:[#allocation4 + $0x81c] sm:$0xf0]  ;;  %v11728_v55 = vld [vmem:[#allocation4 + $0x320] sm:$0xf0] }
 0x233   :  { %v12622_v53 = vld [vmem:[#allocation4 + $0xa00] sm:$0xf]  ;;  %v12367_v13 = vor.u32 %v15384_v20, %v12366_v56  ;;  %6385 = vmatpush.bf16.msra.mxu2 %v12943_v7  ;;  %v12051_v56 = vor.u32 %v15300_v42, %v12048_v35  ;;  %v12016_v63 = vld [vmem:[#allocation4 + $0x560] sm:$0xf0]  ;;  %v11475_v20 = vor.u32 %v15156_v43, %v11472_v44  ;;  %v11731_v62 = vor.u32 %v15220_v52, %v11728_v55 }
 0x234   :  { %v15448_v61 = vld [vmem:[#allocation4 + $0xa1c] sm:$0xf0]  ;;  %v11440_v7 = vld [vmem:[#allocation4 + $0xe0] sm:$0xf0]  ;;  %v11923_v55 = vor.u32 %v15268_v37, %v11920_v45 }
 0x235   :  { %v12910_v10 = vld [vmem:[#allocation4 + $0xc40] sm:$0xf]  ;;  %v12623_v19 = vor.u32 %v15448_v61, %v12622_v53  ;;  %6361 = vmatpush.bf16.msra.mxu3 %v12367_v13  ;;  %v16339_v53 = vpop.f32.mrf.mxu1  ;;  %v11984_v13 = vld [vmem:[#allocation4 + $0x520] sm:$0xf0]  ;;  %v11443_v15 = vor.u32 %v15148_v4, %v11440_v7  ;;  %v16343_v34 = vpop.f32.mrf.mxu3 }
 0x236   :  { %v15520_v12 = vld [vmem:[#allocation4 + $0xc5c] sm:$0xf0]  ;;  %v15436_v44 = vld [vmem:[#allocation4 + $0x9c4] sm:$0xf]  ;;  %v3055_v45 = vadd.f32 %v16343_v34, %v16339_v53 }
 0x237   :  { %v12911_v23 = vor.u32 %v15520_v12, %v12910_v10  ;;  %v12878_v25 = vld [vmem:[#allocation4 + $0xc00] sm:$0xf]  ;;  %6374 = vmatpush.bf16.msra.mxu1 %v12623_v19  ;;  %v12019_v10 = vor.u32 %v15292_v3, %v12016_v63  ;;  %v15284_v12 = vld [vmem:[#allocation4 + $0x504] sm:$0xf] }
 0x238   :  { %v15512_v26 = vld [vmem:[#allocation4 + $0xc1c] sm:$0xf0]  ;;  %6362 = vmatmul.bf16.vlgmr.msra.gmra.mxu3 %v16333_v0  ;;  %v11987_v24 = vor.u32 %v15284_v12, %v11984_v13  ;;  %v15500_v52 = vld [vmem:[#allocation4 + $0xbc4] sm:$0xf] }
 0x239   :  { %6406 = vmatpush.bf16.msrb.mxu3 %v11571_v6  ;;  %v13358_v2 = vld [vmem:[#allocation4 + $0xfc0] sm:$0xf]  ;;  %6386 = vmatpush.bf16.msra.mxu2 %v12911_v23  ;;  %v12879_v5 = vor.u32 %v15512_v26, %v12878_v25  ;;  %v11699_v6 = vor.u32 %v15212_v54, %v11696_v38  ;;  %v11664_v23 = vld [vmem:[#allocation4 + $0x2a0] sm:$0xf0]  ;;  %v16341_v25 = vpop.f32.mrf.mxu0 }
 0x23a   :  { %v15632_v8 = vld [vmem:[#allocation4 + $0xfdc] sm:$0xf0]  ;;  %6375 = vmatmul.bf16.vlgmr.msra.gmra.mxu1 %v16336_v51  ;;  %v15276_v26 = vld [vmem:[#allocation4 + $0x4c4] sm:$0xf] }
 0x23b   :  { %6419 = vmatpush.bf16.msrb.mxu1 %v11827_v16  ;;  %v13359_v39 = vor.u32 %v15632_v8, %v13358_v2  ;;  %v13326_v21 = vld [vmem:[#allocation4 + $0xf80] sm:$0xf]  ;;  %v15140_v16 = vld [vmem:[#allocation4 + $0x84] sm:$0xf]  ;;  %v11667_v8 = vor.u32 %v15204_v22, %v11664_v23  ;;  %v11955_v59 = vor.u32 %v15276_v26, %v11952_v27 }
 0x23c   :  { %v15624_v49 = vld [vmem:[#allocation4 + $0xf9c] sm:$0xf0]  ;;  %v11411_v29 = vor.u32 %v15140_v16, %v11408_v17  ;;  %v12848_v3 = vld [vmem:[#allocation4 + $0xbe0] sm:$0xf0] }
 0x23d   :  { %6393 = vmatpush.bf16.msra.mxu0 %v13359_v39  ;;  %6407 = vmatpush.bf16.msrb.mxu3 %v11539_v31  ;;  %v13327_v58 = vor.u32 %v15624_v49, %v13326_v21  ;;  %v13294_v61 = vld [vmem:[#allocation4 + $0xf40] sm:$0xf]  ;;  %v3043_v30 = vpop.f32.mrf.mxu1  ;;  %v11632_v39 = vld [vmem:[#allocation4 + $0x260] sm:$0xf0]  ;;  %v3056_v7 = vpop.f32.mrf.mxu3 }
 0x23e   :  { %6387 = vmatpush.bf16.msra.mxu2 %v12879_v5  ;;  %v15616_v48 = vld [vmem:[#allocation4 + $0xf5c] sm:$0xf0]  ;;  %v15196_v5 = vld [vmem:[#allocation4 + $0x244] sm:$0xf] }
 0x23f   :  { %6420 = vmatpush.bf16.msrb.mxu1 %v11795_v32  ;;  %v13295_v9 = vor.u32 %v15616_v48, %v13294_v61  ;;  %v13262_v60 = vld [vmem:[#allocation4 + $0xf00] sm:$0xf]  ;;  %v15132_v32 = vld [vmem:[#allocation4 + $0x44] sm:$0xf]  ;;  %v11635_v36 = vor.u32 %v15196_v5, %v11632_v39 }
 0x240   :  { %v15608_v19 = vld [vmem:[#allocation4 + $0xf1c] sm:$0xf0]  ;;  %v11379_v40 = vor.u32 %v15132_v32, %v11376_v57  ;;  %v15188_v21 = vld [vmem:[#allocation4 + $0x204] sm:$0xf] }
 0x241   :  { %6408 = vmatpush.bf16.msrb.mxu3 %v11507_v46  ;;  %6394 = vmatpush.bf16.msra.mxu0 %v13327_v58  ;;  %v13263_v18 = vor.u32 %v15608_v19, %v13262_v60  ;;  %v13230_v31 = vld [vmem:[#allocation4 + $0xec0] sm:$0xf]  ;;  %v11344_v46 = vld [vmem:[#allocation4 + $0x20] sm:$0xf0]  ;;  %v16345_v58 = vpop.f32.mrf.mxu2 }
 0x242   :  { %6432 = vmatpush.bf16.msrb.mxu2 %v12083_v41  ;;  %v15600_v2 = vld [vmem:[#allocation4 + $0xedc] sm:$0xf0]  ;;  %v15124_v41 = vld [vmem:[#allocation4 + $0x4] sm:$0xf] }
 0x243   :  { %6421 = vmatpush.bf16.msrb.mxu1 %v11763_v28  ;;  %v13231_v33 = vor.u32 %v15600_v2, %v13230_v31  ;;  %v13198_v42 = vld [vmem:[#allocation4 + $0xe80] sm:$0xf]  ;;  %v11600_v28 = vld [vmem:[#allocation4 + $0x220] sm:$0xf0]  ;;  %v11347_v61 = vor.u32 %v15124_v41, %v11344_v46 }
 0x244   :  { %v15592_v35 = vld [vmem:[#allocation4 + $0xe9c] sm:$0xf0]  ;;  %v12592_v49 = vld [vmem:[#allocation4 + $0x9e0] sm:$0xf0]  ;;  %v11603_v1 = vor.u32 %v15188_v21, %v11600_v28 }
 0x245   :  { %6409 = vmatpush.bf16.msrb.mxu3 %v11475_v20  ;;  %6395 = vmatpush.bf16.msra.mxu0 %v13295_v9  ;;  %v13199_v43 = vor.u32 %v15592_v35, %v13198_v42  ;;  %v15260_v63 = vld [vmem:[#allocation4 + $0x444] sm:$0xf]  ;;  %v13166_v48 = vld [vmem:[#allocation4 + $0xe40] sm:$0xf]  ;;  %v12595_v4 = vor.u32 %v15436_v44, %v12592_v49  ;;  %v12851_v9 = vor.u32 %v15500_v52, %v12848_v3  ;;  %v3093_v35 = vpop.f32.mrf.mxu1 }
 0x246   :  { %6433 = vmatpush.bf16.msrb.mxu2 %v12051_v56  ;;  %v3069_v56 = vpop.f32.mrf.mxu0  ;;  %v11888_v20 = vld [vmem:[#allocation4 + $0x460] sm:$0xf0]  ;;  %v15576_v16 = vld [vmem:[#allocation4 + $0xe1c] sm:$0xf0]  ;;  %v3068_v49 = vadd.f32 %v16341_v25, %v3055_v45  ;;  %v15249_v45 = vld [vmem:[#allocation4 + $0x3e4] sm:$0xf0] }
 0x247   :  { %6422 = vmatpush.bf16.msrb.mxu1 %v11731_v62  ;;  %v15584_v62 = vld [vmem:[#allocation4 + $0xe5c] sm:$0xf0]  ;;  %v15428_v54 = vld [vmem:[#allocation4 + $0x984] sm:$0xf]  ;;  %v11891_v12 = vor.u32 %v15260_v63, %v11888_v20 }
 0x248   :  { %v12560_v38 = vld [vmem:[#allocation4 + $0x9a0] sm:$0xf0]  ;;  %v13167_v19 = vor.u32 %v15584_v62, %v13166_v48  ;;  %v3081_v62 = vadd.f32 %v16345_v58, %v3068_v49  ;;  %v11542_v49 = vld [vmem:[#allocation4 + $0x188] sm:$0xf] }
 0x249   :  { %6410 = vmatpush.bf16.msrb.mxu3 %v11443_v15  ;;  %6396 = vmatpush.bf16.msra.mxu0 %v13263_v18  ;;  %v12816_v13 = vld [vmem:[#allocation4 + $0xba0] sm:$0xf0]  ;;  %v12563_v17 = vor.u32 %v15428_v54, %v12560_v38  ;;  %v3082_v2 = vpop.f32.mrf.mxu2 }
 0x24a   :  { %6434 = vmatpush.bf16.msrb.mxu2 %v12019_v10  ;;  %v15492_v10 = vld [vmem:[#allocation4 + $0xb84] sm:$0xf]  ;;  %v3094_v25 = vadd.f32 %v3093_v35, %v3081_v62 }
 0x24b   :  { %6423 = vmatpush.bf16.msrb.mxu1 %v11699_v6  ;;  %v15252_v15 = vld [vmem:[#allocation4 + $0x404] sm:$0xf]  ;;  %v13134_v6 = vld [vmem:[#allocation4 + $0xe00] sm:$0xf]  ;;  %v12819_v22 = vor.u32 %v15492_v10, %v12816_v13 }
 0x24c   :  { %v11856_v60 = vld [vmem:[#allocation4 + $0x420] sm:$0xf0] }
 0x24d   :  { %6411 = vmatpush.bf16.msrb.mxu3 %v11411_v29  ;;  %6397 = vmatpush.bf16.msra.mxu0 %v13231_v33  ;;  %v15420_v18 = vld [vmem:[#allocation4 + $0x944] sm:$0xf]  ;;  %v3095_v54 = vpop.f32.mrf.mxu1 }
 0x24e   :  { %6435 = vmatpush.bf16.msrb.mxu2 %v11987_v24  ;;  %v12528_v23 = vld [vmem:[#allocation4 + $0x960] sm:$0xf0]  ;;  %v11859_v24 = vor.u32 %v15252_v15, %v11856_v60  ;;  %v16348_v31 = vpop.f32.mrf.mxu0  ;;  %v11766_v54 = vld [vmem:[#allocation4 + $0x348] sm:$0xf] }
 0x24f   :  { %6424 = vmatpush.bf16.msrb.mxu1 %v11667_v8  ;;  %v15372_v26 = vld [vmem:[#allocation4 + $0x7c4] sm:$0xf]  ;;  %v13135_v8 = vor.u32 %v15576_v16, %v13134_v6  ;;  %v12531_v57 = vor.u32 %v15420_v18, %v12528_v23 }
 0x250   :  { %v12336_v27 = vld [vmem:[#allocation4 + $0x7e0] sm:$0xf0] }
 0x251   :  { %6412 = vmatpush.bf16.msrb.mxu3 %v11379_v40  ;;  %6398 = vmatpush.bf16.msra.mxu0 %v13199_v43  ;;  %v15484_v29 = vld [vmem:[#allocation4 + $0xb44] sm:$0xf]  ;;  %v12339_v32 = vor.u32 %v15372_v26, %v12336_v27 }
 0x252   :  { %6436 = vmatpush.bf16.msrb.mxu2 %v11955_v59  ;;  %v12784_v30 = vld [vmem:[#allocation4 + $0xb60] sm:$0xf0] }
 0x253   :  { %6425 = vmatpush.bf16.msrb.mxu1 %v11635_v36  ;;  %v15364_v33 = vld [vmem:[#allocation4 + $0x784] sm:$0xf]  ;;  %v12787_v39 = vor.u32 %v15484_v29, %v12784_v30 }
 0x254   :  { %v12304_v5 = vld [vmem:[#allocation4 + $0x7a0] sm:$0xf0] }
 0x255   :  { %6413 = vmatpush.bf16.msrb.mxu3 %v11347_v61  ;;  %6399 = vmatpush.bf16.msra.mxu0 %v13167_v19  ;;  %v15412_v59 = vld [vmem:[#allocation4 + $0x904] sm:$0xf]  ;;  %v12307_v42 = vor.u32 %v15364_v33, %v12304_v5  ;;  %v11574_v33 = vld [vmem:[#allocation4 + $0x1c8] sm:$0xf] }
 0x256   :  { %6437 = vmatpush.bf16.msrb.mxu2 %v11923_v55  ;;  %v12496_v37 = vld [vmem:[#allocation4 + $0x920] sm:$0xf0]  ;;  %v3121_v56 = vpop.f32.mrf.mxu0  ;;  %v15185_v5 = vld [vmem:[#allocation4 + $0x1e4] sm:$0xf0] }
 0x257   :  { %6426 = vmatpush.bf16.msrb.mxu1 %v11603_v1  ;;  %v15476_v40 = vld [vmem:[#allocation4 + $0xb04] sm:$0xf]  ;;  %v12499_v36 = vor.u32 %v15412_v59, %v12496_v37  ;;  %v16358_v59 = vpop.f32.mrf.mxu2  ;;  %v11830_v37 = vld [vmem:[#allocation4 + $0x3c8] sm:$0xf] }
 0x258   :  { %6414 = vmatmul.bf16.vlgmr.msrb.gmra.mxu3 %v16311_v47  ;;  %v12752_v41 = vld [vmem:[#allocation4 + $0xb20] sm:$0xf0] }
 0x259   :  { %6458 = vmatpush.bf16.msra.mxu3 %v12595_v4  ;;  %6400 = vmatpush.bf16.msra.mxu0 %v13135_v8  ;;  %v15356_v46 = vld [vmem:[#allocation4 + $0x744] sm:$0xf]  ;;  %v12755_v28 = vor.u32 %v15476_v40, %v12752_v41 }
 0x25a   :  { %6438 = vmatpush.bf16.msrb.mxu2 %v11891_v12  ;;  %6427 = vmatmul.bf16.vlgmr.msrb.gmra.mxu1 %v16313_v50  ;;  %v12272_v21 = vld [vmem:[#allocation4 + $0x760] sm:$0xf0]  ;;  %v3106_v12 = vpop.f32.mrf.mxu3 }
 0x25b   :  { %6471 = vmatpush.bf16.msra.mxu1 %v12851_v9  ;;  %v15404_v43 = vld [vmem:[#allocation4 + $0x8c4] sm:$0xf]  ;;  %v12275_v53 = vor.u32 %v15356_v46, %v12272_v21  ;;  %v3107_v19 = vadd.f32 %v3106_v12, %v3094_v25  ;;  %v11575_v46 = vor.u32 %v15185_v5, %v11574_v33 }
 0x25c   :  { %v12464_v44 = vld [vmem:[#allocation4 + $0x8e0] sm:$0xf0] }
 0x25d   :  { %6459 = vmatpush.bf16.msra.mxu3 %v12563_v17  ;;  %6445 = vmatpush.bf16.msrb.mxu0 %v12339_v32  ;;  %v15468_v52 = vld [vmem:[#allocation4 + $0xac4] sm:$0xf]  ;;  %v12467_v34 = vor.u32 %v15404_v43, %v12464_v44  ;;  %v3120_v23 = vadd.f32 %v16348_v31, %v3107_v19  ;;  %v11831_v44 = vor.u32 %v15249_v45, %v11830_v37  ;;  %v11478_v19 = vld [vmem:[#allocation4 + $0x108] sm:$0xf] }
 0x25e   :  { %6439 = vmatpush.bf16.msrb.mxu2 %v11859_v24  ;;  %v12720_v55 = vld [vmem:[#allocation4 + $0xae0] sm:$0xf0]  ;;  %v16355_v17 = vpop.f32.mrf.mxu0  ;;  %v11414_v37 = vld [vmem:[#allocation4 + $0x88] sm:$0xf] }
 0x25f   :  { %6472 = vmatpush.bf16.msra.mxu1 %v12819_v22  ;;  %v15348_v3 = vld [vmem:[#allocation4 + $0x704] sm:$0xf]  ;;  %v12723_v20 = vor.u32 %v15468_v52, %v12720_v55  ;;  %v15177_v52 = vld [vmem:[#allocation4 + $0x1a4] sm:$0xf0] }
 0x260   :  { %v12240_v63 = vld [vmem:[#allocation4 + $0x720] sm:$0xf0]  ;;  %v15145_v45 = vld [vmem:[#allocation4 + $0xa4] sm:$0xf0] }
 0x261   :  { %6460 = vmatpush.bf16.msra.mxu3 %v12531_v57  ;;  %6446 = vmatpush.bf16.msrb.mxu0 %v12307_v42  ;;  %v15396_v61 = vld [vmem:[#allocation4 + $0x884] sm:$0xf]  ;;  %v12243_v7 = vor.u32 %v15348_v3, %v12240_v63  ;;  %v3220_v57 = vmax.f32 %v3120_v23, 0.0 }
 0x262   :  { %v12432_v48 = vld [vmem:[#allocation4 + $0x8a0] sm:$0xf0]  ;;  %v3108_v21 = vpop.f32.mrf.mxu3 }
 0x263   :  { %6473 = vmatpush.bf16.msra.mxu1 %v12787_v39  ;;  %v15460_v1 = vld [vmem:[#allocation4 + $0xa84] sm:$0xf]  ;;  %v12435_v9 = vor.u32 %v15396_v61, %v12432_v48  ;;  %v16360_v40 = vpack.c.bf16 %v3220_v57, %v3220_v57  ;;  %v11543_v61 = vor.u32 %v15177_v52, %v11542_v49  ;;  %v11382_v49 = vld [vmem:[#allocation4 + $0x48] sm:$0xf] }
 0x264   :  { %v12688_v4 = vld [vmem:[#allocation4 + $0xaa0] sm:$0xf0]  ;;  %v15137_v52 = vld [vmem:[#allocation4 + $0x64] sm:$0xf0] }
 0x265   :  { %6461 = vmatpush.bf16.msra.mxu3 %v12499_v36  ;;  %6447 = vmatpush.bf16.msrb.mxu0 %v12275_v53  ;;  %v15340_v38 = vld [vmem:[#allocation4 + $0x6c4] sm:$0xf]  ;;  %v12691_v13 = vor.u32 %v15460_v1, %v12688_v4  ;;  %v11798_v53 = vld [vmem:[#allocation4 + $0x388] sm:$0xf] }
 0x266   :  { %v12208_v10 = vld [vmem:[#allocation4 + $0x6e0] sm:$0xf0]  ;;  %6388 = vmatmul.bf16.vlgmr.msra.gmra.mxu2 %v16360_v40  ;;  %v3147_v55 = vpop.f32.mrf.mxu0  ;;  %v11510_v4 = vld [vmem:[#allocation4 + $0x148] sm:$0xf] }
 0x267   :  { %6474 = vmatpush.bf16.msra.mxu1 %v12755_v28  ;;  %v15388_v15 = vld [vmem:[#allocation4 + $0x844] sm:$0xf]  ;;  %v12211_v22 = vor.u32 %v15340_v38, %v12208_v10  ;;  %v15233_v38 = vld [vmem:[#allocation4 + $0x364] sm:$0xf0] }
 0x268   :  { %v12400_v60 = vld [vmem:[#allocation4 + $0x860] sm:$0xf0] }
 0x269   :  { %6462 = vmatpush.bf16.msra.mxu3 %v12467_v34  ;;  %v15452_v6 = vld [vmem:[#allocation4 + $0xa44] sm:$0xf]  ;;  %6448 = vmatpush.bf16.msrb.mxu0 %v12243_v7  ;;  %v12403_v24 = vor.u32 %v15388_v15, %v12400_v60  ;;  %v15241_v34 = vld [vmem:[#allocation4 + $0x3a4] sm:$0xf0]  ;;  %v11767_v60 = vor.u32 %v15233_v38, %v11766_v54 }
 0x26a   :  { %v12656_v16 = vld [vmem:[#allocation4 + $0xa60] sm:$0xf0]  ;;  %v11799_v1 = vor.u32 %v15241_v34, %v11798_v53  ;;  %v15169_v7 = vld [vmem:[#allocation4 + $0x164] sm:$0xf0] }
 0x26b   :  { %6475 = vmatpush.bf16.msra.mxu1 %v12723_v20  ;;  %v15564_v58 = vld [vmem:[#allocation4 + $0xdc4] sm:$0xf]  ;;  %v12659_v30 = vor.u32 %v15452_v6, %v12656_v16  ;;  %v11511_v15 = vor.u32 %v15169_v7, %v11510_v4  ;;  %v15161_v6 = vld [vmem:[#allocation4 + $0x124] sm:$0xf0] }
 0x26c   :  { %v13104_v18 = vld [vmem:[#allocation4 + $0xde0] sm:$0xf0]  ;;  %v11638_v53 = vld [vmem:[#allocation4 + $0x248] sm:$0xf] }
 0x26d   :  { %6463 = vmatpush.bf16.msra.mxu3 %v12435_v9  ;;  %v15380_v26 = vld [vmem:[#allocation4 + $0x804] sm:$0xf]  ;;  %v13107_v39 = vor.u32 %v15564_v58, %v13104_v18  ;;  %6449 = vmatpush.bf16.msrb.mxu0 %v12211_v22  ;;  %v3134_v9 = vpop.f32.mrf.mxu2  ;;  %v11734_v58 = vld [vmem:[#allocation4 + $0x308] sm:$0xf] }
 0x26e   :  { %v15332_v27 = vld [vmem:[#allocation4 + $0x684] sm:$0xf]  ;;  %v15225_v18 = vld [vmem:[#allocation4 + $0x324] sm:$0xf0]  ;;  %v3197_v55 = vpop.f32.mrf.mxu0 }
 0x26f   :  { %v12176_v29 = vld [vmem:[#allocation4 + $0x6a0] sm:$0xf0]  ;;  %6476 = vmatpush.bf16.msra.mxu1 %v12691_v13  ;;  %6484 = vmatpush.bf16.msra.mxu2 %v13107_v39  ;;  %v15201_v34 = vld [vmem:[#allocation4 + $0x264] sm:$0xf0] }
 0x270   :  { %v12368_v2 = vld [vmem:[#allocation4 + $0x820] sm:$0xf0]  ;;  %v12179_v31 = vor.u32 %v15332_v27, %v12176_v29  ;;  %v11735_v27 = vor.u32 %v15225_v18, %v11734_v58  ;;  %v11446_v29 = vld [vmem:[#allocation4 + $0xc8] sm:$0xf] }
 0x271   :  { %v15444_v8 = vld [vmem:[#allocation4 + $0xa04] sm:$0xf]  ;;  %6464 = vmatpush.bf16.msra.mxu3 %v12403_v24  ;;  %v12371_v41 = vor.u32 %v15380_v26, %v12368_v2  ;;  %v3158_v24 = vpop.f32.mrf.mxu1  ;;  %v11479_v26 = vor.u32 %v15161_v6, %v11478_v19  ;;  %v15193_v9 = vld [vmem:[#allocation4 + $0x224] sm:$0xf0] }
 0x272   :  { %v12624_v32 = vld [vmem:[#allocation4 + $0xa20] sm:$0xf0]  ;;  %6450 = vmatpush.bf16.msrb.mxu0 %v12179_v31  ;;  %v12598_v54 = vld [vmem:[#allocation4 + $0x9c8] sm:$0xf] }
 0x273   :  { %v15556_v42 = vld [vmem:[#allocation4 + $0xd84] sm:$0xf]  ;;  %6477 = vmatpush.bf16.msra.mxu1 %v12659_v30  ;;  %v12627_v36 = vor.u32 %v15444_v8, %v12624_v32  ;;  %v15153_v30 = vld [vmem:[#allocation4 + $0xe4] sm:$0xf0] }
 0x274   :  { %v13072_v35 = vld [vmem:[#allocation4 + $0xda0] sm:$0xf0]  ;;  %v11702_v8 = vld [vmem:[#allocation4 + $0x2c8] sm:$0xf]  ;;  %v11447_v5 = vor.u32 %v15153_v30, %v11446_v29 }
 0x275   :  { %v15324_v28 = vld [vmem:[#allocation4 + $0x644] sm:$0xf]  ;;  %v13075_v56 = vor.u32 %v15556_v42, %v13072_v35  ;;  %6465 = vmatpush.bf16.msra.mxu3 %v12371_v41  ;;  %v15217_v32 = vld [vmem:[#allocation4 + $0x2e4] sm:$0xf0]  ;;  %v3184_v38 = vpop.f32.mrf.mxu2 }
 0x276   :  { %v12144_v43 = vld [vmem:[#allocation4 + $0x660] sm:$0xf0]  ;;  %6440 = vmatmul.bf16.vlgmr.msrb.gmra.mxu2 %v16320_v11  ;;  %v11703_v39 = vor.u32 %v15217_v32, %v11702_v8  ;;  %v11670_v41 = vld [vmem:[#allocation4 + $0x288] sm:$0xf] }
 0x277   :  { %v15548_v3 = vld [vmem:[#allocation4 + $0xd44] sm:$0xf]  ;;  %v12147_v20 = vor.u32 %v15324_v28, %v12144_v43  ;;  %6478 = vmatpush.bf16.msra.mxu1 %v12627_v36  ;;  %6485 = vmatpush.bf16.msra.mxu2 %v13075_v56  ;;  %v15209_v42 = vld [vmem:[#allocation4 + $0x2a4] sm:$0xf0]  ;;  %v11415_v28 = vor.u32 %v15145_v45, %v11414_v37  ;;  %v3171_v43 = vpop.f32.mrf.mxu3 }
 0x278   :  { %v13040_v63 = vld [vmem:[#allocation4 + $0xd60] sm:$0xf0]  ;;  %6466 = vmatmul.bf16.vlgmr.msra.gmra.mxu3 %v16333_v0  ;;  %v15305_v58 = vld [vmem:[#allocation4 + $0x5a4] sm:$0xf0] }
 0x279   :  { %6510 = vmatpush.bf16.msrb.mxu3 %v11575_v46  ;;  %v15316_v48 = vld [vmem:[#allocation4 + $0x604] sm:$0xf]  ;;  %v13043_v25 = vor.u32 %v15548_v3, %v13040_v63  ;;  %6451 = vmatpush.bf16.msrb.mxu0 %v12147_v20  ;;  %v3146_v46 = vadd.f32 %v16355_v17, %v16358_v59  ;;  %v3160_v21 = vpop.f32.mrf.mxu1  ;;  %v15313_v17 = vld [vmem:[#allocation4 + $0x5e4] sm:$0xf0]  ;;  %v11639_v59 = vor.u32 %v15201_v34, %v11638_v53 }
 0x27a   :  { %v12112_v62 = vld [vmem:[#allocation4 + $0x620] sm:$0xf0]  ;;  %6479 = vmatmul.bf16.vlgmr.msra.gmra.mxu1 %v16336_v51  ;;  %v12566_v29 = vld [vmem:[#allocation4 + $0x988] sm:$0xf] }
 0x27b   :  { %6523 = vmatpush.bf16.msrb.mxu1 %v11831_v44  ;;  %v15540_v10 = vld [vmem:[#allocation4 + $0xd04] sm:$0xf]  ;;  %v12115_v13 = vor.u32 %v15316_v48, %v12112_v62  ;;  %6486 = vmatpush.bf16.msra.mxu2 %v13043_v25  ;;  %v11671_v44 = vor.u32 %v15209_v42, %v11670_v41  ;;  %v3159_v20 = vadd.f32 %v3158_v24, %v3146_v46  ;;  %v12086_v48 = vld [vmem:[#allocation4 + $0x5c8] sm:$0xf]  ;;  %v3199_v24 = vpop.f32.mrf.mxu0 }
 0x27c   :  { %v13008_v12 = vld [vmem:[#allocation4 + $0xd20] sm:$0xf0]  ;;  %v11350_v62 = vld [vmem:[#allocation4 + $0x8] sm:$0xf] }
 0x27d   :  { %6511 = vmatpush.bf16.msrb.mxu3 %v11543_v61  ;;  %v13011_v16 = vor.u32 %v15540_v10, %v13008_v12  ;;  %v15532_v22 = vld [vmem:[#allocation4 + $0xcc4] sm:$0xf]  ;;  %6452 = vmatpush.bf16.msrb.mxu0 %v12115_v13  ;;  %v11383_v61 = vor.u32 %v15137_v52, %v11382_v49  ;;  %v3172_v4 = vadd.f32 %v3171_v43, %v3159_v20  ;;  %v11606_v25 = vld [vmem:[#allocation4 + $0x208] sm:$0xf] }
 0x27e   :  { %v12976_v23 = vld [vmem:[#allocation4 + $0xce0] sm:$0xf0]  ;;  %v12087_v10 = vor.u32 %v15313_v17, %v12086_v48  ;;  %v15441_v12 = vld [vmem:[#allocation4 + $0x9e4] sm:$0xf0] }
 0x27f   :  { %6524 = vmatpush.bf16.msrb.mxu1 %v11799_v1  ;;  %6487 = vmatpush.bf16.msra.mxu2 %v13011_v16  ;;  %v12979_v2 = vor.u32 %v15532_v22, %v12976_v23  ;;  %v15524_v57 = vld [vmem:[#allocation4 + $0xc84] sm:$0xf]  ;;  %v15129_v1 = vld [vmem:[#allocation4 + $0x24] sm:$0xf0]  ;;  %v3173_v18 = vpop.f32.mrf.mxu3  ;;  %v11607_v22 = vor.u32 %v15193_v9, %v11606_v25 }
 0x280   :  { %v12944_v33 = vld [vmem:[#allocation4 + $0xca0] sm:$0xf0]  ;;  %v12854_v13 = vld [vmem:[#allocation4 + $0xbc8] sm:$0xf]  ;;  %v11351_v6 = vor.u32 %v15129_v1, %v11350_v62 }
 0x281   :  { %6512 = vmatpush.bf16.msrb.mxu3 %v11511_v15  ;;  %v12947_v31 = vor.u32 %v15524_v57, %v12944_v33  ;;  %v15516_v35 = vld [vmem:[#allocation4 + $0xc44] sm:$0xf]  ;;  %v15505_v15 = vld [vmem:[#allocation4 + $0xbe4] sm:$0xf0]  ;;  %v3210_v19 = vpop.f32.mrf.mxu1 }
 0x282   :  { %v12912_v36 = vld [vmem:[#allocation4 + $0xc60] sm:$0xf0]  ;;  %v12054_v16 = vld [vmem:[#allocation4 + $0x588] sm:$0xf] }
 0x283   :  { %6525 = vmatpush.bf16.msrb.mxu1 %v11767_v60  ;;  %6488 = vmatpush.bf16.msra.mxu2 %v12979_v2  ;;  %v12915_v56 = vor.u32 %v15516_v35, %v12912_v36  ;;  %v15508_v3 = vld [vmem:[#allocation4 + $0xc04] sm:$0xf]  ;;  %v3185_v60 = vadd.f32 %v3184_v38, %v3172_v4  ;;  %v12055_v30 = vor.u32 %v15305_v58, %v12054_v16  ;;  %v15433_v2 = vld [vmem:[#allocation4 + $0x9a4] sm:$0xf0]  ;;  %v3186_v35 = vpop.f32.mrf.mxu2 }
 0x284   :  { %v12880_v63 = vld [vmem:[#allocation4 + $0xc20] sm:$0xf0]  ;;  %v12822_v8 = vld [vmem:[#allocation4 + $0xb88] sm:$0xf] }
 0x285   :  { %6513 = vmatpush.bf16.msrb.mxu3 %v11479_v26  ;;  %v12883_v7 = vor.u32 %v15508_v3, %v12880_v63  ;;  %v3198_v23 = vadd.f32 %v3197_v55, %v3185_v60  ;;  %v12599_v26 = vor.u32 %v15441_v12, %v12598_v54  ;;  %v15497_v32 = vld [vmem:[#allocation4 + $0xba4] sm:$0xf0]  ;;  %v13360_v37 = vld [vmem:[#allocation4 + $0xfe0] sm:$0xf0] }
 0x286   :  { %v12022_v33 = vld [vmem:[#allocation4 + $0x548] sm:$0xf]  ;;  %v12823_v41 = vor.u32 %v15497_v32, %v12822_v8  ;;  %v13328_v53 = vld [vmem:[#allocation4 + $0xfa0] sm:$0xf0] }
 0x287   :  { %6526 = vmatpush.bf16.msrb.mxu1 %v11735_v27  ;;  %6489 = vmatpush.bf16.msra.mxu2 %v12947_v31  ;;  %v12855_v27 = vor.u32 %v15505_v15, %v12854_v13  ;;  %v3211_v57 = vadd.f32 %v3210_v19, %v3198_v23  ;;  %v12567_v31 = vor.u32 %v15433_v2, %v12566_v29  ;;  %v12534_v42 = vld [vmem:[#allocation4 + $0x948] sm:$0xf]  ;;  %v15612_v4 = vld [vmem:[#allocation4 + $0xf44] sm:$0xf] }
 0x288   :  { %v15425_v46 = vld [vmem:[#allocation4 + $0x964] sm:$0xf0]  ;;  %v15604_v16 = vld [vmem:[#allocation4 + $0xf04] sm:$0xf] }
 0x289   :  { %6514 = vmatpush.bf16.msrb.mxu3 %v11447_v5  ;;  %v15297_v5 = vld [vmem:[#allocation4 + $0x564] sm:$0xf0]  ;;  %v3221_v45 = vmax.f32 %v3211_v57, 0.0  ;;  %v12535_v34 = vor.u32 %v15425_v46, %v12534_v42  ;;  %v13264_v58 = vld [vmem:[#allocation4 + $0xf20] sm:$0xf0] }
 0x28a   :  { %v12023_v36 = vor.u32 %v15297_v5, %v12022_v33  ;;  %v12790_v21 = vld [vmem:[#allocation4 + $0xb48] sm:$0xf]  ;;  %v15596_v32 = vld [vmem:[#allocation4 + $0xec4] sm:$0xf] }
 0x28b   :  { %6527 = vmatpush.bf16.msrb.mxu1 %v11703_v39  ;;  %6490 = vmatpush.bf16.msra.mxu2 %v12915_v56  ;;  %v15628_v39 = vld [vmem:[#allocation4 + $0xfc4] sm:$0xf]  ;;  %v16370_v43 = vpack.c.bf16 %v3221_v45, %v3221_v45  ;;  %v11990_v52 = vld [vmem:[#allocation4 + $0x508] sm:$0xf]  ;;  %v6311_v33 = vpop.f32.mrf.mxu3 }
 0x28c   :  { %v13363_v49 = vor.u32 %v15628_v39, %v13360_v37  ;;  %v15289_v55 = vld [vmem:[#allocation4 + $0x524] sm:$0xf0]  ;;  %v15620_v56 = vld [vmem:[#allocation4 + $0xf84] sm:$0xf] }
 0x28d   :  { %6515 = vmatpush.bf16.msrb.mxu3 %v11415_v28  ;;  %v15489_v28 = vld [vmem:[#allocation4 + $0xb64] sm:$0xf0]  ;;  %6401 = vmatmul.bf16.vlgmr.msra.gmra.mxu0 %v16370_v43  ;;  %v11991_v20 = vor.u32 %v15289_v55, %v11990_v52  ;;  %v13232_v57 = vld [vmem:[#allocation4 + $0xee0] sm:$0xf0] }
 0x28e   :  { %v12791_v3 = vor.u32 %v15489_v28, %v12790_v21  ;;  %v12502_v63 = vld [vmem:[#allocation4 + $0x908] sm:$0xf]  ;;  %6497 = vmatpush.bf16.msra.mxu0 %v13363_v49  ;;  %v13235_v46 = vor.u32 %v15596_v32, %v13232_v57  ;;  %v15588_v21 = vld [vmem:[#allocation4 + $0xe84] sm:$0xf] }
 0x28f   :  { %6528 = vmatpush.bf16.msrb.mxu1 %v11671_v44  ;;  %6491 = vmatpush.bf16.msra.mxu2 %v12883_v7  ;;  %v3212_v44 = vpop.f32.mrf.mxu1  ;;  %v12758_v48 = vld [vmem:[#allocation4 + $0xb08] sm:$0xf]  ;;  %v13296_v7 = vld [vmem:[#allocation4 + $0xf60] sm:$0xf0] }
 0x290   :  { %v15481_v17 = vld [vmem:[#allocation4 + $0xb24] sm:$0xf0]  ;;  %v13299_v15 = vor.u32 %v15612_v4, %v13296_v7  ;;  %v13200_v52 = vld [vmem:[#allocation4 + $0xea0] sm:$0xf0]  ;;  %v15181_v4 = vld [vmem:[#allocation4 + $0x1cc] sm:$0xf] }
 0x291   :  { %6516 = vmatpush.bf16.msrb.mxu3 %v11383_v61  ;;  %v15417_v61 = vld [vmem:[#allocation4 + $0x924] sm:$0xf0]  ;;  %v12759_v9 = vor.u32 %v15481_v17, %v12758_v48  ;;  %v11576_v7 = vld [vmem:[#allocation4 + $0x1e8] sm:$0xf0] }
 0x292   :  { %6492 = vmatmul.bf16.vlgmr.msra.gmra.mxu2 %v16360_v40  ;;  %v11958_v62 = vld [vmem:[#allocation4 + $0x4c8] sm:$0xf]  ;;  %v12503_v25 = vor.u32 %v15417_v61, %v12502_v63 }
 0x293   :  { %6529 = vmatpush.bf16.msrb.mxu1 %v11639_v59  ;;  %6536 = vmatpush.bf16.msrb.mxu2 %v12087_v10  ;;  %v13331_v59 = vor.u32 %v15620_v56, %v13328_v53  ;;  %v15281_v1 = vld [vmem:[#allocation4 + $0x4e4] sm:$0xf0] }
 0x294   :  { %v12470_v54 = vld [vmem:[#allocation4 + $0x8c8] sm:$0xf]  ;;  %v11959_v38 = vor.u32 %v15281_v1, %v11958_v62  ;;  %v15580_v1 = vld [vmem:[#allocation4 + $0xe44] sm:$0xf] }
 0x295   :  { %6517 = vmatpush.bf16.msrb.mxu3 %v11351_v6  ;;  %v15409_v10 = vld [vmem:[#allocation4 + $0x8e4] sm:$0xf0]  ;;  %6498 = vmatpush.bf16.msra.mxu0 %v13331_v59  ;;  %v13203_v59 = vor.u32 %v15588_v21, %v13200_v52 }
 0x296   :  { %v12726_v12 = vld [vmem:[#allocation4 + $0xac8] sm:$0xf]  ;;  %v12471_v18 = vor.u32 %v15409_v10, %v12470_v54  ;;  %v15245_v54 = vld [vmem:[#allocation4 + $0x3cc] sm:$0xf]  ;;  %v6313_v10 = vpop.f32.mrf.mxu3 }
 0x297   :  { %6530 = vmatpush.bf16.msrb.mxu1 %v11607_v22  ;;  %6537 = vmatpush.bf16.msrb.mxu2 %v12055_v30  ;;  %v15473_v13 = vld [vmem:[#allocation4 + $0xae4] sm:$0xf0]  ;;  %v6324_v6 = vpop.f32.mrf.mxu1  ;;  %v13267_v30 = vor.u32 %v15604_v16, %v13264_v58  ;;  %v6337_v17 = vpop.f32.mrf.mxu2  ;;  %v15572_v16 = vld [vmem:[#allocation4 + $0xe04] sm:$0xf] }
 0x298   :  { %6518 = vmatmul.bf16.vlgmr.msrb.gmra.mxu3 %v16311_v47  ;;  %v11926_v60 = vld [vmem:[#allocation4 + $0x488] sm:$0xf]  ;;  %v12727_v22 = vor.u32 %v15473_v13, %v12726_v12  ;;  %v6325_v45 = vadd.f32 %v6324_v6, %v6311_v33  ;;  %v11579_v6 = vor.u32 %v15181_v4, %v11576_v7  ;;  %v11448_v4 = vld [vmem:[#allocation4 + $0xe8] sm:$0xf0] }
 0x299   :  { %6562 = vmatpush.bf16.msra.mxu3 %v12599_v26  ;;  %v15273_v19 = vld [vmem:[#allocation4 + $0x4a4] sm:$0xf0]  ;;  %6499 = vmatpush.bf16.msra.mxu0 %v13299_v15 }
 0x29a   :  { %6531 = vmatmul.bf16.vlgmr.msrb.gmra.mxu1 %v16313_v50  ;;  %v12438_v23 = vld [vmem:[#allocation4 + $0x888] sm:$0xf]  ;;  %v11927_v24 = vor.u32 %v15273_v19, %v11926_v60 }
 0x29b   :  { %6575 = vmatpush.bf16.msra.mxu1 %v12855_v27  ;;  %6538 = vmatpush.bf16.msrb.mxu2 %v12023_v36  ;;  %v15401_v26 = vld [vmem:[#allocation4 + $0x8a4] sm:$0xf0] }
 0x29c   :  { %v12694_v27 = vld [vmem:[#allocation4 + $0xa88] sm:$0xf]  ;;  %v12439_v5 = vor.u32 %v15401_v26, %v12438_v23  ;;  %v13136_v23 = vld [vmem:[#allocation4 + $0xe20] sm:$0xf0]  ;;  %v11544_v26 = vld [vmem:[#allocation4 + $0x1a8] sm:$0xf0] }
 0x29d   :  { %6563 = vmatpush.bf16.msra.mxu3 %v12567_v31  ;;  %v15465_v29 = vld [vmem:[#allocation4 + $0xaa4] sm:$0xf0]  ;;  %v6350_v31 = vpop.f32.mrf.mxu0  ;;  %6500 = vmatpush.bf16.msra.mxu0 %v13267_v30  ;;  %v11800_v30 = vld [vmem:[#allocation4 + $0x3a8] sm:$0xf0] }
 0x29e   :  { %v11894_v2 = vld [vmem:[#allocation4 + $0x448] sm:$0xf]  ;;  %v12695_v39 = vor.u32 %v15465_v29, %v12694_v27  ;;  %6453 = vmatmul.bf16.vlgmr.msrb.gmra.mxu0 %v16322_v14  ;;  %v15237_v29 = vld [vmem:[#allocation4 + $0x38c] sm:$0xf] }
 0x29f   :  { %6576 = vmatpush.bf16.msra.mxu1 %v12823_v41  ;;  %6539 = vmatpush.bf16.msrb.mxu2 %v11991_v20  ;;  %v15265_v8 = vld [vmem:[#allocation4 + $0x464] sm:$0xf0]  ;;  %v6326_v49 = vpop.f32.mrf.mxu1 }
 0x2a0   :  { %v12406_v37 = vld [vmem:[#allocation4 + $0x848] sm:$0xf]  ;;  %v11895_v41 = vor.u32 %v15265_v8, %v11894_v2 }
 0x2a1   :  { %6564 = vmatpush.bf16.msra.mxu3 %v12535_v34  ;;  %v15393_v42 = vld [vmem:[#allocation4 + $0x864] sm:$0xf0]  ;;  %6501 = vmatpush.bf16.msra.mxu0 %v13235_v46 }
 0x2a2   :  { %v12662_v35 = vld [vmem:[#allocation4 + $0xa48] sm:$0xf]  ;;  %v12407_v53 = vor.u32 %v15393_v42, %v12406_v37  ;;  %v11803_v37 = vor.u32 %v15237_v29, %v11800_v30 }
 0x2a3   :  { %6577 = vmatpush.bf16.msra.mxu1 %v12791_v3  ;;  %6540 = vmatpush.bf16.msrb.mxu2 %v11959_v38  ;;  %v15457_v36 = vld [vmem:[#allocation4 + $0xa64] sm:$0xf0]  ;;  %v11832_v38 = vld [vmem:[#allocation4 + $0x3e8] sm:$0xf0] }
 0x2a4   :  { %v11862_v28 = vld [vmem:[#allocation4 + $0x408] sm:$0xf]  ;;  %v12663_v34 = vor.u32 %v15457_v36, %v12662_v35  ;;  %v15229_v35 = vld [vmem:[#allocation4 + $0x34c] sm:$0xf] }
 0x2a5   :  { %6565 = vmatpush.bf16.msra.mxu3 %v12503_v25  ;;  %v15257_v44 = vld [vmem:[#allocation4 + $0x424] sm:$0xf0]  ;;  %v6338_v25 = vadd.f32 %v6337_v17, %v6325_v45  ;;  %v6352_v60 = vpop.f32.mrf.mxu0  ;;  %6502 = vmatpush.bf16.msra.mxu0 %v13203_v59  ;;  %v15165_v45 = vld [vmem:[#allocation4 + $0x14c] sm:$0xf] }
 0x2a6   :  { %v13110_v55 = vld [vmem:[#allocation4 + $0xdc8] sm:$0xf]  ;;  %v11863_v63 = vor.u32 %v15257_v44, %v11862_v28  ;;  %v11768_v36 = vld [vmem:[#allocation4 + $0x368] sm:$0xf0] }
 0x2a7   :  { %6578 = vmatpush.bf16.msra.mxu1 %v12759_v9  ;;  %6541 = vmatpush.bf16.msrb.mxu2 %v11927_v24  ;;  %v15569_v56 = vld [vmem:[#allocation4 + $0xde4] sm:$0xf0]  ;;  %v13168_v9 = vld [vmem:[#allocation4 + $0xe60] sm:$0xf0]  ;;  %v16375_v58 = vadd.f32 %v6350_v31, %v6338_v25  ;;  %v15173_v24 = vld [vmem:[#allocation4 + $0x18c] sm:$0xf]  ;;  %v11771_v52 = vor.u32 %v15229_v35, %v11768_v36 }
 0x2a8   :  { %v12374_v3 = vld [vmem:[#allocation4 + $0x808] sm:$0xf]  ;;  %v13111_v62 = vor.u32 %v15569_v56, %v13110_v55  ;;  %v11547_v33 = vor.u32 %v15173_v24, %v11544_v26  ;;  %v11512_v31 = vld [vmem:[#allocation4 + $0x168] sm:$0xf0] }
 0x2a9   :  { %6566 = vmatpush.bf16.msra.mxu3 %v12471_v18  ;;  %v15385_v20 = vld [vmem:[#allocation4 + $0x824] sm:$0xf0]  ;;  %v13171_v18 = vor.u32 %v15580_v1, %v13168_v9  ;;  %v11515_v49 = vor.u32 %v15165_v45, %v11512_v31  ;;  %v15157_v55 = vld [vmem:[#allocation4 + $0x10c] sm:$0xf] }
 0x2aa   :  { %v12630_v61 = vld [vmem:[#allocation4 + $0xa08] sm:$0xf]  ;;  %v12375_v12 = vor.u32 %v15385_v20, %v12374_v3  ;;  %v11480_v56 = vld [vmem:[#allocation4 + $0x128] sm:$0xf0] }
 0x2ab   :  { %6579 = vmatpush.bf16.msra.mxu1 %v12727_v22  ;;  %6542 = vmatpush.bf16.msrb.mxu2 %v11895_v41  ;;  %v15449_v48 = vld [vmem:[#allocation4 + $0xa24] sm:$0xf0]  ;;  %v11835_v22 = vor.u32 %v15245_v54, %v11832_v38  ;;  %v15221_v3 = vld [vmem:[#allocation4 + $0x30c] sm:$0xf]  ;;  %v11483_v59 = vor.u32 %v15157_v55, %v11480_v56 }
 0x2ac   :  { %v13078_v13 = vld [vmem:[#allocation4 + $0xd88] sm:$0xf]  ;;  %v12631_v19 = vor.u32 %v15449_v48, %v12630_v61  ;;  %6503 = vmatpush.bf16.msra.mxu0 %v13171_v18  ;;  %v15149_v1 = vld [vmem:[#allocation4 + $0xcc] sm:$0xf] }
 0x2ad   :  { %6567 = vmatpush.bf16.msra.mxu3 %v12439_v5  ;;  %v15561_v15 = vld [vmem:[#allocation4 + $0xda4] sm:$0xf0]  ;;  %v6339_v5 = vpop.f32.mrf.mxu2  ;;  %v15213_v9 = vld [vmem:[#allocation4 + $0x2cc] sm:$0xf] }
 0x2ae   :  { %v13079_v27 = vor.u32 %v15561_v15, %v13078_v13  ;;  %v12342_v2 = vld [vmem:[#allocation4 + $0x7c8] sm:$0xf]  ;;  %v11704_v54 = vld [vmem:[#allocation4 + $0x2e8] sm:$0xf0]  ;;  %v11451_v15 = vor.u32 %v15149_v1, %v11448_v4 }
 0x2af   :  { %6580 = vmatpush.bf16.msra.mxu1 %v12695_v39  ;;  %6543 = vmatpush.bf16.msrb.mxu2 %v11863_v63  ;;  %v15377_v8 = vld [vmem:[#allocation4 + $0x7e4] sm:$0xf0]  ;;  %v13139_v39 = vor.u32 %v15572_v16, %v13136_v23  ;;  %v11736_v63 = vld [vmem:[#allocation4 + $0x328] sm:$0xf0]  ;;  %v11707_v60 = vor.u32 %v15213_v9, %v11704_v54 }
 0x2b0   :  { %v13046_v32 = vld [vmem:[#allocation4 + $0xd48] sm:$0xf]  ;;  %v12343_v41 = vor.u32 %v15377_v8, %v12342_v2  ;;  %v11672_v23 = vld [vmem:[#allocation4 + $0x2a8] sm:$0xf0] }
 0x2b1   :  { %6568 = vmatpush.bf16.msra.mxu3 %v12407_v53  ;;  %v15553_v57 = vld [vmem:[#allocation4 + $0xd64] sm:$0xf0]  ;;  %6504 = vmatpush.bf16.msra.mxu0 %v13139_v39  ;;  %v11384_v5 = vld [vmem:[#allocation4 + $0x68] sm:$0xf0] }
 0x2b2   :  { %6544 = vmatmul.bf16.vlgmr.msrb.gmra.mxu2 %v16320_v11  ;;  %v13047_v42 = vor.u32 %v15553_v57, %v13046_v32  ;;  %v12310_v46 = vld [vmem:[#allocation4 + $0x788] sm:$0xf]  ;;  %v15197_v45 = vld [vmem:[#allocation4 + $0x24c] sm:$0xf] }
 0x2b3   :  { %6581 = vmatpush.bf16.msra.mxu1 %v12663_v34  ;;  %6588 = vmatpush.bf16.msra.mxu2 %v13111_v62  ;;  %v15369_v21 = vld [vmem:[#allocation4 + $0x7a4] sm:$0xf0]  ;;  %v11739_v62 = vor.u32 %v15221_v3, %v11736_v63  ;;  %v11640_v31 = vld [vmem:[#allocation4 + $0x268] sm:$0xf0] }
 0x2b4   :  { %v13014_v28 = vld [vmem:[#allocation4 + $0xd08] sm:$0xf]  ;;  %v12311_v53 = vor.u32 %v15369_v21, %v12310_v46  ;;  %6505 = vmatmul.bf16.vlgmr.msra.gmra.mxu0 %v16370_v43  ;;  %v15189_v55 = vld [vmem:[#allocation4 + $0x20c] sm:$0xf] }
 0x2b5   :  { %6569 = vmatpush.bf16.msra.mxu3 %v12375_v12  ;;  %v15545_v44 = vld [vmem:[#allocation4 + $0xd24] sm:$0xf0]  ;;  %6549 = vmatpush.bf16.msrb.mxu0 %v12343_v41  ;;  %v12856_v4 = vld [vmem:[#allocation4 + $0xbe8] sm:$0xf0] }
 0x2b6   :  { %v13015_v34 = vor.u32 %v15545_v44, %v13014_v28  ;;  %v12278_v20 = vld [vmem:[#allocation4 + $0x748] sm:$0xf]  ;;  %v15309_v28 = vld [vmem:[#allocation4 + $0x5cc] sm:$0xf] }
 0x2b7   :  { %6582 = vmatpush.bf16.msra.mxu1 %v12631_v19  ;;  %6589 = vmatpush.bf16.msra.mxu2 %v13079_v27  ;;  %v15361_v61 = vld [vmem:[#allocation4 + $0x764] sm:$0xf0]  ;;  %v15141_v19 = vld [vmem:[#allocation4 + $0x8c] sm:$0xf]  ;;  %v6376_v2 = vpop.f32.mrf.mxu1 }
 0x2b8   :  { %6570 = vmatmul.bf16.vlgmr.msra.gmra.mxu3 %v16333_v0  ;;  %v12982_v48 = vld [vmem:[#allocation4 + $0xcc8] sm:$0xf]  ;;  %v12279_v7 = vor.u32 %v15361_v61, %v12278_v20  ;;  %v12088_v44 = vld [vmem:[#allocation4 + $0x5e8] sm:$0xf0] }
 0x2b9   :  { %6614 = vmatpush.bf16.msrb.mxu3 %v11579_v6  ;;  %v15537_v17 = vld [vmem:[#allocation4 + $0xce4] sm:$0xf0]  ;;  %6550 = vmatpush.bf16.msrb.mxu0 %v12311_v53  ;;  %v11416_v6 = vld [vmem:[#allocation4 + $0xa8] sm:$0xf0]  ;;  %v12091_v20 = vor.u32 %v15309_v28, %v12088_v44 }
 0x2ba   :  { %6583 = vmatmul.bf16.vlgmr.msra.gmra.mxu1 %v16336_v51  ;;  %v12983_v25 = vor.u32 %v15537_v17, %v12982_v48  ;;  %v12246_v38 = vld [vmem:[#allocation4 + $0x708] sm:$0xf]  ;;  %v11419_v8 = vor.u32 %v15141_v19, %v11416_v6  ;;  %v15437_v61 = vld [vmem:[#allocation4 + $0x9cc] sm:$0xf] }
 0x2bb   :  { %6627 = vmatpush.bf16.msrb.mxu1 %v11835_v22  ;;  %6590 = vmatpush.bf16.msra.mxu2 %v13047_v42  ;;  %v15353_v10 = vld [vmem:[#allocation4 + $0x724] sm:$0xf0]  ;;  %v15205_v22 = vld [vmem:[#allocation4 + $0x28c] sm:$0xf]  ;;  %v6363_v30 = vpop.f32.mrf.mxu3 }
 0x2bc   :  { %v12950_v12 = vld [vmem:[#allocation4 + $0xc88] sm:$0xf]  ;;  %v12247_v16 = vor.u32 %v15353_v10, %v12246_v38  ;;  %v6364_v32 = vadd.f32 %v6363_v30, %v16375_v58  ;;  %v11675_v57 = vor.u32 %v15205_v22, %v11672_v23  ;;  %v11643_v58 = vor.u32 %v15197_v45, %v11640_v31  ;;  %v12600_v48 = vld [vmem:[#allocation4 + $0x9e8] sm:$0xf0] }
 0x2bd   :  { %6615 = vmatpush.bf16.msrb.mxu3 %v11547_v33  ;;  %v15529_v13 = vld [vmem:[#allocation4 + $0xca4] sm:$0xf0]  ;;  %6551 = vmatpush.bf16.msrb.mxu0 %v12279_v7  ;;  %v15133_v33 = vld [vmem:[#allocation4 + $0x4c] sm:$0xf]  ;;  %v12603_v38 = vor.u32 %v15437_v61, %v12600_v48 }
 0x2be   :  { %v12951_v18 = vor.u32 %v15529_v13, %v12950_v12  ;;  %v12214_v24 = vld [vmem:[#allocation4 + $0x6c8] sm:$0xf]  ;;  %v16382_v42 = vadd.f32 %v6376_v2, %v6364_v32  ;;  %v11387_v21 = vor.u32 %v15133_v33, %v11384_v5  ;;  %v15501_v17 = vld [vmem:[#allocation4 + $0xbcc] sm:$0xf] }
 0x2bf   :  { %6628 = vmatpush.bf16.msrb.mxu1 %v11803_v37  ;;  %6591 = vmatpush.bf16.msra.mxu2 %v13015_v34  ;;  %v15345_v26 = vld [vmem:[#allocation4 + $0x6e4] sm:$0xf0]  ;;  %v11608_v34 = vld [vmem:[#allocation4 + $0x228] sm:$0xf0]  ;;  %v12859_v13 = vor.u32 %v15501_v17, %v12856_v4 }
 0x2c0   :  { %v12918_v27 = vld [vmem:[#allocation4 + $0xc48] sm:$0xf]  ;;  %v12215_v39 = vor.u32 %v15345_v26, %v12214_v24  ;;  %v15301_v7 = vld [vmem:[#allocation4 + $0x58c] sm:$0xf]  ;;  %v11611_v9 = vor.u32 %v15189_v55, %v11608_v34 }
 0x2c1   :  { %6616 = vmatpush.bf16.msrb.mxu3 %v11515_v49  ;;  %v15521_v29 = vld [vmem:[#allocation4 + $0xc64] sm:$0xf0]  ;;  %6552 = vmatpush.bf16.msrb.mxu0 %v12247_v16  ;;  %v15125_v49 = vld [vmem:[#allocation4 + $0xc] sm:$0xf] }
 0x2c2   :  { %v12919_v37 = vor.u32 %v15521_v29, %v12918_v27  ;;  %v12182_v41 = vld [vmem:[#allocation4 + $0x688] sm:$0xf]  ;;  %v12568_v19 = vld [vmem:[#allocation4 + $0x9a8] sm:$0xf0] }
 0x2c3   :  { %6629 = vmatpush.bf16.msrb.mxu1 %v11771_v52  ;;  %6592 = vmatpush.bf16.msra.mxu2 %v12983_v25  ;;  %v15337_v35 = vld [vmem:[#allocation4 + $0x6a4] sm:$0xf0]  ;;  %v11352_v52 = vld [vmem:[#allocation4 + $0x28] sm:$0xf0] }
 0x2c4   :  { %v12886_v36 = vld [vmem:[#allocation4 + $0xc08] sm:$0xf]  ;;  %v12183_v56 = vor.u32 %v15337_v35, %v12182_v41  ;;  %v11355_v1 = vor.u32 %v15125_v49, %v11352_v52  ;;  %v12056_v25 = vld [vmem:[#allocation4 + $0x5a8] sm:$0xf0] }
 0x2c5   :  { %6617 = vmatpush.bf16.msrb.mxu3 %v11483_v59  ;;  %v15513_v46 = vld [vmem:[#allocation4 + $0xc24] sm:$0xf0]  ;;  %6553 = vmatpush.bf16.msrb.mxu0 %v12215_v39  ;;  %v6365_v59 = vpop.f32.mrf.mxu3  ;;  %v15493_v6 = vld [vmem:[#allocation4 + $0xb8c] sm:$0xf] }
 0x2c6   :  { %v12887_v53 = vor.u32 %v15513_v46, %v12886_v36  ;;  %v12150_v3 = vld [vmem:[#allocation4 + $0x648] sm:$0xf]  ;;  %v12824_v16 = vld [vmem:[#allocation4 + $0xba8] sm:$0xf0] }
 0x2c7   :  { %6630 = vmatpush.bf16.msrb.mxu1 %v11739_v62  ;;  %6593 = vmatpush.bf16.msra.mxu2 %v12951_v18  ;;  %v15329_v63 = vld [vmem:[#allocation4 + $0x664] sm:$0xf0]  ;;  %v6378_v62 = vpop.f32.mrf.mxu1  ;;  %v15293_v23 = vld [vmem:[#allocation4 + $0x54c] sm:$0xf]  ;;  %v12827_v29 = vor.u32 %v15493_v6, %v12824_v16 }
 0x2c8   :  { %v12151_v54 = vor.u32 %v15329_v63, %v12150_v3  ;;  %v12118_v10 = vld [vmem:[#allocation4 + $0x608] sm:$0xf]  ;;  %v12024_v24 = vld [vmem:[#allocation4 + $0x568] sm:$0xf0] }
 0x2c9   :  { %6618 = vmatpush.bf16.msrb.mxu3 %v11451_v15  ;;  %6554 = vmatpush.bf16.msrb.mxu0 %v12183_v56  ;;  %v15321_v12 = vld [vmem:[#allocation4 + $0x624] sm:$0xf0]  ;;  %v12059_v15 = vor.u32 %v15301_v7, %v12056_v25  ;;  %v15421_v2 = vld [vmem:[#allocation4 + $0x94c] sm:$0xf] }
 0x2ca   :  { %v13366_v18 = vld [vmem:[#allocation4 + $0xfc8] sm:$0xf]  ;;  %v12119_v26 = vor.u32 %v15321_v12, %v12118_v10  ;;  %v15485_v32 = vld [vmem:[#allocation4 + $0xb4c] sm:$0xf] }
 0x2cb   :  { %6631 = vmatpush.bf16.msrb.mxu1 %v11707_v60  ;;  %6594 = vmatpush.bf16.msra.mxu2 %v12919_v37  ;;  %v15429_v60 = vld [vmem:[#allocation4 + $0x98c] sm:$0xf]  ;;  %v15633_v22 = vld [vmem:[#allocation4 + $0xfe4] sm:$0xf0] }
 0x2cc   :  { %v12571_v27 = vor.u32 %v15429_v60, %v12568_v19  ;;  %v13367_v30 = vor.u32 %v15633_v22, %v13366_v18  ;;  %v12792_v33 = vld [vmem:[#allocation4 + $0xb68] sm:$0xf0]  ;;  %v13334_v5 = vld [vmem:[#allocation4 + $0xf88] sm:$0xf] }
 0x2cd   :  { %6619 = vmatpush.bf16.msrb.mxu3 %v11419_v8  ;;  %6555 = vmatpush.bf16.msrb.mxu0 %v12151_v54  ;;  %v12536_v8 = vld [vmem:[#allocation4 + $0x968] sm:$0xf0]  ;;  %v15625_v39 = vld [vmem:[#allocation4 + $0xfa4] sm:$0xf0]  ;;  %v12795_v41 = vor.u32 %v15485_v32, %v12792_v33 }
 0x2ce   :  { %v15285_v37 = vld [vmem:[#allocation4 + $0x50c] sm:$0xf]  ;;  %v12539_v31 = vor.u32 %v15421_v2, %v12536_v8  ;;  %v13335_v35 = vor.u32 %v15625_v39, %v13334_v5  ;;  %v15617_v49 = vld [vmem:[#allocation4 + $0xf64] sm:$0xf0] }
 0x2cf   :  { %6632 = vmatpush.bf16.msrb.mxu1 %v11675_v57  ;;  %6595 = vmatpush.bf16.msra.mxu2 %v12887_v53  ;;  %v12027_v57 = vor.u32 %v15293_v23, %v12024_v24  ;;  %v11992_v45 = vld [vmem:[#allocation4 + $0x528] sm:$0xf0]  ;;  %v13270_v59 = vld [vmem:[#allocation4 + $0xf08] sm:$0xf] }
 0x2d0   :  { %v15413_v36 = vld [vmem:[#allocation4 + $0x90c] sm:$0xf]  ;;  %v11995_v28 = vor.u32 %v15285_v37, %v11992_v45  ;;  %v15609_v62 = vld [vmem:[#allocation4 + $0xf24] sm:$0xf0] }
 0x2d1   :  { %6620 = vmatpush.bf16.msrb.mxu3 %v11387_v21  ;;  %6556 = vmatpush.bf16.msrb.mxu0 %v12119_v26  ;;  %v12504_v46 = vld [vmem:[#allocation4 + $0x928] sm:$0xf0]  ;;  %v15601_v60 = vld [vmem:[#allocation4 + $0xee4] sm:$0xf0] }
 0x2d2   :  { %6596 = vmatmul.bf16.vlgmr.msra.gmra.mxu2 %v16360_v40  ;;  %v15477_v21 = vld [vmem:[#allocation4 + $0xb0c] sm:$0xf]  ;;  %v12507_v56 = vor.u32 %v15413_v36, %v12504_v46  ;;  %v13206_v32 = vld [vmem:[#allocation4 + $0xe88] sm:$0xf] }
 0x2d3   :  { %6633 = vmatpush.bf16.msrb.mxu1 %v11643_v58  ;;  %6640 = vmatpush.bf16.msrb.mxu2 %v12091_v20  ;;  %v12760_v44 = vld [vmem:[#allocation4 + $0xb28] sm:$0xf0]  ;;  %v13302_v58 = vld [vmem:[#allocation4 + $0xf48] sm:$0xf] }
 0x2d4   :  { %6557 = vmatmul.bf16.vlgmr.msrb.gmra.mxu0 %v16322_v14  ;;  %v15277_v52 = vld [vmem:[#allocation4 + $0x4cc] sm:$0xf]  ;;  %v12763_v53 = vor.u32 %v15477_v21, %v12760_v44  ;;  %v13303_v34 = vor.u32 %v15617_v49, %v13302_v58  ;;  %v13174_v44 = vld [vmem:[#allocation4 + $0xe48] sm:$0xf] }
 0x2d5   :  { %6621 = vmatpush.bf16.msrb.mxu3 %v11355_v1  ;;  %6601 = vmatpush.bf16.msra.mxu0 %v13367_v30  ;;  %v11960_v55 = vld [vmem:[#allocation4 + $0x4e8] sm:$0xf0]  ;;  %v15585_v58 = vld [vmem:[#allocation4 + $0xe64] sm:$0xf0] }
 0x2d6   :  { %v15405_v3 = vld [vmem:[#allocation4 + $0x8cc] sm:$0xf]  ;;  %v11963_v48 = vor.u32 %v15277_v52, %v11960_v55  ;;  %v11582_v55 = vld [vmem:[#allocation4 + $0x1d0] sm:$0xf] }
 0x2d7   :  { %6634 = vmatpush.bf16.msrb.mxu1 %v11611_v9  ;;  %6641 = vmatpush.bf16.msrb.mxu2 %v12059_v15  ;;  %v12472_v63 = vld [vmem:[#allocation4 + $0x8e8] sm:$0xf0]  ;;  %v6428_v61 = vpop.f32.mrf.mxu1  ;;  %v13271_v9 = vor.u32 %v15609_v62, %v13270_v59  ;;  %v13238_v15 = vld [vmem:[#allocation4 + $0xec8] sm:$0xf] }
 0x2d8   :  { %6622 = vmatmul.bf16.vlgmr.msrb.gmra.mxu3 %v16311_v47  ;;  %v15469_v20 = vld [vmem:[#allocation4 + $0xacc] sm:$0xf]  ;;  %v12475_v7 = vor.u32 %v15405_v3, %v12472_v63  ;;  %v13239_v24 = vor.u32 %v15601_v60, %v13238_v15  ;;  %v15250_v3 = vld [vmem:[#allocation4 + $0x3ec] sm:$0xf0]  ;;  %v13142_v59 = vld [vmem:[#allocation4 + $0xe08] sm:$0xf] }
 0x2d9   :  { %6666 = vmatpush.bf16.msra.mxu3 %v12603_v38  ;;  %6602 = vmatpush.bf16.msra.mxu0 %v13335_v35  ;;  %v12728_v17 = vld [vmem:[#allocation4 + $0xae8] sm:$0xf0]  ;;  %v15577_v62 = vld [vmem:[#allocation4 + $0xe24] sm:$0xf0] }
 0x2da   :  { %6635 = vmatmul.bf16.vlgmr.msrb.gmra.mxu1 %v16313_v50  ;;  %v15269_v1 = vld [vmem:[#allocation4 + $0x48c] sm:$0xf]  ;;  %v12731_v25 = vor.u32 %v15469_v20, %v12728_v17  ;;  %v13143_v15 = vor.u32 %v15577_v62, %v13142_v59  ;;  %v11422_v62 = vld [vmem:[#allocation4 + $0x90] sm:$0xf] }
 0x2db   :  { %6679 = vmatpush.bf16.msra.mxu1 %v12859_v13  ;;  %6642 = vmatpush.bf16.msrb.mxu2 %v12027_v57  ;;  %v11928_v4 = vld [vmem:[#allocation4 + $0x4a8] sm:$0xf0]  ;;  %v6415_v19 = vpop.f32.mrf.mxu3  ;;  %v15593_v57 = vld [vmem:[#allocation4 + $0xea4] sm:$0xf0] }
 0x2dc   :  { %v15397_v54 = vld [vmem:[#allocation4 + $0x88c] sm:$0xf]  ;;  %v11931_v12 = vor.u32 %v15269_v1, %v11928_v4  ;;  %v16388_v18 = vadd.f32 %v6428_v61, %v6415_v19 }
 0x2dd   :  { %6667 = vmatpush.bf16.msra.mxu3 %v12571_v27  ;;  %6603 = vmatpush.bf16.msra.mxu0 %v13303_v34  ;;  %v12440_v38 = vld [vmem:[#allocation4 + $0x8a8] sm:$0xf0] }
 0x2de   :  { %v15461_v10 = vld [vmem:[#allocation4 + $0xa8c] sm:$0xf]  ;;  %v12443_v22 = vor.u32 %v15397_v54, %v12440_v38  ;;  %v15242_v54 = vld [vmem:[#allocation4 + $0x3ac] sm:$0xf0] }
 0x2df   :  { %6680 = vmatpush.bf16.msra.mxu1 %v12827_v29  ;;  %6643 = vmatpush.bf16.msrb.mxu2 %v11995_v28  ;;  %v12696_v13 = vld [vmem:[#allocation4 + $0xaa8] sm:$0xf0]  ;;  %v6430_v30 = vpop.f32.mrf.mxu1 }
 0x2e0   :  { %v15261_v6 = vld [vmem:[#allocation4 + $0x44c] sm:$0xf]  ;;  %v12699_v23 = vor.u32 %v15461_v10, %v12696_v13 }
 0x2e1   :  { %6668 = vmatpush.bf16.msra.mxu3 %v12539_v31  ;;  %v11896_v16 = vld [vmem:[#allocation4 + $0x468] sm:$0xf0]  ;;  %6604 = vmatpush.bf16.msra.mxu0 %v13271_v9  ;;  %v11806_v9 = vld [vmem:[#allocation4 + $0x390] sm:$0xf] }
 0x2e2   :  { %v15389_v26 = vld [vmem:[#allocation4 + $0x84c] sm:$0xf]  ;;  %v11899_v2 = vor.u32 %v15261_v6, %v11896_v16  ;;  %v11807_v19 = vor.u32 %v15242_v54, %v11806_v9  ;;  %v11518_v16 = vld [vmem:[#allocation4 + $0x150] sm:$0xf] }
 0x2e3   :  { %6681 = vmatpush.bf16.msra.mxu1 %v12795_v41  ;;  %6644 = vmatpush.bf16.msrb.mxu2 %v11963_v48  ;;  %v12408_v27 = vld [vmem:[#allocation4 + $0x868] sm:$0xf0]  ;;  %v13207_v41 = vor.u32 %v15593_v57, %v13206_v32  ;;  %v6417_v49 = vpop.f32.mrf.mxu3  ;;  %v13175_v48 = vor.u32 %v15585_v58, %v13174_v44 }
 0x2e4   :  { %v15453_v29 = vld [vmem:[#allocation4 + $0xa4c] sm:$0xf]  ;;  %v12411_v39 = vor.u32 %v15389_v26, %v12408_v27  ;;  %v15234_v26 = vld [vmem:[#allocation4 + $0x36c] sm:$0xf0] }
 0x2e5   :  { %6669 = vmatpush.bf16.msra.mxu3 %v12507_v56  ;;  %v12664_v8 = vld [vmem:[#allocation4 + $0xa68] sm:$0xf0]  ;;  %6605 = vmatpush.bf16.msra.mxu0 %v13239_v24  ;;  %v15186_v56 = vld [vmem:[#allocation4 + $0x1ec] sm:$0xf0] }
 0x2e6   :  { %v15253_v33 = vld [vmem:[#allocation4 + $0x40c] sm:$0xf]  ;;  %v12667_v31 = vor.u32 %v15453_v29, %v12664_v8  ;;  %v11583_v17 = vor.u32 %v15186_v56, %v11582_v55  ;;  %v11454_v49 = vld [vmem:[#allocation4 + $0xd0] sm:$0xf] }
 0x2e7   :  { %6682 = vmatpush.bf16.msra.mxu1 %v12763_v53  ;;  %6645 = vmatpush.bf16.msrb.mxu2 %v11931_v12  ;;  %v11864_v5 = vld [vmem:[#allocation4 + $0x428] sm:$0xf0]  ;;  %v11838_v53 = vld [vmem:[#allocation4 + $0x3d0] sm:$0xf] }
 0x2e8   :  { %v15565_v37 = vld [vmem:[#allocation4 + $0xdcc] sm:$0xf]  ;;  %v11867_v21 = vor.u32 %v15253_v33, %v11864_v5  ;;  %v11839_v1 = vor.u32 %v15250_v3, %v11838_v53  ;;  %v11486_v33 = vld [vmem:[#allocation4 + $0x110] sm:$0xf] }
 0x2e9   :  { %6670 = vmatpush.bf16.msra.mxu3 %v12475_v7  ;;  %v13112_v45 = vld [vmem:[#allocation4 + $0xde8] sm:$0xf0]  ;;  %6606 = vmatpush.bf16.msra.mxu0 %v13207_v41  ;;  %v11550_v7 = vld [vmem:[#allocation4 + $0x190] sm:$0xf] }
 0x2ea   :  { %v15381_v35 = vld [vmem:[#allocation4 + $0x80c] sm:$0xf]  ;;  %v13115_v52 = vor.u32 %v15565_v37, %v13112_v45  ;;  %v15162_v5 = vld [vmem:[#allocation4 + $0x12c] sm:$0xf0] }
 0x2eb   :  { %6683 = vmatpush.bf16.msra.mxu1 %v12731_v25  ;;  %v12376_v36 = vld [vmem:[#allocation4 + $0x828] sm:$0xf0]  ;;  %6646 = vmatpush.bf16.msrb.mxu2 %v11899_v2  ;;  %v15178_v25 = vld [vmem:[#allocation4 + $0x1ac] sm:$0xf0] }
 0x2ec   :  { %v15445_v46 = vld [vmem:[#allocation4 + $0xa0c] sm:$0xf]  ;;  %v12379_v34 = vor.u32 %v15381_v35, %v12376_v36  ;;  %v11551_v60 = vor.u32 %v15178_v25, %v11550_v7  ;;  %v15226_v45 = vld [vmem:[#allocation4 + $0x32c] sm:$0xf0] }
 0x2ed   :  { %6671 = vmatpush.bf16.msra.mxu3 %v12443_v22  ;;  %v12632_v28 = vld [vmem:[#allocation4 + $0xa28] sm:$0xf0]  ;;  %6607 = vmatpush.bf16.msra.mxu0 %v13175_v48  ;;  %v15170_v22 = vld [vmem:[#allocation4 + $0x16c] sm:$0xf0] }
 0x2ee   :  { %v15557_v63 = vld [vmem:[#allocation4 + $0xd8c] sm:$0xf]  ;;  %v12635_v61 = vor.u32 %v15445_v46, %v12632_v28  ;;  %v11519_v8 = vor.u32 %v15170_v22, %v11518_v16  ;;  %v11487_v46 = vor.u32 %v15162_v5, %v11486_v33  ;;  %v6389_v28 = vpop.f32.mrf.mxu2  ;;  %v11710_v55 = vld [vmem:[#allocation4 + $0x2d0] sm:$0xf] }
 0x2ef   :  { %6684 = vmatpush.bf16.msra.mxu1 %v12699_v23  ;;  %v13080_v20 = vld [vmem:[#allocation4 + $0xda8] sm:$0xf0]  ;;  %6647 = vmatpush.bf16.msrb.mxu2 %v11867_v21  ;;  %v11774_v23 = vld [vmem:[#allocation4 + $0x350] sm:$0xf]  ;;  %v16397_v56 = vadd.f32 %v6389_v28, %v16382_v42 }
 0x2f0   :  { %v13083_v4 = vor.u32 %v15557_v63, %v13080_v20  ;;  %v15373_v38 = vld [vmem:[#allocation4 + $0x7cc] sm:$0xf]  ;;  %v11775_v32 = vor.u32 %v15234_v26, %v11774_v23  ;;  %v15210_v25 = vld [vmem:[#allocation4 + $0x2ac] sm:$0xf0] }
 0x2f1   :  { %6672 = vmatpush.bf16.msra.mxu3 %v12411_v39  ;;  %v12344_v10 = vld [vmem:[#allocation4 + $0x7e8] sm:$0xf0]  ;;  %6608 = vmatpush.bf16.msra.mxu0 %v13143_v15  ;;  %v11742_v39 = vld [vmem:[#allocation4 + $0x310] sm:$0xf] }
 0x2f2   :  { %6648 = vmatmul.bf16.vlgmr.msrb.gmra.mxu2 %v16320_v11  ;;  %v15549_v12 = vld [vmem:[#allocation4 + $0xd4c] sm:$0xf]  ;;  %v12347_v6 = vor.u32 %v15373_v38, %v12344_v10  ;;  %v11743_v44 = vor.u32 %v15226_v45, %v11742_v39  ;;  %v15138_v16 = vld [vmem:[#allocation4 + $0x6c] sm:$0xf0] }
 0x2f3   :  { %6685 = vmatpush.bf16.msra.mxu1 %v12667_v31  ;;  %6692 = vmatpush.bf16.msra.mxu2 %v13115_v52  ;;  %v13048_v13 = vld [vmem:[#allocation4 + $0xd68] sm:$0xf0]  ;;  %v15154_v52 = vld [vmem:[#allocation4 + $0xec] sm:$0xf0] }
 0x2f4   :  { %v13051_v24 = vor.u32 %v15549_v12, %v13048_v13  ;;  %v15365_v27 = vld [vmem:[#allocation4 + $0x78c] sm:$0xf]  ;;  %6609 = vmatmul.bf16.vlgmr.msra.gmra.mxu0 %v16370_v43  ;;  %v11455_v48 = vor.u32 %v15154_v52, %v11454_v49  ;;  %v11646_v22 = vld [vmem:[#allocation4 + $0x250] sm:$0xf] }
 0x2f5   :  { %6673 = vmatpush.bf16.msra.mxu3 %v12379_v34  ;;  %v12312_v29 = vld [vmem:[#allocation4 + $0x7a8] sm:$0xf0]  ;;  %6653 = vmatpush.bf16.msrb.mxu0 %v12347_v6  ;;  %v15218_v34 = vld [vmem:[#allocation4 + $0x2ec] sm:$0xf0] }
 0x2f6   :  { %v15541_v30 = vld [vmem:[#allocation4 + $0xd0c] sm:$0xf]  ;;  %v12315_v57 = vor.u32 %v15365_v27, %v12312_v29  ;;  %v6391_v15 = vpop.f32.mrf.mxu2  ;;  %v11390_v6 = vld [vmem:[#allocation4 + $0x50] sm:$0xf] }
 0x2f7   :  { %6686 = vmatpush.bf16.msra.mxu1 %v12635_v61  ;;  %6693 = vmatpush.bf16.msra.mxu2 %v13083_v4  ;;  %v13016_v2 = vld [vmem:[#allocation4 + $0xd28] sm:$0xf0]  ;;  %v16394_v21 = vpop.f32.mrf.mxu1  ;;  %v11678_v4 = vld [vmem:[#allocation4 + $0x290] sm:$0xf] }
 0x2f8   :  { %6674 = vmatmul.bf16.vlgmr.msra.gmra.mxu3 %v16333_v0  ;;  %v13019_v37 = vor.u32 %v15541_v30, %v13016_v2  ;;  %v15357_v31 = vld [vmem:[#allocation4 + $0x74c] sm:$0xf]  ;;  %v11391_v2 = vor.u32 %v15138_v16, %v11390_v6  ;;  %v11358_v5 = vld [vmem:[#allocation4 + $0x10] sm:$0xf] }
 0x2f9   :  { %6718 = vmatpush.bf16.msrb.mxu3 %v11583_v17  ;;  %v12280_v41 = vld [vmem:[#allocation4 + $0x768] sm:$0xf0]  ;;  %6654 = vmatpush.bf16.msrb.mxu0 %v12315_v57  ;;  %v11711_v17 = vor.u32 %v15218_v34, %v11710_v55  ;;  %v15130_v39 = vld [vmem:[#allocation4 + $0x2c] sm:$0xf0] }
 0x2fa   :  { %6687 = vmatmul.bf16.vlgmr.msra.gmra.mxu1 %v16336_v51  ;;  %v15533_v35 = vld [vmem:[#allocation4 + $0xccc] sm:$0xf]  ;;  %v12283_v58 = vor.u32 %v15357_v31, %v12280_v41  ;;  %v15194_v41 = vld [vmem:[#allocation4 + $0x22c] sm:$0xf0]  ;;  %v11359_v49 = vor.u32 %v15130_v39, %v11358_v5 }
 0x2fb   :  { %6731 = vmatpush.bf16.msrb.mxu1 %v11839_v1  ;;  %6694 = vmatpush.bf16.msra.mxu2 %v13051_v24  ;;  %v12984_v36 = vld [vmem:[#allocation4 + $0xce8] sm:$0xf0]  ;;  %v15146_v1 = vld [vmem:[#allocation4 + $0xac] sm:$0xf0]  ;;  %v16399_v7 = vpop.f32.mrf.mxu3 }
 0x2fc   :  { %v12987_v53 = vor.u32 %v15533_v35, %v12984_v36  ;;  %v15349_v3 = vld [vmem:[#allocation4 + $0x70c] sm:$0xf]  ;;  %v11423_v12 = vor.u32 %v15146_v1, %v11422_v62  ;;  %v15202_v24 = vld [vmem:[#allocation4 + $0x26c] sm:$0xf0] }
 0x2fd   :  { %6719 = vmatpush.bf16.msrb.mxu3 %v11551_v60  ;;  %v12248_v63 = vld [vmem:[#allocation4 + $0x728] sm:$0xf0]  ;;  %6655 = vmatpush.bf16.msrb.mxu0 %v12283_v58  ;;  %v11679_v60 = vor.u32 %v15210_v25, %v11678_v4  ;;  %v11647_v57 = vor.u32 %v15202_v24, %v11646_v22  ;;  %v12606_v28 = vld [vmem:[#allocation4 + $0x9d0] sm:$0xf] }
 0x2fe   :  { %v15525_v20 = vld [vmem:[#allocation4 + $0xc8c] sm:$0xf]  ;;  %v12251_v59 = vor.u32 %v15349_v3, %v12248_v63  ;;  %v12862_v58 = vld [vmem:[#allocation4 + $0xbd0] sm:$0xf]  ;;  %v6441_v34 = vpop.f32.mrf.mxu2 }
 0x2ff   :  { %6732 = vmatpush.bf16.msrb.mxu1 %v11807_v19  ;;  %6695 = vmatpush.bf16.msra.mxu2 %v13019_v37  ;;  %v12952_v61 = vld [vmem:[#allocation4 + $0xca8] sm:$0xf0]  ;;  %v6482_v13 = vpop.f32.mrf.mxu1  ;;  %v11614_v37 = vld [vmem:[#allocation4 + $0x210] sm:$0xf]  ;;  %v16402_v63 = vadd.f32 %v6441_v34, %v16388_v18 }
 0x300   :  { %v12955_v42 = vor.u32 %v15525_v20, %v12952_v61  ;;  %v15341_v9 = vld [vmem:[#allocation4 + $0x6cc] sm:$0xf]  ;;  %v15506_v52 = vld [vmem:[#allocation4 + $0xbec] sm:$0xf0]  ;;  %v11615_v3 = vor.u32 %v15194_v41, %v11614_v37 }
 0x301   :  { %6720 = vmatpush.bf16.msrb.mxu3 %v11519_v8  ;;  %v12216_v54 = vld [vmem:[#allocation4 + $0x6e8] sm:$0xf0]  ;;  %6656 = vmatpush.bf16.msrb.mxu0 %v12251_v59  ;;  %v12094_v8 = vld [vmem:[#allocation4 + $0x5d0] sm:$0xf]  ;;  %v12863_v59 = vor.u32 %v15506_v52, %v12862_v58 }
 0x302   :  { %v15517_v38 = vld [vmem:[#allocation4 + $0xc4c] sm:$0xf]  ;;  %v12219_v19 = vor.u32 %v15341_v9, %v12216_v54  ;;  %v12062_v55 = vld [vmem:[#allocation4 + $0x590] sm:$0xf] }
 0x303   :  { %6733 = vmatpush.bf16.msrb.mxu1 %v11775_v32  ;;  %6696 = vmatpush.bf16.msra.mxu2 %v12987_v53  ;;  %v12920_v10 = vld [vmem:[#allocation4 + $0xc68] sm:$0xf0]  ;;  %v15314_v32 = vld [vmem:[#allocation4 + $0x5ec] sm:$0xf0]  ;;  %v6469_v45 = vpop.f32.mrf.mxu3 }
 0x304   :  { %v12923_v23 = vor.u32 %v15517_v38, %v12920_v10  ;;  %v15333_v26 = vld [vmem:[#allocation4 + $0x68c] sm:$0xf]  ;;  %v15306_v53 = vld [vmem:[#allocation4 + $0x5ac] sm:$0xf0] }
 0x305   :  { %6721 = vmatpush.bf16.msrb.mxu3 %v11487_v46  ;;  %v12184_v27 = vld [vmem:[#allocation4 + $0x6a8] sm:$0xf0]  ;;  %6657 = vmatpush.bf16.msrb.mxu0 %v12219_v19  ;;  %v12095_v46 = vor.u32 %v15314_v32, %v12094_v8  ;;  %v12063_v62 = vor.u32 %v15306_v53, %v12062_v55  ;;  %v12574_v1 = vld [vmem:[#allocation4 + $0x990] sm:$0xf] }
 0x306   :  { %v15509_v29 = vld [vmem:[#allocation4 + $0xc0c] sm:$0xf]  ;;  %v12187_v33 = vor.u32 %v15333_v26, %v12184_v27  ;;  %v15434_v4 = vld [vmem:[#allocation4 + $0x9ac] sm:$0xf0]  ;;  %v6443_v26 = vpop.f32.mrf.mxu2 }
 0x307   :  { %6734 = vmatpush.bf16.msrb.mxu1 %v11743_v44  ;;  %6697 = vmatpush.bf16.msra.mxu2 %v12955_v42  ;;  %v12888_v30 = vld [vmem:[#allocation4 + $0xc28] sm:$0xf0]  ;;  %v15442_v44 = vld [vmem:[#allocation4 + $0x9ec] sm:$0xf0] }
 0x308   :  { %v12891_v31 = vor.u32 %v15509_v29, %v12888_v30  ;;  %v15325_v35 = vld [vmem:[#allocation4 + $0x64c] sm:$0xf]  ;;  %v12607_v61 = vor.u32 %v15442_v44, %v12606_v28  ;;  %v12830_v42 = vld [vmem:[#allocation4 + $0xb90] sm:$0xf] }
 0x309   :  { %6722 = vmatpush.bf16.msrb.mxu3 %v11455_v48  ;;  %v12152_v36 = vld [vmem:[#allocation4 + $0x668] sm:$0xf0]  ;;  %6658 = vmatpush.bf16.msrb.mxu0 %v12187_v33  ;;  %v15498_v25 = vld [vmem:[#allocation4 + $0xbac] sm:$0xf0] }
 0x30a   :  { %v12155_v20 = vor.u32 %v15325_v35, %v12152_v36  ;;  %v15317_v48 = vld [vmem:[#allocation4 + $0x60c] sm:$0xf]  ;;  %v12030_v38 = vld [vmem:[#allocation4 + $0x550] sm:$0xf]  ;;  %v12831_v13 = vor.u32 %v15498_v25, %v12830_v42 }
 0x30b   :  { %6735 = vmatpush.bf16.msrb.mxu1 %v11711_v17  ;;  %6698 = vmatpush.bf16.msra.mxu2 %v12923_v23  ;;  %v12120_v17 = vld [vmem:[#allocation4 + $0x628] sm:$0xf0]  ;;  %v15298_v18 = vld [vmem:[#allocation4 + $0x56c] sm:$0xf0] }
 0x30c   :  { %v15629_v9 = vld [vmem:[#allocation4 + $0xfcc] sm:$0xf]  ;;  %v12123_v10 = vor.u32 %v15317_v48, %v12120_v17  ;;  %v15426_v19 = vld [vmem:[#allocation4 + $0x96c] sm:$0xf0]  ;;  %v12031_v16 = vor.u32 %v15298_v18, %v12030_v38 }
 0x30d   :  { %6723 = vmatpush.bf16.msrb.mxu3 %v11423_v12  ;;  %v13368_v54 = vld [vmem:[#allocation4 + $0xfe8] sm:$0xf0]  ;;  %6659 = vmatpush.bf16.msrb.mxu0 %v12155_v20  ;;  %v12575_v12 = vor.u32 %v15434_v4, %v12574_v1  ;;  %v12798_v6 = vld [vmem:[#allocation4 + $0xb50] sm:$0xf] }
 0x30e   :  { %v13371_v15 = vor.u32 %v15629_v9, %v13368_v54  ;;  %v15490_v22 = vld [vmem:[#allocation4 + $0xb6c] sm:$0xf0]  ;;  %v15621_v23 = vld [vmem:[#allocation4 + $0xf8c] sm:$0xf] }
 0x30f   :  { %6736 = vmatpush.bf16.msrb.mxu1 %v11679_v60  ;;  %6699 = vmatpush.bf16.msra.mxu2 %v12891_v31  ;;  %v12542_v60 = vld [vmem:[#allocation4 + $0x950] sm:$0xf]  ;;  %v13336_v24 = vld [vmem:[#allocation4 + $0xfa8] sm:$0xf0] }
 0x310   :  { %v11998_v27 = vld [vmem:[#allocation4 + $0x510] sm:$0xf]  ;;  %v12543_v30 = vor.u32 %v15426_v19, %v12542_v60  ;;  %v13339_v8 = vor.u32 %v15621_v23, %v13336_v24  ;;  %v15613_v37 = vld [vmem:[#allocation4 + $0xf4c] sm:$0xf] }
 0x311   :  { %6724 = vmatpush.bf16.msrb.mxu3 %v11391_v2  ;;  %v15290_v29 = vld [vmem:[#allocation4 + $0x52c] sm:$0xf0]  ;;  %6660 = vmatpush.bf16.msrb.mxu0 %v12123_v10  ;;  %v12799_v2 = vor.u32 %v15490_v22, %v12798_v6  ;;  %v13304_v45 = vld [vmem:[#allocation4 + $0xf68] sm:$0xf0] }
 0x312   :  { %6700 = vmatmul.bf16.vlgmr.msra.gmra.mxu2 %v16360_v40  ;;  %v12510_v32 = vld [vmem:[#allocation4 + $0x910] sm:$0xf]  ;;  %v11999_v5 = vor.u32 %v15290_v29, %v11998_v27  ;;  %v13307_v28 = vor.u32 %v15613_v37, %v13304_v45  ;;  %v15605_v53 = vld [vmem:[#allocation4 + $0xf0c] sm:$0xf] }
 0x313   :  { %6737 = vmatpush.bf16.msrb.mxu1 %v11647_v57  ;;  %6744 = vmatpush.bf16.msrb.mxu2 %v12095_v46  ;;  %v15418_v57 = vld [vmem:[#allocation4 + $0x92c] sm:$0xf0]  ;;  %v13272_v34 = vld [vmem:[#allocation4 + $0xf28] sm:$0xf0] }
 0x314   :  { %v12766_v33 = vld [vmem:[#allocation4 + $0xb10] sm:$0xf]  ;;  %6661 = vmatmul.bf16.vlgmr.msrb.gmra.mxu0 %v16322_v14  ;;  %v12511_v36 = vor.u32 %v15418_v57, %v12510_v32  ;;  %v13275_v4 = vor.u32 %v15605_v53, %v13272_v34  ;;  %v15597_v10 = vld [vmem:[#allocation4 + $0xecc] sm:$0xf]  ;;  %v11840_v34 = vld [vmem:[#allocation4 + $0x3f0] sm:$0xf0] }
 0x315   :  { %6725 = vmatpush.bf16.msrb.mxu3 %v11359_v49  ;;  %6705 = vmatpush.bf16.msra.mxu0 %v13371_v15  ;;  %v15482_v39 = vld [vmem:[#allocation4 + $0xb2c] sm:$0xf0]  ;;  %v16408_v20 = vpop.f32.mrf.mxu2  ;;  %v15589_v27 = vld [vmem:[#allocation4 + $0xe8c] sm:$0xf] }
 0x316   :  { %v11966_v31 = vld [vmem:[#allocation4 + $0x4d0] sm:$0xf]  ;;  %v12767_v46 = vor.u32 %v15482_v39, %v12766_v33  ;;  %v13208_v29 = vld [vmem:[#allocation4 + $0xea8] sm:$0xf0] }
 0x317   :  { %6738 = vmatpush.bf16.msrb.mxu1 %v11615_v3  ;;  %6745 = vmatpush.bf16.msrb.mxu2 %v12063_v62  ;;  %v15282_v41 = vld [vmem:[#allocation4 + $0x4ec] sm:$0xf0]  ;;  %v6532_v35 = vpop.f32.mrf.mxu1  ;;  %v6402_v3 = vpop.f32.mrf.mxu0  ;;  %v13211_v45 = vor.u32 %v15589_v27, %v13208_v29  ;;  %v15230_v27 = vld [vmem:[#allocation4 + $0x354] sm:$0xf] }
 0x318   :  { %6726 = vmatmul.bf16.vlgmr.msrb.gmra.mxu3 %v16311_v47  ;;  %v12478_v44 = vld [vmem:[#allocation4 + $0x8d0] sm:$0xf]  ;;  %v11967_v52 = vor.u32 %v15282_v41, %v11966_v31  ;;  %v16411_v17 = vadd.f32 %v6402_v3, %v16397_v56 }
 0x319   :  { %6770 = vmatpush.bf16.msra.mxu3 %v12607_v61  ;;  %6706 = vmatpush.bf16.msra.mxu0 %v13339_v8  ;;  %v15410_v58 = vld [vmem:[#allocation4 + $0x8ec] sm:$0xf0] }
 0x31a   :  { %6739 = vmatmul.bf16.vlgmr.msrb.gmra.mxu1 %v16313_v50  ;;  %v12734_v49 = vld [vmem:[#allocation4 + $0xad0] sm:$0xf] }
 0x31b   :  { %6783 = vmatpush.bf16.msra.mxu1 %v12863_v59  ;;  %6746 = vmatpush.bf16.msrb.mxu2 %v12031_v16  ;;  %v15474_v55 = vld [vmem:[#allocation4 + $0xaec] sm:$0xf0]  ;;  %v12479_v59 = vor.u32 %v15410_v58, %v12478_v44  ;;  %v6519_v1 = vpop.f32.mrf.mxu3  ;;  %v13176_v44 = vld [vmem:[#allocation4 + $0xe68] sm:$0xf0] }
 0x31c   :  { %v11934_v61 = vld [vmem:[#allocation4 + $0x490] sm:$0xf]  ;;  %v12735_v62 = vor.u32 %v15474_v55, %v12734_v49  ;;  %v16413_v54 = vadd.f32 %v6532_v35, %v6519_v1  ;;  %v15182_v49 = vld [vmem:[#allocation4 + $0x1d4] sm:$0xf]  ;;  %v15573_v1 = vld [vmem:[#allocation4 + $0xe0c] sm:$0xf] }
 0x31d   :  { %6771 = vmatpush.bf16.msra.mxu3 %v12575_v12  ;;  %v15274_v48 = vld [vmem:[#allocation4 + $0x4ac] sm:$0xf0]  ;;  %6707 = vmatpush.bf16.msra.mxu0 %v13307_v28  ;;  %v13240_v12 = vld [vmem:[#allocation4 + $0xee8] sm:$0xf0]  ;;  %v15246_v55 = vld [vmem:[#allocation4 + $0x3d4] sm:$0xf] }
 0x31e   :  { %v12446_v42 = vld [vmem:[#allocation4 + $0x890] sm:$0xf]  ;;  %v11935_v38 = vor.u32 %v15274_v48, %v11934_v61  ;;  %v13243_v6 = vor.u32 %v15597_v10, %v13240_v12  ;;  %v15581_v28 = vld [vmem:[#allocation4 + $0xe4c] sm:$0xf]  ;;  %v15238_v10 = vld [vmem:[#allocation4 + $0x394] sm:$0xf] }
 0x31f   :  { %6784 = vmatpush.bf16.msra.mxu1 %v12831_v13  ;;  %6747 = vmatpush.bf16.msrb.mxu2 %v11999_v5  ;;  %v15402_v25 = vld [vmem:[#allocation4 + $0x8ac] sm:$0xf0]  ;;  %v6534_v56 = vpop.f32.mrf.mxu1 }
 0x320   :  { %v12702_v9 = vld [vmem:[#allocation4 + $0xa90] sm:$0xf]  ;;  %v12447_v60 = vor.u32 %v15402_v25, %v12446_v42  ;;  %v11843_v42 = vor.u32 %v15246_v55, %v11840_v34  ;;  %v11456_v34 = vld [vmem:[#allocation4 + $0xf0] sm:$0xf0] }
 0x321   :  { %6772 = vmatpush.bf16.msra.mxu3 %v12543_v30  ;;  %v15466_v18 = vld [vmem:[#allocation4 + $0xaac] sm:$0xf0]  ;;  %6708 = vmatpush.bf16.msra.mxu0 %v13275_v4  ;;  %v6404_v30 = vpop.f32.mrf.mxu0  ;;  %v13144_v4 = vld [vmem:[#allocation4 + $0xe28] sm:$0xf0] }
 0x322   :  { %v11902_v13 = vld [vmem:[#allocation4 + $0x450] sm:$0xf]  ;;  %v12703_v19 = vor.u32 %v15466_v18, %v12702_v9  ;;  %v11552_v18 = vld [vmem:[#allocation4 + $0x1b0] sm:$0xf0] }
 0x323   :  { %6785 = vmatpush.bf16.msra.mxu1 %v12799_v2  ;;  %6748 = vmatpush.bf16.msrb.mxu2 %v11967_v52  ;;  %v15266_v15 = vld [vmem:[#allocation4 + $0x46c] sm:$0xf0]  ;;  %v6495_v2 = vpop.f32.mrf.mxu2  ;;  %v6521_v37 = vpop.f32.mrf.mxu3  ;;  %v11584_v52 = vld [vmem:[#allocation4 + $0x1f0] sm:$0xf0] }
 0x324   :  { %v12414_v16 = vld [vmem:[#allocation4 + $0x850] sm:$0xf]  ;;  %v11903_v24 = vor.u32 %v15266_v15, %v11902_v13  ;;  %v11808_v13 = vld [vmem:[#allocation4 + $0x3b0] sm:$0xf0] }
 0x325   :  { %6773 = vmatpush.bf16.msra.mxu3 %v12511_v36  ;;  %v15394_v22 = vld [vmem:[#allocation4 + $0x86c] sm:$0xf0]  ;;  %6709 = vmatpush.bf16.msra.mxu0 %v13243_v6  ;;  %v11776_v30 = vld [vmem:[#allocation4 + $0x370] sm:$0xf0] }
 0x326   :  { %v12670_v23 = vld [vmem:[#allocation4 + $0xa50] sm:$0xf]  ;;  %v12415_v57 = vor.u32 %v15394_v22, %v12414_v16  ;;  %v13147_v16 = vor.u32 %v15573_v1, %v13144_v4 }
 0x327   :  { %6786 = vmatpush.bf16.msra.mxu1 %v12767_v46  ;;  %6749 = vmatpush.bf16.msrb.mxu2 %v11935_v38  ;;  %v15458_v26 = vld [vmem:[#allocation4 + $0xa6c] sm:$0xf0]  ;;  %v15174_v38 = vld [vmem:[#allocation4 + $0x194] sm:$0xf] }
 0x328   :  { %v11870_v8 = vld [vmem:[#allocation4 + $0x410] sm:$0xf]  ;;  %v12671_v39 = vor.u32 %v15458_v26, %v12670_v23  ;;  %v11555_v22 = vor.u32 %v15174_v38, %v11552_v18  ;;  %v11811_v23 = vor.u32 %v15238_v10, %v11808_v13  ;;  %v15166_v26 = vld [vmem:[#allocation4 + $0x154] sm:$0xf] }
 0x329   :  { %6774 = vmatpush.bf16.msra.mxu3 %v12479_v59  ;;  %v15258_v32 = vld [vmem:[#allocation4 + $0x42c] sm:$0xf0]  ;;  %6710 = vmatpush.bf16.msra.mxu0 %v13211_v45  ;;  %v13179_v59 = vor.u32 %v15581_v28, %v13176_v44  ;;  %v6454_v25 = vpop.f32.mrf.mxu0  ;;  %v15142_v13 = vld [vmem:[#allocation4 + $0x94] sm:$0xf] }
 0x32a   :  { %v13118_v33 = vld [vmem:[#allocation4 + $0xdd0] sm:$0xf]  ;;  %v11871_v36 = vor.u32 %v15258_v32, %v11870_v8  ;;  %v6455_v12 = vadd.f32 %v6454_v25, %v16402_v63  ;;  %v11520_v63 = vld [vmem:[#allocation4 + $0x170] sm:$0xf0] }
 0x32b   :  { %6787 = vmatpush.bf16.msra.mxu1 %v12735_v62  ;;  %v15570_v5 = vld [vmem:[#allocation4 + $0xdec] sm:$0xf0]  ;;  %6750 = vmatpush.bf16.msrb.mxu2 %v11903_v24  ;;  %v11587_v62 = vor.u32 %v15182_v49, %v11584_v52 }
 0x32c   :  { %v12382_v31 = vld [vmem:[#allocation4 + $0x810] sm:$0xf]  ;;  %v13119_v58 = vor.u32 %v15570_v5, %v13118_v33  ;;  %v6468_v6 = vadd.f32 %v16399_v7, %v6455_v12  ;;  %v11523_v33 = vor.u32 %v15166_v26, %v11520_v63 }
 0x32d   :  { %6775 = vmatpush.bf16.msra.mxu3 %v12447_v60  ;;  %v15386_v41 = vld [vmem:[#allocation4 + $0x82c] sm:$0xf0]  ;;  %6711 = vmatpush.bf16.msra.mxu0 %v13179_v59  ;;  %v11712_v59 = vld [vmem:[#allocation4 + $0x2f0] sm:$0xf0] }
 0x32e   :  { %v12638_v35 = vld [vmem:[#allocation4 + $0xa10] sm:$0xf]  ;;  %v12383_v53 = vor.u32 %v15386_v41, %v12382_v31  ;;  %v6481_v32 = vadd.f32 %v16394_v21, %v6468_v6  ;;  %v15158_v31 = vld [vmem:[#allocation4 + $0x114] sm:$0xf] }
 0x32f   :  { %6788 = vmatpush.bf16.msra.mxu1 %v12703_v19  ;;  %v15450_v46 = vld [vmem:[#allocation4 + $0xa2c] sm:$0xf0]  ;;  %6751 = vmatpush.bf16.msrb.mxu2 %v11871_v36  ;;  %v11488_v41 = vld [vmem:[#allocation4 + $0x130] sm:$0xf0] }
 0x330   :  { %v13086_v3 = vld [vmem:[#allocation4 + $0xd90] sm:$0xf]  ;;  %v12639_v48 = vor.u32 %v15450_v46, %v12638_v35  ;;  %v6494_v5 = vadd.f32 %v16408_v20, %v6481_v32  ;;  %v15222_v35 = vld [vmem:[#allocation4 + $0x314] sm:$0xf]  ;;  %v11491_v20 = vor.u32 %v15158_v31, %v11488_v41 }
 0x331   :  { %6776 = vmatpush.bf16.msra.mxu3 %v12415_v57  ;;  %v15562_v61 = vld [vmem:[#allocation4 + $0xdac] sm:$0xf0]  ;;  %6712 = vmatpush.bf16.msra.mxu0 %v13147_v16  ;;  %v6456_v37 = vpop.f32.mrf.mxu0  ;;  %v11744_v46 = vld [vmem:[#allocation4 + $0x330] sm:$0xf0] }
 0x332   :  { %v13087_v9 = vor.u32 %v15562_v61, %v13086_v3  ;;  %v12350_v15 = vld [vmem:[#allocation4 + $0x7d0] sm:$0xf]  ;;  %6752 = vmatmul.bf16.vlgmr.msrb.gmra.mxu2 %v16320_v11  ;;  %v11747_v52 = vor.u32 %v15222_v35, %v11744_v46  ;;  %v15214_v3 = vld [vmem:[#allocation4 + $0x2d4] sm:$0xf] }
 0x333   :  { %6789 = vmatpush.bf16.msra.mxu1 %v12671_v39  ;;  %6796 = vmatpush.bf16.msra.mxu2 %v13119_v58  ;;  %v15378_v56 = vld [vmem:[#allocation4 + $0x7ec] sm:$0xf0]  ;;  %v11779_v39 = vor.u32 %v15230_v27, %v11776_v30  ;;  %v11715_v38 = vor.u32 %v15214_v3, %v11712_v59  ;;  %v11392_v30 = vld [vmem:[#allocation4 + $0x70] sm:$0xf0] }
 0x334   :  { %v13054_v60 = vld [vmem:[#allocation4 + $0xd50] sm:$0xf]  ;;  %v12351_v24 = vor.u32 %v15378_v56, %v12350_v15  ;;  %6713 = vmatmul.bf16.vlgmr.msra.gmra.mxu0 %v16370_v43  ;;  %v11424_v15 = vld [vmem:[#allocation4 + $0xb0] sm:$0xf0] }
 0x335   :  { %6777 = vmatpush.bf16.msra.mxu3 %v12383_v53  ;;  %v15554_v19 = vld [vmem:[#allocation4 + $0xd6c] sm:$0xf0]  ;;  %v15150_v53 = vld [vmem:[#allocation4 + $0xd4] sm:$0xf]  ;;  %v11427_v26 = vor.u32 %v15142_v13, %v11424_v15 }
 0x336   :  { %v13055_v29 = vor.u32 %v15554_v19, %v13054_v60  ;;  %v12318_v2 = vld [vmem:[#allocation4 + $0x790] sm:$0xf]  ;;  %6757 = vmatpush.bf16.msrb.mxu0 %v12351_v24  ;;  %v15206_v56 = vld [vmem:[#allocation4 + $0x294] sm:$0xf] }
 0x337   :  { %6790 = vmatpush.bf16.msra.mxu1 %v12639_v48  ;;  %6797 = vmatpush.bf16.msra.mxu2 %v13087_v9  ;;  %v15370_v8 = vld [vmem:[#allocation4 + $0x7ac] sm:$0xf0]  ;;  %v16423_v49 = vpop.f32.mrf.mxu1  ;;  %v6545_v48 = vpop.f32.mrf.mxu2  ;;  %v11459_v9 = vor.u32 %v15150_v53, %v11456_v34  ;;  %v12096_v31 = vld [vmem:[#allocation4 + $0x5f0] sm:$0xf0] }
 0x338   :  { %6778 = vmatmul.bf16.vlgmr.msra.gmra.mxu3 %v16333_v0  ;;  %v13022_v7 = vld [vmem:[#allocation4 + $0xd10] sm:$0xf]  ;;  %v12319_v45 = vor.u32 %v15370_v8, %v12318_v2  ;;  %v16426_v4 = vadd.f32 %v6545_v48, %v16413_v54  ;;  %v11680_v54 = vld [vmem:[#allocation4 + $0x2b0] sm:$0xf0] }
 0x339   :  { %6822 = vmatpush.bf16.msrb.mxu3 %v11587_v62  ;;  %v15546_v57 = vld [vmem:[#allocation4 + $0xd2c] sm:$0xf0]  ;;  %v6506_v18 = vpop.f32.mrf.mxu0  ;;  %v11683_v63 = vor.u32 %v15206_v56, %v11680_v54  ;;  %v15198_v2 = vld [vmem:[#allocation4 + $0x254] sm:$0xf] }
 0x33a   :  { %6791 = vmatmul.bf16.vlgmr.msra.gmra.mxu1 %v16336_v51  ;;  %v13023_v36 = vor.u32 %v15546_v57, %v13022_v7  ;;  %v12286_v28 = vld [vmem:[#allocation4 + $0x750] sm:$0xf]  ;;  %6758 = vmatpush.bf16.msrb.mxu0 %v12319_v45  ;;  %v16430_v60 = vadd.f32 %v6506_v18, %v6494_v5  ;;  %v11648_v7 = vld [vmem:[#allocation4 + $0x270] sm:$0xf0] }
 0x33b   :  { %6835 = vmatpush.bf16.msrb.mxu1 %v11843_v42  ;;  %6798 = vmatpush.bf16.msra.mxu2 %v13055_v29  ;;  %v15362_v21 = vld [vmem:[#allocation4 + $0x76c] sm:$0xf0]  ;;  %v16428_v10 = vpop.f32.mrf.mxu3  ;;  %v15134_v29 = vld [vmem:[#allocation4 + $0x54] sm:$0xf]  ;;  %v11651_v41 = vor.u32 %v15198_v2, %v11648_v7 }
 0x33c   :  { %v12990_v44 = vld [vmem:[#allocation4 + $0xcd0] sm:$0xf]  ;;  %v12287_v55 = vor.u32 %v15362_v21, %v12286_v28  ;;  %v11395_v37 = vor.u32 %v15134_v29, %v11392_v30  ;;  %v15310_v45 = vld [vmem:[#allocation4 + $0x5d4] sm:$0xf] }
 0x33d   :  { %6823 = vmatpush.bf16.msrb.mxu3 %v11555_v22  ;;  %v15538_v58 = vld [vmem:[#allocation4 + $0xcec] sm:$0xf0]  ;;  %v15126_v28 = vld [vmem:[#allocation4 + $0x14] sm:$0xf]  ;;  %v12099_v53 = vor.u32 %v15310_v45, %v12096_v31 }
 0x33e   :  { %v12991_v61 = vor.u32 %v15538_v58, %v12990_v44  ;;  %v12254_v62 = vld [vmem:[#allocation4 + $0x710] sm:$0xf]  ;;  %6759 = vmatpush.bf16.msrb.mxu0 %v12287_v55  ;;  %v11360_v21 = vld [vmem:[#allocation4 + $0x30] sm:$0xf0] }
 0x33f   :  { %6836 = vmatpush.bf16.msrb.mxu1 %v11811_v23  ;;  %6799 = vmatpush.bf16.msra.mxu2 %v13023_v36  ;;  %v15354_v1 = vld [vmem:[#allocation4 + $0x72c] sm:$0xf0]  ;;  %v6586_v24 = vpop.f32.mrf.mxu1  ;;  %v6547_v32 = vpop.f32.mrf.mxu2  ;;  %v15190_v44 = vld [vmem:[#allocation4 + $0x214] sm:$0xf]  ;;  %v11363_v48 = vor.u32 %v15126_v28, %v11360_v21 }
 0x340   :  { %v12958_v42 = vld [vmem:[#allocation4 + $0xc90] sm:$0xf]  ;;  %v12255_v12 = vor.u32 %v15354_v1, %v12254_v62  ;;  %v15438_v34 = vld [vmem:[#allocation4 + $0x9d4] sm:$0xf] }
 0x341   :  { %6824 = vmatpush.bf16.msrb.mxu3 %v11523_v33  ;;  %v15530_v25 = vld [vmem:[#allocation4 + $0xcac] sm:$0xf0]  ;;  %v6508_v35 = vpop.f32.mrf.mxu0  ;;  %v12608_v3 = vld [vmem:[#allocation4 + $0x9f0] sm:$0xf0] }
 0x342   :  { %v12959_v19 = vor.u32 %v15530_v25, %v12958_v42  ;;  %v12222_v6 = vld [vmem:[#allocation4 + $0x6d0] sm:$0xf]  ;;  %6760 = vmatpush.bf16.msrb.mxu0 %v12255_v12  ;;  %v12864_v59 = vld [vmem:[#allocation4 + $0xbf0] sm:$0xf0] }
 0x343   :  { %6837 = vmatpush.bf16.msrb.mxu1 %v11779_v39  ;;  %6800 = vmatpush.bf16.msra.mxu2 %v12991_v61  ;;  %v15346_v16 = vld [vmem:[#allocation4 + $0x6ec] sm:$0xf0]  ;;  %v6573_v36 = vpop.f32.mrf.mxu3  ;;  %v15502_v61 = vld [vmem:[#allocation4 + $0xbd4] sm:$0xf] }
 0x344   :  { %v12926_v22 = vld [vmem:[#allocation4 + $0xc50] sm:$0xf]  ;;  %v12223_v27 = vor.u32 %v15346_v16, %v12222_v6  ;;  %v15302_v62 = vld [vmem:[#allocation4 + $0x594] sm:$0xf]  ;;  %v12867_v12 = vor.u32 %v15502_v61, %v12864_v59 }
 0x345   :  { %6825 = vmatpush.bf16.msrb.mxu3 %v11491_v20  ;;  %v15522_v23 = vld [vmem:[#allocation4 + $0xc6c] sm:$0xf0]  ;;  %v11616_v20 = vld [vmem:[#allocation4 + $0x230] sm:$0xf0] }
 0x346   :  { %v12927_v8 = vor.u32 %v15522_v23, %v12926_v22  ;;  %v12190_v57 = vld [vmem:[#allocation4 + $0x690] sm:$0xf]  ;;  %6761 = vmatpush.bf16.msrb.mxu0 %v12223_v27  ;;  %v12064_v1 = vld [vmem:[#allocation4 + $0x5b0] sm:$0xf0]  ;;  %v11619_v42 = vor.u32 %v15190_v44, %v11616_v20 }
 0x347   :  { %6838 = vmatpush.bf16.msrb.mxu1 %v11747_v52  ;;  %6801 = vmatpush.bf16.msra.mxu2 %v12959_v19  ;;  %v15338_v33 = vld [vmem:[#allocation4 + $0x6ac] sm:$0xf0]  ;;  %v12067_v13 = vor.u32 %v15302_v62, %v12064_v1  ;;  %v15430_v15 = vld [vmem:[#allocation4 + $0x994] sm:$0xf] }
 0x348   :  { %v12894_v5 = vld [vmem:[#allocation4 + $0xc10] sm:$0xf]  ;;  %v12191_v46 = vor.u32 %v15338_v33, %v12190_v57  ;;  %v12576_v56 = vld [vmem:[#allocation4 + $0x9b0] sm:$0xf0] }
 0x349   :  { %6826 = vmatpush.bf16.msrb.mxu3 %v11459_v9  ;;  %v15514_v39 = vld [vmem:[#allocation4 + $0xc2c] sm:$0xf0]  ;;  %v12611_v9 = vor.u32 %v15438_v34, %v12608_v3  ;;  %v15494_v19 = vld [vmem:[#allocation4 + $0xb94] sm:$0xf] }
 0x34a   :  { %v12895_v58 = vor.u32 %v15514_v39, %v12894_v5  ;;  %v12158_v52 = vld [vmem:[#allocation4 + $0x650] sm:$0xf]  ;;  %6762 = vmatpush.bf16.msrb.mxu0 %v12191_v46  ;;  %v12832_v54 = vld [vmem:[#allocation4 + $0xbb0] sm:$0xf0] }
 0x34b   :  { %6839 = vmatpush.bf16.msrb.mxu1 %v11715_v38  ;;  %6802 = vmatpush.bf16.msra.mxu2 %v12927_v8  ;;  %v15330_v55 = vld [vmem:[#allocation4 + $0x66c] sm:$0xf0]  ;;  %v15294_v22 = vld [vmem:[#allocation4 + $0x554] sm:$0xf] }
 0x34c   :  { %v12159_v25 = vor.u32 %v15330_v55, %v12158_v52  ;;  %v12126_v38 = vld [vmem:[#allocation4 + $0x610] sm:$0xf]  ;;  %v12032_v23 = vld [vmem:[#allocation4 + $0x570] sm:$0xf0] }
 0x34d   :  { %6827 = vmatpush.bf16.msrb.mxu3 %v11427_v26  ;;  %v15322_v18 = vld [vmem:[#allocation4 + $0x62c] sm:$0xf0]  ;;  %v12579_v26 = vor.u32 %v15430_v15, %v12576_v56  ;;  %v15422_v29 = vld [vmem:[#allocation4 + $0x954] sm:$0xf]  ;;  %v12035_v8 = vor.u32 %v15294_v22, %v12032_v23 }
 0x34e   :  { %v13374_v6 = vld [vmem:[#allocation4 + $0xfd0] sm:$0xf]  ;;  %6763 = vmatpush.bf16.msrb.mxu0 %v12159_v25  ;;  %v12127_v24 = vor.u32 %v15322_v18, %v12126_v38  ;;  %v12544_v30 = vld [vmem:[#allocation4 + $0x970] sm:$0xf0] }
 0x34f   :  { %6840 = vmatpush.bf16.msrb.mxu1 %v11683_v63  ;;  %6803 = vmatpush.bf16.msra.mxu2 %v12895_v58  ;;  %v15634_v16 = vld [vmem:[#allocation4 + $0xfec] sm:$0xf0]  ;;  %v12835_v63 = vor.u32 %v15494_v19, %v12832_v54  ;;  %v15486_v2 = vld [vmem:[#allocation4 + $0xb54] sm:$0xf]  ;;  %v12547_v39 = vor.u32 %v15422_v29, %v12544_v30 }
 0x350   :  { %v13375_v27 = vor.u32 %v15634_v16, %v13374_v6  ;;  %v12800_v32 = vld [vmem:[#allocation4 + $0xb70] sm:$0xf0]  ;;  %v13342_v7 = vld [vmem:[#allocation4 + $0xf90] sm:$0xf] }
 0x351   :  { %6828 = vmatpush.bf16.msrb.mxu3 %v11395_v37  ;;  %v15626_v57 = vld [vmem:[#allocation4 + $0xfac] sm:$0xf0]  ;;  %v15286_v33 = vld [vmem:[#allocation4 + $0x514] sm:$0xf]  ;;  %v12803_v37 = vor.u32 %v15486_v2, %v12800_v32  ;;  %v6558_v38 = vpop.f32.mrf.mxu0 }
 0x352   :  { %6804 = vmatmul.bf16.vlgmr.msra.gmra.mxu2 %v16360_v40  ;;  %v12000_v5 = vld [vmem:[#allocation4 + $0x530] sm:$0xf0]  ;;  %6764 = vmatpush.bf16.msrb.mxu0 %v12127_v24  ;;  %v13343_v45 = vor.u32 %v15626_v57, %v13342_v7  ;;  %v13310_v28 = vld [vmem:[#allocation4 + $0xf50] sm:$0xf] }
 0x353   :  { %6841 = vmatpush.bf16.msrb.mxu1 %v11651_v41  ;;  %6848 = vmatpush.bf16.msrb.mxu2 %v12099_v53  ;;  %v15414_v31 = vld [vmem:[#allocation4 + $0x914] sm:$0xf]  ;;  %v12003_v36 = vor.u32 %v15286_v33, %v12000_v5  ;;  %v15618_v21 = vld [vmem:[#allocation4 + $0xf6c] sm:$0xf0] }
 0x354   :  { %v12512_v41 = vld [vmem:[#allocation4 + $0x930] sm:$0xf0]  ;;  %v13311_v53 = vor.u32 %v15618_v21, %v13310_v28  ;;  %v13278_v1 = vld [vmem:[#allocation4 + $0xf10] sm:$0xf] }
 0x355   :  { %6829 = vmatpush.bf16.msrb.mxu3 %v11363_v48  ;;  %v15478_v35 = vld [vmem:[#allocation4 + $0xb14] sm:$0xf]  ;;  %6765 = vmatmul.bf16.vlgmr.msrb.gmra.mxu0 %v16322_v14  ;;  %v12515_v52 = vor.u32 %v15414_v31, %v12512_v41  ;;  %v6597_v59 = vpop.f32.mrf.mxu2  ;;  %v13246_v24 = vld [vmem:[#allocation4 + $0xed0] sm:$0xf] }
 0x356   :  { %6809 = vmatpush.bf16.msra.mxu0 %v13375_v27  ;;  %v12768_v46 = vld [vmem:[#allocation4 + $0xb30] sm:$0xf0] }
 0x357   :  { %6842 = vmatpush.bf16.msrb.mxu1 %v11619_v42  ;;  %6849 = vmatpush.bf16.msrb.mxu2 %v12067_v13  ;;  %v6636_v44 = vpop.f32.mrf.mxu1  ;;  %v15278_v58 = vld [vmem:[#allocation4 + $0x4d4] sm:$0xf]  ;;  %v12771_v55 = vor.u32 %v15478_v35, %v12768_v46  ;;  %v15610_v42 = vld [vmem:[#allocation4 + $0xf2c] sm:$0xf0] }
 0x358   :  { %6830 = vmatmul.bf16.vlgmr.msrb.gmra.mxu3 %v16311_v47  ;;  %v11968_v20 = vld [vmem:[#allocation4 + $0x4f0] sm:$0xf0]  ;;  %v13279_v56 = vor.u32 %v15610_v42, %v13278_v1  ;;  %v11846_v1 = vld [vmem:[#allocation4 + $0x3d8] sm:$0xf] }
 0x359   :  { %6874 = vmatpush.bf16.msra.mxu3 %v12611_v9  ;;  %v15406_v34 = vld [vmem:[#allocation4 + $0x8d4] sm:$0xf]  ;;  %v11971_v48 = vor.u32 %v15278_v58, %v11968_v20 }
 0x35a   :  { %6843 = vmatmul.bf16.vlgmr.msrb.gmra.mxu1 %v16313_v50  ;;  %6810 = vmatpush.bf16.msra.mxu0 %v13343_v45  ;;  %v12480_v3 = vld [vmem:[#allocation4 + $0x8f0] sm:$0xf0]  ;;  %v13214_v45 = vld [vmem:[#allocation4 + $0xe90] sm:$0xf] }
 0x35b   :  { %6887 = vmatpush.bf16.msra.mxu1 %v12867_v12  ;;  %6850 = vmatpush.bf16.msrb.mxu2 %v12035_v8  ;;  %v15470_v61 = vld [vmem:[#allocation4 + $0xad4] sm:$0xf]  ;;  %v12483_v18 = vor.u32 %v15406_v34, %v12480_v3  ;;  %v6559_v12 = vadd.f32 %v6558_v38, %v16426_v4  ;;  %v6623_v15 = vpop.f32.mrf.mxu3  ;;  %v13182_v3 = vld [vmem:[#allocation4 + $0xe50] sm:$0xf] }
 0x35c   :  { %v12736_v62 = vld [vmem:[#allocation4 + $0xaf0] sm:$0xf0]  ;;  %v16437_v16 = vadd.f32 %v6636_v44, %v6623_v15  ;;  %v13150_v15 = vld [vmem:[#allocation4 + $0xe10] sm:$0xf] }
 0x35d   :  { %6875 = vmatpush.bf16.msra.mxu3 %v12579_v26  ;;  %v15270_v25 = vld [vmem:[#allocation4 + $0x494] sm:$0xf]  ;;  %v12739_v13 = vor.u32 %v15470_v61, %v12736_v62  ;;  %v15602_v26 = vld [vmem:[#allocation4 + $0xeec] sm:$0xf0]  ;;  %v15187_v62 = vld [vmem:[#allocation4 + $0x1f4] sm:$0xf0] }
 0x35e   :  { %v11936_v9 = vld [vmem:[#allocation4 + $0x4b0] sm:$0xf0]  ;;  %6811 = vmatpush.bf16.msra.mxu0 %v13311_v53  ;;  %v13247_v8 = vor.u32 %v15602_v26, %v13246_v24  ;;  %v15586_v61 = vld [vmem:[#allocation4 + $0xe6c] sm:$0xf0]  ;;  %v15243_v24 = vld [vmem:[#allocation4 + $0x3b4] sm:$0xf0] }
 0x35f   :  { %6888 = vmatpush.bf16.msra.mxu1 %v12835_v63  ;;  %6851 = vmatpush.bf16.msrb.mxu2 %v12003_v36  ;;  %v15398_v19 = vld [vmem:[#allocation4 + $0x894] sm:$0xf]  ;;  %v11939_v22 = vor.u32 %v15270_v25, %v11936_v9  ;;  %v6572_v63 = vadd.f32 %v16428_v10, %v6559_v12  ;;  %v6638_v27 = vpop.f32.mrf.mxu1  ;;  %v15594_v10 = vld [vmem:[#allocation4 + $0xeac] sm:$0xf0]  ;;  %v6560_v36 = vpop.f32.mrf.mxu0  ;;  %v15251_v25 = vld [vmem:[#allocation4 + $0x3f4] sm:$0xf0]  ;;  %v13183_v12 = vor.u32 %v15586_v61, %v13182_v3 }
 0x360   :  { %v12448_v54 = vld [vmem:[#allocation4 + $0x8b0] sm:$0xf0] }
 0x361   :  { %6876 = vmatpush.bf16.msra.mxu3 %v12547_v39  ;;  %v15462_v6 = vld [vmem:[#allocation4 + $0xa94] sm:$0xf]  ;;  %v12451_v4 = vor.u32 %v15398_v19, %v12448_v54  ;;  %v6585_v33 = vadd.f32 %v16423_v49, %v6572_v63  ;;  %v6599_v39 = vpop.f32.mrf.mxu2  ;;  %v13215_v49 = vor.u32 %v15594_v10, %v13214_v45  ;;  %v11847_v19 = vor.u32 %v15251_v25, %v11846_v1  ;;  %v15219_v25 = vld [vmem:[#allocation4 + $0x2f4] sm:$0xf0] }
 0x362   :  { %v12704_v23 = vld [vmem:[#allocation4 + $0xab0] sm:$0xf0]  ;;  %6812 = vmatpush.bf16.msra.mxu0 %v13279_v56  ;;  %v15578_v56 = vld [vmem:[#allocation4 + $0xe2c] sm:$0xf0] }
 0x363   :  { %6889 = vmatpush.bf16.msra.mxu1 %v12803_v37  ;;  %6852 = vmatpush.bf16.msrb.mxu2 %v11971_v48  ;;  %v15262_v29 = vld [vmem:[#allocation4 + $0x454] sm:$0xf]  ;;  %v12707_v2 = vor.u32 %v15462_v6, %v12704_v23  ;;  %v16441_v35 = vadd.f32 %v6597_v59, %v6585_v33  ;;  %v6625_v58 = vpop.f32.mrf.mxu3  ;;  %v11590_v59 = vld [vmem:[#allocation4 + $0x1d8] sm:$0xf] }
 0x364   :  { %v11904_v30 = vld [vmem:[#allocation4 + $0x470] sm:$0xf0]  ;;  %v11558_v6 = vld [vmem:[#allocation4 + $0x198] sm:$0xf] }
 0x365   :  { %6877 = vmatpush.bf16.msra.mxu3 %v12515_v52  ;;  %v15390_v32 = vld [vmem:[#allocation4 + $0x854] sm:$0xf]  ;;  %v11907_v5 = vor.u32 %v15262_v29, %v11904_v30  ;;  %v11814_v23 = vld [vmem:[#allocation4 + $0x398] sm:$0xf]  ;;  %v13151_v30 = vor.u32 %v15578_v56, %v13150_v15 }
 0x366   :  { %v12416_v7 = vld [vmem:[#allocation4 + $0x870] sm:$0xf0]  ;;  %6813 = vmatpush.bf16.msra.mxu0 %v13247_v8  ;;  %v15227_v58 = vld [vmem:[#allocation4 + $0x334] sm:$0xf0] }
 0x367   :  { %6890 = vmatpush.bf16.msra.mxu1 %v12771_v55  ;;  %v15454_v57 = vld [vmem:[#allocation4 + $0xa54] sm:$0xf]  ;;  %6853 = vmatpush.bf16.msrb.mxu2 %v11939_v22  ;;  %v12419_v46 = vor.u32 %v15390_v32, %v12416_v7  ;;  %v15179_v22 = vld [vmem:[#allocation4 + $0x1b4] sm:$0xf0] }
 0x368   :  { %v12672_v37 = vld [vmem:[#allocation4 + $0xa70] sm:$0xf0]  ;;  %v11526_v32 = vld [vmem:[#allocation4 + $0x158] sm:$0xf] }
 0x369   :  { %6878 = vmatpush.bf16.msra.mxu3 %v12483_v18  ;;  %v15254_v31 = vld [vmem:[#allocation4 + $0x414] sm:$0xf]  ;;  %v12675_v44 = vor.u32 %v15454_v57, %v12672_v37  ;;  %v15171_v7 = vld [vmem:[#allocation4 + $0x174] sm:$0xf0] }
 0x36a   :  { %v11872_v41 = vld [vmem:[#allocation4 + $0x430] sm:$0xf0]  ;;  %6814 = vmatpush.bf16.msra.mxu0 %v13215_v49  ;;  %v11782_v57 = vld [vmem:[#allocation4 + $0x358] sm:$0xf] }
 0x36b   :  { %6891 = vmatpush.bf16.msra.mxu1 %v12739_v13  ;;  %v15566_v28 = vld [vmem:[#allocation4 + $0xdd4] sm:$0xf]  ;;  %6854 = vmatpush.bf16.msrb.mxu2 %v11907_v5  ;;  %v11875_v53 = vor.u32 %v15254_v31, %v11872_v41  ;;  %v11591_v13 = vor.u32 %v15187_v62, %v11590_v59  ;;  %v15235_v5 = vld [vmem:[#allocation4 + $0x374] sm:$0xf0]  ;;  %v11527_v31 = vor.u32 %v15171_v7, %v11526_v32 }
 0x36c   :  { %v13120_v21 = vld [vmem:[#allocation4 + $0xdf0] sm:$0xf0]  ;;  %v11783_v41 = vor.u32 %v15235_v5, %v11782_v57  ;;  %v15155_v59 = vld [vmem:[#allocation4 + $0xf4] sm:$0xf0] }
 0x36d   :  { %6879 = vmatpush.bf16.msra.mxu3 %v12451_v4  ;;  %v15382_v20 = vld [vmem:[#allocation4 + $0x814] sm:$0xf]  ;;  %v13123_v48 = vor.u32 %v15566_v28, %v13120_v21  ;;  %v11559_v4 = vor.u32 %v15179_v22, %v11558_v6  ;;  %v15163_v28 = vld [vmem:[#allocation4 + $0x134] sm:$0xf0] }
 0x36e   :  { %v12384_v52 = vld [vmem:[#allocation4 + $0x830] sm:$0xf0]  ;;  %6815 = vmatpush.bf16.msra.mxu0 %v13183_v12  ;;  %v11750_v21 = vld [vmem:[#allocation4 + $0x318] sm:$0xf] }
 0x36f   :  { %6892 = vmatpush.bf16.msra.mxu1 %v12707_v2  ;;  %v15446_v55 = vld [vmem:[#allocation4 + $0xa14] sm:$0xf]  ;;  %v12387_v42 = vor.u32 %v15382_v20, %v12384_v52  ;;  %6855 = vmatpush.bf16.msrb.mxu2 %v11875_v53  ;;  %v11815_v2 = vor.u32 %v15243_v24, %v11814_v23  ;;  %v11751_v3 = vor.u32 %v15227_v58, %v11750_v21  ;;  %v11718_v62 = vld [vmem:[#allocation4 + $0x2d8] sm:$0xf] }
 0x370   :  { %v12640_v34 = vld [vmem:[#allocation4 + $0xa30] sm:$0xf0]  ;;  %v11430_v23 = vld [vmem:[#allocation4 + $0x98] sm:$0xf] }
 0x371   :  { %6880 = vmatpush.bf16.msra.mxu3 %v12419_v46  ;;  %v15558_v9 = vld [vmem:[#allocation4 + $0xd94] sm:$0xf]  ;;  %v12643_v18 = vor.u32 %v15446_v55, %v12640_v34  ;;  %v11494_v46 = vld [vmem:[#allocation4 + $0x118] sm:$0xf]  ;;  %v6610_v15 = vpop.f32.mrf.mxu0 }
 0x372   :  { %v13088_v38 = vld [vmem:[#allocation4 + $0xdb0] sm:$0xf0]  ;;  %6856 = vmatmul.bf16.vlgmr.msrb.gmra.mxu2 %v16320_v11  ;;  %6816 = vmatpush.bf16.msra.mxu0 %v13151_v30  ;;  %v11495_v34 = vor.u32 %v15163_v28, %v11494_v46  ;;  %v15147_v24 = vld [vmem:[#allocation4 + $0xb4] sm:$0xf0] }
 0x373   :  { %6893 = vmatpush.bf16.msra.mxu1 %v12675_v44  ;;  %6900 = vmatpush.bf16.msra.mxu2 %v13123_v48  ;;  %v13091_v54 = vor.u32 %v15558_v9, %v13088_v38  ;;  %v15374_v26 = vld [vmem:[#allocation4 + $0x7d4] sm:$0xf]  ;;  %v11462_v48 = vld [vmem:[#allocation4 + $0xd8] sm:$0xf] }
 0x374   :  { %v12352_v63 = vld [vmem:[#allocation4 + $0x7f0] sm:$0xf0]  ;;  %v11463_v56 = vor.u32 %v15155_v59, %v11462_v48  ;;  %v11398_v7 = vld [vmem:[#allocation4 + $0x58] sm:$0xf] }
 0x375   :  { %6881 = vmatpush.bf16.msra.mxu3 %v12387_v42  ;;  %v15550_v27 = vld [vmem:[#allocation4 + $0xd54] sm:$0xf]  ;;  %v12355_v8 = vor.u32 %v15374_v26, %v12352_v63  ;;  %6817 = vmatmul.bf16.vlgmr.msra.gmra.mxu0 %v16370_v43  ;;  %v6649_v42 = vpop.f32.mrf.mxu2  ;;  %v11686_v26 = vld [vmem:[#allocation4 + $0x298] sm:$0xf] }
 0x376   :  { %v13056_v29 = vld [vmem:[#allocation4 + $0xd70] sm:$0xf0]  ;;  %v15211_v63 = vld [vmem:[#allocation4 + $0x2b4] sm:$0xf0] }
 0x377   :  { %6894 = vmatpush.bf16.msra.mxu1 %v12643_v18  ;;  %6901 = vmatpush.bf16.msra.mxu2 %v13091_v54  ;;  %v13059_v33 = vor.u32 %v15550_v27, %v13056_v29  ;;  %v15366_v39 = vld [vmem:[#allocation4 + $0x794] sm:$0xf]  ;;  %v16447_v52 = vpop.f32.mrf.mxu1  ;;  %v16450_v18 = vadd.f32 %v6649_v42, %v16437_v16  ;;  %v11719_v54 = vor.u32 %v15219_v25, %v11718_v62  ;;  %v15139_v57 = vld [vmem:[#allocation4 + $0x74] sm:$0xf0] }
 0x378   :  { %6882 = vmatmul.bf16.vlgmr.msra.gmra.mxu3 %v16333_v0  ;;  %v12320_v37 = vld [vmem:[#allocation4 + $0x7b0] sm:$0xf0]  ;;  %6861 = vmatpush.bf16.msrb.mxu0 %v12355_v8  ;;  %v11431_v8 = vor.u32 %v15147_v24, %v11430_v23  ;;  %v11399_v46 = vor.u32 %v15139_v57, %v11398_v7  ;;  %v12102_v28 = vld [vmem:[#allocation4 + $0x5d8] sm:$0xf] }
 0x379   :  { %6926 = vmatpush.bf16.msrb.mxu3 %v11591_v13  ;;  %v15542_v45 = vld [vmem:[#allocation4 + $0xd14] sm:$0xf]  ;;  %v12323_v36 = vor.u32 %v15366_v39, %v12320_v37  ;;  %v15203_v37 = vld [vmem:[#allocation4 + $0x274] sm:$0xf0] }
 0x37a   :  { %6895 = vmatmul.bf16.vlgmr.msra.gmra.mxu1 %v16336_v51  ;;  %v13024_v10 = vld [vmem:[#allocation4 + $0xd30] sm:$0xf0]  ;;  %v15315_v21 = vld [vmem:[#allocation4 + $0x5f4] sm:$0xf0] }
 0x37b   :  { %6939 = vmatpush.bf16.msrb.mxu1 %v11847_v19  ;;  %6902 = vmatpush.bf16.msra.mxu2 %v13059_v33  ;;  %v13027_v44 = vor.u32 %v15542_v45, %v13024_v10  ;;  %v15358_v49 = vld [vmem:[#allocation4 + $0x754] sm:$0xf]  ;;  %v16453_v19 = vadd.f32 %v6610_v15, %v16441_v35  ;;  %v16455_v6 = vpop.f32.mrf.mxu3  ;;  %v11687_v35 = vor.u32 %v15211_v63, %v11686_v26  ;;  %v11654_v33 = vld [vmem:[#allocation4 + $0x258] sm:$0xf] }
 0x37c   :  { %v12288_v20 = vld [vmem:[#allocation4 + $0x770] sm:$0xf0]  ;;  %6862 = vmatpush.bf16.msrb.mxu0 %v12323_v36  ;;  %v6612_v36 = vpop.f32.mrf.mxu0  ;;  %v12103_v59 = vor.u32 %v15315_v21, %v12102_v28  ;;  %v12614_v62 = vld [vmem:[#allocation4 + $0x9d8] sm:$0xf] }
 0x37d   :  { %6927 = vmatpush.bf16.msrb.mxu3 %v11559_v4  ;;  %v15534_v55 = vld [vmem:[#allocation4 + $0xcd4] sm:$0xf]  ;;  %v12291_v61 = vor.u32 %v15358_v49, %v12288_v20  ;;  %v6651_v39 = vpop.f32.mrf.mxu2  ;;  %v11366_v20 = vld [vmem:[#allocation4 + $0x18] sm:$0xf] }
 0x37e   :  { %v12992_v53 = vld [vmem:[#allocation4 + $0xcf0] sm:$0xf0]  ;;  %v12870_v42 = vld [vmem:[#allocation4 + $0xbd8] sm:$0xf] }
 0x37f   :  { %6940 = vmatpush.bf16.msrb.mxu1 %v11815_v2  ;;  %6903 = vmatpush.bf16.msra.mxu2 %v13027_v44  ;;  %v12995_v1 = vor.u32 %v15534_v55, %v12992_v53  ;;  %v15350_v9 = vld [vmem:[#allocation4 + $0x714] sm:$0xf]  ;;  %v6690_v30 = vpop.f32.mrf.mxu1  ;;  %v11655_v44 = vor.u32 %v15203_v37, %v11654_v33  ;;  %v15131_v55 = vld [vmem:[#allocation4 + $0x34] sm:$0xf0] }
 0x380   :  { %v12256_v38 = vld [vmem:[#allocation4 + $0x730] sm:$0xf0]  ;;  %6863 = vmatpush.bf16.msrb.mxu0 %v12291_v61  ;;  %v11622_v53 = vld [vmem:[#allocation4 + $0x218] sm:$0xf]  ;;  %v11367_v25 = vor.u32 %v15131_v55, %v11366_v20 }
 0x381   :  { %6928 = vmatpush.bf16.msrb.mxu3 %v11527_v31  ;;  %v15526_v12 = vld [vmem:[#allocation4 + $0xc94] sm:$0xf]  ;;  %v12259_v22 = vor.u32 %v15350_v9, %v12256_v38  ;;  %v15507_v9 = vld [vmem:[#allocation4 + $0xbf4] sm:$0xf0] }
 0x382   :  { %v12960_v13 = vld [vmem:[#allocation4 + $0xcb0] sm:$0xf0]  ;;  %v12070_v38 = vld [vmem:[#allocation4 + $0x598] sm:$0xf]  ;;  %v12871_v23 = vor.u32 %v15507_v9, %v12870_v42 }
 0x383   :  { %6941 = vmatpush.bf16.msrb.mxu1 %v11783_v41  ;;  %6904 = vmatpush.bf16.msra.mxu2 %v12995_v1  ;;  %v12963_v16 = vor.u32 %v15526_v12, %v12960_v13  ;;  %v15342_v27 = vld [vmem:[#allocation4 + $0x6d4] sm:$0xf]  ;;  %v6677_v58 = vpop.f32.mrf.mxu3  ;;  %v15443_v1 = vld [vmem:[#allocation4 + $0x9f4] sm:$0xf0] }
 0x384   :  { %v12224_v29 = vld [vmem:[#allocation4 + $0x6f0] sm:$0xf0]  ;;  %6864 = vmatpush.bf16.msrb.mxu0 %v12259_v22  ;;  %v15307_v12 = vld [vmem:[#allocation4 + $0x5b4] sm:$0xf0] }
 0x385   :  { %6929 = vmatpush.bf16.msrb.mxu3 %v11495_v34  ;;  %v15518_v4 = vld [vmem:[#allocation4 + $0xc54] sm:$0xf]  ;;  %v12227_v32 = vor.u32 %v15342_v27, %v12224_v29  ;;  %v12071_v24 = vor.u32 %v15307_v12, %v12070_v38  ;;  %v12582_v26 = vld [vmem:[#allocation4 + $0x998] sm:$0xf] }
 0x386   :  { %v12928_v2 = vld [vmem:[#allocation4 + $0xc70] sm:$0xf0]  ;;  %v12838_v63 = vld [vmem:[#allocation4 + $0xb98] sm:$0xf] }
 0x387   :  { %6942 = vmatpush.bf16.msrb.mxu1 %v11751_v3  ;;  %6905 = vmatpush.bf16.msra.mxu2 %v12963_v16  ;;  %v12931_v5 = vor.u32 %v15518_v4, %v12928_v2  ;;  %v15334_v45 = vld [vmem:[#allocation4 + $0x694] sm:$0xf]  ;;  %v15195_v3 = vld [vmem:[#allocation4 + $0x234] sm:$0xf0] }
 0x388   :  { %v12192_v10 = vld [vmem:[#allocation4 + $0x6b0] sm:$0xf0]  ;;  %6865 = vmatpush.bf16.msrb.mxu0 %v12227_v32  ;;  %v11623_v13 = vor.u32 %v15195_v3, %v11622_v53  ;;  %v15435_v16 = vld [vmem:[#allocation4 + $0x9b4] sm:$0xf0] }
 0x389   :  { %6930 = vmatpush.bf16.msrb.mxu3 %v11463_v56  ;;  %v15510_v31 = vld [vmem:[#allocation4 + $0xc14] sm:$0xf]  ;;  %v12195_v49 = vor.u32 %v15334_v45, %v12192_v10  ;;  %v12615_v56 = vor.u32 %v15443_v1, %v12614_v62  ;;  %v15499_v27 = vld [vmem:[#allocation4 + $0xbb4] sm:$0xf0] }
 0x38a   :  { %v12896_v41 = vld [vmem:[#allocation4 + $0xc30] sm:$0xf0]  ;;  %v12038_v4 = vld [vmem:[#allocation4 + $0x558] sm:$0xf]  ;;  %v12839_v32 = vor.u32 %v15499_v27, %v12838_v63 }
 0x38b   :  { %6943 = vmatpush.bf16.msrb.mxu1 %v11719_v54  ;;  %6906 = vmatpush.bf16.msra.mxu2 %v12931_v5  ;;  %v12899_v34 = vor.u32 %v15510_v31, %v12896_v41  ;;  %v15326_v61 = vld [vmem:[#allocation4 + $0x654] sm:$0xf]  ;;  %v15299_v2 = vld [vmem:[#allocation4 + $0x574] sm:$0xf0] }
 0x38c   :  { %v12160_v48 = vld [vmem:[#allocation4 + $0x670] sm:$0xf0]  ;;  %6866 = vmatpush.bf16.msrb.mxu0 %v12195_v49  ;;  %v12550_v57 = vld [vmem:[#allocation4 + $0x958] sm:$0xf]  ;;  %v12039_v39 = vor.u32 %v15299_v2, %v12038_v4 }
 0x38d   :  { %6931 = vmatpush.bf16.msrb.mxu3 %v11431_v8  ;;  %v12163_v15 = vor.u32 %v15326_v61, %v12160_v48  ;;  %v15318_v54 = vld [vmem:[#allocation4 + $0x614] sm:$0xf]  ;;  %v15427_v33 = vld [vmem:[#allocation4 + $0x974] sm:$0xf0] }
 0x38e   :  { %v12128_v22 = vld [vmem:[#allocation4 + $0x630] sm:$0xf0]  ;;  %v12806_v5 = vld [vmem:[#allocation4 + $0xb58] sm:$0xf]  ;;  %v12551_v36 = vor.u32 %v15427_v33, %v12550_v57 }
 0x38f   :  { %6944 = vmatpush.bf16.msrb.mxu1 %v11687_v35  ;;  %6907 = vmatpush.bf16.msra.mxu2 %v12899_v34  ;;  %v15630_v29 = vld [vmem:[#allocation4 + $0xfd4] sm:$0xf]  ;;  %v12131_v8 = vor.u32 %v15318_v54, %v12128_v22  ;;  %v12583_v35 = vor.u32 %v15435_v16, %v12582_v26  ;;  %v15491_v37 = vld [vmem:[#allocation4 + $0xb74] sm:$0xf0] }
 0x390   :  { %v13376_v30 = vld [vmem:[#allocation4 + $0xff0] sm:$0xf0]  ;;  %6867 = vmatpush.bf16.msrb.mxu0 %v12163_v15  ;;  %v12006_v31 = vld [vmem:[#allocation4 + $0x518] sm:$0xf] }
 0x391   :  { %6932 = vmatpush.bf16.msrb.mxu3 %v11399_v46  ;;  %v13379_v7 = vor.u32 %v15630_v29, %v13376_v30  ;;  %v15622_v45 = vld [vmem:[#allocation4 + $0xf94] sm:$0xf]  ;;  %v15291_v41 = vld [vmem:[#allocation4 + $0x534] sm:$0xf0]  ;;  %v12807_v46 = vor.u32 %v15491_v37, %v12806_v5  ;;  %v6662_v22 = vpop.f32.mrf.mxu0 }
 0x392   :  { %6908 = vmatmul.bf16.vlgmr.msra.gmra.mxu2 %v16360_v40  ;;  %v13344_v10 = vld [vmem:[#allocation4 + $0xfb0] sm:$0xf0]  ;;  %v12518_v21 = vld [vmem:[#allocation4 + $0x918] sm:$0xf]  ;;  %v12007_v49 = vor.u32 %v15291_v41, %v12006_v31 }
 0x393   :  { %6945 = vmatpush.bf16.msrb.mxu1 %v11655_v44  ;;  %6952 = vmatpush.bf16.msrb.mxu2 %v12103_v59  ;;  %v13347_v28 = vor.u32 %v15622_v45, %v13344_v10  ;;  %v15419_v44 = vld [vmem:[#allocation4 + $0x934] sm:$0xf0]  ;;  %v15614_v55 = vld [vmem:[#allocation4 + $0xf54] sm:$0xf] }
 0x394   :  { %6868 = vmatpush.bf16.msrb.mxu0 %v12131_v8  ;;  %v12774_v58 = vld [vmem:[#allocation4 + $0xb18] sm:$0xf]  ;;  %v13312_v53 = vld [vmem:[#allocation4 + $0xf70] sm:$0xf0]  ;;  %v12519_v48 = vor.u32 %v15419_v44, %v12518_v21 }
 0x395   :  { %6933 = vmatpush.bf16.msrb.mxu3 %v11367_v25  ;;  %v15483_v20 = vld [vmem:[#allocation4 + $0xb34] sm:$0xf0]  ;;  %v13315_v62 = vor.u32 %v15614_v55, %v13312_v53  ;;  %v6701_v38 = vpop.f32.mrf.mxu2  ;;  %v13280_v15 = vld [vmem:[#allocation4 + $0xf30] sm:$0xf0] }
 0x396   :  { %v11974_v3 = vld [vmem:[#allocation4 + $0x4d8] sm:$0xf]  ;;  %v12775_v59 = vor.u32 %v15483_v20, %v12774_v58  ;;  %v15590_v21 = vld [vmem:[#allocation4 + $0xe94] sm:$0xf] }
 0x397   :  { %6946 = vmatpush.bf16.msrb.mxu1 %v11623_v13  ;;  %6953 = vmatpush.bf16.msrb.mxu2 %v12071_v24  ;;  %v6740_v34 = vpop.f32.mrf.mxu1  ;;  %v15283_v61 = vld [vmem:[#allocation4 + $0x4f4] sm:$0xf0]  ;;  %v15606_v13 = vld [vmem:[#allocation4 + $0xf14] sm:$0xf]  ;;  %v6663_v24 = vadd.f32 %v6662_v22, %v16450_v18 }
 0x398   :  { %6934 = vmatmul.bf16.vlgmr.msrb.gmra.mxu3 %v16311_v47  ;;  %6913 = vmatpush.bf16.msra.mxu0 %v13379_v7  ;;  %v12486_v1 = vld [vmem:[#allocation4 + $0x8d8] sm:$0xf]  ;;  %v11975_v9 = vor.u32 %v15283_v61, %v11974_v3  ;;  %v13283_v63 = vor.u32 %v15606_v13, %v13280_v15  ;;  %v11592_v13 = vld [vmem:[#allocation4 + $0x1f8] sm:$0xf0] }
 0x399   :  { %6978 = vmatpush.bf16.msra.mxu3 %v12615_v56  ;;  %6869 = vmatmul.bf16.vlgmr.msrb.gmra.mxu0 %v16322_v14  ;;  %v15411_v42 = vld [vmem:[#allocation4 + $0x8f4] sm:$0xf0]  ;;  %v6676_v7 = vadd.f32 %v16455_v6, %v6663_v24  ;;  %v13216_v6 = vld [vmem:[#allocation4 + $0xeb0] sm:$0xf0]  ;;  %v6664_v20 = vpop.f32.mrf.mxu0  ;;  %v15247_v15 = vld [vmem:[#allocation4 + $0x3dc] sm:$0xf] }
 0x39a   :  { %6947 = vmatmul.bf16.vlgmr.msrb.gmra.mxu1 %v16313_v50  ;;  %v12742_v25 = vld [vmem:[#allocation4 + $0xad8] sm:$0xf] }
 0x39b   :  { %6991 = vmatpush.bf16.msra.mxu1 %v12871_v23  ;;  %6954 = vmatpush.bf16.msrb.mxu2 %v12039_v39  ;;  %v15475_v12 = vld [vmem:[#allocation4 + $0xaf4] sm:$0xf0]  ;;  %v12487_v23 = vor.u32 %v15411_v42, %v12486_v1  ;;  %v6727_v16 = vpop.f32.mrf.mxu3  ;;  %v6689_v41 = vadd.f32 %v16447_v52, %v6676_v7  ;;  %v13219_v52 = vor.u32 %v15590_v21, %v13216_v6 }
 0x39c   :  { %6914 = vmatpush.bf16.msra.mxu0 %v13347_v28  ;;  %v11942_v56 = vld [vmem:[#allocation4 + $0x498] sm:$0xf]  ;;  %v12743_v26 = vor.u32 %v15475_v12, %v12742_v25  ;;  %v16462_v4 = vadd.f32 %v6740_v34, %v6727_v16  ;;  %v15582_v25 = vld [vmem:[#allocation4 + $0xe54] sm:$0xf]  ;;  %v15183_v12 = vld [vmem:[#allocation4 + $0x1dc] sm:$0xf] }
 0x39d   :  { %6979 = vmatpush.bf16.msra.mxu3 %v12583_v35  ;;  %v15275_v54 = vld [vmem:[#allocation4 + $0x4b4] sm:$0xf0]  ;;  %v15598_v35 = vld [vmem:[#allocation4 + $0xed4] sm:$0xf]  ;;  %v11595_v16 = vor.u32 %v15183_v12, %v11592_v13  ;;  %v15151_v12 = vld [vmem:[#allocation4 + $0xdc] sm:$0xf] }
 0x39e   :  { %v12454_v27 = vld [vmem:[#allocation4 + $0x898] sm:$0xf]  ;;  %v11943_v2 = vor.u32 %v15275_v54, %v11942_v56  ;;  %v11848_v54 = vld [vmem:[#allocation4 + $0x3f8] sm:$0xf0] }
 0x39f   :  { %6992 = vmatpush.bf16.msra.mxu1 %v12839_v32  ;;  %6955 = vmatpush.bf16.msrb.mxu2 %v12007_v49  ;;  %v15403_v29 = vld [vmem:[#allocation4 + $0x8b4] sm:$0xf0]  ;;  %v13248_v32 = vld [vmem:[#allocation4 + $0xef0] sm:$0xf0]  ;;  %v6742_v57 = vpop.f32.mrf.mxu1  ;;  %v16466_v49 = vadd.f32 %v6701_v38, %v6689_v41  ;;  %v15231_v41 = vld [vmem:[#allocation4 + $0x35c] sm:$0xf] }
 0x3a0   :  { %6915 = vmatpush.bf16.msra.mxu0 %v13315_v62  ;;  %v12710_v30 = vld [vmem:[#allocation4 + $0xa98] sm:$0xf]  ;;  %v12455_v18 = vor.u32 %v15403_v29, %v12454_v27  ;;  %v13251_v37 = vor.u32 %v15598_v35, %v13248_v32  ;;  %v13152_v27 = vld [vmem:[#allocation4 + $0xe30] sm:$0xf0]  ;;  %v11851_v29 = vor.u32 %v15247_v15, %v11848_v54  ;;  %v15239_v35 = vld [vmem:[#allocation4 + $0x39c] sm:$0xf] }
 0x3a1   :  { %6980 = vmatpush.bf16.msra.mxu3 %v12551_v36  ;;  %v15467_v8 = vld [vmem:[#allocation4 + $0xab4] sm:$0xf0]  ;;  %v11816_v32 = vld [vmem:[#allocation4 + $0x3b8] sm:$0xf0] }
 0x3a2   :  { %v11910_v33 = vld [vmem:[#allocation4 + $0x458] sm:$0xf]  ;;  %v12711_v39 = vor.u32 %v15467_v8, %v12710_v30  ;;  %v11560_v8 = vld [vmem:[#allocation4 + $0x1b8] sm:$0xf0] }
 0x3a3   :  { %6993 = vmatpush.bf16.msra.mxu1 %v12807_v46  ;;  %6956 = vmatpush.bf16.msrb.mxu2 %v11975_v9  ;;  %v15267_v5 = vld [vmem:[#allocation4 + $0x474] sm:$0xf0]  ;;  %v6703_v46 = vpop.f32.mrf.mxu2  ;;  %v6729_v61 = vpop.f32.mrf.mxu3  ;;  %v13184_v9 = vld [vmem:[#allocation4 + $0xe70] sm:$0xf0]  ;;  %v11464_v13 = vld [vmem:[#allocation4 + $0xf8] sm:$0xf0] }
 0x3a4   :  { %6916 = vmatpush.bf16.msra.mxu0 %v13283_v63  ;;  %v12422_v45 = vld [vmem:[#allocation4 + $0x858] sm:$0xf]  ;;  %v11911_v36 = vor.u32 %v15267_v5, %v11910_v33  ;;  %v15574_v63 = vld [vmem:[#allocation4 + $0xe14] sm:$0xf]  ;;  %v11784_v46 = vld [vmem:[#allocation4 + $0x378] sm:$0xf0] }
 0x3a5   :  { %6981 = vmatpush.bf16.msra.mxu3 %v12519_v48  ;;  %v15395_v10 = vld [vmem:[#allocation4 + $0x874] sm:$0xf0]  ;;  %v11787_v20 = vor.u32 %v15231_v41, %v11784_v46  ;;  %v15215_v15 = vld [vmem:[#allocation4 + $0x2dc] sm:$0xf] }
 0x3a6   :  { %v12678_v31 = vld [vmem:[#allocation4 + $0xa58] sm:$0xf]  ;;  %v12423_v55 = vor.u32 %v15395_v10, %v12422_v45  ;;  %v15167_v10 = vld [vmem:[#allocation4 + $0x15c] sm:$0xf] }
 0x3a7   :  { %6994 = vmatpush.bf16.msra.mxu1 %v12775_v59  ;;  %6957 = vmatpush.bf16.msrb.mxu2 %v11943_v2  ;;  %v15459_v28 = vld [vmem:[#allocation4 + $0xa74] sm:$0xf0]  ;;  %v15175_v2 = vld [vmem:[#allocation4 + $0x19c] sm:$0xf] }
 0x3a8   :  { %v11878_v44 = vld [vmem:[#allocation4 + $0x418] sm:$0xf]  ;;  %6917 = vmatpush.bf16.msra.mxu0 %v13251_v37  ;;  %v12679_v3 = vor.u32 %v15459_v28, %v12678_v31  ;;  %v11819_v37 = vor.u32 %v15239_v35, %v11816_v32  ;;  %v11528_v31 = vld [vmem:[#allocation4 + $0x178] sm:$0xf0] }
 0x3a9   :  { %6982 = vmatpush.bf16.msra.mxu3 %v12487_v23  ;;  %v15259_v58 = vld [vmem:[#allocation4 + $0x434] sm:$0xf0]  ;;  %v15143_v32 = vld [vmem:[#allocation4 + $0x9c] sm:$0xf] }
 0x3aa   :  { %v13126_v53 = vld [vmem:[#allocation4 + $0xdd8] sm:$0xf]  ;;  %v11879_v1 = vor.u32 %v15259_v58, %v11878_v44  ;;  %v11531_v58 = vor.u32 %v15167_v10, %v11528_v31  ;;  %v15135_v41 = vld [vmem:[#allocation4 + $0x5c] sm:$0xf] }
 0x3ab   :  { %6995 = vmatpush.bf16.msra.mxu1 %v12743_v26  ;;  %v15571_v34 = vld [vmem:[#allocation4 + $0xdf4] sm:$0xf0]  ;;  %6958 = vmatpush.bf16.msrb.mxu2 %v11911_v36  ;;  %v13187_v26 = vor.u32 %v15582_v25, %v13184_v9  ;;  %v15199_v46 = vld [vmem:[#allocation4 + $0x25c] sm:$0xf] }
 0x3ac   :  { %v12390_v48 = vld [vmem:[#allocation4 + $0x818] sm:$0xf]  ;;  %v13127_v38 = vor.u32 %v15571_v34, %v13126_v53  ;;  %6918 = vmatpush.bf16.msra.mxu0 %v13219_v52  ;;  %v15159_v53 = vld [vmem:[#allocation4 + $0x11c] sm:$0xf] }
 0x3ad   :  { %6983 = vmatpush.bf16.msra.mxu3 %v12455_v18  ;;  %v15387_v59 = vld [vmem:[#allocation4 + $0x834] sm:$0xf0]  ;;  %v13155_v18 = vor.u32 %v15574_v63, %v13152_v27  ;;  %v11496_v34 = vld [vmem:[#allocation4 + $0x138] sm:$0xf0] }
 0x3ae   :  { %v12646_v62 = vld [vmem:[#allocation4 + $0xa18] sm:$0xf]  ;;  %v12391_v56 = vor.u32 %v15387_v59, %v12390_v48  ;;  %v11752_v52 = vld [vmem:[#allocation4 + $0x338] sm:$0xf0]  ;;  %v11499_v25 = vor.u32 %v15159_v53, %v11496_v34 }
 0x3af   :  { %6996 = vmatpush.bf16.msra.mxu1 %v12711_v39  ;;  %v15451_v42 = vld [vmem:[#allocation4 + $0xa34] sm:$0xf0]  ;;  %6959 = vmatpush.bf16.msrb.mxu2 %v11879_v1  ;;  %v11563_v39 = vor.u32 %v15175_v2, %v11560_v8 }
 0x3b0   :  { %v13094_v22 = vld [vmem:[#allocation4 + $0xd98] sm:$0xf]  ;;  %v12647_v24 = vor.u32 %v15451_v42, %v12646_v62  ;;  %6919 = vmatpush.bf16.msra.mxu0 %v13187_v26 }
 0x3b1   :  { %6984 = vmatpush.bf16.msra.mxu3 %v12423_v55  ;;  %v15563_v23 = vld [vmem:[#allocation4 + $0xdb4] sm:$0xf0]  ;;  %v6714_v27 = vpop.f32.mrf.mxu0 }
 0x3b2   :  { %v13095_v30 = vor.u32 %v15563_v23, %v13094_v22  ;;  %v12358_v7 = vld [vmem:[#allocation4 + $0x7d8] sm:$0xf]  ;;  %6960 = vmatmul.bf16.vlgmr.msrb.gmra.mxu2 %v16320_v11  ;;  %v11720_v22 = vld [vmem:[#allocation4 + $0x2f8] sm:$0xf0] }
 0x3b3   :  { %6997 = vmatpush.bf16.msra.mxu1 %v12679_v3  ;;  %7004 = vmatpush.bf16.msra.mxu2 %v13127_v38  ;;  %v15379_v57 = vld [vmem:[#allocation4 + $0x7f4] sm:$0xf0]  ;;  %v15223_v3 = vld [vmem:[#allocation4 + $0x31c] sm:$0xf]  ;;  %v11723_v2 = vor.u32 %v15215_v15, %v11720_v22 }
 0x3b4   :  { %v13062_v33 = vld [vmem:[#allocation4 + $0xd58] sm:$0xf]  ;;  %v12359_v45 = vor.u32 %v15379_v57, %v12358_v7  ;;  %6920 = vmatpush.bf16.msra.mxu0 %v13155_v18  ;;  %v11755_v9 = vor.u32 %v15223_v3, %v11752_v52  ;;  %v11432_v7 = vld [vmem:[#allocation4 + $0xb8] sm:$0xf0] }
 0x3b5   :  { %6985 = vmatpush.bf16.msra.mxu3 %v12391_v56  ;;  %v15555_v5 = vld [vmem:[#allocation4 + $0xd74] sm:$0xf0]  ;;  %v6753_v54 = vpop.f32.mrf.mxu2  ;;  %v15207_v57 = vld [vmem:[#allocation4 + $0x29c] sm:$0xf]  ;;  %v11435_v10 = vor.u32 %v15143_v32, %v11432_v7 }
 0x3b6   :  { %v13063_v36 = vor.u32 %v15555_v5, %v13062_v33  ;;  %v12326_v28 = vld [vmem:[#allocation4 + $0x798] sm:$0xf]  ;;  %v16475_v26 = vadd.f32 %v6753_v54, %v16462_v4  ;;  %v11688_v33 = vld [vmem:[#allocation4 + $0x2b8] sm:$0xf0] }
 0x3b7   :  { %6998 = vmatpush.bf16.msra.mxu1 %v12647_v24  ;;  %7005 = vmatpush.bf16.msra.mxu2 %v13095_v30  ;;  %v15371_v21 = vld [vmem:[#allocation4 + $0x7b4] sm:$0xf0]  ;;  %v16472_v62 = vpop.f32.mrf.mxu1  ;;  %v16478_v30 = vadd.f32 %v6714_v27, %v16466_v49  ;;  %v11691_v49 = vor.u32 %v15207_v57, %v11688_v33  ;;  %v15311_v3 = vld [vmem:[#allocation4 + $0x5dc] sm:$0xf] }
 0x3b8   :  { %6986 = vmatmul.bf16.vlgmr.msra.gmra.mxu3 %v16333_v0  ;;  %v13030_v6 = vld [vmem:[#allocation4 + $0xd18] sm:$0xf]  ;;  %6965 = vmatpush.bf16.msrb.mxu0 %v12359_v45  ;;  %v12327_v55 = vor.u32 %v15371_v21, %v12326_v28  ;;  %v12616_v54 = vld [vmem:[#allocation4 + $0x9f8] sm:$0xf0] }
 0x3b9   :  { %7030 = vmatpush.bf16.msrb.mxu3 %v11595_v16  ;;  %v15547_v44 = vld [vmem:[#allocation4 + $0xd34] sm:$0xf0]  ;;  %6921 = vmatmul.bf16.vlgmr.msra.gmra.mxu0 %v16370_v43  ;;  %v6716_v53 = vpop.f32.mrf.mxu0  ;;  %v15503_v22 = vld [vmem:[#allocation4 + $0xbdc] sm:$0xf] }
 0x3ba   :  { %6999 = vmatmul.bf16.vlgmr.msra.gmra.mxu1 %v16336_v51  ;;  %v13031_v61 = vor.u32 %v15547_v44, %v13030_v6  ;;  %v12294_v48 = vld [vmem:[#allocation4 + $0x758] sm:$0xf]  ;;  %v11656_v6 = vld [vmem:[#allocation4 + $0x278] sm:$0xf0] }
 0x3bb   :  { %7043 = vmatpush.bf16.msrb.mxu1 %v11851_v29  ;;  %7006 = vmatpush.bf16.msra.mxu2 %v13063_v36  ;;  %v15363_v59 = vld [vmem:[#allocation4 + $0x774] sm:$0xf0]  ;;  %v11467_v29 = vor.u32 %v15151_v12, %v11464_v13  ;;  %v16480_v8 = vpop.f32.mrf.mxu3  ;;  %v11400_v36 = vld [vmem:[#allocation4 + $0x78] sm:$0xf0]  ;;  %v11659_v52 = vor.u32 %v15199_v46, %v11656_v6 }
 0x3bc   :  { %v12998_v1 = vld [vmem:[#allocation4 + $0xcd8] sm:$0xf]  ;;  %6966 = vmatpush.bf16.msrb.mxu0 %v12327_v55  ;;  %v12295_v38 = vor.u32 %v15363_v59, %v12294_v48  ;;  %v11403_v34 = vor.u32 %v15135_v41, %v11400_v36  ;;  %v12584_v33 = vld [vmem:[#allocation4 + $0x9b8] sm:$0xf0] }
 0x3bd   :  { %7031 = vmatpush.bf16.msrb.mxu3 %v11563_v39  ;;  %v15539_v42 = vld [vmem:[#allocation4 + $0xcf4] sm:$0xf0]  ;;  %v6755_v21 = vpop.f32.mrf.mxu2  ;;  %v15423_v46 = vld [vmem:[#allocation4 + $0x95c] sm:$0xf] }
 0x3be   :  { %v12999_v56 = vor.u32 %v15539_v42, %v12998_v1  ;;  %v12262_v23 = vld [vmem:[#allocation4 + $0x718] sm:$0xf]  ;;  %v15127_v1 = vld [vmem:[#allocation4 + $0x1c] sm:$0xf] }
 0x3bf   :  { %7044 = vmatpush.bf16.msrb.mxu1 %v11819_v37  ;;  %7007 = vmatpush.bf16.msra.mxu2 %v13031_v61  ;;  %v15355_v24 = vld [vmem:[#allocation4 + $0x734] sm:$0xf0]  ;;  %v6794_v39 = vpop.f32.mrf.mxu1  ;;  %v12104_v61 = vld [vmem:[#allocation4 + $0x5f8] sm:$0xf0] }
 0x3c0   :  { %v12966_v16 = vld [vmem:[#allocation4 + $0xc98] sm:$0xf]  ;;  %6967 = vmatpush.bf16.msrb.mxu0 %v12295_v38  ;;  %v12263_v35 = vor.u32 %v15355_v24, %v12262_v23  ;;  %v11368_v42 = vld [vmem:[#allocation4 + $0x38] sm:$0xf0]  ;;  %v12107_v15 = vor.u32 %v15311_v3, %v12104_v61 }
 0x3c1   :  { %7032 = vmatpush.bf16.msrb.mxu3 %v11531_v58  ;;  %v15531_v63 = vld [vmem:[#allocation4 + $0xcb4] sm:$0xf0]  ;;  %v11624_v38 = vld [vmem:[#allocation4 + $0x238] sm:$0xf0]  ;;  %v11371_v23 = vor.u32 %v15127_v1, %v11368_v42 }
 0x3c2   :  { %v12967_v4 = vor.u32 %v15531_v63, %v12966_v16  ;;  %v12230_v5 = vld [vmem:[#allocation4 + $0x6d8] sm:$0xf]  ;;  %v12872_v24 = vld [vmem:[#allocation4 + $0xbf8] sm:$0xf0] }
 0x3c3   :  { %7045 = vmatpush.bf16.msrb.mxu1 %v11787_v20  ;;  %7008 = vmatpush.bf16.msra.mxu2 %v12999_v56  ;;  %v15347_v18 = vld [vmem:[#allocation4 + $0x6f4] sm:$0xf0]  ;;  %v6781_v48 = vpop.f32.mrf.mxu3  ;;  %v15439_v56 = vld [vmem:[#allocation4 + $0x9dc] sm:$0xf]  ;;  %v12875_v7 = vor.u32 %v15503_v22, %v12872_v24 }
 0x3c4   :  { %v12934_v37 = vld [vmem:[#allocation4 + $0xc58] sm:$0xf]  ;;  %6968 = vmatpush.bf16.msrb.mxu0 %v12263_v35  ;;  %v12231_v31 = vor.u32 %v15347_v18, %v12230_v5  ;;  %v15303_v16 = vld [vmem:[#allocation4 + $0x59c] sm:$0xf] }
 0x3c5   :  { %7033 = vmatpush.bf16.msrb.mxu3 %v11499_v25  ;;  %v15523_v45 = vld [vmem:[#allocation4 + $0xc74] sm:$0xf0]  ;;  %v15191_v25 = vld [vmem:[#allocation4 + $0x21c] sm:$0xf] }
 0x3c6   :  { %v12935_v28 = vor.u32 %v15523_v45, %v12934_v37  ;;  %v12198_v44 = vld [vmem:[#allocation4 + $0x698] sm:$0xf]  ;;  %v12072_v63 = vld [vmem:[#allocation4 + $0x5b8] sm:$0xf0]  ;;  %v11627_v27 = vor.u32 %v15191_v25, %v11624_v38 }
 0x3c7   :  { %7046 = vmatpush.bf16.msrb.mxu1 %v11755_v9  ;;  %7009 = vmatpush.bf16.msra.mxu2 %v12967_v4  ;;  %v15339_v58 = vld [vmem:[#allocation4 + $0x6b4] sm:$0xf0]  ;;  %v12075_v57 = vor.u32 %v15303_v16, %v12072_v63  ;;  %v15431_v4 = vld [vmem:[#allocation4 + $0x99c] sm:$0xf] }
 0x3c8   :  { %v12902_v20 = vld [vmem:[#allocation4 + $0xc18] sm:$0xf]  ;;  %6969 = vmatpush.bf16.msrb.mxu0 %v12231_v31  ;;  %v12199_v59 = vor.u32 %v15339_v58, %v12198_v44  ;;  %v15495_v5 = vld [vmem:[#allocation4 + $0xb9c] sm:$0xf]  ;;  %v12587_v31 = vor.u32 %v15431_v4, %v12584_v33 }
 0x3c9   :  { %7034 = vmatpush.bf16.msrb.mxu3 %v11467_v29  ;;  %v15515_v55 = vld [vmem:[#allocation4 + $0xc34] sm:$0xf0]  ;;  %v12840_v18 = vld [vmem:[#allocation4 + $0xbb8] sm:$0xf0] }
 0x3ca   :  { %v12903_v9 = vor.u32 %v15515_v55, %v12902_v20  ;;  %v12166_v12 = vld [vmem:[#allocation4 + $0x658] sm:$0xf]  ;;  %v15295_v45 = vld [vmem:[#allocation4 + $0x55c] sm:$0xf]  ;;  %v12843_v41 = vor.u32 %v15495_v5, %v12840_v18 }
 0x3cb   :  { %7047 = vmatpush.bf16.msrb.mxu1 %v11723_v2  ;;  %7010 = vmatpush.bf16.msra.mxu2 %v12935_v28  ;;  %v15331_v13 = vld [vmem:[#allocation4 + $0x674] sm:$0xf0]  ;;  %v12619_v2 = vor.u32 %v15439_v56, %v12616_v54  ;;  %v12552_v28 = vld [vmem:[#allocation4 + $0x978] sm:$0xf0] }
 0x3cc   :  { %6970 = vmatpush.bf16.msrb.mxu0 %v12199_v59  ;;  %v12167_v29 = vor.u32 %v15331_v13, %v12166_v12  ;;  %v12134_v35 = vld [vmem:[#allocation4 + $0x618] sm:$0xf]  ;;  %v15487_v21 = vld [vmem:[#allocation4 + $0xb5c] sm:$0xf] }
 0x3cd   :  { %7035 = vmatpush.bf16.msrb.mxu3 %v11435_v10  ;;  %v15323_v32 = vld [vmem:[#allocation4 + $0x634] sm:$0xf0]  ;;  %v12040_v10 = vld [vmem:[#allocation4 + $0x578] sm:$0xf0] }
 0x3ce   :  { %v13382_v39 = vld [vmem:[#allocation4 + $0xfd8] sm:$0xf]  ;;  %v12043_v6 = vor.u32 %v15295_v45, %v12040_v10  ;;  %v12808_v44 = vld [vmem:[#allocation4 + $0xb78] sm:$0xf0] }
 0x3cf   :  { %7048 = vmatpush.bf16.msrb.mxu1 %v11691_v49  ;;  %7011 = vmatpush.bf16.msra.mxu2 %v12903_v9  ;;  %v15635_v37 = vld [vmem:[#allocation4 + $0xff4] sm:$0xf0]  ;;  %v12135_v49 = vor.u32 %v15323_v32, %v12134_v35  ;;  %v15287_v55 = vld [vmem:[#allocation4 + $0x51c] sm:$0xf]  ;;  %v12811_v3 = vor.u32 %v15487_v21, %v12808_v44 }
 0x3d0   :  { %6971 = vmatpush.bf16.msrb.mxu0 %v12167_v29  ;;  %v13383_v36 = vor.u32 %v15635_v37, %v13382_v39  ;;  %v13350_v58 = vld [vmem:[#allocation4 + $0xf98] sm:$0xf]  ;;  %v12008_v53 = vld [vmem:[#allocation4 + $0x538] sm:$0xf0] }
 0x3d1   :  { %7036 = vmatpush.bf16.msrb.mxu3 %v11403_v34  ;;  %v15627_v20 = vld [vmem:[#allocation4 + $0xfb4] sm:$0xf0]  ;;  %v12555_v34 = vor.u32 %v15423_v46, %v12552_v28  ;;  %v12520_v48 = vld [vmem:[#allocation4 + $0x938] sm:$0xf0] }
 0x3d2   :  { %7012 = vmatmul.bf16.vlgmr.msra.gmra.mxu2 %v16360_v40  ;;  %v13351_v61 = vor.u32 %v15627_v20, %v13350_v58  ;;  %v15479_v59 = vld [vmem:[#allocation4 + $0xb1c] sm:$0xf]  ;;  %v15619_v42 = vld [vmem:[#allocation4 + $0xf74] sm:$0xf0]  ;;  %v6766_v35 = vpop.f32.mrf.mxu0 }
 0x3d3   :  { %7049 = vmatpush.bf16.msrb.mxu1 %v11659_v52  ;;  %7056 = vmatpush.bf16.msrb.mxu2 %v12107_v15  ;;  %v15415_v52 = vld [vmem:[#allocation4 + $0x91c] sm:$0xf]  ;;  %v13286_v63 = vld [vmem:[#allocation4 + $0xf18] sm:$0xf] }
 0x3d4   :  { %6972 = vmatpush.bf16.msrb.mxu0 %v12135_v49  ;;  %v12776_v1 = vld [vmem:[#allocation4 + $0xb38] sm:$0xf0]  ;;  %v12523_v12 = vor.u32 %v15415_v52, %v12520_v48  ;;  %v13254_v49 = vld [vmem:[#allocation4 + $0xed8] sm:$0xf] }
 0x3d5   :  { %7037 = vmatpush.bf16.msrb.mxu3 %v11371_v23  ;;  %v15279_v9 = vld [vmem:[#allocation4 + $0x4dc] sm:$0xf]  ;;  %v12779_v13 = vor.u32 %v15479_v59, %v12776_v1  ;;  %v6805_v24 = vpop.f32.mrf.mxu2 }
 0x3d6   :  { %v11976_v38 = vld [vmem:[#allocation4 + $0x4f8] sm:$0xf0] }
 0x3d7   :  { %7050 = vmatpush.bf16.msrb.mxu1 %v11627_v27  ;;  %7057 = vmatpush.bf16.msrb.mxu2 %v12075_v57  ;;  %v6844_v25 = vpop.f32.mrf.mxu1  ;;  %v15407_v56 = vld [vmem:[#allocation4 + $0x8dc] sm:$0xf]  ;;  %v11979_v23 = vor.u32 %v15279_v9, %v11976_v38  ;;  %v15611_v27 = vld [vmem:[#allocation4 + $0xf34] sm:$0xf0] }
 0x3d8   :  { %7038 = vmatmul.bf16.vlgmr.msrb.gmra.mxu3 %v16311_v47  ;;  %7017 = vmatpush.bf16.msra.mxu0 %v13383_v36  ;;  %v12011_v47 = vor.u32 %v15287_v55, %v12008_v53  ;;  %v12488_v54 = vld [vmem:[#allocation4 + $0x8f8] sm:$0xf0]  ;;  %v13287_v33 = vor.u32 %v15611_v27, %v13286_v63  ;;  %v13630_v63 = vld [vmem:[#allocation6 + $0x1e0] sm:$0xf] }
 0x3d9   :  { %7082 = vmatpush.bf16.msra.mxu3 %v12619_v2  ;;  %6973 = vmatmul.bf16.vlgmr.msrb.gmra.mxu0 %v16322_v14  ;;  %v15471_v22 = vld [vmem:[#allocation4 + $0xadc] sm:$0xf]  ;;  %v12491_v32 = vor.u32 %v15407_v56, %v12488_v54  ;;  %v13190_v54 = vld [vmem:[#allocation4 + $0xe58] sm:$0xf] }
 0x3da   :  { %7051 = vmatmul.bf16.vlgmr.msrb.gmra.mxu1 %v16313_v50  ;;  %v13318_v50 = vld [vmem:[#allocation4 + $0xf58] sm:$0xf]  ;;  %v12744_v16 = vld [vmem:[#allocation4 + $0xaf8] sm:$0xf0] }
 0x3db   :  { %7095 = vmatpush.bf16.msra.mxu1 %v12875_v7  ;;  %7058 = vmatpush.bf16.msrb.mxu2 %v12043_v6  ;;  %v13319_v15 = vor.u32 %v15619_v42, %v13318_v50  ;;  %v15271_v29 = vld [vmem:[#allocation4 + $0x49c] sm:$0xf]  ;;  %v6767_v7 = vadd.f32 %v6766_v35, %v16475_v26  ;;  %v12747_v57 = vor.u32 %v15471_v22, %v12744_v16  ;;  %v6831_v4 = vpop.f32.mrf.mxu3  ;;  %v15587_v22 = vld [vmem:[#allocation4 + $0xe74] sm:$0xf0]  ;;  %v15666_v16 = vld [vmem:[#allocation6 + $0xec] sm:$0xf0] }
 0x3dc   :  { %7018 = vmatpush.bf16.msra.mxu0 %v13351_v61  ;;  %v11944_v2 = vld [vmem:[#allocation4 + $0x4b8] sm:$0xf0]  ;;  %v16487_v37 = vadd.f32 %v6844_v25, %v6831_v4  ;;  %v13222_v61 = vld [vmem:[#allocation4 + $0xe98] sm:$0xf] }
 0x3dd   :  { %7083 = vmatpush.bf16.msra.mxu3 %v12587_v31  ;;  %v15399_v5 = vld [vmem:[#allocation4 + $0x89c] sm:$0xf]  ;;  %v11947_v45 = vor.u32 %v15271_v29, %v11944_v2  ;;  %v15603_v31 = vld [vmem:[#allocation4 + $0xef4] sm:$0xf0]  ;;  %v15698_v29 = vld [vmem:[#allocation6 + $0x1ec] sm:$0xf0] }
 0x3de   :  { %v12456_v18 = vld [vmem:[#allocation4 + $0x8b8] sm:$0xf0]  ;;  %v13255_v6 = vor.u32 %v15603_v31, %v13254_v49  ;;  %v13158_v4 = vld [vmem:[#allocation4 + $0xe18] sm:$0xf]  ;;  %v15694_v49 = vld [vmem:[#allocation6 + $0x1cc] sm:$0xf0] }
 0x3df   :  { %7096 = vmatpush.bf16.msra.mxu1 %v12843_v41  ;;  %7059 = vmatpush.bf16.msrb.mxu2 %v12011_v47  ;;  %v15463_v39 = vld [vmem:[#allocation4 + $0xa9c] sm:$0xf]  ;;  %v6780_v41 = vadd.f32 %v16480_v8, %v6767_v7  ;;  %v6846_v36 = vpop.f32.mrf.mxu1  ;;  %v12459_v26 = vor.u32 %v15399_v5, %v12456_v18  ;;  %v15595_v8 = vld [vmem:[#allocation4 + $0xeb4] sm:$0xf0]  ;;  %v6768_v47 = vpop.f32.mrf.mxu0  ;;  %v13191_v7 = vor.u32 %v15587_v22, %v13190_v54  ;;  %v15650_v54 = vld [vmem:[#allocation6 + $0x6c] sm:$0xf0] }
 0x3e0   :  { %7019 = vmatpush.bf16.msra.mxu0 %v13319_v15  ;;  %v12712_v10 = vld [vmem:[#allocation4 + $0xab8] sm:$0xf0]  ;;  %v13631_v5 = vor.u32 %v15698_v29, %v13630_v63  ;;  %v13454_v47 = vld [vmem:[#allocation6 + $0x80] sm:$0xf] }
 0x3e1   :  { %7084 = vmatpush.bf16.msra.mxu3 %v12555_v34  ;;  %v15263_v46 = vld [vmem:[#allocation4 + $0x45c] sm:$0xf]  ;;  %v12715_v21 = vor.u32 %v15463_v39, %v12712_v10  ;;  %v6793_v55 = vadd.f32 %v16472_v62, %v6780_v41  ;;  %v6807_v34 = vpop.f32.mrf.mxu2  ;;  %v13223_v62 = vor.u32 %v15595_v8, %v13222_v61  ;;  %v13486_v39 = vld [vmem:[#allocation6 + $0xc0] sm:$0xf] }
 0x3e2   :  { %v11912_v28 = vld [vmem:[#allocation4 + $0x478] sm:$0xf0]  ;;  %v13614_v10 = vld [vmem:[#allocation6 + $0x1c0] sm:$0xf] }
 0x3e3   :  { %7097 = vmatpush.bf16.msra.mxu1 %v12811_v3  ;;  %7060 = vmatpush.bf16.msrb.mxu2 %v11979_v23  ;;  %v15391_v44 = vld [vmem:[#allocation4 + $0x85c] sm:$0xf]  ;;  %v11915_v53 = vor.u32 %v15263_v46, %v11912_v28  ;;  %v16491_v59 = vadd.f32 %v6805_v24, %v6793_v55  ;;  %v6833_v9 = vpop.f32.mrf.mxu3  ;;  %v13502_v24 = vld [vmem:[#allocation6 + $0xe0] sm:$0xf] }
 0x3e4   :  { %7020 = vmatpush.bf16.msra.mxu0 %v13287_v33  ;;  %v12424_v58 = vld [vmem:[#allocation4 + $0x878] sm:$0xf0]  ;;  %v15579_v33 = vld [vmem:[#allocation4 + $0xe34] sm:$0xf0]  ;;  %v13566_v22 = vld [vmem:[#allocation6 + $0x160] sm:$0xf] }
 0x3e5   :  { %7085 = vmatpush.bf16.msra.mxu3 %v12523_v12  ;;  %v15455_v20 = vld [vmem:[#allocation4 + $0xa5c] sm:$0xf]  ;;  %v12427_v1 = vor.u32 %v15391_v44, %v12424_v58  ;;  %v13159_v28 = vor.u32 %v15579_v33, %v13158_v4  ;;  %v13470_v44 = vld [vmem:[#allocation6 + $0xa0] sm:$0xf]  ;;  %v15658_v58 = vld [vmem:[#allocation6 + $0xac] sm:$0xf0] }
 0x3e6   :  { %v12680_v3 = vld [vmem:[#allocation4 + $0xa78] sm:$0xf0]  ;;  %v13471_v8 = vor.u32 %v15658_v58, %v13470_v44  ;;  %v13422_v33 = vld [vmem:[#allocation6 + $0x40] sm:$0xf] }
 0x3e7   :  { %7098 = vmatpush.bf16.msra.mxu1 %v12779_v13  ;;  %7061 = vmatpush.bf16.msrb.mxu2 %v11947_v45  ;;  %v15255_v52 = vld [vmem:[#allocation4 + $0x41c] sm:$0xf]  ;;  %v12683_v25 = vor.u32 %v15455_v20, %v12680_v3  ;;  %v15662_v45 = vld [vmem:[#allocation6 + $0xcc] sm:$0xf0]  ;;  %v13598_v20 = vld [vmem:[#allocation6 + $0x1a0] sm:$0xf] }
 0x3e8   :  { %v11880_v48 = vld [vmem:[#allocation4 + $0x438] sm:$0xf0]  ;;  %7021 = vmatpush.bf16.msra.mxu0 %v13255_v6  ;;  %v13534_v44 = vld [vmem:[#allocation6 + $0x120] sm:$0xf] }
 0x3e9   :  { %7086 = vmatpush.bf16.msra.mxu3 %v12491_v32  ;;  %v15567_v50 = vld [vmem:[#allocation4 + $0xddc] sm:$0xf]  ;;  %v11883_v15 = vor.u32 %v15255_v52, %v11880_v48 }
 0x3ea   :  { %v13128_v42 = vld [vmem:[#allocation4 + $0xdf8] sm:$0xf0] }
 0x3eb   :  { %7099 = vmatpush.bf16.msra.mxu1 %v12747_v57  ;;  %v15383_v38 = vld [vmem:[#allocation4 + $0x81c] sm:$0xf]  ;;  %7062 = vmatpush.bf16.msrb.mxu2 %v11915_v53  ;;  %v13131_v23 = vor.u32 %v15567_v50, %v13128_v42  ;;  %v13503_v57 = vor.u32 %v15666_v16, %v13502_v24  ;;  %v13582_v50 = vld [vmem:[#allocation6 + $0x180] sm:$0xf]  ;;  %v15686_v42 = vld [vmem:[#allocation6 + $0x18c] sm:$0xf0] }
 0x3ec   :  { %v12392_v12 = vld [vmem:[#allocation4 + $0x838] sm:$0xf0]  ;;  %7022 = vmatpush.bf16.msra.mxu0 %v13223_v62  ;;  %v15682_v16 = vld [vmem:[#allocation6 + $0x16c] sm:$0xf0] }
 0x3ed   :  { %7087 = vmatpush.bf16.msra.mxu3 %v12459_v26  ;;  %v15447_v13 = vld [vmem:[#allocation4 + $0xa1c] sm:$0xf]  ;;  %v12395_v27 = vor.u32 %v15383_v38, %v12392_v12  ;;  %v13487_v26 = vor.u32 %v15662_v45, %v13486_v39  ;;  %v15678_v45 = vld [vmem:[#allocation6 + $0x14c] sm:$0xf0] }
 0x3ee   :  { %v12648_v56 = vld [vmem:[#allocation4 + $0xa38] sm:$0xf0] }
 0x3ef   :  { %7100 = vmatpush.bf16.msra.mxu1 %v12715_v21  ;;  %v15559_v2 = vld [vmem:[#allocation4 + $0xd9c] sm:$0xf]  ;;  %v12651_v32 = vor.u32 %v15447_v13, %v12648_v56  ;;  %7063 = vmatpush.bf16.msrb.mxu2 %v11883_v15  ;;  %v13615_v21 = vor.u32 %v15694_v49, %v13614_v10  ;;  %v13583_v13 = vor.u32 %v15686_v42, %v13582_v50  ;;  %v13438_v56 = vld [vmem:[#allocation6 + $0x60] sm:$0xf]  ;;  %v15638_v42 = vld [vmem:[#allocation6 + $0xc] sm:$0xf0] }
 0x3f0   :  { %v13096_v35 = vld [vmem:[#allocation4 + $0xdb8] sm:$0xf0]  ;;  %7023 = vmatpush.bf16.msra.mxu0 %v13191_v7  ;;  %v13567_v7 = vor.u32 %v15682_v16, %v13566_v22  ;;  %v13742_v16 = vld [vmem:[#allocation6 + $0x2c0] sm:$0xf] }
 0x3f1   :  { %7088 = vmatpush.bf16.msra.mxu3 %v12427_v1  ;;  %v13099_v18 = vor.u32 %v15559_v2, %v13096_v35  ;;  %v15375_v31 = vld [vmem:[#allocation4 + $0x7dc] sm:$0xf]  ;;  %v15654_v1 = vld [vmem:[#allocation6 + $0x8c] sm:$0xf0] }
 0x3f2   :  { %v12360_v41 = vld [vmem:[#allocation4 + $0x7f8] sm:$0xf0]  ;;  %7064 = vmatmul.bf16.vlgmr.msrb.gmra.mxu2 %v16320_v11  ;;  %v15690_v11 = vld [vmem:[#allocation6 + $0x1ac] sm:$0xf0]  ;;  %v13455_v12 = vor.u32 %v15654_v1, %v13454_v47  ;;  %v16501_v35 = vpop.f32.mrf.mxu0 }
 0x3f3   :  { %7101 = vmatpush.bf16.msra.mxu1 %v12683_v25  ;;  %7108 = vmatpush.bf16.msra.mxu2 %v13131_v23  ;;  %v15551_v36 = vld [vmem:[#allocation4 + $0xd5c] sm:$0xf]  ;;  %v12363_v6 = vor.u32 %v15375_v31, %v12360_v41  ;;  %v13599_v52 = vor.u32 %v15690_v11, %v13598_v20 }
 0x3f4   :  { %v13064_v46 = vld [vmem:[#allocation4 + $0xd78] sm:$0xf0]  ;;  %7024 = vmatpush.bf16.msra.mxu0 %v13159_v28 }
 0x3f5   :  { %7089 = vmatpush.bf16.msra.mxu3 %v12395_v27  ;;  %v13067_v55 = vor.u32 %v15551_v36, %v13064_v46  ;;  %v15367_v53 = vld [vmem:[#allocation4 + $0x79c] sm:$0xf]  ;;  %v16499_v24 = vpop.f32.mrf.mxu2 }
 0x3f6   :  { %v12328_v34 = vld [vmem:[#allocation4 + $0x7b8] sm:$0xf0] }
 0x3f7   :  { %7102 = vmatpush.bf16.msra.mxu1 %v12651_v32  ;;  %7109 = vmatpush.bf16.msra.mxu2 %v13099_v18  ;;  %v15543_v3 = vld [vmem:[#allocation4 + $0xd1c] sm:$0xf]  ;;  %v12331_v48 = vor.u32 %v15367_v53, %v12328_v34  ;;  %v16497_v9 = vpop.f32.mrf.mxu1  ;;  %v13439_v32 = vor.u32 %v15650_v54, %v13438_v56  ;;  %v13550_v18 = vld [vmem:[#allocation6 + $0x140] sm:$0xf]  ;;  %v15794_v56 = vld [vmem:[#allocation6 + $0x4ec] sm:$0xf0] }
 0x3f8   :  { %7090 = vmatmul.bf16.vlgmr.msra.gmra.mxu3 %v16333_v0  ;;  %v13032_v61 = vld [vmem:[#allocation4 + $0xd38] sm:$0xf0]  ;;  %7069 = vmatpush.bf16.msrb.mxu0 %v12363_v6  ;;  %v13551_v28 = vor.u32 %v15678_v45, %v13550_v18  ;;  %v15642_v6 = vld [vmem:[#allocation6 + $0x2c] sm:$0xf0]  ;;  %v14142_v54 = vld [vmem:[#allocation6 + $0x5e0] sm:$0xf] }
 0x3f9   :  { %8686 = vmatpush.bf16.msrb.mxu3 %v13503_v57  ;;  %v13035_v0 = vor.u32 %v15543_v3, %v13032_v61  ;;  %v12296_v25 = vld [vmem:[#allocation4 + $0x778] sm:$0xf0]  ;;  %7025 = vmatmul.bf16.vlgmr.msra.gmra.mxu0 %v16370_v43  ;;  %v15790_v45 = vld [vmem:[#allocation6 + $0x4cc] sm:$0xf0] }
 0x3fa   :  { %7103 = vmatmul.bf16.vlgmr.msra.gmra.mxu1 %v16336_v51  ;;  %v15359_v51 = vld [vmem:[#allocation4 + $0x75c] sm:$0xf]  ;;  %v6820_v61 = vpop.f32.mrf.mxu0 }
 0x3fb   :  { %8699 = vmatpush.bf16.msrb.mxu1 %v13631_v5  ;;  %7110 = vmatpush.bf16.msra.mxu2 %v13067_v55  ;;  %v15535_v62 = vld [vmem:[#allocation4 + $0xcdc] sm:$0xf]  ;;  %v12299_v15 = vor.u32 %v15359_v51, %v12296_v25  ;;  %v16503_v57 = vpop.f32.mrf.mxu3  ;;  %v15646_v5 = vld [vmem:[#allocation6 + $0x4c] sm:$0xf0]  ;;  %v13518_v51 = vld [vmem:[#allocation6 + $0x100] sm:$0xf] }
 0x3fc   :  { %v13000_v38 = vld [vmem:[#allocation4 + $0xcf8] sm:$0xf0]  ;;  %7070 = vmatpush.bf16.msrb.mxu0 %v12331_v48  ;;  %v13423_v46 = vor.u32 %v15646_v5, %v13422_v33  ;;  %v15674_v55 = vld [vmem:[#allocation6 + $0x12c] sm:$0xf0] }
 0x3fd   :  { %8687 = vmatpush.bf16.msrb.mxu3 %v13487_v26  ;;  %v13003_v23 = vor.u32 %v15535_v62, %v13000_v38  ;;  %v15351_v63 = vld [vmem:[#allocation4 + $0x71c] sm:$0xf]  ;;  %v6859_v20 = vpop.f32.mrf.mxu2  ;;  %v15730_v48 = vld [vmem:[#allocation6 + $0x2ec] sm:$0xf0]  ;;  %v13535_v47 = vor.u32 %v15674_v55, %v13534_v44  ;;  %v13982_v44 = vld [vmem:[#allocation6 + $0x4a0] sm:$0xf] }
 0x3fe   :  { %v12264_v27 = vld [vmem:[#allocation4 + $0x738] sm:$0xf0]  ;;  %v15670_v62 = vld [vmem:[#allocation6 + $0x10c] sm:$0xf0]  ;;  %v14110_v20 = vld [vmem:[#allocation6 + $0x5a0] sm:$0xf] }
 0x3ff   :  { %8700 = vmatpush.bf16.msrb.mxu1 %v13615_v21  ;;  %7111 = vmatpush.bf16.msra.mxu2 %v13035_v0  ;;  %v15527_v29 = vld [vmem:[#allocation4 + $0xc9c] sm:$0xf]  ;;  %v12267_v4 = vor.u32 %v15351_v63, %v12264_v27  ;;  %v6898_v31 = vpop.f32.mrf.mxu1  ;;  %v13406_v21 = vld [vmem:[#allocation6 + $0x20] sm:$0xf]  ;;  %v15726_v63 = vld [vmem:[#allocation6 + $0x2cc] sm:$0xf0] }
 0x400   :  { %v12968_v2 = vld [vmem:[#allocation4 + $0xcb8] sm:$0xf0]  ;;  %7071 = vmatpush.bf16.msrb.mxu0 %v12299_v15  ;;  %v13390_v0 = vld [vmem:[#allocation6] sm:$0xf]  ;;  %v7134_v27 = vmax.f32 %v16411_v17, 0.0  ;;  %v13743_v18 = vor.u32 %v15726_v63, %v13742_v16 }
 0x401   :  { %8688 = vmatpush.bf16.msrb.mxu3 %v13471_v8  ;;  %v12971_v39 = vor.u32 %v15527_v29, %v12968_v2  ;;  %v15343_v10 = vld [vmem:[#allocation4 + $0x6dc] sm:$0xf]  ;;  %v13407_v8 = vor.u32 %v15642_v6, %v13406_v21  ;;  %v14014_v15 = vld [vmem:[#allocation6 + $0x4e0] sm:$0xf]  ;;  %v13391_v22 = vor.u32 %v15638_v42, %v13390_v0  ;;  %v13519_v29 = vor.u32 %v15670_v62, %v13518_v51  ;;  %v15818_v55 = vld [vmem:[#allocation6 + $0x5ac] sm:$0xf0] }
 0x402   :  { %v12232_v49 = vld [vmem:[#allocation4 + $0x6f8] sm:$0xf0]  ;;  %v7135_v2 = vmax.f32 %v16430_v60, 0.0  ;;  %v13726_v60 = vld [vmem:[#allocation6 + $0x2a0] sm:$0xf] }
 0x403   :  { %8701 = vmatpush.bf16.msrb.mxu1 %v13599_v52  ;;  %7112 = vmatpush.bf16.msra.mxu2 %v13003_v23  ;;  %v15519_v41 = vld [vmem:[#allocation4 + $0xc5c] sm:$0xf]  ;;  %v12235_v26 = vor.u32 %v15343_v10, %v12232_v49  ;;  %v13758_v52 = vld [vmem:[#allocation6 + $0x2e0] sm:$0xf]  ;;  %v6885_v1 = vpop.f32.mrf.mxu3  ;;  %v15826_v23 = vld [vmem:[#allocation6 + $0x5ec] sm:$0xf0] }
 0x404   :  { %v12936_v36 = vld [vmem:[#allocation4 + $0xc78] sm:$0xf0]  ;;  %7072 = vmatpush.bf16.msrb.mxu0 %v12267_v4  ;;  %v14143_v5 = vor.u32 %v15826_v23, %v14142_v54  ;;  %v14126_v10 = vld [vmem:[#allocation6 + $0x5c0] sm:$0xf]  ;;  %v15822_v49 = vld [vmem:[#allocation6 + $0x5cc] sm:$0xf0] }
 0x405   :  { %8689 = vmatpush.bf16.msrb.mxu3 %v13455_v12  ;;  %v12939_v58 = vor.u32 %v15519_v41, %v12936_v36  ;;  %v15335_v11 = vld [vmem:[#allocation4 + $0x69c] sm:$0xf]  ;;  %v16507_v41 = vpack.c.bf16 %v7134_v27, %v7134_v27  ;;  %v15722_v36 = vld [vmem:[#allocation6 + $0x2ac] sm:$0xf0]  ;;  %v14127_v21 = vor.u32 %v15822_v49, %v14126_v10  ;;  %v14094_v1 = vld [vmem:[#allocation6 + $0x580] sm:$0xf] }
 0x406   :  { %v12200_v53 = vld [vmem:[#allocation4 + $0x6b8] sm:$0xf0]  ;;  %v15814_v0 = vld [vmem:[#allocation6 + $0x58c] sm:$0xf0]  ;;  %v13694_v62 = vld [vmem:[#allocation6 + $0x260] sm:$0xf] }
 0x407   :  { %8702 = vmatpush.bf16.msrb.mxu1 %v13583_v13  ;;  %7113 = vmatpush.bf16.msra.mxu2 %v12971_v39  ;;  %v15511_v34 = vld [vmem:[#allocation4 + $0xc1c] sm:$0xf]  ;;  %v12203_v50 = vor.u32 %v15335_v11, %v12200_v53  ;;  %v13759_v13 = vor.u32 %v15730_v48, %v13758_v52  ;;  %v13998_v39 = vld [vmem:[#allocation6 + $0x4c0] sm:$0xf]  ;;  %v15778_v54 = vld [vmem:[#allocation6 + $0x46c] sm:$0xf0] }
 0x408   :  { %v12904_v3 = vld [vmem:[#allocation4 + $0xc38] sm:$0xf0]  ;;  %7073 = vmatpush.bf16.msrb.mxu0 %v12235_v26  ;;  %v13999_v26 = vor.u32 %v15790_v45, %v13998_v39  ;;  %v13966_v48 = vld [vmem:[#allocation6 + $0x480] sm:$0xf]  ;;  %v15810_v63 = vld [vmem:[#allocation6 + $0x56c] sm:$0xf0] }
 0x409   :  { %8690 = vmatpush.bf16.msrb.mxu3 %v13439_v32  ;;  %v12907_v25 = vor.u32 %v15511_v34, %v12904_v3  ;;  %v15327_v38 = vld [vmem:[#allocation4 + $0x65c] sm:$0xf]  ;;  %v13710_v34 = vld [vmem:[#allocation6 + $0x280] sm:$0xf]  ;;  %v15718_v3 = vld [vmem:[#allocation6 + $0x28c] sm:$0xf0] }
 0x40a   :  { %v12168_v12 = vld [vmem:[#allocation4 + $0x678] sm:$0xf0]  ;;  %v15774_v39 = vld [vmem:[#allocation6 + $0x44c] sm:$0xf0]  ;;  %v14062_v45 = vld [vmem:[#allocation6 + $0x540] sm:$0xf] }
 0x40b   :  { %8703 = vmatpush.bf16.msrb.mxu1 %v13567_v7  ;;  %7114 = vmatpush.bf16.msra.mxu2 %v12939_v58  ;;  %v12171_v32 = vor.u32 %v15327_v38, %v12168_v12  ;;  %v14015_v7 = vor.u32 %v15794_v56, %v14014_v15  ;;  %v15319_v4 = vld [vmem:[#allocation4 + $0x61c] sm:$0xf]  ;;  %v15786_v58 = vld [vmem:[#allocation6 + $0x4ac] sm:$0xf0]  ;;  %v13950_v56 = vld [vmem:[#allocation6 + $0x460] sm:$0xf] }
 0x40c   :  { %7074 = vmatpush.bf16.msrb.mxu0 %v12203_v50  ;;  %v12136_v33 = vld [vmem:[#allocation4 + $0x638] sm:$0xf0]  ;;  %v13983_v61 = vor.u32 %v15786_v58, %v13982_v44  ;;  %v13711_v50 = vor.u32 %v15718_v3, %v13710_v34  ;;  %v15714_v38 = vld [vmem:[#allocation6 + $0x26c] sm:$0xf0]  ;;  %v13918_v58 = vld [vmem:[#allocation6 + $0x420] sm:$0xf] }
 0x40d   :  { %8691 = vmatpush.bf16.msrb.mxu3 %v13423_v46  ;;  %v15631_v31 = vld [vmem:[#allocation4 + $0xfdc] sm:$0xf]  ;;  %v16510_v46 = vpack.c.bf16 %v7135_v2, %v7135_v2  ;;  %v13695_v23 = vor.u32 %v15714_v38, %v13694_v62  ;;  %v15710_v2 = vld [vmem:[#allocation6 + $0x24c] sm:$0xf0]  ;;  %v13902_v62 = vld [vmem:[#allocation6 + $0x400] sm:$0xf] }
 0x40e   :  { %v13384_v17 = vld [vmem:[#allocation4 + $0xff8] sm:$0xf0]  ;;  %v15766_v38 = vld [vmem:[#allocation6 + $0x40c] sm:$0xf0] }
 0x40f   :  { %8704 = vmatpush.bf16.msrb.mxu1 %v13551_v28  ;;  %7115 = vmatpush.bf16.msra.mxu2 %v12907_v25  ;;  %v12139_v28 = vor.u32 %v15319_v4, %v12136_v33  ;;  %v13387_v6 = vor.u32 %v15631_v31, %v13384_v17  ;;  %v15623_v11 = vld [vmem:[#allocation4 + $0xf9c] sm:$0xf]  ;;  %v15806_v31 = vld [vmem:[#allocation6 + $0x54c] sm:$0xf0] }
 0x410   :  { %7075 = vmatpush.bf16.msrb.mxu0 %v12171_v32  ;;  %v13352_v53 = vld [vmem:[#allocation4 + $0xfb8] sm:$0xf0] }
 0x411   :  { %8692 = vmatpush.bf16.msrb.mxu3 %v13407_v8  ;;  %v14111_v8 = vor.u32 %v15818_v55, %v14110_v20  ;;  %v13355_v52 = vor.u32 %v15623_v11, %v13352_v53  ;;  %v15615_v42 = vld [vmem:[#allocation4 + $0xf5c] sm:$0xf]  ;;  %v15770_v20 = vld [vmem:[#allocation6 + $0x42c] sm:$0xf0] }
 0x412   :  { %7116 = vmatmul.bf16.vlgmr.msra.gmra.mxu2 %v16360_v40  ;;  %v13727_v40 = vor.u32 %v15722_v36, %v13726_v60  ;;  %v13320_v51 = vld [vmem:[#allocation4 + $0xf78] sm:$0xf0]  ;;  %v15802_v53 = vld [vmem:[#allocation6 + $0x52c] sm:$0xf0] }
 0x413   :  { %8705 = vmatpush.bf16.msrb.mxu1 %v13535_v47  ;;  %8712 = vmatpush.bf16.msrb.mxu2 %v13759_v13  ;;  %v15782_v47 = vld [vmem:[#allocation6 + $0x48c] sm:$0xf0]  ;;  %v14095_v13 = vor.u32 %v15814_v0, %v14094_v1  ;;  %v13323_v15 = vor.u32 %v15615_v42, %v13320_v51  ;;  %v15607_v27 = vld [vmem:[#allocation4 + $0xf1c] sm:$0xf]  ;;  %v6819_v0 = vadd.f32 %v16501_v35, %v16491_v59  ;;  %v13632_v59 = vld [vmem:[#allocation6 + $0x1f0] sm:$0xf0] }
 0x414   :  { %7076 = vmatpush.bf16.msrb.mxu0 %v12139_v28  ;;  %v13967_v12 = vor.u32 %v15782_v47, %v13966_v48  ;;  %v15599_v17 = vld [vmem:[#allocation4 + $0xedc] sm:$0xf]  ;;  %v13662_v28 = vld [vmem:[#allocation6 + $0x220] sm:$0xf]  ;;  %v13919_v48 = vor.u32 %v15770_v20, %v13918_v58  ;;  %v15858_v1 = vld [vmem:[#allocation6 + $0x6ec] sm:$0xf0] }
 0x415   :  { %8693 = vmatpush.bf16.msrb.mxu3 %v13391_v22  ;;  %v14078_v22 = vld [vmem:[#allocation6 + $0x560] sm:$0xf]  ;;  %v16515_v16 = vpop.f32.mrf.mxu2  ;;  %v13256_v60 = vld [vmem:[#allocation4 + $0xef8] sm:$0xf0]  ;;  %v7138_v35 = vmax.f32 %v6819_v0, 0.0 }
 0x416   :  { %v16517_v32 = vpop.f32.mrf.mxu0  ;;  %v14079_v4 = vor.u32 %v15810_v63, %v14078_v22  ;;  %v13259_v44 = vor.u32 %v15599_v17, %v13256_v60  ;;  %v15591_v34 = vld [vmem:[#allocation4 + $0xe9c] sm:$0xf]  ;;  %v14270_v47 = vld [vmem:[#allocation6 + $0x6e0] sm:$0xf]  ;;  %v15664_v22 = vld [vmem:[#allocation6 + $0xe4] sm:$0xf] }
 0x417   :  { %8706 = vmatpush.bf16.msrb.mxu1 %v13519_v29  ;;  %8713 = vmatpush.bf16.msrb.mxu2 %v13743_v18  ;;  %v6948_v25 = vpop.f32.mrf.mxu1  ;;  %v13288_v29 = vld [vmem:[#allocation4 + $0xf38] sm:$0xf0]  ;;  %v13934_v18 = vld [vmem:[#allocation6 + $0x440] sm:$0xf]  ;;  %v14271_v63 = vor.u32 %v15858_v1, %v14270_v47  ;;  %v15692_v17 = vld [vmem:[#allocation6 + $0x1c4] sm:$0xf] }
 0x418   :  { %8694 = vmatmul.bf16.vlgmr.msrb.gmra.mxu3 %v16507_v41  ;;  %7121 = vmatpush.bf16.msra.mxu0 %v13387_v6  ;;  %v14063_v6 = vor.u32 %v15806_v31, %v14062_v45  ;;  %v13224_v3 = vld [vmem:[#allocation4 + $0xeb8] sm:$0xf0]  ;;  %v13488_v31 = vld [vmem:[#allocation6 + $0xd0] sm:$0xf0]  ;;  %v15850_v58 = vld [vmem:[#allocation6 + $0x6ac] sm:$0xf0] }
 0x419   :  { %8738 = vmatpush.bf16.msra.mxu3 %v14015_v7  ;;  %7077 = vmatmul.bf16.vlgmr.msrb.gmra.mxu0 %v16322_v14  ;;  %v13678_v14 = vld [vmem:[#allocation6 + $0x240] sm:$0xf]  ;;  %v13951_v7 = vor.u32 %v15778_v54, %v13950_v56  ;;  %v15583_v56 = vld [vmem:[#allocation4 + $0xe5c] sm:$0xf]  ;;  %v13616_v60 = vld [vmem:[#allocation6 + $0x1d0] sm:$0xf0] }
 0x41a   :  { %8707 = vmatmul.bf16.vlgmr.msrb.gmra.mxu1 %v16510_v46  ;;  %v13679_v49 = vor.u32 %v15710_v2, %v13678_v14  ;;  %v13192_v54 = vld [vmem:[#allocation4 + $0xe78] sm:$0xf0]  ;;  %v14254_v14 = vld [vmem:[#allocation6 + $0x6c0] sm:$0xf]  ;;  %v15854_v2 = vld [vmem:[#allocation6 + $0x6cc] sm:$0xf0]  ;;  %v13619_v20 = vor.u32 %v15692_v17, %v13616_v60 }
 0x41b   :  { %8751 = vmatpush.bf16.msra.mxu1 %v14143_v5  ;;  %8714 = vmatpush.bf16.msrb.mxu2 %v13727_v40  ;;  %v6935_v33 = vpop.f32.mrf.mxu3  ;;  %v13291_v5 = vor.u32 %v15607_v27, %v13288_v29  ;;  %v14046_v40 = vld [vmem:[#allocation6 + $0x520] sm:$0xf]  ;;  %v15696_v27 = vld [vmem:[#allocation6 + $0x1e4] sm:$0xf]  ;;  %v13424_v17 = vld [vmem:[#allocation6 + $0x50] sm:$0xf0] }
 0x41c   :  { %7122 = vmatpush.bf16.msra.mxu0 %v13355_v52  ;;  %v16519_v10 = vadd.f32 %v6948_v25, %v6935_v33  ;;  %v14047_v42 = vor.u32 %v15802_v53, %v14046_v40  ;;  %v13227_v25 = vor.u32 %v15591_v34, %v13224_v3  ;;  %v15575_v33 = vld [vmem:[#allocation4 + $0xe1c] sm:$0xf]  ;;  %v13635_v45 = vor.u32 %v15696_v27, %v13632_v59  ;;  %v15688_v53 = vld [vmem:[#allocation6 + $0x1a4] sm:$0xf]  ;;  %v13600_v34 = vld [vmem:[#allocation6 + $0x1b0] sm:$0xf0] }
 0x41d   :  { %8739 = vmatpush.bf16.msra.mxu3 %v13999_v26  ;;  %v15706_v26 = vld [vmem:[#allocation6 + $0x22c] sm:$0xf0]  ;;  %v6911_v11 = vpop.f32.mrf.mxu2  ;;  %v13870_v3 = vld [vmem:[#allocation6 + $0x3c0] sm:$0xf]  ;;  %v13603_v1 = vor.u32 %v15688_v53, %v13600_v34  ;;  %v15652_v0 = vld [vmem:[#allocation6 + $0x84] sm:$0xf] }
 0x41e   :  { %v13663_v55 = vor.u32 %v15706_v26, %v13662_v28  ;;  %v6872_v52 = vpop.f32.mrf.mxu0  ;;  %v15762_v28 = vld [vmem:[#allocation6 + $0x3ec] sm:$0xf0]  ;;  %v14255_v26 = vor.u32 %v15854_v2, %v14254_v14  ;;  %v13472_v11 = vld [vmem:[#allocation6 + $0xb0] sm:$0xf0]  ;;  %v15680_v27 = vld [vmem:[#allocation6 + $0x164] sm:$0xf] }
 0x41f   :  { %8752 = vmatpush.bf16.msra.mxu1 %v14127_v21  ;;  %8715 = vmatpush.bf16.msrb.mxu2 %v13711_v50  ;;  %v6950_v36 = vpop.f32.mrf.mxu1  ;;  %v13935_v21 = vor.u32 %v15774_v39, %v13934_v18  ;;  %v7136_v50 = vmax.f32 %v16453_v19, 0.0  ;;  %v13903_v19 = vor.u32 %v15766_v38, %v13902_v62  ;;  %v6858_v39 = vadd.f32 %v16499_v24, %v16487_v37  ;;  %v14222_v52 = vld [vmem:[#allocation6 + $0x680] sm:$0xf]  ;;  %v15754_v38 = vld [vmem:[#allocation6 + $0x3ac] sm:$0xf0] }
 0x420   :  { %7123 = vmatpush.bf16.msra.mxu0 %v13323_v15  ;;  %v15798_v15 = vld [vmem:[#allocation6 + $0x50c] sm:$0xf0]  ;;  %v13886_v36 = vld [vmem:[#allocation6 + $0x3e0] sm:$0xf]  ;;  %v15676_v60 = vld [vmem:[#allocation6 + $0x144] sm:$0xf] }
 0x421   :  { %8740 = vmatpush.bf16.msra.mxu3 %v13983_v61  ;;  %v13646_v61 = vld [vmem:[#allocation6 + $0x200] sm:$0xf]  ;;  %v16524_v18 = vpack.c.bf16 %v7136_v50, %v7136_v50  ;;  %v13887_v40 = vor.u32 %v15762_v28, %v13886_v36  ;;  %v13552_v36 = vld [vmem:[#allocation6 + $0x150] sm:$0xf0]  ;;  %v15672_v34 = vld [vmem:[#allocation6 + $0x124] sm:$0xf] }
 0x422   :  { %v13854_v62 = vld [vmem:[#allocation6 + $0x3a0] sm:$0xf]  ;;  %v13408_v53 = vld [vmem:[#allocation6 + $0x30] sm:$0xf0] }
 0x423   :  { %8753 = vmatpush.bf16.msra.mxu1 %v14111_v8  ;;  %8716 = vmatpush.bf16.msrb.mxu2 %v13695_v23  ;;  %v15702_v8 = vld [vmem:[#allocation6 + $0x20c] sm:$0xf0]  ;;  %v6937_v51 = vpop.f32.mrf.mxu3  ;;  %v13504_v23 = vld [vmem:[#allocation6 + $0xf0] sm:$0xf0]  ;;  %v14190_v2 = vld [vmem:[#allocation6 + $0x640] sm:$0xf] }
 0x424   :  { %7124 = vmatpush.bf16.msra.mxu0 %v13291_v5  ;;  %v13160_v5 = vld [vmem:[#allocation4 + $0xe38] sm:$0xf0]  ;;  %v15684_v51 = vld [vmem:[#allocation6 + $0x184] sm:$0xf]  ;;  %v13822_v28 = vld [vmem:[#allocation6 + $0x360] sm:$0xf] }
 0x425   :  { %8741 = vmatpush.bf16.msra.mxu3 %v13967_v12  ;;  %v13647_v12 = vor.u32 %v15702_v8, %v13646_v61  ;;  %v13163_v37 = vor.u32 %v15575_v33, %v13160_v5 }
 0x427   :  { %8754 = vmatpush.bf16.msra.mxu1 %v14095_v13  ;;  %8717 = vmatpush.bf16.msrb.mxu2 %v13679_v49  ;;  %v14030_v13 = vld [vmem:[#allocation6 + $0x500] sm:$0xf]  ;;  %v15660_v49 = vld [vmem:[#allocation6 + $0xc4] sm:$0xf] }
 0x428   :  { %7125 = vmatpush.bf16.msra.mxu0 %v13259_v44  ;;  %v14031_v29 = vor.u32 %v15798_v15, %v14030_v13  ;;  %v14238_v44 = vld [vmem:[#allocation6 + $0x6a0] sm:$0xf]  ;;  %v13491_v24 = vor.u32 %v15660_v49, %v13488_v31  ;;  %v15644_v31 = vld [vmem:[#allocation6 + $0x44] sm:$0xf] }
 0x429   :  { %8742 = vmatpush.bf16.msra.mxu3 %v13951_v7  ;;  %v13195_v7 = vor.u32 %v15583_v56, %v13192_v54  ;;  %v14239_v61 = vor.u32 %v15850_v58, %v14238_v44  ;;  %v14206_v15 = vld [vmem:[#allocation6 + $0x660] sm:$0xf]  ;;  %v15842_v56 = vld [vmem:[#allocation6 + $0x66c] sm:$0xf0] }
 0x42a   :  { %v14207_v14 = vor.u32 %v15842_v56, %v14206_v15  ;;  %v14174_v58 = vld [vmem:[#allocation6 + $0x620] sm:$0xf]  ;;  %v13520_v15 = vld [vmem:[#allocation6 + $0x110] sm:$0xf0] }
 0x42b   :  { %8755 = vmatpush.bf16.msra.mxu1 %v14079_v4  ;;  %8718 = vmatpush.bf16.msrb.mxu2 %v13663_v55  ;;  %v13507_v4 = vor.u32 %v15664_v22, %v13504_v23  ;;  %v15656_v55 = vld [vmem:[#allocation6 + $0xa4] sm:$0xf]  ;;  %v13855_v23 = vor.u32 %v15754_v38, %v13854_v62  ;;  %v13790_v56 = vld [vmem:[#allocation6 + $0x320] sm:$0xf] }
 0x42c   :  { %7126 = vmatpush.bf16.msra.mxu0 %v13227_v25  ;;  %v13475_v47 = vor.u32 %v15656_v55, %v13472_v11  ;;  %v13584_v25 = vld [vmem:[#allocation6 + $0x190] sm:$0xf0]  ;;  %v15640_v11 = vld [vmem:[#allocation6 + $0x24] sm:$0xf] }
 0x42d   :  { %8743 = vmatpush.bf16.msra.mxu3 %v13935_v21  ;;  %v16528_v21 = vpack.c.bf16 %v7138_v35, %v7138_v35  ;;  %v13587_v22 = vor.u32 %v15684_v51, %v13584_v25  ;;  %v13568_v35 = vld [vmem:[#allocation6 + $0x170] sm:$0xf0] }
 0x42e   :  { %v13760_v51 = vld [vmem:[#allocation6 + $0x2f0] sm:$0xf0] }
 0x42f   :  { %8756 = vmatpush.bf16.msra.mxu1 %v14063_v6  ;;  %8719 = vmatpush.bf16.msrb.mxu2 %v13647_v12  ;;  %v6871_v6 = vadd.f32 %v16517_v32, %v6858_v39  ;;  %v15758_v32 = vld [vmem:[#allocation6 + $0x3cc] sm:$0xf0]  ;;  %v13571_v39 = vor.u32 %v15680_v27, %v13568_v35  ;;  %v14144_v27 = vld [vmem:[#allocation6 + $0x5f0] sm:$0xf0] }
 0x430   :  { %7127 = vmatpush.bf16.msra.mxu0 %v13195_v7  ;;  %v13871_v50 = vor.u32 %v15758_v32, %v13870_v3  ;;  %v15838_v7 = vld [vmem:[#allocation6 + $0x64c] sm:$0xf0]  ;;  %v13536_v32 = vld [vmem:[#allocation6 + $0x130] sm:$0xf0] }
 0x431   :  { %8744 = vmatpush.bf16.msra.mxu3 %v13919_v48  ;;  %v6884_v8 = vadd.f32 %v16503_v57, %v6871_v6  ;;  %v15846_v48 = vld [vmem:[#allocation6 + $0x68c] sm:$0xf0]  ;;  %v13539_v25 = vor.u32 %v15672_v34, %v13536_v32  ;;  %v15780_v32 = vld [vmem:[#allocation6 + $0x484] sm:$0xf] }
 0x432   :  { %8720 = vmatmul.bf16.vlgmr.msrb.gmra.mxu2 %v16524_v18  ;;  %v14223_v12 = vor.u32 %v15846_v48, %v14222_v52  ;;  %v14158_v48 = vld [vmem:[#allocation6 + $0x600] sm:$0xf] }
 0x433   :  { %8757 = vmatpush.bf16.msra.mxu1 %v14047_v42  ;;  %8764 = vmatpush.bf16.msra.mxu2 %v14271_v63  ;;  %v13456_v42 = vld [vmem:[#allocation6 + $0x90] sm:$0xf0]  ;;  %v6897_v13 = vadd.f32 %v16497_v9, %v6884_v8  ;;  %v15648_v63 = vld [vmem:[#allocation6 + $0x64] sm:$0xf]  ;;  %v15742_v8 = vld [vmem:[#allocation6 + $0x34c] sm:$0xf0] }
 0x434   :  { %7128 = vmatpush.bf16.msra.mxu0 %v13163_v37  ;;  %v13459_v54 = vor.u32 %v15652_v0, %v13456_v42  ;;  %v15834_v37 = vld [vmem:[#allocation6 + $0x62c] sm:$0xf0]  ;;  %v15636_v0 = vld [vmem:[#allocation6 + $0x4] sm:$0xf] }
 0x435   :  { %8745 = vmatpush.bf16.msra.mxu3 %v13903_v19  ;;  %v13440_v19 = vld [vmem:[#allocation6 + $0x70] sm:$0xf0]  ;;  %v16538_v59 = vpop.f32.mrf.mxu2  ;;  %v6910_v9 = vadd.f32 %v16515_v16, %v6897_v13  ;;  %v14191_v16 = vor.u32 %v15838_v7, %v14190_v2  ;;  %v14175_v52 = vor.u32 %v15834_v37, %v14174_v58  ;;  %v15728_v42 = vld [vmem:[#allocation6 + $0x2e4] sm:$0xf] }
 0x436   :  { %v13443_v33 = vor.u32 %v15648_v63, %v13440_v19  ;;  %v15668_v13 = vld [vmem:[#allocation6 + $0x104] sm:$0xf]  ;;  %v14016_v63 = vld [vmem:[#allocation6 + $0x4f0] sm:$0xf0]  ;;  %v13763_v35 = vor.u32 %v15728_v42, %v13760_v51 }
 0x437   :  { %8758 = vmatpush.bf16.msra.mxu1 %v14031_v29  ;;  %8765 = vmatpush.bf16.msra.mxu2 %v14255_v26  ;;  %v16535_v57 = vpop.f32.mrf.mxu1  ;;  %v13838_v29 = vld [vmem:[#allocation6 + $0x380] sm:$0xf]  ;;  %v15746_v26 = vld [vmem:[#allocation6 + $0x36c] sm:$0xf0]  ;;  %v15824_v19 = vld [vmem:[#allocation6 + $0x5e4] sm:$0xf] }
 0x438   :  { %8746 = vmatmul.bf16.vlgmr.msra.gmra.mxu3 %v16528_v21  ;;  %8725 = vmatpush.bf16.msrb.mxu0 %v13887_v40  ;;  %v13555_v40 = vor.u32 %v15676_v60, %v13552_v36  ;;  %v13823_v55 = vor.u32 %v15746_v26, %v13822_v28  ;;  %v15720_v36 = vld [vmem:[#allocation6 + $0x2a4] sm:$0xf]  ;;  %v13728_v28 = vld [vmem:[#allocation6 + $0x2b0] sm:$0xf0] }
 0x439   :  { %8790 = vmatpush.bf16.msrb.mxu3 %v13507_v4  ;;  %7129 = vmatmul.bf16.vlgmr.msra.gmra.mxu0 %v16370_v43  ;;  %v15750_v43 = vld [vmem:[#allocation6 + $0x38c] sm:$0xf0]  ;;  %v6922_v4 = vpop.f32.mrf.mxu0  ;;  %v15784_v58 = vld [vmem:[#allocation6 + $0x4a4] sm:$0xf]  ;;  %v13984_v37 = vld [vmem:[#allocation6 + $0x4b0] sm:$0xf0] }
 0x43a   :  { %v6923_v5 = vadd.f32 %v6922_v4, %v6910_v9  ;;  %v13839_v49 = vor.u32 %v15750_v43, %v13838_v29  ;;  %v15724_v43 = vld [vmem:[#allocation6 + $0x2c4] sm:$0xf]  ;;  %v13523_v9 = vor.u32 %v15668_v13, %v13520_v15  ;;  %v14147_v4 = vor.u32 %v15824_v19, %v14144_v27  ;;  %v13936_v27 = vld [vmem:[#allocation6 + $0x450] sm:$0xf0] }
 0x43b   :  { %8803 = vmatpush.bf16.msrb.mxu1 %v13635_v45  ;;  %8766 = vmatpush.bf16.msra.mxu2 %v14239_v61  ;;  %v16541_v45 = vpop.f32.mrf.mxu3  ;;  %v13806_v61 = vld [vmem:[#allocation6 + $0x340] sm:$0xf]  ;;  %v15776_v51 = vld [vmem:[#allocation6 + $0x464] sm:$0xf] }
 0x43c   :  { %8726 = vmatpush.bf16.msrb.mxu0 %v13871_v50  ;;  %v7139_v6 = vmax.f32 %v6923_v5, 0.0  ;;  %v13411_v50 = vor.u32 %v15640_v11, %v13408_v53  ;;  %v13807_v38 = vor.u32 %v15742_v8, %v13806_v61  ;;  %v15734_v5 = vld [vmem:[#allocation6 + $0x30c] sm:$0xf0]  ;;  %v15716_v11 = vld [vmem:[#allocation6 + $0x284] sm:$0xf] }
 0x43d   :  { %8791 = vmatpush.bf16.msrb.mxu3 %v13491_v24  ;;  %v13427_v24 = vor.u32 %v15644_v31, %v13424_v17  ;;  %v6963_v3 = vpop.f32.mrf.mxu2  ;;  %v15820_v31 = vld [vmem:[#allocation6 + $0x5c4] sm:$0xf]  ;;  %v14128_v17 = vld [vmem:[#allocation6 + $0x5d0] sm:$0xf0] }
 0x43e   :  { %v13712_v53 = vld [vmem:[#allocation6 + $0x290] sm:$0xf0]  ;;  %v15812_v8 = vld [vmem:[#allocation6 + $0x584] sm:$0xf] }
 0x43f   :  { %8804 = vmatpush.bf16.msrb.mxu1 %v13619_v20  ;;  %8767 = vmatpush.bf16.msra.mxu2 %v14223_v12  ;;  %v7002_v44 = vpop.f32.mrf.mxu1  ;;  %v16543_v20 = vpack.c.bf16 %v7139_v6, %v7139_v6  ;;  %v13392_v12 = vld [vmem:[#allocation6 + $0x10] sm:$0xf0]  ;;  %v15708_v15 = vld [vmem:[#allocation6 + $0x244] sm:$0xf] }
 0x440   :  { %8727 = vmatpush.bf16.msrb.mxu0 %v13855_v23  ;;  %v13395_v29 = vor.u32 %v15636_v0, %v13392_v12  ;;  %v14131_v44 = vor.u32 %v15820_v31, %v14128_v17  ;;  %v13968_v61 = vld [vmem:[#allocation6 + $0x490] sm:$0xf0] }
 0x441   :  { %8792 = vmatpush.bf16.msrb.mxu3 %v13475_v47  ;;  %8759 = vmatmul.bf16.vlgmr.msra.gmra.mxu1 %v16543_v20  ;;  %v15830_v47 = vld [vmem:[#allocation6 + $0x60c] sm:$0xf0]  ;;  %v13971_v0 = vor.u32 %v15780_v32, %v13968_v61  ;;  %v14048_v31 = vld [vmem:[#allocation6 + $0x530] sm:$0xf0]  ;;  %v14382_v32 = vld [vmem:[#allocation6 + $0x7c0] sm:$0xf] }
 0x442   :  { %v14159_v23 = vor.u32 %v15830_v47, %v14158_v48  ;;  %v13715_v48 = vor.u32 %v15716_v11, %v13712_v53  ;;  %v15712_v47 = vld [vmem:[#allocation6 + $0x264] sm:$0xf]  ;;  %v14032_v11 = vld [vmem:[#allocation6 + $0x510] sm:$0xf0]  ;;  %v15886_v61 = vld [vmem:[#allocation6 + $0x7cc] sm:$0xf0] }
 0x443   :  { %8805 = vmatpush.bf16.msrb.mxu1 %v13603_v1  ;;  %8768 = vmatpush.bf16.msra.mxu2 %v14207_v14  ;;  %v6924_v1 = vpop.f32.mrf.mxu0  ;;  %v6989_v62 = vpop.f32.mrf.mxu3  ;;  %v13744_v14 = vld [vmem:[#allocation6 + $0x2d0] sm:$0xf0] }
 0x444   :  { %8728 = vmatpush.bf16.msrb.mxu0 %v13839_v49  ;;  %v14000_v49 = vld [vmem:[#allocation6 + $0x4d0] sm:$0xf0]  ;;  %v13747_v60 = vor.u32 %v15724_v43, %v13744_v14  ;;  %v15808_v62 = vld [vmem:[#allocation6 + $0x564] sm:$0xf] }
 0x445   :  { %8793 = vmatpush.bf16.msrb.mxu3 %v13459_v54  ;;  %v15738_v54 = vld [vmem:[#allocation6 + $0x32c] sm:$0xf0]  ;;  %v13696_v1 = vld [vmem:[#allocation6 + $0x270] sm:$0xf0] }
 0x446   :  { %v13791_v2 = vor.u32 %v15738_v54, %v13790_v56  ;;  %v13699_v12 = vor.u32 %v15712_v47, %v13696_v1  ;;  %v13680_v56 = vld [vmem:[#allocation6 + $0x250] sm:$0xf0]  ;;  %v14383_v47 = vor.u32 %v15886_v61, %v14382_v32  ;;  %v15866_v32 = vld [vmem:[#allocation6 + $0x72c] sm:$0xf0]  ;;  %v15647_v61 = vld [vmem:[#allocation6 + $0x54] sm:$0xf0] }
 0x447   :  { %8806 = vmatpush.bf16.msrb.mxu1 %v13587_v22  ;;  %8769 = vmatpush.bf16.msra.mxu2 %v14191_v16  ;;  %v15792_v22 = vld [vmem:[#allocation6 + $0x4e4] sm:$0xf]  ;;  %v7137_v16 = vmax.f32 %v16478_v30, 0.0  ;;  %v13987_v30 = vor.u32 %v15784_v58, %v13984_v37  ;;  %v13683_v43 = vor.u32 %v15708_v15, %v13680_v56  ;;  %v15695_v15 = vld [vmem:[#allocation6 + $0x1d4] sm:$0xf0] }
 0x448   :  { %8729 = vmatpush.bf16.msrb.mxu0 %v13823_v55  ;;  %v14019_v7 = vor.u32 %v15792_v22, %v14016_v63  ;;  %v13731_v55 = vor.u32 %v15720_v36, %v13728_v28  ;;  %v15772_v63 = vld [vmem:[#allocation6 + $0x444] sm:$0xf]  ;;  %v15890_v36 = vld [vmem:[#allocation6 + $0x7ec] sm:$0xf0] }
 0x449   :  { %8794 = vmatpush.bf16.msrb.mxu3 %v13443_v33  ;;  %v13774_v33 = vld [vmem:[#allocation6 + $0x300] sm:$0xf]  ;;  %v16548_v34 = vpack.c.bf16 %v7137_v16, %v7137_v16  ;;  %v13648_v16 = vld [vmem:[#allocation6 + $0x210] sm:$0xf0] }
 0x44a   :  { %v13775_v26 = vor.u32 %v15734_v5, %v13774_v33  ;;  %v15768_v5 = vld [vmem:[#allocation6 + $0x424] sm:$0xf] }
 0x44b   :  { %8807 = vmatpush.bf16.msrb.mxu1 %v13571_v39  ;;  %8770 = vmatpush.bf16.msra.mxu2 %v14175_v52  ;;  %v15788_v39 = vld [vmem:[#allocation6 + $0x4c4] sm:$0xf]  ;;  %v14096_v52 = vld [vmem:[#allocation6 + $0x590] sm:$0xf0] }
 0x44c   :  { %8730 = vmatpush.bf16.msrb.mxu0 %v13807_v38  ;;  %v14003_v6 = vor.u32 %v15788_v39, %v14000_v49  ;;  %v14099_v42 = vor.u32 %v15812_v8, %v14096_v52  ;;  %v14080_v38 = vld [vmem:[#allocation6 + $0x570] sm:$0xf0]  ;;  %v15800_v49 = vld [vmem:[#allocation6 + $0x524] sm:$0xf]  ;;  %v15667_v8 = vld [vmem:[#allocation6 + $0xf4] sm:$0xf0] }
 0x44d   :  { %8795 = vmatpush.bf16.msrb.mxu3 %v13427_v24  ;;  %v15816_v24 = vld [vmem:[#allocation6 + $0x5a4] sm:$0xf]  ;;  %v13920_v39 = vld [vmem:[#allocation6 + $0x430] sm:$0xf0]  ;;  %v13638_v52 = vld [vmem:[#allocation6 + $0x1e8] sm:$0xf] }
 0x44e   :  { %v13923_v37 = vor.u32 %v15768_v5, %v13920_v39  ;;  %v15874_v5 = vld [vmem:[#allocation6 + $0x76c] sm:$0xf0]  ;;  %v15655_v39 = vld [vmem:[#allocation6 + $0x94] sm:$0xf0] }
 0x44f   :  { %8808 = vmatpush.bf16.msrb.mxu1 %v13555_v40  ;;  %8771 = vmatpush.bf16.msra.mxu2 %v14159_v23  ;;  %v14112_v40 = vld [vmem:[#allocation6 + $0x5b0] sm:$0xf0]  ;;  %v14083_v23 = vor.u32 %v15808_v62, %v14080_v38  ;;  %v15882_v62 = vld [vmem:[#allocation6 + $0x7ac] sm:$0xf0]  ;;  %v15663_v38 = vld [vmem:[#allocation6 + $0xd4] sm:$0xf0] }
 0x450   :  { %8731 = vmatpush.bf16.msrb.mxu0 %v13791_v2  ;;  %v14115_v3 = vor.u32 %v15816_v24, %v14112_v40  ;;  %v13664_v2 = vld [vmem:[#allocation6 + $0x230] sm:$0xf0]  ;;  %v14051_v24 = vor.u32 %v15800_v49, %v14048_v31  ;;  %v13590_v49 = vld [vmem:[#allocation6 + $0x188] sm:$0xf]  ;;  %v15687_v31 = vld [vmem:[#allocation6 + $0x194] sm:$0xf0] }
 0x451   :  { %8796 = vmatpush.bf16.msrb.mxu3 %v13411_v50  ;;  %v13904_v40 = vld [vmem:[#allocation6 + $0x410] sm:$0xf0] }
 0x453   :  { %8809 = vmatpush.bf16.msrb.mxu1 %v13539_v25  ;;  %8816 = vmatpush.bf16.msrb.mxu2 %v13763_v35  ;;  %v13952_v25 = vld [vmem:[#allocation6 + $0x470] sm:$0xf0]  ;;  %v15804_v35 = vld [vmem:[#allocation6 + $0x544] sm:$0xf] }
 0x454   :  { %8732 = vmatpush.bf16.msrb.mxu0 %v13775_v26  ;;  %v13955_v22 = vor.u32 %v15776_v51, %v13952_v25  ;;  %v15700_v26 = vld [vmem:[#allocation6 + $0x204] sm:$0xf]  ;;  %v13494_v51 = vld [vmem:[#allocation6 + $0xc8] sm:$0xf]  ;;  %v14366_v25 = vld [vmem:[#allocation6 + $0x7a0] sm:$0xf] }
 0x455   :  { %8797 = vmatpush.bf16.msrb.mxu3 %v13395_v29  ;;  %v16552_v13 = vpop.f32.mrf.mxu2  ;;  %v14064_v29 = vld [vmem:[#allocation6 + $0x550] sm:$0xf0]  ;;  %v14367_v56 = vor.u32 %v15882_v62, %v14366_v25 }
 0x456   :  { %v16554_v54 = vpop.f32.mrf.mxu0  ;;  %v14067_v33 = vor.u32 %v15804_v35, %v14064_v29  ;;  %v14350_v35 = vld [vmem:[#allocation6 + $0x780] sm:$0xf]  ;;  %v15878_v29 = vld [vmem:[#allocation6 + $0x78c] sm:$0xf0] }
 0x457   :  { %8810 = vmatpush.bf16.msrb.mxu1 %v13523_v9  ;;  %8817 = vmatpush.bf16.msrb.mxu2 %v13747_v60  ;;  %v7052_v50 = vpop.f32.mrf.mxu1  ;;  %v15704_v9 = vld [vmem:[#allocation6 + $0x224] sm:$0xf]  ;;  %v14398_v60 = vld [vmem:[#allocation6 + $0x7e0] sm:$0xf] }
 0x458   :  { %8798 = vmatmul.bf16.vlgmr.msrb.gmra.mxu3 %v16507_v41  ;;  %8733 = vmatmul.bf16.vlgmr.msrb.gmra.mxu0 %v16548_v34  ;;  %v13667_v17 = vor.u32 %v15704_v9, %v13664_v2  ;;  %v13606_v9 = vld [vmem:[#allocation6 + $0x1a8] sm:$0xf]  ;;  %v15691_v2 = vld [vmem:[#allocation6 + $0x1b4] sm:$0xf0] }
 0x459   :  { %8842 = vmatpush.bf16.msra.mxu3 %v14019_v7 }
 0x45a   :  { %8811 = vmatmul.bf16.vlgmr.msrb.gmra.mxu1 %v16510_v46 }
 0x45b   :  { %8855 = vmatpush.bf16.msra.mxu1 %v14147_v4  ;;  %8818 = vmatpush.bf16.msrb.mxu2 %v13731_v55  ;;  %v7039_v19 = vpop.f32.mrf.mxu3  ;;  %v13939_v4 = vor.u32 %v15772_v63, %v13936_v27  ;;  %v15796_v55 = vld [vmem:[#allocation6 + $0x504] sm:$0xf]  ;;  %v13495_v63 = vor.u32 %v15663_v38, %v13494_v51  ;;  %v13478_v27 = vld [vmem:[#allocation6 + $0xa8] sm:$0xf]  ;;  %v15643_v51 = vld [vmem:[#allocation6 + $0x34] sm:$0xf0] }
 0x45c   :  { %v16556_v14 = vadd.f32 %v7052_v50, %v7039_v19  ;;  %v14035_v50 = vor.u32 %v15796_v55, %v14032_v11 }
 0x45d   :  { %8843 = vmatpush.bf16.msra.mxu3 %v14003_v6  ;;  %v7015_v28 = vpop.f32.mrf.mxu2  ;;  %v14399_v6 = vor.u32 %v15890_v36, %v14398_v60 }
 0x45e   :  { %v6976_v58 = vpop.f32.mrf.mxu0  ;;  %v13591_v28 = vor.u32 %v15687_v31, %v13590_v49  ;;  %v15756_v49 = vld [vmem:[#allocation6 + $0x3c4] sm:$0xf]  ;;  %v13872_v31 = vld [vmem:[#allocation6 + $0x3d0] sm:$0xf0] }
 0x45f   :  { %8856 = vmatpush.bf16.msra.mxu1 %v14131_v44  ;;  %8819 = vmatpush.bf16.msrb.mxu2 %v13715_v48  ;;  %v7054_v7 = vpop.f32.mrf.mxu1  ;;  %v15764_v44 = vld [vmem:[#allocation6 + $0x404] sm:$0xf]  ;;  %v15699_v48 = vld [vmem:[#allocation6 + $0x1f4] sm:$0xf0]  ;;  %v13574_v58 = vld [vmem:[#allocation6 + $0x168] sm:$0xf] }
 0x460   :  { %8777 = vmatpush.bf16.msra.mxu0 %v14399_v6  ;;  %v13907_v1 = vor.u32 %v15764_v44, %v13904_v40  ;;  %v14351_v7 = vor.u32 %v15878_v29, %v14350_v35  ;;  %v15870_v6 = vld [vmem:[#allocation6 + $0x74c] sm:$0xf0]  ;;  %v15651_v44 = vld [vmem:[#allocation6 + $0x74] sm:$0xf0]  ;;  %v13888_v35 = vld [vmem:[#allocation6 + $0x3f0] sm:$0xf0] }
 0x461   :  { %8844 = vmatpush.bf16.msra.mxu3 %v13987_v30  ;;  %v13510_v30 = vld [vmem:[#allocation6 + $0xe8] sm:$0xf] }
 0x463   :  { %8857 = vmatpush.bf16.msra.mxu1 %v14115_v3  ;;  %8820 = vmatpush.bf16.msrb.mxu2 %v13699_v12  ;;  %v7041_v53 = vpop.f32.mrf.mxu3  ;;  %v13651_v3 = vor.u32 %v15700_v26, %v13648_v16  ;;  %v13622_v12 = vld [vmem:[#allocation6 + $0x1c8] sm:$0xf]  ;;  %v14318_v16 = vld [vmem:[#allocation6 + $0x740] sm:$0xf] }
 0x464   :  { %8778 = vmatpush.bf16.msra.mxu0 %v14383_v47  ;;  %v13623_v19 = vor.u32 %v15695_v15, %v13622_v12  ;;  %v13446_v26 = vld [vmem:[#allocation6 + $0x68] sm:$0xf]  ;;  %v14286_v12 = vld [vmem:[#allocation6 + $0x700] sm:$0xf]  ;;  %v15862_v15 = vld [vmem:[#allocation6 + $0x70c] sm:$0xf0] }
 0x465   :  { %8845 = vmatpush.bf16.msra.mxu3 %v13971_v0  ;;  %v13511_v0 = vor.u32 %v15667_v8, %v13510_v30  ;;  %v13447_v11 = vor.u32 %v15651_v44, %v13446_v26  ;;  %v13430_v30 = vld [vmem:[#allocation6 + $0x48] sm:$0xf]  ;;  %v15827_v26 = vld [vmem:[#allocation6 + $0x5f4] sm:$0xf0]  ;;  %v14240_v44 = vld [vmem:[#allocation6 + $0x6b0] sm:$0xf0] }
 0x466   :  { %v13558_v8 = vld [vmem:[#allocation6 + $0x148] sm:$0xf]  ;;  %v13431_v62 = vor.u32 %v15647_v61, %v13430_v30  ;;  %v13856_v30 = vld [vmem:[#allocation6 + $0x3b0] sm:$0xf0]  ;;  %v15823_v61 = vld [vmem:[#allocation6 + $0x5d4] sm:$0xf0] }
 0x467   :  { %8858 = vmatpush.bf16.msra.mxu1 %v14099_v42  ;;  %8821 = vmatpush.bf16.msrb.mxu2 %v13683_v43  ;;  %v13639_v42 = vor.u32 %v15699_v48, %v13638_v52  ;;  %v15659_v43 = vld [vmem:[#allocation6 + $0xb4] sm:$0xf0] }
 0x468   :  { %8779 = vmatpush.bf16.msra.mxu0 %v14367_v56  ;;  %v15679_v52 = vld [vmem:[#allocation6 + $0x154] sm:$0xf0]  ;;  %v13542_v56 = vld [vmem:[#allocation6 + $0x128] sm:$0xf] }
 0x469   :  { %8846 = vmatpush.bf16.msra.mxu3 %v13955_v22  ;;  %v6962_v22 = vadd.f32 %v16538_v59, %v16519_v10  ;;  %v13479_v59 = vor.u32 %v15659_v43, %v13478_v27  ;;  %v13559_v38 = vor.u32 %v15679_v52, %v13558_v8  ;;  %v15852_v43 = vld [vmem:[#allocation6 + $0x6c4] sm:$0xf] }
 0x46a   :  { %v15844_v52 = vld [vmem:[#allocation6 + $0x684] sm:$0xf] }
 0x46b   :  { %8859 = vmatpush.bf16.msra.mxu1 %v14083_v23  ;;  %8822 = vmatpush.bf16.msrb.mxu2 %v13667_v17  ;;  %v6975_v23 = vadd.f32 %v16554_v54, %v6962_v22  ;;  %v13607_v54 = vor.u32 %v15691_v2, %v13606_v9  ;;  %v15675_v22 = vld [vmem:[#allocation6 + $0x134] sm:$0xf0]  ;;  %v14256_v9 = vld [vmem:[#allocation6 + $0x6d0] sm:$0xf0]  ;;  %v13398_v2 = vld [vmem:[#allocation6 + $0x8] sm:$0xf] }
 0x46c   :  { %8780 = vmatpush.bf16.msra.mxu0 %v14351_v7 }
 0x46d   :  { %8847 = vmatpush.bf16.msra.mxu3 %v13939_v4  ;;  %v6988_v10 = vadd.f32 %v16541_v45, %v6975_v23  ;;  %v13462_v4 = vld [vmem:[#allocation6 + $0x88] sm:$0xf]  ;;  %v14287_v23 = vor.u32 %v15862_v15, %v14286_v12  ;;  %v15840_v15 = vld [vmem:[#allocation6 + $0x664] sm:$0xf] }
 0x46e   :  { %v13463_v36 = vor.u32 %v15655_v39, %v13462_v4  ;;  %v13526_v4 = vld [vmem:[#allocation6 + $0x108] sm:$0xf] }
 0x46f   :  { %8860 = vmatpush.bf16.msra.mxu1 %v14067_v33  ;;  %8823 = vmatpush.bf16.msrb.mxu2 %v13651_v3  ;;  %v14334_v33 = vld [vmem:[#allocation6 + $0x760] sm:$0xf]  ;;  %v7001_v45 = vadd.f32 %v16535_v57, %v6988_v10  ;;  %v14022_v39 = vld [vmem:[#allocation6 + $0x4e8] sm:$0xf] }
 0x470   :  { %v14335_v17 = vor.u32 %v15874_v5, %v14334_v33  ;;  %v14302_v3 = vld [vmem:[#allocation6 + $0x720] sm:$0xf]  ;;  %v15671_v33 = vld [vmem:[#allocation6 + $0x114] sm:$0xf0] }
 0x471   :  { %8848 = vmatpush.bf16.msra.mxu3 %v13923_v37  ;;  %v15683_v37 = vld [vmem:[#allocation6 + $0x174] sm:$0xf0]  ;;  %v7014_v55 = vadd.f32 %v16552_v13, %v7001_v45  ;;  %v14303_v48 = vor.u32 %v15866_v32, %v14302_v3  ;;  %v14150_v45 = vld [vmem:[#allocation6 + $0x5e8] sm:$0xf] }
 0x472   :  { %8781 = vmatpush.bf16.msra.mxu0 %v14335_v17  ;;  %v13575_v53 = vor.u32 %v15683_v37, %v13574_v58  ;;  %v13527_v37 = vor.u32 %v15671_v33, %v13526_v4  ;;  %v15791_v32 = vld [vmem:[#allocation6 + $0x4d4] sm:$0xf0]  ;;  %v13958_v33 = vld [vmem:[#allocation6 + $0x468] sm:$0xf] }
 0x473   :  { %8861 = vmatpush.bf16.msra.mxu1 %v14051_v24  ;;  %v14319_v24 = vor.u32 %v15870_v6, %v14318_v16  ;;  %v13875_v16 = vor.u32 %v15756_v49, %v13872_v31  ;;  %v15848_v6 = vld [vmem:[#allocation6 + $0x6a4] sm:$0xf]  ;;  %v15811_v31 = vld [vmem:[#allocation6 + $0x574] sm:$0xf0] }
 0x474   :  { %v14243_v3 = vor.u32 %v15848_v6, %v14240_v44 }
 0x475   :  { %8849 = vmatpush.bf16.msra.mxu3 %v13907_v1  ;;  %v16567_v40 = vpop.f32.mrf.mxu2 }
 0x476   :  { %v7026_v57 = vpop.f32.mrf.mxu0  ;;  %8782 = vmatpush.bf16.msra.mxu0 %v14319_v24 }
 0x477   :  { %8862 = vmatpush.bf16.msra.mxu1 %v14035_v50  ;;  %v16564_v60 = vpop.f32.mrf.mxu1  ;;  %v7027_v47 = vadd.f32 %v7026_v57, %v7014_v55  ;;  %v15856_v50 = vld [vmem:[#allocation6 + $0x6e4] sm:$0xf]  ;;  %v14151_v55 = vor.u32 %v15827_v26, %v14150_v45  ;;  %v14134_v57 = vld [vmem:[#allocation6 + $0x5c8] sm:$0xf] }
 0x478   :  { %8850 = vmatmul.bf16.vlgmr.msra.gmra.mxu3 %v16528_v21  ;;  %v15832_v26 = vld [vmem:[#allocation6 + $0x624] sm:$0xf] }
 0x479   :  { %8894 = vmatpush.bf16.msrb.mxu3 %v13511_v0  ;;  %v14272_v0 = vld [vmem:[#allocation6 + $0x6f0] sm:$0xf0]  ;;  %v7140_v25 = vmax.f32 %v7027_v47, 0.0 }
 0x47a   :  { %8863 = vmatmul.bf16.vlgmr.msra.gmra.mxu1 %v16543_v20  ;;  %8783 = vmatpush.bf16.msra.mxu0 %v14303_v48  ;;  %v14275_v27 = vor.u32 %v15856_v50, %v14272_v0  ;;  %v14224_v48 = vld [vmem:[#allocation6 + $0x690] sm:$0xf0]  ;;  %v14135_v50 = vor.u32 %v15823_v61, %v14134_v57  ;;  %v13990_v0 = vld [vmem:[#allocation6 + $0x4a8] sm:$0xf]  ;;  %v15828_v57 = vld [vmem:[#allocation6 + $0x604] sm:$0xf] }
 0x47b   :  { %8907 = vmatpush.bf16.msrb.mxu1 %v13639_v42  ;;  %v16570_v1 = vpop.f32.mrf.mxu3  ;;  %v13414_v42 = vld [vmem:[#allocation6 + $0x28] sm:$0xf] }
 0x47c   :  { %v13415_v10 = vor.u32 %v15643_v51, %v13414_v42  ;;  %v15787_v42 = vld [vmem:[#allocation6 + $0x4b4] sm:$0xf0]  ;;  %v14118_v51 = vld [vmem:[#allocation6 + $0x5a8] sm:$0xf] }
 0x47d   :  { %8895 = vmatpush.bf16.msrb.mxu3 %v13495_v63  ;;  %v15760_v63 = vld [vmem:[#allocation6 + $0x3e4] sm:$0xf]  ;;  %v7067_v29 = vpop.f32.mrf.mxu2 }
 0x47e   :  { %v13891_v7 = vor.u32 %v15760_v63, %v13888_v35  ;;  %v7028_v5 = vpop.f32.mrf.mxu0  ;;  %8784 = vmatpush.bf16.msra.mxu0 %v14287_v23  ;;  %v13974_v63 = vld [vmem:[#allocation6 + $0x488] sm:$0xf]  ;;  %v15815_v29 = vld [vmem:[#allocation6 + $0x594] sm:$0xf0] }
 0x47f   :  { %8908 = vmatpush.bf16.msrb.mxu1 %v13623_v19  ;;  %v7106_v13 = vpop.f32.mrf.mxu1  ;;  %v16572_v19 = vpack.c.bf16 %v7140_v25, %v7140_v25  ;;  %v14227_v25 = vor.u32 %v15844_v52, %v14224_v48  ;;  %v14102_v35 = vld [vmem:[#allocation6 + $0x588] sm:$0xf]  ;;  %v15779_v5 = vld [vmem:[#allocation6 + $0x474] sm:$0xf0]  ;;  %v14160_v52 = vld [vmem:[#allocation6 + $0x610] sm:$0xf0] }
 0x480   :  { %v15819_v13 = vld [vmem:[#allocation6 + $0x5b4] sm:$0xf0]  ;;  %v14103_v4 = vor.u32 %v15815_v29, %v14102_v35  ;;  %v13959_v44 = vor.u32 %v15779_v5, %v13958_v33  ;;  %v13766_v48 = vld [vmem:[#allocation6 + $0x2e8] sm:$0xf]  ;;  %v15697_v33 = vld [vmem:[#allocation6 + $0x1ec] sm:$0xf] }
 0x481   :  { %8896 = vmatpush.bf16.msrb.mxu3 %v13479_v59  ;;  %v13543_v59 = vor.u32 %v15675_v22, %v13542_v56  ;;  %8772 = vmatmul.bf16.vlgmr.msra.gmra.mxu2 %v16572_v19  ;;  %v14208_v56 = vld [vmem:[#allocation6 + $0x670] sm:$0xf0]  ;;  %v13991_v22 = vor.u32 %v15787_v42, %v13990_v0  ;;  %v14119_v23 = vor.u32 %v15819_v13, %v14118_v51  ;;  %v13926_v51 = vld [vmem:[#allocation6 + $0x428] sm:$0xf]  ;;  %v13640_v5 = vld [vmem:[#allocation6 + $0x1f8] sm:$0xf0] }
 0x482   :  { %8868 = vmatpush.bf16.msra.mxu2 %v14275_v27  ;;  %8829 = vmatpush.bf16.msrb.mxu0 %v13891_v7  ;;  %v15783_v27 = vld [vmem:[#allocation6 + $0x494] sm:$0xf0]  ;;  %v14054_v13 = vld [vmem:[#allocation6 + $0x528] sm:$0xf] }
 0x483   :  { %8909 = vmatpush.bf16.msrb.mxu1 %v13607_v54  ;;  %v15639_v54 = vld [vmem:[#allocation6 + $0x14] sm:$0xf0]  ;;  %v7093_v17 = vpop.f32.mrf.mxu3 }
 0x484   :  { %v13399_v58 = vor.u32 %v15639_v54, %v13398_v2  ;;  %v14211_v2 = vor.u32 %v15840_v15, %v14208_v56  ;;  %v13975_v54 = vor.u32 %v15783_v27, %v13974_v63  ;;  %v15740_v17 = vld [vmem:[#allocation6 + $0x344] sm:$0xf]  ;;  %v13776_v15 = vld [vmem:[#allocation6 + $0x310] sm:$0xf0]  ;;  %v14163_v56 = vor.u32 %v15828_v57, %v14160_v52  ;;  %v13750_v63 = vld [vmem:[#allocation6 + $0x2c8] sm:$0xf] }
 0x485   :  { %8897 = vmatpush.bf16.msrb.mxu3 %v13463_v36  ;;  %v14259_v36 = vor.u32 %v15852_v43, %v14256_v9  ;;  %v15744_v43 = vld [vmem:[#allocation6 + $0x364] sm:$0xf]  ;;  %v13824_v9 = vld [vmem:[#allocation6 + $0x370] sm:$0xf0]  ;;  %v15657_v57 = vld [vmem:[#allocation6 + $0xac] sm:$0xf] }
 0x486   :  { %8830 = vmatpush.bf16.msrb.mxu0 %v13875_v16  ;;  %v13827_v7 = vor.u32 %v15744_v43, %v13824_v9  ;;  %v14176_v16 = vld [vmem:[#allocation6 + $0x630] sm:$0xf0]  ;;  %v15727_v43 = vld [vmem:[#allocation6 + $0x2d4] sm:$0xf0]  ;;  %v13910_v9 = vld [vmem:[#allocation6 + $0x408] sm:$0xf] }
 0x487   :  { %8910 = vmatpush.bf16.msrb.mxu1 %v13591_v28  ;;  %v15795_v28 = vld [vmem:[#allocation6 + $0x4f4] sm:$0xf0]  ;;  %8869 = vmatpush.bf16.msra.mxu2 %v14259_v36  ;;  %v13808_v36 = vld [vmem:[#allocation6 + $0x350] sm:$0xf0]  ;;  %v13608_v52 = vld [vmem:[#allocation6 + $0x1b8] sm:$0xf0] }
 0x488   :  { %v14023_v24 = vor.u32 %v15795_v28, %v14022_v39  ;;  %v14086_v39 = vld [vmem:[#allocation6 + $0x568] sm:$0xf]  ;;  %v13811_v45 = vor.u32 %v15740_v17, %v13808_v36 }
 0x489   :  { %8898 = vmatpush.bf16.msrb.mxu3 %v13447_v11  ;;  %v14006_v11 = vld [vmem:[#allocation6 + $0x4c8] sm:$0xf] }
 0x48a   :  { %v14007_v47 = vor.u32 %v15791_v32, %v14006_v11  ;;  %v15807_v11 = vld [vmem:[#allocation6 + $0x554] sm:$0xf0]  ;;  %v14179_v32 = vor.u32 %v15832_v26, %v14176_v16  ;;  %v13734_v36 = vld [vmem:[#allocation6 + $0x2a8] sm:$0xf]  ;;  %v13643_v26 = vor.u32 %v15697_v33, %v13640_v5  ;;  %v15661_v16 = vld [vmem:[#allocation6 + $0xcc] sm:$0xf] }
 0x48b   :  { %8911 = vmatpush.bf16.msrb.mxu1 %v13575_v53  ;;  %v15752_v53 = vld [vmem:[#allocation6 + $0x3a4] sm:$0xf]  ;;  %8870 = vmatpush.bf16.msra.mxu2 %v14243_v3  ;;  %v13560_v33 = vld [vmem:[#allocation6 + $0x158] sm:$0xf0] }
 0x48c   :  { %v13859_v8 = vor.u32 %v15752_v53, %v13856_v30  ;;  %v15736_v53 = vld [vmem:[#allocation6 + $0x324] sm:$0xf]  ;;  %v13792_v30 = vld [vmem:[#allocation6 + $0x330] sm:$0xf0] }
 0x48d   :  { %8899 = vmatpush.bf16.msrb.mxu3 %v13431_v62  ;;  %v15748_v62 = vld [vmem:[#allocation6 + $0x384] sm:$0xf]  ;;  %v13795_v61 = vor.u32 %v15736_v53, %v13792_v30  ;;  %v7066_v53 = vadd.f32 %v16567_v40, %v16556_v14 }
 0x48e   :  { %8831 = vmatpush.bf16.msrb.mxu0 %v13859_v8 }
 0x48f   :  { %8912 = vmatpush.bf16.msrb.mxu1 %v13559_v38  ;;  %v13840_v38 = vld [vmem:[#allocation6 + $0x390] sm:$0xf0]  ;;  %8871 = vmatpush.bf16.msra.mxu2 %v14227_v25  ;;  %v15771_v25 = vld [vmem:[#allocation6 + $0x434] sm:$0xf0] }
 0x490   :  { %v13843_v12 = vor.u32 %v15748_v62, %v13840_v38  ;;  %v15803_v38 = vld [vmem:[#allocation6 + $0x534] sm:$0xf0]  ;;  %v13927_v35 = vor.u32 %v15771_v25, %v13926_v51  ;;  %v15653_v51 = vld [vmem:[#allocation6 + $0x8c] sm:$0xf]  ;;  %v13464_v25 = vld [vmem:[#allocation6 + $0x98] sm:$0xf0] }
 0x491   :  { %8900 = vmatpush.bf16.msrb.mxu3 %v13415_v10  ;;  %v15836_v10 = vld [vmem:[#allocation6 + $0x644] sm:$0xf]  ;;  %8824 = vmatmul.bf16.vlgmr.msrb.gmra.mxu2 %v16524_v18  ;;  %v14055_v29 = vor.u32 %v15803_v38, %v14054_v13  ;;  %v15685_v13 = vld [vmem:[#allocation6 + $0x18c] sm:$0xf] }
 0x492   :  { %8832 = vmatpush.bf16.msrb.mxu0 %v13843_v12  ;;  %v15732_v12 = vld [vmem:[#allocation6 + $0x304] sm:$0xf] }
 0x493   :  { %8913 = vmatpush.bf16.msrb.mxu1 %v13543_v59  ;;  %v14192_v59 = vld [vmem:[#allocation6 + $0x650] sm:$0xf0]  ;;  %8872 = vmatpush.bf16.msra.mxu2 %v14211_v2  ;;  %v15767_v2 = vld [vmem:[#allocation6 + $0x414] sm:$0xf0] }
 0x494   :  { %v14195_v28 = vor.u32 %v15836_v10, %v14192_v59  ;;  %v15799_v10 = vld [vmem:[#allocation6 + $0x514] sm:$0xf0]  ;;  %v15665_v59 = vld [vmem:[#allocation6 + $0xec] sm:$0xf] }
 0x495   :  { %8901 = vmatpush.bf16.msrb.mxu3 %v13399_v58  ;;  %v16578_v6 = vpop.f32.mrf.mxu2  ;;  %v14087_v58 = vor.u32 %v15811_v31, %v14086_v39  ;;  %v13911_v31 = vor.u32 %v15767_v2, %v13910_v9  ;;  %v13670_v9 = vld [vmem:[#allocation6 + $0x228] sm:$0xf]  ;;  %v15707_v2 = vld [vmem:[#allocation6 + $0x234] sm:$0xf0] }
 0x496   :  { %8833 = vmatpush.bf16.msrb.mxu0 %v13827_v7  ;;  %v16580_v3 = vpop.f32.mrf.mxu0  ;;  %v14038_v7 = vld [vmem:[#allocation6 + $0x508] sm:$0xf] }
 0x497   :  { %8914 = vmatpush.bf16.msrb.mxu1 %v13527_v37  ;;  %v8708_v49 = vpop.f32.mrf.mxu1  ;;  %v13942_v37 = vld [vmem:[#allocation6 + $0x448] sm:$0xf]  ;;  %8873 = vmatpush.bf16.msra.mxu2 %v14195_v28  ;;  %v14039_v17 = vor.u32 %v15799_v10, %v14038_v7  ;;  %v15723_v28 = vld [vmem:[#allocation6 + $0x2b4] sm:$0xf0]  ;;  %v15645_v10 = vld [vmem:[#allocation6 + $0x4c] sm:$0xf] }
 0x498   :  { %8902 = vmatmul.bf16.vlgmr.msrb.gmra.mxu3 %v16507_v41 }
 0x499   :  { %8946 = vmatpush.bf16.msra.mxu3 %v14023_v24  ;;  %v15775_v24 = vld [vmem:[#allocation6 + $0x454] sm:$0xf0] }
 0x49a   :  { %8915 = vmatmul.bf16.vlgmr.msrb.gmra.mxu1 %v16510_v46  ;;  %8834 = vmatpush.bf16.msrb.mxu0 %v13811_v45  ;;  %v13943_v0 = vor.u32 %v15775_v24, %v13942_v37  ;;  %v13624_v37 = vld [vmem:[#allocation6 + $0x1d8] sm:$0xf0]  ;;  %v13735_v24 = vor.u32 %v15723_v28, %v13734_v36  ;;  %v15703_v36 = vld [vmem:[#allocation6 + $0x214] sm:$0xf0]  ;;  %v15888_v28 = vld [vmem:[#allocation6 + $0x7e4] sm:$0xf] }
 0x49b   :  { %8959 = vmatpush.bf16.msra.mxu1 %v14151_v55  ;;  %v14070_v55 = vld [vmem:[#allocation6 + $0x548] sm:$0xf]  ;;  %v8695_v8 = vpop.f32.mrf.mxu3  ;;  %8874 = vmatpush.bf16.msra.mxu2 %v14179_v32 }
 0x49c   :  { %v14071_v42 = vor.u32 %v15807_v11, %v14070_v55  ;;  %v13718_v55 = vld [vmem:[#allocation6 + $0x288] sm:$0xf]  ;;  %v15719_v11 = vld [vmem:[#allocation6 + $0x294] sm:$0xf0] }
 0x49d   :  { %8947 = vmatpush.bf16.msra.mxu3 %v14007_v47  ;;  %v15731_v47 = vld [vmem:[#allocation6 + $0x2f4] sm:$0xf0]  ;;  %v7119_v27 = vpop.f32.mrf.mxu2 }
 0x49e   :  { %8835 = vmatpush.bf16.msrb.mxu0 %v13795_v61  ;;  %v13480_v61 = vld [vmem:[#allocation6 + $0xb8] sm:$0xf0]  ;;  %v15681_v27 = vld [vmem:[#allocation6 + $0x16c] sm:$0xf] }
 0x49f   :  { %8960 = vmatpush.bf16.msra.mxu1 %v14135_v50  ;;  %v16582_v50 = vadd.f32 %v8708_v49, %v8695_v8  ;;  %v8710_v62 = vpop.f32.mrf.mxu1  ;;  %8875 = vmatpush.bf16.msra.mxu2 %v14163_v56  ;;  %v13751_v49 = vor.u32 %v15727_v43, %v13750_v63  ;;  %v15689_v8 = vld [vmem:[#allocation6 + $0x1ac] sm:$0xf]  ;;  %v13483_v14 = vor.u32 %v15657_v57, %v13480_v61  ;;  %v13448_v63 = vld [vmem:[#allocation6 + $0x78] sm:$0xf0]  ;;  %v15884_v57 = vld [vmem:[#allocation6 + $0x7c4] sm:$0xf] }
 0x4a0   :  { %v13611_v40 = vor.u32 %v15689_v8, %v13608_v52  ;;  %v13592_v62 = vld [vmem:[#allocation6 + $0x198] sm:$0xf0]  ;;  %v13467_v56 = vor.u32 %v15653_v51, %v13464_v25  ;;  %v14384_v61 = vld [vmem:[#allocation6 + $0x7d0] sm:$0xf0]  ;;  %v14262_v8 = vld [vmem:[#allocation6 + $0x6c8] sm:$0xf] }
 0x4a1   :  { %8948 = vmatpush.bf16.msra.mxu3 %v13991_v22  ;;  %v13779_v22 = vor.u32 %v15732_v12, %v13776_v15  ;;  %v13686_v12 = vld [vmem:[#allocation6 + $0x248] sm:$0xf]  ;;  %v15711_v15 = vld [vmem:[#allocation6 + $0x254] sm:$0xf0]  ;;  %v15669_v51 = vld [vmem:[#allocation6 + $0x10c] sm:$0xf] }
 0x4a2   :  { %8876 = vmatmul.bf16.vlgmr.msra.gmra.mxu2 %v16572_v19  ;;  %v13528_v25 = vld [vmem:[#allocation6 + $0x118] sm:$0xf0] }
 0x4a3   :  { %8961 = vmatpush.bf16.msra.mxu1 %v14119_v23  ;;  %v13767_v23 = vor.u32 %v15731_v47, %v13766_v48  ;;  %8836 = vmatpush.bf16.msrb.mxu0 %v13779_v22  ;;  %v8697_v39 = vpop.f32.mrf.mxu3  ;;  %v7079_v48 = vadd.f32 %v16580_v3, %v7066_v53  ;;  %v13719_v47 = vor.u32 %v15719_v11, %v13718_v55  ;;  %v15673_v55 = vld [vmem:[#allocation6 + $0x12c] sm:$0xf]  ;;  %v13544_v11 = vld [vmem:[#allocation6 + $0x138] sm:$0xf0] }
 0x4a4   :  { %v13595_v22 = vor.u32 %v15685_v13, %v13592_v62  ;;  %v15793_v13 = vld [vmem:[#allocation6 + $0x4ec] sm:$0xf]  ;;  %v14024_v62 = vld [vmem:[#allocation6 + $0x4f8] sm:$0xf0] }
 0x4a5   :  { %8949 = vmatpush.bf16.msra.mxu3 %v13975_v54  ;;  %v7080_v54 = vpop.f32.mrf.mxu0  ;;  %8920 = vmatpush.bf16.msrb.mxu2 %v13767_v23  ;;  %v7092_v38 = vadd.f32 %v16570_v1, %v7079_v48  ;;  %v15649_v23 = vld [vmem:[#allocation6 + $0x6c] sm:$0xf] }
 0x4a6   :  { %v13451_v1 = vor.u32 %v15649_v23, %v13448_v63  ;;  %v13432_v54 = vld [vmem:[#allocation6 + $0x58] sm:$0xf0]  ;;  %v15880_v23 = vld [vmem:[#allocation6 + $0x7a4] sm:$0xf] }
 0x4a7   :  { %8962 = vmatpush.bf16.msra.mxu1 %v14103_v4  ;;  %v13512_v4 = vld [vmem:[#allocation6 + $0xf8] sm:$0xf0]  ;;  %v7105_v43 = vadd.f32 %v16564_v60, %v7092_v38  ;;  %v15825_v38 = vld [vmem:[#allocation6 + $0x5ec] sm:$0xf] }
 0x4a8   :  { %v13515_v45 = vor.u32 %v15665_v59, %v13512_v4  ;;  %v15677_v4 = vld [vmem:[#allocation6 + $0x14c] sm:$0xf] }
 0x4a9   :  { %8950 = vmatpush.bf16.msra.mxu3 %v13959_v44  ;;  %v13496_v44 = vld [vmem:[#allocation6 + $0xd8] sm:$0xf0]  ;;  %8921 = vmatpush.bf16.msrb.mxu2 %v13751_v49  ;;  %v7118_v39 = vadd.f32 %v16578_v6, %v7105_v43  ;;  %v13671_v49 = vor.u32 %v15707_v2, %v13670_v9  ;;  %v15851_v43 = vld [vmem:[#allocation6 + $0x6b4] sm:$0xf0]  ;;  %v14027_v9 = vor.u32 %v15793_v13, %v14024_v62  ;;  %v15809_v13 = vld [vmem:[#allocation6 + $0x56c] sm:$0xf] }
 0x4aa   :  { %v13499_v30 = vor.u32 %v15661_v16, %v13496_v44  ;;  %v13435_v16 = vor.u32 %v15645_v10, %v13432_v54  ;;  %v13563_v44 = vor.u32 %v15677_v4, %v13560_v33  ;;  %v15821_v10 = vld [vmem:[#allocation6 + $0x5cc] sm:$0xf]  ;;  %v14088_v62 = vld [vmem:[#allocation6 + $0x578] sm:$0xf0] }
 0x4ab   :  { %8963 = vmatpush.bf16.msra.mxu1 %v14087_v58  ;;  %v15693_v58 = vld [vmem:[#allocation6 + $0x1cc] sm:$0xf] }
 0x4ac   :  { %v13627_v32 = vor.u32 %v15693_v58, %v13624_v37  ;;  %v14278_v58 = vld [vmem:[#allocation6 + $0x6e8] sm:$0xf]  ;;  %v15859_v37 = vld [vmem:[#allocation6 + $0x6f4] sm:$0xf0] }
 0x4ad   :  { %8951 = vmatpush.bf16.msra.mxu3 %v13943_v0  ;;  %8922 = vmatpush.bf16.msrb.mxu2 %v13735_v24  ;;  %v13702_v0 = vld [vmem:[#allocation6 + $0x268] sm:$0xf]  ;;  %v13416_v24 = vld [vmem:[#allocation6 + $0x38] sm:$0xf0] }
 0x4af   :  { %8964 = vmatpush.bf16.msra.mxu1 %v14071_v42  ;;  %v15715_v42 = vld [vmem:[#allocation6 + $0x274] sm:$0xf0] }
 0x4b0   :  { %v13703_v3 = vor.u32 %v15715_v42, %v13702_v0  ;;  %v15855_v0 = vld [vmem:[#allocation6 + $0x6d4] sm:$0xf0]  ;;  %v15637_v42 = vld [vmem:[#allocation6 + $0xc] sm:$0xf] }
 0x4b1   :  { %8952 = vmatpush.bf16.msra.mxu3 %v13927_v35  ;;  %8923 = vmatpush.bf16.msrb.mxu2 %v13719_v47  ;;  %v13576_v35 = vld [vmem:[#allocation6 + $0x178] sm:$0xf0]  ;;  %v13547_v47 = vor.u32 %v15673_v55, %v13544_v11  ;;  %v14214_v55 = vld [vmem:[#allocation6 + $0x668] sm:$0xf]  ;;  %v15843_v11 = vld [vmem:[#allocation6 + $0x674] sm:$0xf0] }
 0x4b2   :  { %v13579_v7 = vor.u32 %v15681_v27, %v13576_v35  ;;  %v13531_v27 = vor.u32 %v15669_v51, %v13528_v25  ;;  %v14368_v35 = vld [vmem:[#allocation6 + $0x7b0] sm:$0xf0]  ;;  %v15777_v51 = vld [vmem:[#allocation6 + $0x46c] sm:$0xf]  ;;  %v13960_v25 = vld [vmem:[#allocation6 + $0x478] sm:$0xf0] }
 0x4b3   :  { %8965 = vmatpush.bf16.msra.mxu1 %v14055_v29  ;;  %v13687_v29 = vor.u32 %v15711_v15, %v13686_v12  ;;  %v14371_v54 = vor.u32 %v15880_v23, %v14368_v35  ;;  %v13963_v23 = vor.u32 %v15777_v51, %v13960_v25  ;;  %v13944_v35 = vld [vmem:[#allocation6 + $0x458] sm:$0xf0]  ;;  %v13862_v51 = vld [vmem:[#allocation6 + $0x3a8] sm:$0xf] }
 0x4b5   :  { %8953 = vmatpush.bf16.msra.mxu3 %v13911_v31  ;;  %8924 = vmatpush.bf16.msrb.mxu2 %v13703_v3  ;;  %v8721_v59 = vpop.f32.mrf.mxu2  ;;  %v13654_v31 = vld [vmem:[#allocation6 + $0x208] sm:$0xf]  ;;  %v14152_v3 = vld [vmem:[#allocation6 + $0x5f8] sm:$0xf0] }
 0x4b6   :  { %v16593_v5 = vadd.f32 %v8721_v59, %v16582_v50  ;;  %v7130_v60 = vpop.f32.mrf.mxu0  ;;  %v15641_v50 = vld [vmem:[#allocation6 + $0x2c] sm:$0xf]  ;;  %v13655_v53 = vor.u32 %v15703_v36, %v13654_v31  ;;  %v14155_v2 = vor.u32 %v15825_v38, %v14152_v3  ;;  %v14136_v59 = vld [vmem:[#allocation6 + $0x5d8] sm:$0xf0]  ;;  %v14230_v31 = vld [vmem:[#allocation6 + $0x688] sm:$0xf] }
 0x4b7   :  { %8966 = vmatpush.bf16.msra.mxu1 %v14039_v17  ;;  %v13419_v48 = vor.u32 %v15641_v50, %v13416_v24  ;;  %v15872_v50 = vld [vmem:[#allocation6 + $0x764] sm:$0xf]  ;;  %v14336_v24 = vld [vmem:[#allocation6 + $0x770] sm:$0xf0] }
 0x4b8   :  { %8954 = vmatmul.bf16.vlgmr.msra.gmra.mxu3 %v16528_v21 }
 0x4b9   :  { %8998 = vmatpush.bf16.msrb.mxu3 %v13515_v45  ;;  %8925 = vmatpush.bf16.msrb.mxu2 %v13687_v29  ;;  %v14400_v45 = vld [vmem:[#allocation6 + $0x7f0] sm:$0xf0]  ;;  %v14246_v29 = vld [vmem:[#allocation6 + $0x6a8] sm:$0xf] }
 0x4ba   :  { %8967 = vmatmul.bf16.vlgmr.msra.gmra.mxu1 %v16543_v20  ;;  %v14247_v4 = vor.u32 %v15851_v43, %v14246_v29  ;;  %v15805_v29 = vld [vmem:[#allocation6 + $0x54c] sm:$0xf]  ;;  %v14072_v43 = vld [vmem:[#allocation6 + $0x558] sm:$0xf0] }
 0x4bb   :  { %9011 = vmatpush.bf16.msrb.mxu1 %v13643_v26  ;;  %v16596_v17 = vpop.f32.mrf.mxu3  ;;  %v7131_v26 = vadd.f32 %v7130_v60, %v7118_v39  ;;  %v15876_v39 = vld [vmem:[#allocation6 + $0x784] sm:$0xf]  ;;  %v15847_v60 = vld [vmem:[#allocation6 + $0x694] sm:$0xf0] }
 0x4bd   :  { %8999 = vmatpush.bf16.msrb.mxu3 %v13499_v30  ;;  %v7141_v6 = vmax.f32 %v7131_v26, 0.0  ;;  %8926 = vmatpush.bf16.msrb.mxu2 %v13671_v49  ;;  %v14403_v30 = vor.u32 %v15888_v28, %v14400_v45  ;;  %v14352_v49 = vld [vmem:[#allocation6 + $0x790] sm:$0xf0]  ;;  %v14139_v28 = vor.u32 %v15821_v10, %v14136_v59  ;;  %v15785_v45 = vld [vmem:[#allocation6 + $0x4ac] sm:$0xf] }
 0x4be   :  { %v7132_v12 = vpop.f32.mrf.mxu0  ;;  %v16602_v33 = vpop.f32.mrf.mxu1  ;;  %v13992_v26 = vld [vmem:[#allocation6 + $0x4b8] sm:$0xf0]  ;;  %v14288_v10 = vld [vmem:[#allocation6 + $0x710] sm:$0xf0]  ;;  %v14166_v59 = vld [vmem:[#allocation6 + $0x608] sm:$0xf] }
 0x4bf   :  { %9012 = vmatpush.bf16.msrb.mxu1 %v13627_v32  ;;  %v14279_v32 = vor.u32 %v15859_v37, %v14278_v58  ;;  %v16598_v52 = vpack.c.bf16 %v7141_v6, %v7141_v6  ;;  %v14355_v58 = vor.u32 %v15876_v39, %v14352_v49  ;;  %v14231_v37 = vor.u32 %v15847_v60, %v14230_v31  ;;  %v15864_v12 = vld [vmem:[#allocation6 + $0x724] sm:$0xf]  ;;  %v13894_v39 = vld [vmem:[#allocation6 + $0x3e8] sm:$0xf]  ;;  %v15763_v49 = vld [vmem:[#allocation6 + $0x3f4] sm:$0xf0] }
 0x4c0   :  { %v13995_v6 = vor.u32 %v15785_v45, %v13992_v26  ;;  %v15729_v45 = vld [vmem:[#allocation6 + $0x2ec] sm:$0xf]  ;;  %v13768_v26 = vld [vmem:[#allocation6 + $0x2f8] sm:$0xf0] }
 0x4c1   :  { %9000 = vmatpush.bf16.msrb.mxu3 %v13483_v14  ;;  %v13400_v14 = vld [vmem:[#allocation6 + $0x18] sm:$0xf0]  ;;  %8927 = vmatpush.bf16.msrb.mxu2 %v13655_v53 }
 0x4c2   :  { %8785 = vmatmul.bf16.vlgmr.msra.gmra.mxu0 %v16598_v52  ;;  %v13403_v63 = vor.u32 %v15637_v42, %v13400_v14  ;;  %v14198_v42 = vld [vmem:[#allocation6 + $0x648] sm:$0xf] }
 0x4c3   :  { %9013 = vmatpush.bf16.msrb.mxu1 %v13611_v40  ;;  %v8723_v40 = vpop.f32.mrf.mxu2  ;;  %8881 = vmatpush.bf16.msra.mxu0 %v14403_v30  ;;  %v8749_v15 = vpop.f32.mrf.mxu3  ;;  %v15781_v30 = vld [vmem:[#allocation6 + $0x48c] sm:$0xf] }
 0x4c4   :  { %8928 = vmatmul.bf16.vlgmr.msrb.gmra.mxu2 %v16524_v18  ;;  %v14304_v15 = vld [vmem:[#allocation6 + $0x730] sm:$0xf0] }
 0x4c5   :  { %9001 = vmatpush.bf16.msrb.mxu3 %v13467_v56  ;;  %8972 = vmatpush.bf16.msra.mxu2 %v14279_v32  ;;  %v14387_v56 = vor.u32 %v15884_v57, %v14384_v61  ;;  %v13976_v32 = vld [vmem:[#allocation6 + $0x498] sm:$0xf0]  ;;  %v15813_v57 = vld [vmem:[#allocation6 + $0x58c] sm:$0xf] }
 0x4c6   :  { %v14104_v61 = vld [vmem:[#allocation6 + $0x598] sm:$0xf0]  ;;  %v13979_v14 = vor.u32 %v15781_v30, %v13976_v32  ;;  %v15759_v30 = vld [vmem:[#allocation6 + $0x3d4] sm:$0xf0] }
 0x4c7   :  { %9014 = vmatpush.bf16.msrb.mxu1 %v13595_v22  ;;  %v14263_v22 = vor.u32 %v15855_v0, %v14262_v8  ;;  %8882 = vmatpush.bf16.msra.mxu0 %v14387_v56  ;;  %v14339_v8 = vor.u32 %v15872_v50, %v14336_v24  ;;  %v15868_v0 = vld [vmem:[#allocation6 + $0x744] sm:$0xf]  ;;  %v14107_v40 = vor.u32 %v15813_v57, %v14104_v61  ;;  %v14182_v56 = vld [vmem:[#allocation6 + $0x628] sm:$0xf]  ;;  %v14056_v50 = vld [vmem:[#allocation6 + $0x538] sm:$0xf0] }
 0x4c8   :  { %v15725_v61 = vld [vmem:[#allocation6 + $0x2cc] sm:$0xf] }
 0x4c9   :  { %9002 = vmatpush.bf16.msrb.mxu3 %v13451_v1  ;;  %v15789_v1 = vld [vmem:[#allocation6 + $0x4cc] sm:$0xf]  ;;  %8973 = vmatpush.bf16.msra.mxu2 %v14263_v22  ;;  %v15835_v22 = vld [vmem:[#allocation6 + $0x634] sm:$0xf0] }
 0x4cb   :  { %9015 = vmatpush.bf16.msrb.mxu1 %v13579_v7  ;;  %v14008_v7 = vld [vmem:[#allocation6 + $0x4d8] sm:$0xf0]  ;;  %8883 = vmatpush.bf16.msra.mxu0 %v14371_v54 }
 0x4cc   :  { %v14011_v36 = vor.u32 %v15789_v1, %v14008_v7  ;;  %v15860_v7 = vld [vmem:[#allocation6 + $0x704] sm:$0xf] }
 0x4cd   :  { %9003 = vmatpush.bf16.msrb.mxu3 %v13435_v16  ;;  %v15817_v16 = vld [vmem:[#allocation6 + $0x5ac] sm:$0xf]  ;;  %8974 = vmatpush.bf16.msra.mxu2 %v14247_v4  ;;  %v15831_v4 = vld [vmem:[#allocation6 + $0x614] sm:$0xf0] }
 0x4cf   :  { %9016 = vmatpush.bf16.msrb.mxu1 %v13563_v44  ;;  %v14120_v44 = vld [vmem:[#allocation6 + $0x5b8] sm:$0xf0]  ;;  %8884 = vmatpush.bf16.msra.mxu0 %v14355_v58 }
 0x4d0   :  { %v14123_v53 = vor.u32 %v15817_v16, %v14120_v44  ;;  %v15769_v16 = vld [vmem:[#allocation6 + $0x42c] sm:$0xf]  ;;  %v13928_v58 = vld [vmem:[#allocation6 + $0x438] sm:$0xf0] }
 0x4d1   :  { %9004 = vmatpush.bf16.msrb.mxu3 %v13419_v48  ;;  %8975 = vmatpush.bf16.msra.mxu2 %v14231_v37  ;;  %v14215_v48 = vor.u32 %v15843_v11, %v14214_v55  ;;  %v15801_v37 = vld [vmem:[#allocation6 + $0x52c] sm:$0xf]  ;;  %v14291_v55 = vor.u32 %v15860_v7, %v14288_v10  ;;  %v14167_v11 = vor.u32 %v15831_v4, %v14166_v59  ;;  %v13814_v10 = vld [vmem:[#allocation6 + $0x348] sm:$0xf]  ;;  %v15743_v59 = vld [vmem:[#allocation6 + $0x354] sm:$0xf0] }
 0x4d2   :  { %8837 = vmatmul.bf16.vlgmr.msrb.gmra.mxu0 %v16548_v34  ;;  %v13931_v32 = vor.u32 %v15769_v16, %v13928_v58  ;;  %v14059_v57 = vor.u32 %v15801_v37, %v14056_v50  ;;  %v13688_v4 = vld [vmem:[#allocation6 + $0x258] sm:$0xf0]  ;;  %v15735_v16 = vld [vmem:[#allocation6 + $0x314] sm:$0xf0]  ;;  %v15701_v58 = vld [vmem:[#allocation6 + $0x20c] sm:$0xf] }
 0x4d3   :  { %9017 = vmatpush.bf16.msrb.mxu1 %v13547_v47  ;;  %v8762_v47 = vpop.f32.mrf.mxu1  ;;  %8885 = vmatpush.bf16.msra.mxu0 %v14339_v8  ;;  %v13752_v8 = vld [vmem:[#allocation6 + $0x2d8] sm:$0xf0]  ;;  %v14406_v50 = vld [vmem:[#allocation6 + $0x7e8] sm:$0xf] }
 0x4d4   :  { %v13656_v37 = vld [vmem:[#allocation6 + $0x218] sm:$0xf0] }
 0x4d5   :  { %9005 = vmatpush.bf16.msrb.mxu3 %v13403_v63  ;;  %8976 = vmatpush.bf16.msra.mxu2 %v14215_v48  ;;  %v14091_v63 = vor.u32 %v15809_v13, %v14088_v62  ;;  %v8734_v54 = vpop.f32.mrf.mxu0  ;;  %v15765_v48 = vld [vmem:[#allocation6 + $0x40c] sm:$0xf] }
 0x4d6   :  { %v8735_v31 = vadd.f32 %v8734_v54, %v16593_v5  ;;  %v13895_v5 = vor.u32 %v15763_v49, %v13894_v39  ;;  %v15709_v54 = vld [vmem:[#allocation6 + $0x24c] sm:$0xf]  ;;  %v13815_v39 = vor.u32 %v15743_v59, %v13814_v10  ;;  %v14216_v59 = vld [vmem:[#allocation6 + $0x678] sm:$0xf0] }
 0x4d7   :  { %9018 = vmatpush.bf16.msrb.mxu1 %v13531_v27  ;;  %v15773_v27 = vld [vmem:[#allocation6 + $0x44c] sm:$0xf]  ;;  %v13691_v49 = vor.u32 %v15709_v54, %v13688_v4 }
 0x4d8   :  { %9006 = vmatmul.bf16.vlgmr.msrb.gmra.mxu3 %v16507_v41  ;;  %v14320_v41 = vld [vmem:[#allocation6 + $0x750] sm:$0xf0]  ;;  %v8748_v24 = vadd.f32 %v16596_v17, %v8735_v31  ;;  %v15797_v17 = vld [vmem:[#allocation6 + $0x50c] sm:$0xf]  ;;  %v13798_v31 = vld [vmem:[#allocation6 + $0x328] sm:$0xf] }
 0x4d9   :  { %9050 = vmatpush.bf16.msra.mxu3 %v14027_v9  ;;  %v14323_v38 = vor.u32 %v15868_v0, %v14320_v41  ;;  %v14307_v9 = vor.u32 %v15864_v12, %v14304_v15  ;;  %v13912_v0 = vld [vmem:[#allocation6 + $0x418] sm:$0xf0]  ;;  %v15841_v10 = vld [vmem:[#allocation6 + $0x66c] sm:$0xf] }
 0x4da   :  { %9019 = vmatmul.bf16.vlgmr.msrb.gmra.mxu1 %v16510_v46  ;;  %v15839_v46 = vld [vmem:[#allocation6 + $0x654] sm:$0xf0]  ;;  %v16612_v47 = vadd.f32 %v16602_v33, %v8748_v24  ;;  %v14040_v41 = vld [vmem:[#allocation6 + $0x518] sm:$0xf0]  ;;  %v13915_v13 = vor.u32 %v15765_v48, %v13912_v0  ;;  %v15721_v33 = vld [vmem:[#allocation6 + $0x2ac] sm:$0xf] }
 0x4db   :  { %9063 = vmatpush.bf16.msra.mxu1 %v14155_v2  ;;  %v14199_v3 = vor.u32 %v15839_v46, %v14198_v42  ;;  %8886 = vmatpush.bf16.msra.mxu0 %v14323_v38  ;;  %v14183_v2 = vor.u32 %v15835_v22, %v14182_v56  ;;  %v8812_v1 = vpop.f32.mrf.mxu1  ;;  %v8799_v60 = vpop.f32.mrf.mxu3  ;;  %v14043_v62 = vor.u32 %v15797_v17, %v14040_v41  ;;  %v15755_v38 = vld [vmem:[#allocation6 + $0x3b4] sm:$0xf0]  ;;  %v13846_v56 = vld [vmem:[#allocation6 + $0x388] sm:$0xf]  ;;  %v15853_v17 = vld [vmem:[#allocation6 + $0x6cc] sm:$0xf] }
 0x4dc   :  { %v16608_v44 = vadd.f32 %v8812_v1, %v8799_v60  ;;  %v13863_v12 = vor.u32 %v15755_v38, %v13862_v51  ;;  %v15751_v22 = vld [vmem:[#allocation6 + $0x394] sm:$0xf0]  ;;  %v14264_v41 = vld [vmem:[#allocation6 + $0x6d8] sm:$0xf0]  ;;  %v14462_v51 = vld [vmem:[#allocation7 + $0x60] sm:$0xf] }
 0x4dd   :  { %9051 = vmatpush.bf16.msra.mxu3 %v14011_v36  ;;  %8977 = vmatpush.bf16.msra.mxu2 %v14199_v3  ;;  %v13947_v36 = vor.u32 %v15773_v27, %v13944_v35  ;;  %v8736_v46 = vpop.f32.mrf.mxu0  ;;  %v13736_v3 = vld [vmem:[#allocation6 + $0x2b8] sm:$0xf0]  ;;  %v13847_v27 = vor.u32 %v15751_v22, %v13846_v56  ;;  %v15891_v24 = vld [vmem:[#allocation6 + $0x7f4] sm:$0xf0]  ;;  %v14358_v56 = vld [vmem:[#allocation6 + $0x788] sm:$0xf] }
 0x4de   :  { %v13739_v15 = vor.u32 %v15721_v33, %v13736_v3  ;;  %v15907_v48 = vld [vmem:[#allocation7 + $0x74] sm:$0xf0]  ;;  %v14248_v38 = vld [vmem:[#allocation6 + $0x6b8] sm:$0xf0]  ;;  %v14454_v22 = vld [vmem:[#allocation7 + $0x50] sm:$0xf] }
 0x4df   :  { %9064 = vmatpush.bf16.msra.mxu1 %v14139_v28  ;;  %v14075_v28 = vor.u32 %v15805_v29, %v14072_v43  ;;  %8887 = vmatpush.bf16.msra.mxu0 %v14307_v9  ;;  %v13830_v29 = vld [vmem:[#allocation6 + $0x368] sm:$0xf]  ;;  %v15747_v43 = vld [vmem:[#allocation6 + $0x374] sm:$0xf0]  ;;  %v15713_v9 = vld [vmem:[#allocation6 + $0x26c] sm:$0xf] }
 0x4e0   :  { %v13831_v1 = vor.u32 %v15747_v43, %v13830_v29  ;;  %v15887_v0 = vld [vmem:[#allocation6 + $0x7d4] sm:$0xf0] }
 0x4e1   :  { %9052 = vmatpush.bf16.msra.mxu3 %v13995_v6  ;;  %8978 = vmatpush.bf16.msra.mxu2 %v14183_v2  ;;  %v13771_v6 = vor.u32 %v15729_v45, %v13768_v26  ;;  %v13704_v2 = vld [vmem:[#allocation6 + $0x278] sm:$0xf0]  ;;  %v13782_v26 = vld [vmem:[#allocation6 + $0x308] sm:$0xf] }
 0x4e2   :  { %v13707_v7 = vor.u32 %v15713_v9, %v13704_v2  ;;  %v14342_v2 = vld [vmem:[#allocation6 + $0x768] sm:$0xf] }
 0x4e3   :  { %9065 = vmatpush.bf16.msra.mxu1 %v14123_v53  ;;  %v13878_v53 = vld [vmem:[#allocation6 + $0x3c8] sm:$0xf]  ;;  %8888 = vmatpush.bf16.msra.mxu0 %v14291_v55  ;;  %v8814_v42 = vpop.f32.mrf.mxu1  ;;  %v8801_v25 = vpop.f32.mrf.mxu3  ;;  %v15857_v55 = vld [vmem:[#allocation6 + $0x6ec] sm:$0xf] }
 0x4e4   :  { %v15905_v25 = vld [vmem:[#allocation7 + $0x64] sm:$0xf0] }
 0x4e5   :  { %9053 = vmatpush.bf16.msra.mxu3 %v13979_v14  ;;  %8979 = vmatpush.bf16.msra.mxu2 %v14167_v11  ;;  %v13879_v14 = vor.u32 %v15759_v30, %v13878_v53  ;;  %v14280_v11 = vld [vmem:[#allocation6 + $0x6f8] sm:$0xf0]  ;;  %v13659_v53 = vor.u32 %v15701_v58, %v13656_v37  ;;  %v14463_v33 = vor.u32 %v15905_v25, %v14462_v51  ;;  %v14310_v37 = vld [vmem:[#allocation6 + $0x728] sm:$0xf] }
 0x4e6   :  { %8889 = vmatmul.bf16.vlgmr.msra.gmra.mxu0 %v16598_v52 }
 0x4e7   :  { %9066 = vmatpush.bf16.msra.mxu1 %v14107_v40  ;;  %8933 = vmatpush.bf16.msrb.mxu0 %v13895_v5  ;;  %v13755_v40 = vor.u32 %v15725_v61, %v13752_v8  ;;  %v14390_v61 = vld [vmem:[#allocation6 + $0x7c8] sm:$0xf]  ;;  %v14470_v8 = vld [vmem:[#allocation7 + $0x70] sm:$0xf] }
 0x4e8   :  { %8980 = vmatmul.bf16.vlgmr.msra.gmra.mxu2 %v16572_v19  ;;  %v14471_v42 = vor.u32 %v15907_v48, %v14470_v8  ;;  %v14391_v46 = vor.u32 %v15887_v0, %v14390_v61  ;;  %v14294_v61 = vld [vmem:[#allocation6 + $0x708] sm:$0xf]  ;;  %v14422_v8 = vld [vmem:[#allocation7 + $0x10] sm:$0xf]  ;;  %v15895_v48 = vld [vmem:[#allocation7 + $0x14] sm:$0xf0] }
 0x4e9   :  { %9054 = vmatpush.bf16.msra.mxu3 %v13963_v23  ;;  %9024 = vmatpush.bf16.msrb.mxu2 %v13771_v6  ;;  %v15717_v23 = vld [vmem:[#allocation6 + $0x28c] sm:$0xf]  ;;  %v13783_v6 = vor.u32 %v15735_v16, %v13782_v26 }
 0x4eb   :  { %9067 = vmatpush.bf16.msra.mxu1 %v14091_v63  ;;  %8934 = vmatpush.bf16.msrb.mxu0 %v13879_v14  ;;  %v13720_v63 = vld [vmem:[#allocation6 + $0x298] sm:$0xf0]  ;;  %v14267_v14 = vor.u32 %v15853_v17, %v14264_v41  ;;  %v15863_v17 = vld [vmem:[#allocation6 + $0x714] sm:$0xf0]  ;;  %v15829_v41 = vld [vmem:[#allocation6 + $0x60c] sm:$0xf] }
 0x4ec   :  { %v13723_v35 = vor.u32 %v15717_v23, %v13720_v63  ;;  %v15903_v23 = vld [vmem:[#allocation7 + $0x54] sm:$0xf0] }
 0x4ed   :  { %9055 = vmatpush.bf16.msra.mxu3 %v13947_v36  ;;  %9025 = vmatpush.bf16.msrb.mxu2 %v13755_v40  ;;  %v13672_v36 = vld [vmem:[#allocation6 + $0x238] sm:$0xf0]  ;;  %v14374_v40 = vld [vmem:[#allocation6 + $0x7a8] sm:$0xf]  ;;  %v15879_v63 = vld [vmem:[#allocation6 + $0x794] sm:$0xf0]  ;;  %v14455_v29 = vor.u32 %v15903_v23, %v14454_v22 }
 0x4ee   :  { %v14359_v43 = vor.u32 %v15879_v63, %v14358_v56  ;;  %v14472_v56 = vld [vmem:[#allocation7 + $0x78] sm:$0xf0]  ;;  %v15757_v22 = vld [vmem:[#allocation6 + $0x3cc] sm:$0xf] }
 0x4ef   :  { %9068 = vmatpush.bf16.msra.mxu1 %v14075_v28  ;;  %8935 = vmatpush.bf16.msrb.mxu0 %v13863_v12  ;;  %v13880_v23 = vld [vmem:[#allocation6 + $0x3d8] sm:$0xf0] }
 0x4f1   :  { %9056 = vmatpush.bf16.msra.mxu3 %v13931_v32  ;;  %9026 = vmatpush.bf16.msrb.mxu2 %v13739_v15  ;;  %v14407_v32 = vor.u32 %v15891_v24, %v14406_v50  ;;  %v14430_v50 = vld [vmem:[#allocation7 + $0x20] sm:$0xf]  ;;  %v15897_v24 = vld [vmem:[#allocation7 + $0x24] sm:$0xf0] }
 0x4f3   :  { %9069 = vmatpush.bf16.msra.mxu1 %v14059_v57  ;;  %8936 = vmatpush.bf16.msrb.mxu0 %v13847_v27  ;;  %v14283_v57 = vor.u32 %v15857_v55, %v14280_v11  ;;  %v15845_v27 = vld [vmem:[#allocation6 + $0x68c] sm:$0xf]  ;;  %v15867_v11 = vld [vmem:[#allocation6 + $0x734] sm:$0xf0] }
 0x4f5   :  { %9057 = vmatpush.bf16.msra.mxu3 %v13915_v13  ;;  %9027 = vmatpush.bf16.msrb.mxu2 %v13723_v35  ;;  %v15883_v13 = vld [vmem:[#allocation6 + $0x7b4] sm:$0xf0]  ;;  %v14232_v35 = vld [vmem:[#allocation6 + $0x698] sm:$0xf0] }
 0x4f6   :  { %v14375_v12 = vor.u32 %v15883_v13, %v14374_v40  ;;  %v14235_v9 = vor.u32 %v15845_v27, %v14232_v35  ;;  %v13896_v40 = vld [vmem:[#allocation6 + $0x3f8] sm:$0xf0]  ;;  %v14295_v13 = vor.u32 %v15863_v17, %v14294_v61  ;;  %v14534_v35 = vld [vmem:[#allocation7 + $0xf0] sm:$0xf] }
 0x4f7   :  { %9070 = vmatpush.bf16.msra.mxu1 %v14043_v62  ;;  %8937 = vmatpush.bf16.msrb.mxu0 %v13831_v1  ;;  %v16618_v60 = vpop.f32.mrf.mxu1  ;;  %v15849_v62 = vld [vmem:[#allocation6 + $0x6ac] sm:$0xf]  ;;  %v14446_v1 = vld [vmem:[#allocation7 + $0x40] sm:$0xf]  ;;  %v13816_v17 = vld [vmem:[#allocation6 + $0x358] sm:$0xf0] }
 0x4f8   :  { %9058 = vmatmul.bf16.vlgmr.msra.gmra.mxu3 %v16528_v21  ;;  %v15739_v21 = vld [vmem:[#allocation6 + $0x334] sm:$0xf0]  ;;  %v14251_v15 = vor.u32 %v15849_v62, %v14248_v38  ;;  %v14414_v38 = vld [vmem:[#allocation7] sm:$0xf] }
 0x4f9   :  { %9028 = vmatpush.bf16.msrb.mxu2 %v13707_v7  ;;  %v13799_v28 = vor.u32 %v15739_v21, %v13798_v31  ;;  %9494 = vmatpush.bf16.msrb.mxu3 %v14471_v42  ;;  %v15901_v7 = vld [vmem:[#allocation7 + $0x44] sm:$0xf0]  ;;  %v14438_v31 = vld [vmem:[#allocation7 + $0x30] sm:$0xf]  ;;  %v15899_v21 = vld [vmem:[#allocation7 + $0x34] sm:$0xf0] }
 0x4fa   :  { %9071 = vmatmul.bf16.vlgmr.msra.gmra.mxu1 %v16543_v20  ;;  %v15705_v20 = vld [vmem:[#allocation6 + $0x22c] sm:$0xf]  ;;  %v14447_v54 = vor.u32 %v15901_v7, %v14446_v1  ;;  %v14439_v26 = vor.u32 %v15899_v21, %v14438_v31  ;;  %v14168_v42 = vld [vmem:[#allocation6 + $0x618] sm:$0xf0]  ;;  %v15902_v21 = vld [vmem:[#allocation7 + $0x54] sm:$0xf] }
 0x4fb   :  { %8938 = vmatpush.bf16.msrb.mxu0 %v13815_v39  ;;  %v13675_v45 = vor.u32 %v15705_v20, %v13672_v36  ;;  %v16620_v5 = vpop.f32.mrf.mxu3  ;;  %v14219_v39 = vor.u32 %v15841_v10, %v14216_v59  ;;  %v15871_v36 = vld [vmem:[#allocation6 + $0x754] sm:$0xf0]  ;;  %v14171_v62 = vor.u32 %v15829_v41, %v14168_v42  ;;  %v15753_v7 = vld [vmem:[#allocation6 + $0x3ac] sm:$0xf]  ;;  %v14502_v42 = vld [vmem:[#allocation7 + $0xb0] sm:$0xf] }
 0x4fd   :  { %9029 = vmatpush.bf16.msrb.mxu2 %v13691_v49  ;;  %9495 = vmatpush.bf16.msrb.mxu3 %v14463_v33  ;;  %v14326_v49 = vld [vmem:[#allocation6 + $0x748] sm:$0xf] }
 0x4fe   :  { %v14327_v16 = vor.u32 %v15871_v36, %v14326_v49  ;;  %v14456_v36 = vld [vmem:[#allocation7 + $0x58] sm:$0xf0] }
 0x4ff   :  { %8939 = vmatpush.bf16.msrb.mxu0 %v13799_v28  ;;  %v8866_v30 = vpop.f32.mrf.mxu1  ;;  %v15837_v28 = vld [vmem:[#allocation6 + $0x64c] sm:$0xf] }
 0x500   :  { %v14431_v30 = vor.u32 %v15897_v24, %v14430_v50  ;;  %v15900_v50 = vld [vmem:[#allocation7 + $0x44] sm:$0xf]  ;;  %v14448_v24 = vld [vmem:[#allocation7 + $0x48] sm:$0xf0] }
 0x501   :  { %9030 = vmatpush.bf16.msrb.mxu2 %v13675_v45  ;;  %9496 = vmatpush.bf16.msrb.mxu3 %v14455_v29  ;;  %v14200_v45 = vld [vmem:[#allocation6 + $0x658] sm:$0xf0]  ;;  %v13883_v29 = vor.u32 %v15757_v22, %v13880_v23  ;;  %v15913_v22 = vld [vmem:[#allocation7 + $0xa4] sm:$0xf0]  ;;  %v15894_v23 = vld [vmem:[#allocation7 + $0x14] sm:$0xf] }
 0x502   :  { %v14203_v58 = vor.u32 %v15837_v28, %v14200_v45  ;;  %v15749_v28 = vld [vmem:[#allocation6 + $0x38c] sm:$0xf]  ;;  %v13848_v45 = vld [vmem:[#allocation6 + $0x398] sm:$0xf0] }
 0x503   :  { %8940 = vmatpush.bf16.msrb.mxu0 %v13783_v6  ;;  %v8853_v3 = vpop.f32.mrf.mxu3  ;;  %v15833_v6 = vld [vmem:[#allocation6 + $0x62c] sm:$0xf] }
 0x504   :  { %v16624_v20 = vpop.f32.mrf.mxu2 }
 0x505   :  { %9031 = vmatpush.bf16.msrb.mxu2 %v13659_v53  ;;  %9497 = vmatpush.bf16.msrb.mxu3 %v14447_v54  ;;  %v14184_v53 = vld [vmem:[#allocation6 + $0x638] sm:$0xf0] }
 0x506   :  { %8941 = vmatmul.bf16.vlgmr.msrb.gmra.mxu0 %v16548_v34 }
 0x507   :  { %8985 = vmatpush.bf16.msra.mxu0 %v14407_v32  ;;  %v14311_v32 = vor.u32 %v15867_v11, %v14310_v37  ;;  %v15919_v37 = vld [vmem:[#allocation7 + $0xd4] sm:$0xf0]  ;;  %v13832_v11 = vld [vmem:[#allocation6 + $0x378] sm:$0xf0] }
 0x508   :  { %9032 = vmatmul.bf16.vlgmr.msrb.gmra.mxu2 %v16524_v18  ;;  %v15875_v18 = vld [vmem:[#allocation6 + $0x774] sm:$0xf0] }
 0x509   :  { %9076 = vmatpush.bf16.msra.mxu2 %v14283_v57  ;;  %v14343_v4 = vor.u32 %v15875_v18, %v14342_v2  ;;  %9498 = vmatpush.bf16.msrb.mxu3 %v14439_v26  ;;  %v14187_v57 = vor.u32 %v15833_v6, %v14184_v53  ;;  %v14464_v2 = vld [vmem:[#allocation7 + $0x68] sm:$0xf0]  ;;  %v13864_v18 = vld [vmem:[#allocation6 + $0x3b8] sm:$0xf0]  ;;  %v14459_v26 = vor.u32 %v15902_v21, %v14456_v36 }
 0x50a   :  { %v13867_v49 = vor.u32 %v15753_v7, %v13864_v18  ;;  %v14451_v53 = vor.u32 %v15900_v50, %v14448_v24  ;;  %v14486_v18 = vld [vmem:[#allocation7 + $0x90] sm:$0xf]  ;;  %v14536_v50 = vld [vmem:[#allocation7 + $0xf8] sm:$0xf0] }
 0x50b   :  { %8986 = vmatpush.bf16.msra.mxu0 %v14391_v46  ;;  %v14423_v46 = vor.u32 %v15895_v48, %v14422_v8  ;;  %v15898_v8 = vld [vmem:[#allocation7 + $0x34] sm:$0xf]  ;;  %v14440_v48 = vld [vmem:[#allocation7 + $0x38] sm:$0xf0] }
 0x50c   :  { %v8775_v0 = vpop.f32.mrf.mxu2  ;;  %v14443_v41 = vor.u32 %v15898_v8, %v14440_v48  ;;  %v14360_v8 = vld [vmem:[#allocation6 + $0x798] sm:$0xf0]  ;;  %v8774_v48 = vadd.f32 %v16624_v20, %v16612_v47  ;;  %v15914_v20 = vld [vmem:[#allocation7 + $0xb4] sm:$0xf] }
 0x50d   :  { %9077 = vmatpush.bf16.msra.mxu2 %v14267_v14  ;;  %9499 = vmatpush.bf16.msrb.mxu3 %v14431_v30  ;;  %v15761_v14 = vld [vmem:[#allocation6 + $0x3ec] sm:$0xf]  ;;  %v14510_v30 = vld [vmem:[#allocation7 + $0xc0] sm:$0xf]  ;;  %v14328_v47 = vld [vmem:[#allocation6 + $0x758] sm:$0xf0] }
 0x50e   :  { %v13899_v3 = vor.u32 %v15761_v14, %v13896_v40  ;;  %v15741_v0 = vld [vmem:[#allocation6 + $0x34c] sm:$0xf]  ;;  %v15915_v14 = vld [vmem:[#allocation7 + $0xb4] sm:$0xf0]  ;;  %v15896_v40 = vld [vmem:[#allocation7 + $0x24] sm:$0xf] }
 0x50f   :  { %8987 = vmatpush.bf16.msra.mxu0 %v14375_v12  ;;  %v15893_v12 = vld [vmem:[#allocation7 + $0x4] sm:$0xf0] }
 0x510   :  { %v14415_v63 = vor.u32 %v15893_v12, %v14414_v38  ;;  %v13800_v38 = vld [vmem:[#allocation6 + $0x338] sm:$0xf0] }
 0x511   :  { %9078 = vmatpush.bf16.msra.mxu2 %v14251_v15  ;;  %9500 = vmatpush.bf16.msrb.mxu3 %v14423_v46  ;;  %v15906_v15 = vld [vmem:[#allocation7 + $0x74] sm:$0xf]  ;;  %v13819_v46 = vor.u32 %v15741_v0, %v13816_v17  ;;  %v14520_v17 = vld [vmem:[#allocation7 + $0xd8] sm:$0xf0] }
 0x512   :  { %v14475_v27 = vor.u32 %v15906_v15, %v14472_v56  ;;  %v14494_v15 = vld [vmem:[#allocation7 + $0xa0] sm:$0xf]  ;;  %v15918_v0 = vld [vmem:[#allocation7 + $0xd4] sm:$0xf] }
 0x513   :  { %8988 = vmatpush.bf16.msra.mxu0 %v14359_v43  ;;  %v15923_v43 = vld [vmem:[#allocation7 + $0xf4] sm:$0xf0] }
 0x514   :  { %v16628_v1 = vpop.f32.mrf.mxu2  ;;  %v14535_v10 = vor.u32 %v15923_v43, %v14534_v35  ;;  %v13784_v35 = vld [vmem:[#allocation6 + $0x318] sm:$0xf0] }
 0x515   :  { %9079 = vmatpush.bf16.msra.mxu2 %v14235_v9  ;;  %9501 = vmatpush.bf16.msrb.mxu3 %v14415_v63  ;;  %v15904_v9 = vld [vmem:[#allocation7 + $0x64] sm:$0xf]  ;;  %v14424_v63 = vld [vmem:[#allocation7 + $0x18] sm:$0xf0] }
 0x516   :  { %v14467_v59 = vor.u32 %v15904_v9, %v14464_v2  ;;  %9507 = vmatpush.bf16.msrb.mxu1 %v14535_v10  ;;  %v14427_v43 = vor.u32 %v15894_v23, %v14424_v63  ;;  %v15889_v9 = vld [vmem:[#allocation6 + $0x7ec] sm:$0xf]  ;;  %v14408_v2 = vld [vmem:[#allocation6 + $0x7f8] sm:$0xf0] }
 0x517   :  { %8989 = vmatpush.bf16.msra.mxu0 %v14343_v4  ;;  %v8916_v55 = vpop.f32.mrf.mxu1  ;;  %v14526_v4 = vld [vmem:[#allocation7 + $0xe0] sm:$0xf] }
 0x519   :  { %9080 = vmatpush.bf16.msra.mxu2 %v14219_v39  ;;  %9546 = vmatpush.bf16.msra.mxu3 %v14475_v27  ;;  %v15921_v39 = vld [vmem:[#allocation7 + $0xe4] sm:$0xf0]  ;;  %v15733_v27 = vld [vmem:[#allocation6 + $0x30c] sm:$0xf] }
 0x51a   :  { %v14527_v31 = vor.u32 %v15921_v39, %v14526_v4  ;;  %v13787_v10 = vor.u32 %v15733_v27, %v13784_v35  ;;  %v14416_v4 = vld [vmem:[#allocation7 + $0x8] sm:$0xf0] }
 0x51b   :  { %8990 = vmatpush.bf16.msra.mxu0 %v14327_v16  ;;  %v8903_v51 = vpop.f32.mrf.mxu3  ;;  %v14518_v16 = vld [vmem:[#allocation7 + $0xd0] sm:$0xf] }
 0x51c   :  { %v16626_v25 = vadd.f32 %v8916_v55, %v8903_v51  ;;  %9508 = vmatpush.bf16.msrb.mxu1 %v14527_v31  ;;  %v15745_v55 = vld [vmem:[#allocation6 + $0x36c] sm:$0xf]  ;;  %v14519_v6 = vor.u32 %v15919_v37, %v14518_v16  ;;  %v15909_v16 = vld [vmem:[#allocation7 + $0x84] sm:$0xf0]  ;;  %v15922_v37 = vld [vmem:[#allocation7 + $0xf4] sm:$0xf] }
 0x51d   :  { %9081 = vmatpush.bf16.msra.mxu2 %v14203_v58  ;;  %9547 = vmatpush.bf16.msra.mxu3 %v14467_v59  ;;  %v13851_v58 = vor.u32 %v15749_v28, %v13848_v45  ;;  %v14432_v51 = vld [vmem:[#allocation7 + $0x28] sm:$0xf0]  ;;  %v15911_v59 = vld [vmem:[#allocation7 + $0x94] sm:$0xf0]  ;;  %v14392_v45 = vld [vmem:[#allocation6 + $0x7d8] sm:$0xf0] }
 0x51e   :  { %v14487_v31 = vor.u32 %v15911_v59, %v14486_v18  ;;  %v15885_v28 = vld [vmem:[#allocation6 + $0x7cc] sm:$0xf]  ;;  %v15912_v18 = vld [vmem:[#allocation7 + $0xa4] sm:$0xf] }
 0x51f   :  { %8991 = vmatpush.bf16.msra.mxu0 %v14311_v32  ;;  %v8918_v33 = vpop.f32.mrf.mxu1  ;;  %v15917_v32 = vld [vmem:[#allocation7 + $0xc4] sm:$0xf0]  ;;  %v14395_v24 = vor.u32 %v15885_v28, %v14392_v45 }
 0x520   :  { %9509 = vmatpush.bf16.msrb.mxu1 %v14519_v6  ;;  %v14511_v61 = vor.u32 %v15917_v32, %v14510_v30  ;;  %v14503_v33 = vor.u32 %v15915_v14, %v14502_v42  ;;  %v15881_v6 = vld [vmem:[#allocation6 + $0x7ac] sm:$0xf] }
 0x521   :  { %9082 = vmatpush.bf16.msra.mxu2 %v14187_v57  ;;  %9548 = vmatpush.bf16.msra.mxu3 %v14459_v26  ;;  %v13835_v57 = vor.u32 %v15745_v55, %v13832_v11  ;;  %v14478_v26 = vld [vmem:[#allocation7 + $0x80] sm:$0xf]  ;;  %v15920_v55 = vld [vmem:[#allocation7 + $0xe4] sm:$0xf]  ;;  %v14528_v11 = vld [vmem:[#allocation7 + $0xe8] sm:$0xf0] }
 0x522   :  { %v14531_v32 = vor.u32 %v15920_v55, %v14528_v11  ;;  %v14480_v11 = vld [vmem:[#allocation7 + $0x88] sm:$0xf0] }
 0x523   :  { %8992 = vmatpush.bf16.msra.mxu0 %v14295_v13  ;;  %v8905_v54 = vpop.f32.mrf.mxu3 }
 0x524   :  { %9510 = vmatpush.bf16.msrb.mxu1 %v14511_v61  ;;  %v15892_v54 = vld [vmem:[#allocation7 + $0x4] sm:$0xf]  ;;  %v15877_v61 = vld [vmem:[#allocation6 + $0x78c] sm:$0xf] }
 0x525   :  { %9083 = vmatpush.bf16.msra.mxu2 %v14171_v62  ;;  %9549 = vmatpush.bf16.msra.mxu3 %v14451_v53  ;;  %v15737_v62 = vld [vmem:[#allocation6 + $0x32c] sm:$0xf]  ;;  %v14419_v21 = vor.u32 %v15892_v54, %v14416_v4  ;;  %v14376_v53 = vld [vmem:[#allocation6 + $0x7b8] sm:$0xf0]  ;;  %v14363_v42 = vor.u32 %v15877_v61, %v14360_v8  ;;  %v14582_v8 = vld [vmem:[#allocation7 + $0x150] sm:$0xf] }
 0x526   :  { %8993 = vmatmul.bf16.vlgmr.msra.gmra.mxu0 %v16598_v52  ;;  %v13803_v56 = vor.u32 %v15737_v62, %v13800_v38  ;;  %v15916_v62 = vld [vmem:[#allocation7 + $0xc4] sm:$0xf]  ;;  %v14512_v38 = vld [vmem:[#allocation7 + $0xc8] sm:$0xf0] }
 0x527   :  { %9037 = vmatpush.bf16.msrb.mxu0 %v13899_v3  ;;  %v14435_v3 = vor.u32 %v15896_v40, %v14432_v51  ;;  %v15873_v40 = vld [vmem:[#allocation6 + $0x76c] sm:$0xf] }
 0x528   :  { %9084 = vmatmul.bf16.vlgmr.msra.gmra.mxu2 %v16572_v19  ;;  %v8827_v19 = vpop.f32.mrf.mxu2  ;;  %9511 = vmatpush.bf16.msrb.mxu1 %v14503_v33  ;;  %v15861_v4 = vld [vmem:[#allocation6 + $0x70c] sm:$0xf] }
 0x529   :  { %9550 = vmatpush.bf16.msra.mxu3 %v14443_v41  ;;  %v14539_v19 = vor.u32 %v15922_v37, %v14536_v50  ;;  %v14598_v50 = vld [vmem:[#allocation7 + $0x170] sm:$0xf] }
 0x52b   :  { %9038 = vmatpush.bf16.msrb.mxu0 %v13883_v29  ;;  %v14495_v29 = vor.u32 %v15913_v22, %v14494_v15  ;;  %v14504_v22 = vld [vmem:[#allocation7 + $0xb8] sm:$0xf0] }
 0x52c   :  { %v14507_v27 = vor.u32 %v15914_v20, %v14504_v22  ;;  %v14542_v20 = vld [vmem:[#allocation7 + $0x100] sm:$0xf] }
 0x52d   :  { %9551 = vmatpush.bf16.msra.mxu3 %v14435_v3  ;;  %9512 = vmatpush.bf16.msrb.mxu1 %v14495_v29  ;;  %v14515_v3 = vor.u32 %v15916_v62, %v14512_v38  ;;  %v15865_v29 = vld [vmem:[#allocation6 + $0x72c] sm:$0xf]  ;;  %v14558_v38 = vld [vmem:[#allocation7 + $0x120] sm:$0xf] }
 0x52f   :  { %9039 = vmatpush.bf16.msrb.mxu0 %v13867_v49  ;;  %v14411_v49 = vor.u32 %v15889_v9, %v14408_v2 }
 0x530   :  { %v16632_v13 = vpop.f32.mrf.mxu2 }
 0x531   :  { %9552 = vmatpush.bf16.msra.mxu3 %v14427_v43  ;;  %9513 = vmatpush.bf16.msrb.mxu1 %v14487_v31  ;;  %v14312_v43 = vld [vmem:[#allocation6 + $0x738] sm:$0xf0] }
 0x532   :  { %v14315_v59 = vor.u32 %v15865_v29, %v14312_v43  ;;  %v14488_v31 = vld [vmem:[#allocation7 + $0x98] sm:$0xf0] }
 0x533   :  { %9040 = vmatpush.bf16.msrb.mxu0 %v13851_v58  ;;  %v14479_v58 = vor.u32 %v15909_v16, %v14478_v26 }
 0x535   :  { %9553 = vmatpush.bf16.msra.mxu3 %v14419_v21  ;;  %9514 = vmatpush.bf16.msrb.mxu1 %v14479_v58 }
 0x537   :  { %9041 = vmatpush.bf16.msrb.mxu0 %v13835_v57  ;;  %v16634_v12 = vpop.f32.mrf.mxu1  ;;  %v14379_v57 = vor.u32 %v15881_v6, %v14376_v53 }
 0x538   :  { %v8879_v39 = vpop.f32.mrf.mxu2 }
 0x539   :  { %9559 = vmatpush.bf16.msra.mxu1 %v14539_v19  ;;  %v14296_v39 = vld [vmem:[#allocation6 + $0x718] sm:$0xf0]  ;;  %v15908_v19 = vld [vmem:[#allocation7 + $0x84] sm:$0xf] }
 0x53a   :  { %v14299_v28 = vor.u32 %v15861_v4, %v14296_v39  ;;  %v14483_v6 = vor.u32 %v15908_v19, %v14480_v11  ;;  %v15934_v39 = vld [vmem:[#allocation7 + $0x154] sm:$0xf] }
 0x53b   :  { %9042 = vmatpush.bf16.msrb.mxu0 %v13819_v46  ;;  %v16636_v7 = vpop.f32.mrf.mxu3  ;;  %v14523_v46 = vor.u32 %v15918_v0, %v14520_v17 }
 0x53d   :  { %9560 = vmatpush.bf16.msra.mxu1 %v14531_v32 }
 0x53f   :  { %9043 = vmatpush.bf16.msrb.mxu0 %v13803_v56  ;;  %v8970_v36 = vpop.f32.mrf.mxu1  ;;  %v8786_v41 = vpop.f32.mrf.mxu0  ;;  %v15869_v56 = vld [vmem:[#allocation6 + $0x74c] sm:$0xf] }
 0x540   :  { %v8787_v14 = vadd.f32 %v8786_v41, %v8774_v48  ;;  %v14331_v63 = vor.u32 %v15869_v56, %v14328_v47  ;;  %v15935_v48 = vld [vmem:[#allocation7 + $0x154] sm:$0xf0]  ;;  %v14574_v41 = vld [vmem:[#allocation7 + $0x140] sm:$0xf]  ;;  %v14550_v56 = vld [vmem:[#allocation7 + $0x110] sm:$0xf] }
 0x541   :  { %9561 = vmatpush.bf16.msra.mxu1 %v14523_v46  ;;  %v14583_v0 = vor.u32 %v15935_v48, %v14582_v8  ;;  %v15927_v47 = vld [vmem:[#allocation7 + $0x114] sm:$0xf0] }
 0x542   :  { %v9102_v51 = vmax.f32 %v8787_v14, 0.0  ;;  %v14551_v22 = vor.u32 %v15927_v47, %v14550_v56  ;;  %v14622_v47 = vld [vmem:[#allocation7 + $0x1a0] sm:$0xf] }
 0x543   :  { %9044 = vmatpush.bf16.msrb.mxu0 %v13787_v10  ;;  %v8957_v30 = vpop.f32.mrf.mxu3  ;;  %v14496_v10 = vld [vmem:[#allocation7 + $0xa8] sm:$0xf0] }
 0x544   :  { %v9106_v15 = vpack.c.bf16 %v9102_v51, %v9102_v51  ;;  %v14499_v54 = vor.u32 %v15912_v18, %v14496_v10  ;;  %v15936_v10 = vld [vmem:[#allocation7 + $0x164] sm:$0xf] }
 0x545   :  { %9562 = vmatpush.bf16.msra.mxu1 %v14515_v3 }
 0x546   :  { %9045 = vmatmul.bf16.vlgmr.msrb.gmra.mxu0 %v16548_v34  ;;  %v14344_v34 = vld [vmem:[#allocation6 + $0x778] sm:$0xf0]  ;;  %9502 = vmatmul.bf16.vlgmr.msrb.gmra.mxu3 %v9106_v15 }
 0x547   :  { %9089 = vmatpush.bf16.msra.mxu0 %v14411_v49  ;;  %v14347_v33 = vor.u32 %v15873_v40, %v14344_v34  ;;  %v8788_v23 = vpop.f32.mrf.mxu0  ;;  %v8929_v35 = vpop.f32.mrf.mxu2  ;;  %v15910_v49 = vld [vmem:[#allocation7 + $0x94] sm:$0xf]  ;;  %v14566_v40 = vld [vmem:[#allocation7 + $0x130] sm:$0xf]  ;;  %v15931_v34 = vld [vmem:[#allocation7 + $0x134] sm:$0xf0] }
 0x548   :  { %v16642_v9 = vadd.f32 %v8929_v35, %v16626_v25  ;;  %v14491_v45 = vor.u32 %v15910_v49, %v14488_v31  ;;  %v8826_v25 = vadd.f32 %v16628_v1, %v16608_v44  ;;  %v14590_v44 = vld [vmem:[#allocation7 + $0x160] sm:$0xf]  ;;  %v15937_v1 = vld [vmem:[#allocation7 + $0x164] sm:$0xf0]  ;;  %v14567_v51 = vor.u32 %v15931_v34, %v14566_v40  ;;  %v14584_v49 = vld [vmem:[#allocation7 + $0x158] sm:$0xf0] }
 0x549   :  { %9563 = vmatpush.bf16.msra.mxu1 %v14507_v27  ;;  %v15925_v23 = vld [vmem:[#allocation7 + $0x104] sm:$0xf0]  ;;  %v14600_v27 = vld [vmem:[#allocation7 + $0x178] sm:$0xf0]  ;;  %v14587_v31 = vor.u32 %v15934_v39, %v14584_v49  ;;  %v14638_v34 = vld [vmem:[#allocation7 + $0x1c0] sm:$0xf] }
 0x54a   :  { %v14543_v43 = vor.u32 %v15925_v23, %v14542_v20  ;;  %v15945_v20 = vld [vmem:[#allocation7 + $0x1a4] sm:$0xf0]  ;;  %v14614_v23 = vld [vmem:[#allocation7 + $0x190] sm:$0xf]  ;;  %v14656_v39 = vld [vmem:[#allocation7 + $0x1e8] sm:$0xf0] }
 0x54b   :  { %9090 = vmatpush.bf16.msra.mxu0 %v14395_v24  ;;  %v15939_v24 = vld [vmem:[#allocation7 + $0x174] sm:$0xf0] }
 0x54c   :  { %v14599_v55 = vor.u32 %v15939_v24, %v14598_v50  ;;  %v14560_v50 = vld [vmem:[#allocation7 + $0x128] sm:$0xf0] }
 0x54d   :  { %9564 = vmatpush.bf16.msra.mxu1 %v14499_v54 }
 0x54e   :  { %9520 = vmatpush.bf16.msrb.mxu2 %v14599_v55 }
 0x54f   :  { %9091 = vmatpush.bf16.msra.mxu0 %v14379_v57  ;;  %v8838_v36 = vpop.f32.mrf.mxu0  ;;  %v8931_v16 = vpop.f32.mrf.mxu2  ;;  %v14591_v57 = vor.u32 %v15937_v1, %v14590_v44  ;;  %v15924_v44 = vld [vmem:[#allocation7 + $0x104] sm:$0xf] }
 0x550   :  { %v8839_v37 = vadd.f32 %v8838_v36, %v8826_v25  ;;  %v14576_v36 = vld [vmem:[#allocation7 + $0x148] sm:$0xf0]  ;;  %v15930_v25 = vld [vmem:[#allocation7 + $0x134] sm:$0xf]  ;;  %v14568_v16 = vld [vmem:[#allocation7 + $0x138] sm:$0xf0] }
 0x551   :  { %9565 = vmatpush.bf16.msra.mxu1 %v14491_v45 }
 0x552   :  { %v8852_v53 = vadd.f32 %v16620_v5, %v8839_v37  ;;  %9521 = vmatpush.bf16.msrb.mxu2 %v14591_v57  ;;  %v15933_v5 = vld [vmem:[#allocation7 + $0x144] sm:$0xf0]  ;;  %v15928_v37 = vld [vmem:[#allocation7 + $0x124] sm:$0xf]  ;;  %v15955_v57 = vld [vmem:[#allocation7 + $0x1f4] sm:$0xf0] }
 0x553   :  { %9092 = vmatpush.bf16.msra.mxu0 %v14363_v42  ;;  %v14563_v19 = vor.u32 %v15928_v37, %v14560_v50  ;;  %v14632_v37 = vld [vmem:[#allocation7 + $0x1b8] sm:$0xf0] }
 0x554   :  { %v8865_v61 = vadd.f32 %v16618_v60, %v8852_v53  ;;  %v14552_v53 = vld [vmem:[#allocation7 + $0x118] sm:$0xf0] }
 0x555   :  { %9566 = vmatpush.bf16.msra.mxu1 %v14483_v6  ;;  %v15926_v6 = vld [vmem:[#allocation7 + $0x114] sm:$0xf] }
 0x556   :  { %9554 = vmatmul.bf16.vlgmr.msra.gmra.mxu3 %v9106_v15  ;;  %9522 = vmatpush.bf16.msrb.mxu2 %v14583_v0  ;;  %v8878_v17 = vadd.f32 %v16632_v13, %v8865_v61  ;;  %v14555_v1 = vor.u32 %v15926_v6, %v14552_v53  ;;  %v15942_v53 = vld [vmem:[#allocation7 + $0x194] sm:$0xf] }
 0x557   :  { %9093 = vmatpush.bf16.msra.mxu0 %v14347_v33  ;;  %v9020_v2 = vpop.f32.mrf.mxu1  ;;  %v8840_v32 = vpop.f32.mrf.mxu0  ;;  %v15929_v33 = vld [vmem:[#allocation7 + $0x124] sm:$0xf0] }
 0x558   :  { %v14559_v3 = vor.u32 %v15929_v33, %v14558_v38  ;;  %v14662_v32 = vld [vmem:[#allocation7 + $0x1f0] sm:$0xf] }
 0x559   :  { %v14663_v61 = vor.u32 %v15955_v57, %v14662_v32  ;;  %v14608_v32 = vld [vmem:[#allocation7 + $0x188] sm:$0xf0] }
 0x55b   :  { %9094 = vmatpush.bf16.msra.mxu0 %v14331_v63  ;;  %v9007_v21 = vpop.f32.mrf.mxu3  ;;  %v15938_v63 = vld [vmem:[#allocation7 + $0x174] sm:$0xf] }
 0x55c   :  { %v16646_v26 = vadd.f32 %v9020_v2, %v9007_v21  ;;  %v14603_v18 = vor.u32 %v15938_v63, %v14600_v27  ;;  %v15932_v21 = vld [vmem:[#allocation7 + $0x144] sm:$0xf]  ;;  %v15943_v63 = vld [vmem:[#allocation7 + $0x194] sm:$0xf0] }
 0x55d   :  { %v14579_v45 = vor.u32 %v15932_v21, %v14576_v36  ;;  %v14615_v27 = vor.u32 %v15943_v63, %v14614_v23  ;;  %v14648_v21 = vld [vmem:[#allocation7 + $0x1d8] sm:$0xf0]  ;;  %v15957_v23 = vld [vmem:[#allocation9 + $0x8] sm:$0xff] }
 0x55e   :  { %v15969_v63 = vld [vmem:[#allocation9 + $0x68] sm:$0xff] }
 0x55f   :  { %9095 = vmatpush.bf16.msra.mxu0 %v14315_v59  ;;  %v9022_v58 = vpop.f32.mrf.mxu1  ;;  %v14592_v59 = vld [vmem:[#allocation7 + $0x168] sm:$0xf0] }
 0x560   :  { %v14595_v54 = vor.u32 %v15936_v10, %v14592_v59  ;;  %v14571_v58 = vor.u32 %v15930_v25, %v14568_v16  ;;  %v15954_v10 = vld [vmem:[#allocation7 + $0x1f4] sm:$0xf]  ;;  %v14664_v59 = vld [vmem:[#allocation7 + $0x1f8] sm:$0xf0] }
 0x563   :  { %9096 = vmatpush.bf16.msra.mxu0 %v14299_v28  ;;  %v9009_v30 = vpop.f32.mrf.mxu3  ;;  %v8890_v42 = vpop.f32.mrf.mxu0 }
 0x564   :  { %v8891_v46 = vadd.f32 %v8890_v42, %v8878_v17  ;;  %v14544_v30 = vld [vmem:[#allocation7 + $0x108] sm:$0xf0]  ;;  %v14654_v17 = vld [vmem:[#allocation7 + $0x1e0] sm:$0xf] }
 0x565   :  { %v14547_v48 = vor.u32 %v15924_v44, %v14544_v30  ;;  %v14616_v44 = vld [vmem:[#allocation7 + $0x198] sm:$0xf0]  ;;  %v15940_v30 = vld [vmem:[#allocation7 + $0x184] sm:$0xf] }
 0x566   :  { %9097 = vmatmul.bf16.vlgmr.msra.gmra.mxu0 %v16598_v52  ;;  %v14575_v52 = vor.u32 %v15933_v5, %v14574_v41  ;;  %v9103_v14 = vmax.f32 %v8891_v46, 0.0  ;;  %v15953_v41 = vld [vmem:[#allocation7 + $0x1e4] sm:$0xf0]  ;;  %v15951_v46 = vld [vmem:[#allocation7 + $0x1d4] sm:$0xf0]  ;;  %v14611_v57 = vor.u32 %v15940_v30, %v14608_v32 }
 0x567   :  { %9533 = vmatpush.bf16.msrb.mxu0 %v14663_v61  ;;  %v14655_v5 = vor.u32 %v15953_v41, %v14654_v17 }
 0x568   :  { %9523 = vmatpush.bf16.msrb.mxu2 %v14575_v52  ;;  %v9107_v62 = vpack.c.bf16 %v9103_v14, %v9103_v14  ;;  %v14646_v52 = vld [vmem:[#allocation7 + $0x1d0] sm:$0xf] }
 0x569   :  { %v14647_v14 = vor.u32 %v15951_v46, %v14646_v52 }
 0x56a   :  { %9515 = vmatmul.bf16.vlgmr.msrb.gmra.mxu1 %v9107_v62 }
 0x56b   :  { %v16652_v60 = vpop.f32.mrf.mxu2  ;;  %v8892_v13 = vpop.f32.mrf.mxu0  ;;  %9534 = vmatpush.bf16.msrb.mxu0 %v14655_v5 }
 0x56c   :  { %9524 = vmatpush.bf16.msrb.mxu2 %v14567_v51  ;;  %v15949_v51 = vld [vmem:[#allocation7 + $0x1c4] sm:$0xf0] }
 0x56d   :  { %v14639_v38 = vor.u32 %v15949_v51, %v14638_v34 }
 0x56f   :  { %9535 = vmatpush.bf16.msrb.mxu0 %v14647_v14 }
 0x570   :  { %9525 = vmatpush.bf16.msrb.mxu2 %v14559_v3  ;;  %v15947_v3 = vld [vmem:[#allocation7 + $0x1b4] sm:$0xf0] }
 0x573   :  { %v8983_v29 = vpop.f32.mrf.mxu2  ;;  %9536 = vmatpush.bf16.msrb.mxu0 %v14639_v38 }
 0x574   :  { %9526 = vmatpush.bf16.msrb.mxu2 %v14551_v22  ;;  %v14623_v22 = vor.u32 %v15945_v20, %v14622_v47  ;;  %v15959_v47 = vld [vmem:[#allocation9 + $0x18] sm:$0xff] }
 0x577   :  { %v16654_v15 = vpop.f32.mrf.mxu1 }
 0x578   :  { %9527 = vmatpush.bf16.msrb.mxu2 %v14543_v43  ;;  %v14606_v43 = vld [vmem:[#allocation7 + $0x180] sm:$0xf] }
 0x57a   :  { %9567 = vmatmul.bf16.vlgmr.msra.gmra.mxu1 %v9107_v62 }
 0x57b   :  { %v16656_v35 = vpop.f32.mrf.mxu3 }
 0x57c   :  { %9572 = vmatpush.bf16.msra.mxu2 %v14603_v18 }
 0x57f   :  { %v9074_v2 = vpop.f32.mrf.mxu1 }
 0x580   :  { %9573 = vmatpush.bf16.msra.mxu2 %v14595_v54  ;;  %v15941_v2 = vld [vmem:[#allocation7 + $0x184] sm:$0xf0]  ;;  %v15952_v54 = vld [vmem:[#allocation7 + $0x1e4] sm:$0xf] }
 0x581   :  { %v14607_v18 = vor.u32 %v15941_v2, %v14606_v43  ;;  %v14659_v49 = vor.u32 %v15952_v54, %v14656_v39  ;;  %v15967_v43 = vld [vmem:[#allocation9 + $0x58] sm:$0xff]  ;;  %v15966_v2 = vld [vmem:[#allocation9 + $0x50] sm:$0xff] }
 0x583   :  { %v9061_v4 = vpop.f32.mrf.mxu3  ;;  %v8942_v28 = vpop.f32.mrf.mxu0 }
 0x584   :  { %9574 = vmatpush.bf16.msra.mxu2 %v14587_v31  ;;  %v8943_v0 = vadd.f32 %v8942_v28, %v16642_v9  ;;  %v14667_v4 = vor.u32 %v15954_v10, %v14664_v59  ;;  %v15950_v31 = vld [vmem:[#allocation7 + $0x1d4] sm:$0xf]  ;;  %v15948_v28 = vld [vmem:[#allocation7 + $0x1c4] sm:$0xf] }
 0x585   :  { %v14651_v36 = vor.u32 %v15950_v31, %v14648_v21  ;;  %v15964_v10 = vld [vmem:[#allocation9 + $0x40] sm:$0xff] }
 0x588   :  { %9575 = vmatpush.bf16.msra.mxu2 %v14579_v45  ;;  %v14640_v45 = vld [vmem:[#allocation7 + $0x1c8] sm:$0xf0] }
 0x589   :  { %v14643_v16 = vor.u32 %v15948_v28, %v14640_v45 }
 0x58b   :  { %v9033_v24 = vpop.f32.mrf.mxu2  ;;  %v8944_v11 = vpop.f32.mrf.mxu0 }
 0x58c   :  { %9576 = vmatpush.bf16.msra.mxu2 %v14571_v58  ;;  %v16659_v55 = vadd.f32 %v9033_v24, %v16646_v26  ;;  %v8956_v26 = vadd.f32 %v16636_v7, %v8943_v0  ;;  %v14630_v7 = vld [vmem:[#allocation7 + $0x1b0] sm:$0xf]  ;;  %v15946_v58 = vld [vmem:[#allocation7 + $0x1b4] sm:$0xf]  ;;  %v15944_v24 = vld [vmem:[#allocation7 + $0x1a4] sm:$0xf] }
 0x58d   :  { %v14631_v13 = vor.u32 %v15947_v3, %v14630_v7  ;;  %v14635_v50 = vor.u32 %v15946_v58, %v14632_v37  ;;  %v15970_v7 = vld [vmem:[#allocation9 + $0x70] sm:$0xff]  ;;  %v15961_v3 = vld [vmem:[#allocation9 + $0x28] sm:$0xff] }
 0x58e   :  { %v8969_v42 = vadd.f32 %v16634_v12, %v8956_v26 }
 0x58f   :  { %9537 = vmatpush.bf16.msrb.mxu0 %v14631_v13 }
 0x590   :  { %9577 = vmatpush.bf16.msra.mxu2 %v14563_v19  ;;  %v8982_v40 = vadd.f32 %v16652_v60, %v8969_v42  ;;  %v14624_v19 = vld [vmem:[#allocation7 + $0x1a8] sm:$0xf0] }
 0x591   :  { %v14627_v11 = vor.u32 %v15944_v24, %v14624_v19 }
 0x593   :  { %v9035_v8 = vpop.f32.mrf.mxu2  ;;  %9538 = vmatpush.bf16.msrb.mxu0 %v14623_v22 }
 0x594   :  { %9578 = vmatpush.bf16.msra.mxu2 %v14555_v1  ;;  %v14619_v1 = vor.u32 %v15942_v53, %v14616_v44 }
 0x597   :  { %9539 = vmatpush.bf16.msrb.mxu0 %v14615_v27  ;;  %v15968_v27 = vld [vmem:[#allocation9 + $0x60] sm:$0xff] }
 0x598   :  { %9579 = vmatpush.bf16.msra.mxu2 %v14547_v48 }
 0x59b   :  { %9540 = vmatpush.bf16.msrb.mxu0 %v14607_v18  ;;  %v15965_v18 = vld [vmem:[#allocation9 + $0x48] sm:$0xff] }
 0x59f   :  { %9585 = vmatpush.bf16.msra.mxu0 %v14667_v4 }
 0x5a3   :  { %v8994_v62 = vpop.f32.mrf.mxu0  ;;  %9586 = vmatpush.bf16.msra.mxu0 %v14659_v49 }
 0x5a4   :  { %v8995_v9 = vadd.f32 %v8994_v62, %v8982_v40 }
 0x5a6   :  { %v9104_v33 = vmax.f32 %v8995_v9, 0.0 }
 0x5a7   :  { %9587 = vmatpush.bf16.msra.mxu0 %v14651_v36 }
 0x5a8   :  { %v9108_v56 = vpack.c.bf16 %v9104_v33, %v9104_v33  ;;  %v15971_v33 = vld [vmem:[#allocation9 + $0x78] sm:$0xff] }
 0x5a9   :  { %9743 = vmatpush.bf16.msrb.mxu1 %v15971_v33 }
 0x5aa   :  { %9528 = vmatmul.bf16.vlgmr.msrb.gmra.mxu2 %v9108_v56 }
 0x5ab   :  { %v9085_v12 = vpop.f32.mrf.mxu2  ;;  %v8996_v60 = vpop.f32.mrf.mxu0  ;;  %9588 = vmatpush.bf16.msra.mxu0 %v14643_v16 }
 0x5ac   :  { %v15956_v60 = vld [vmem:[#allocation9] sm:$0xff] }
 0x5ad   :  { %9744 = vmatpush.bf16.msrb.mxu1 %v15970_v7 }
 0x5af   :  { %9589 = vmatpush.bf16.msra.mxu0 %v14635_v50 }
 0x5b1   :  { %9745 = vmatpush.bf16.msrb.mxu1 %v15969_v63 }
 0x5b3   :  { %v9087_v29 = vpop.f32.mrf.mxu2  ;;  %9590 = vmatpush.bf16.msra.mxu0 %v14627_v11 }
 0x5b5   :  { %9746 = vmatpush.bf16.msrb.mxu1 %v15968_v27 }
 0x5b7   :  { %9591 = vmatpush.bf16.msra.mxu0 %v14619_v1 }
 0x5b9   :  { %9747 = vmatpush.bf16.msrb.mxu1 %v15967_v43 }
 0x5ba   :  { %9580 = vmatmul.bf16.vlgmr.msra.gmra.mxu2 %v9108_v56  ;;  %v15960_v56 = vld [vmem:[#allocation9 + $0x20] sm:$0xff] }
 0x5bb   :  { %9592 = vmatpush.bf16.msra.mxu0 %v14611_v57 }
 0x5bd   :  { %9748 = vmatpush.bf16.msrb.mxu1 %v15966_v2 }
 0x5c1   :  { %9749 = vmatpush.bf16.msrb.mxu1 %v15965_v18 }
 0x5c3   :  { %v9046_v25 = vpop.f32.mrf.mxu0 }
 0x5c4   :  { %v9047_v61 = vadd.f32 %v9046_v25, %v16659_v55 }
 0x5c5   :  { %9750 = vmatpush.bf16.msrb.mxu1 %v15964_v10 }
 0x5c6   :  { %v9060_v48 = vadd.f32 %v16656_v35, %v9047_v61  ;;  %v15963_v35 = vld [vmem:[#allocation9 + $0x38] sm:$0xff] }
 0x5c7   :  { %9730 = vmatpush.bf16.msrb.mxu3 %v15963_v35 }
 0x5c8   :  { %v9073_v0 = vadd.f32 %v16654_v15, %v9060_v48  ;;  %v15962_v15 = vld [vmem:[#allocation9 + $0x30] sm:$0xff] }
 0x5c9   :  { %v9503_v8 = vpop.f32.mrf.mxu3 }
 0x5ca   :  { %v9086_v17 = vadd.f32 %v9085_v12, %v9073_v0  ;;  %v15958_v12 = vld [vmem:[#allocation9 + $0x10] sm:$0xff] }
 0x5cb   :  { %v9048_v6 = vpop.f32.mrf.mxu0  ;;  %9731 = vmatpush.bf16.msrb.mxu3 %v15962_v15 }
 0x5cf   :  { %9732 = vmatpush.bf16.msrb.mxu3 %v15961_v3 }
 0x5d1   :  { %v9505_v26 = vpop.f32.mrf.mxu3 }
 0x5d3   :  { %9733 = vmatpush.bf16.msrb.mxu3 %v15960_v56 }
 0x5d7   :  { %9734 = vmatpush.bf16.msrb.mxu3 %v15959_v47 }
 0x5d9   :  { %v9555_v46 = vpop.f32.mrf.mxu3 }
 0x5db   :  { %9735 = vmatpush.bf16.msrb.mxu3 %v15958_v12 }
 0x5df   :  { %9736 = vmatpush.bf16.msrb.mxu3 %v15957_v23 }
 0x5e1   :  { %v9557_v40 = vpop.f32.mrf.mxu3 }
 0x5e3   :  { %v9098_v41 = vpop.f32.mrf.mxu0  ;;  %9737 = vmatpush.bf16.msrb.mxu3 %v15956_v60 }
 0x5e4   :  { %v9099_v5 = vadd.f32 %v9098_v41, %v9086_v17 }
 0x5e6   :  { %v9105_v42 = vmax.f32 %v9099_v5, 0.0 }
 0x5e7   :  { %v9516_v34 = vpop.f32.mrf.mxu1 }
 0x5e8   :  { %v9109_v52 = vpack.c.bf16 %v9105_v42, %v9105_v42  ;;  %v9517_v51 = vadd.f32 %v9516_v34, %v9503_v8 }
 0x5ea   :  { %9541 = vmatmul.bf16.vlgmr.msrb.gmra.mxu0 %v9109_v52 }
 0x5eb   :  { %v9100_v14 = vpop.f32.mrf.mxu0 }
 0x5ef   :  { %v9518_v55 = vpop.f32.mrf.mxu1 }
 0x5f7   :  { %v9568_v62 = vpop.f32.mrf.mxu1 }
 0x5f8   :  { %v9569_v38 = vadd.f32 %v9568_v62, %v9555_v46 }
 0x5fa   :  { %9593 = vmatmul.bf16.vlgmr.msra.gmra.mxu0 %v9109_v52 }
 0x5ff   :  { %v9570_v9 = vpop.f32.mrf.mxu1 }
 0x62d   :  { %v9529_v13 = vpop.f32.mrf.mxu2 }
 0x62e   :  { %v9530_v59 = vadd.f32 %v9529_v13, %v9517_v51 }
 0x635   :  { %v9531_v20 = vpop.f32.mrf.mxu2 }
 0x63d   :  { %v9581_v22 = vpop.f32.mrf.mxu2 }
 0x63e   :  { %v9582_v21 = vadd.f32 %v9581_v22, %v9569_v38 }
 0x645   :  { %v9583_v29 = vpop.f32.mrf.mxu2 }
 0x667   :  { %v9542_v54 = vpop.f32.mrf.mxu0 }
 0x668   :  { %v9543_v4 = vadd.f32 %v9542_v54, %v9530_v59 }
 0x66a   :  { %v9598_v39 = vmax.f32 %v9543_v4, 0.0 }
 0x66c   :  { %v9600_v49 = vpack.c.bf16 %v9598_v39, %v9598_v39 }
 0x66e   :  { %9738 = vmatmul.bf16.vlgmr.msrb.gmra.mxu3 %v9600_v49 }
 0x66f   :  { %v9544_v31 = vpop.f32.mrf.mxu0 }
 0x677   :  { %v9594_v36 = vpop.f32.mrf.mxu0 }
 0x678   :  { %v9595_v28 = vadd.f32 %v9594_v36, %v9582_v21 }
 0x67a   :  { %v9599_v45 = vmax.f32 %v9595_v28, 0.0 }
 0x67c   :  { %v9601_v25 = vpack.c.bf16 %v9599_v45, %v9599_v45 }
 0x67e   :  { %9751 = vmatmul.bf16.vlgmr.msrb.gmra.mxu1 %v9601_v25 }
 0x67f   :  { %v9596_v16 = vpop.f32.mrf.mxu0 }
 0x6f1   :  { %v9739_v58 = vpop.f32.mrf.mxu3 }
 0x6f9   :  { %v9741_v37 = vpop.f32.mrf.mxu3 }
 0x6fb   :  { %v9752_v50 = vpop.f32.mrf.mxu1 }
 0x6fc   :  { %v9753_v24 = vadd.f32 %v9752_v50, %v9739_v58 }
 0x6fe   :  { %9756 = vst [vmem:[%s16677_s6] sm:$0xff] %v9753_v24 }
 0x703   :  { %v9754_v19 = vpop.f32.mrf.mxu1 }
 0x704   :  { %9761 = vsyncpa [#allocation3], 1 }
 0x705   :  { %9762 = vsyncpa [#allocation5], 1 }
 0x706   :  { %9763 = vsyncpa [#allocation8], 1 }

</bundles_post_ra>
